<compile_context>
chip_gen: v5e
topology: v5e:2x2
jax: 0.10.0
libtpu: 0.0.40
codegen_flags: <defaults>
</compile_context>

<pallas_src>
import jax
import jax.numpy as jnp
from jax import lax
from jax.experimental import pallas as pl
from jax.experimental.pallas import tpu as pltpu


def _zero_halo(ref):
    """Zero only the 1-wide spatial halo of a (NB, H+2, W+2, Cp) scratch.

    The interior is fully overwritten every grid step, so the border is the only state
    that matters; doing it unconditionally keeps correctness when the parallel grid axis
    is sharded across TensorCores (a program_id == 0 guard would not)."""
    NB, Hp, Wp, Cp = ref.shape
    H, W = Hp - 2, Wp - 2
    zrow = jnp.zeros((NB, 1, Wp, Cp), ref.dtype)
    ref[:, 0:1, :, :] = zrow
    ref[:, Hp - 1:Hp, :, :] = zrow
    zcol = jnp.zeros((NB, H, 1, Cp), ref.dtype)
    ref[:, 1:H + 1, 0:1, :] = zcol
    ref[:, 1:H + 1, Wp - 1:Wp, :] = zcol


def basic_block_kernel(x_ref, w1_ref, w2_ref, b1_ref, b2_ref, o_ref,
                       xpad_ref, midpad_ref):
    """NB batch elements per grid step; each 3x3 conv = 9 accumulating MXU dots (K=Cp)."""
    NB, H, W, Cp = x_ref.shape
    M = NB * H * W

    _zero_halo(xpad_ref)
    _zero_halo(midpad_ref)

    x = x_ref[...]                                    # (NB, H, W, Cp) bf16 (also identity)
    xpad_ref[:, 1:H + 1, 1:W + 1, :] = x

    def conv3x3(src_ref, w_ref):
        # src_ref: (NB, H+2, W+2, Cp) zero-halo bf16; w_ref: (9, Cp, Cp) bf16 (BN-scaled).
        # ky slices are along an outer (alignment-free) dim; the f32 accumulator stays a
        # traced value so there is no per-tap accumulator read-modify-write through VMEM.
        acc = None
        for ky in range(3):
            for kx in range(3):
                lhs = src_ref[:, ky:ky + H, kx:kx + W, :].reshape(M, Cp)
                part = jnp.dot(lhs, w_ref[3 * ky + kx],
                               preferred_element_type=jnp.float32)
                acc = part if acc is None else acc + part
        return acc                                    # (M, Cp) f32

    # ---- conv1 (BN1 scale folded into weights) -> + shift -> relu ----
    out1 = jnp.maximum(conv3x3(xpad_ref, w1_ref) + b1_ref[...], 0.0)

    # ---- re-pad intermediate (bf16) for conv2 ----
    midpad_ref[:, 1:H + 1, 1:W + 1, :] = out1.reshape(NB, H, W, Cp).astype(midpad_ref.dtype)

    # ---- conv2 -> + shift -> + identity (bf16, promotes per-vreg) -> relu ----
    out2 = conv3x3(midpad_ref, w2_ref) + b2_ref[...] + x.reshape(M, Cp)
    o_ref[...] = jnp.maximum(out2, 0.0).reshape(NB, H, W, Cp).astype(o_ref.dtype)


def _round_up(x, m):
    return (x + m - 1) // m * m


def _pick_nb(N, H, W):
    """Images per grid step: aim for M = NB*H*W >= ~512 (MXU M dim / per-step-overhead
    amortization) while keeping at least two grid steps (pipelining + megacore) when N
    allows, and NB must divide N."""
    hw = H * W
    cap = max(1, 512 // hw)                  # keep the per-step working set modest
    if N > 1:
        cap = min(cap, max(1, N // 2))       # leave >= 2 grid steps if we can
    nb = 1
    for cand in range(1, min(N, cap) + 1):
        if N % cand == 0:
            nb = cand
    return nb


def fold_bn(gamma, beta, mean, var, eps=1e-5):
    inv = gamma / jnp.sqrt(var + eps)
    return inv, beta - mean * inv


def basic_block_forward(x_nhwc, w1, w2, bn1_params, bn2_params, eps=1e-5):
    """x_nhwc: (N, H, W, C) f32; w1, w2: (3, 3, C, C) HWIO; bn params: (gamma, beta, mean, var).

    Returns bf16 activations in the padded (N, H, W, Cp) inter-block layout."""
    N, H, W, C = x_nhwc.shape
    assert w1.shape == (3, 3, C, C) and w2.shape == (3, 3, C, C), \
        "stride=1 / downsample=None path requires Cin == Cout"

    Cp = _round_up(C, 128)                   # lane-dense channel dim
    pc = Cp - C

    s1, b1 = fold_bn(*bn1_params, eps=eps)
    s2, b2 = fold_bn(*bn2_params, eps=eps)

    # Fold BN scales into the conv weights host-side (once). Padded weight columns and
    # padded shifts are zero -> padded output lanes stay exactly zero (chaining invariant).
    w1f = w1 * s1[None, None, None, :]
    w2f = w2 * s2[None, None, None, :]
    w1p = jnp.pad(w1f, ((0, 0), (0, 0), (0, pc), (0, pc))).astype(jnp.bfloat16).reshape(9, Cp, Cp)
    w2p = jnp.pad(w2f, ((0, 0), (0, 0), (0, pc), (0, pc))).astype(jnp.bfloat16).reshape(9, Cp, Cp)
    b1p = jnp.pad(b1, (0, pc)).reshape(1, Cp).astype(jnp.float32)
    b2p = jnp.pad(b2, (0, pc)).reshape(1, Cp).astype(jnp.float32)

    # bf16 operands; f32 accumulation happens on the MXU inside the kernel.
    # (When chaining blocks, feed the previous block's padded bf16 output directly and
    #  skip this pad/cast.)
    xb = jnp.pad(x_nhwc, ((0, 0), (0, 0), (0, 0), (0, pc))).astype(jnp.bfloat16)

    NB = _pick_nb(N, H, W)
    grid = (N // NB,)
    Hp, Wp = H + 2, W + 2

    # ---- VMEM footprint -> explicit scoped-VMEM limit (default is 16 MiB on v5e) ----
    step_elems = NB * H * W * Cp
    footprint = (
        2 * (step_elems * 2) * 2                 # in + out blocks, bf16, double-buffered
        + 2 * (2 * 9 * Cp * Cp * 2)              # two weight slabs, assume double-buffered
        + 2 * (NB * Hp * Wp * Cp * 2)            # two zero-halo padded scratches (bf16)
        + 6 * step_elems * 4                     # f32 accumulators / temporaries in flight
        + (2 << 20))                             # headroom
    vmem_limit = int(min(max(2 * footprint, 32 << 20), 56 << 20))

    flops = N * 2 * 2 * (H * W) * (9 * Cp) * Cp
    bytes_accessed = (xb.size + N * H * W * Cp) * 2 + (w1p.size + w2p.size) * 2 \
        + (b1p.size + b2p.size) * 4
    cost = pl.CostEstimate(flops=int(flops), transcendentals=0,
                           bytes_accessed=int(bytes_accessed))

    out = pl.pallas_call(
        basic_block_kernel,
        out_shape=jax.ShapeDtypeStruct((N, H, W, Cp), jnp.bfloat16),
        grid_spec=pltpu.PrefetchScalarGridSpec(
            num_scalar_prefetch=0,
            grid=grid,
            in_specs=[
                pl.BlockSpec((NB, H, W, Cp), lambda n: (n, 0, 0, 0)),   # x (also identity)
                # Grid-invariant operands (constant index_map) below.
                # TODO(synk): pin single-buffering via pipeline_mode when Cp >= 512 (VMEM).
                pl.BlockSpec((9, Cp, Cp), lambda n: (0, 0, 0)),         # conv1 * bn1 scale
                pl.BlockSpec((9, Cp, Cp), lambda n: (0, 0, 0)),         # conv2 * bn2 scale
                pl.BlockSpec((1, Cp), lambda n: (0, 0)),                # bn1 shift
                pl.BlockSpec((1, Cp), lambda n: (0, 0)),                # bn2 shift
            ],
            out_specs=pl.BlockSpec((NB, H, W, Cp), lambda n: (n, 0, 0, 0)),
            scratch_shapes=[
                pltpu.VMEM((NB, Hp, Wp, Cp), jnp.bfloat16),   # zero-halo x
                pltpu.VMEM((NB, Hp, Wp, Cp), jnp.bfloat16),   # zero-halo conv1 output
            ],
        ),
        compiler_params=pltpu.CompilerParams(
            dimension_semantics=("parallel",),
            vmem_limit_bytes=vmem_limit),
        cost_estimate=cost,
    )(xb, w1p, w2p, b1p, b2p)

    return out   # (N, H, W, Cp) bf16, padded channel layout kept for chaining


def reference_forward(x_nhwc, w1, w2, bn1_params, bn2_params, eps=1e-5):
    """Pure-JAX reference mirroring the kernel's rounding points (bf16 operands,
    bf16 mid activation, bf16 output; f32 accumulation)."""
    dn = ('NHWC', 'HWIO', 'NHWC')
    rnd = lambda a: a.astype(jnp.bfloat16).astype(jnp.float32)
    s1, b1 = fold_bn(*bn1_params, eps=eps)
    s2, b2 = fold_bn(*bn2_params, eps=eps)
    xr = rnd(x_nhwc)
    w1r = rnd(w1 * s1[None, None, None, :])
    w2r = rnd(w2 * s2[None, None, None, :])
    out = lax.conv_general_dilated(xr, w1r, (1, 1), 'SAME', dimension_numbers=dn,
                                   precision=lax.Precision.HIGHEST)
    out = jnp.maximum(out + b1, 0.0)
    out = rnd(out)                                   # kernel stores mid activation as bf16
    out = lax.conv_general_dilated(out, w2r, (1, 1), 'SAME', dimension_numbers=dn,
                                   precision=lax.Precision.HIGHEST)
    out = jnp.maximum(out + b2 + xr, 0.0)
    return rnd(out)                                  # kernel output is bf16


if __name__ == "__main__":
    key = jax.random.PRNGKey(0)
    N, H, W, C = 2, 16, 16, 16   # in_channels == out_channels, stride=1, downsample=None
    ks = jax.random.split(key, 11)

    x = jax.random.normal(ks[0], (N, H, W, C), jnp.float32)
    w1 = 0.1 * jax.random.normal(ks[1], (3, 3, C, C), jnp.float32)
    w2 = 0.1 * jax.random.normal(ks[2], (3, 3, C, C), jnp.float32)

    bn1 = (1.0 + 0.1 * jax.random.normal(ks[3], (C,), jnp.float32),      # gamma
           0.1 * jax.random.normal(ks[4], (C,), jnp.float32),            # beta
           0.1 * jax.random.normal(ks[5], (C,), jnp.float32),            # running_mean
           jnp.abs(jax.random.normal(ks[6], (C,), jnp.float32)) + 0.5)   # running_var
    bn2 = (1.0 + 0.1 * jax.random.normal(ks[7], (C,), jnp.float32),
           0.1 * jax.random.normal(ks[8], (C,), jnp.float32),
           0.1 * jax.random.normal(ks[9], (C,), jnp.float32),
           jnp.abs(jax.random.normal(ks[10], (C,), jnp.float32)) + 0.5)

    out_padded = basic_block_forward(x, w1, w2, bn1, bn2)
    jax.block_until_ready(out_padded)

    Cp = out_padded.shape[-1]
    assert out_padded.shape == (N, H, W, Cp) and out_padded.dtype == jnp.bfloat16
    # Chaining invariant: padded lanes must stay exactly zero.
    assert bool(jnp.all(out_padded[..., C:] == 0)), "padded channels leaked non-zero values"

    out = out_padded[..., :C].astype(jnp.float32)    # slice only for the standalone check
    ref = reference_forward(x, w1, w2, bn1, bn2)
    assert jnp.allclose(out, ref, atol=2e-2, rtol=2e-2), "mismatch vs reference"

    print("KERNEL_OK")
</pallas_src>

<mosaic_0001>
module attributes {stable_mosaic.version = 11 : i64} {
  func.func @basic_block_kernel(%arg0: i32, %arg1: memref<1x16x16x128xbf16, #tpu.memory_space<vmem>>, %arg2: memref<9x128x128xbf16, #tpu.memory_space<vmem>>, %arg3: memref<9x128x128xbf16, #tpu.memory_space<vmem>>, %arg4: memref<1x128xf32, #tpu.memory_space<vmem>>, %arg5: memref<1x128xf32, #tpu.memory_space<vmem>>, %arg6: memref<1x16x16x128xbf16, #tpu.memory_space<vmem>>, %arg7: memref<1x18x18x128xbf16, #tpu.memory_space<vmem>>, %arg8: memref<1x18x18x128xbf16, #tpu.memory_space<vmem>>) attributes {dimension_semantics = [#tpu.dimension_semantics<parallel>], iteration_bounds = array<i64: 2>, scalar_prefetch = 0 : i64, scratch_operands = 2 : i64, tpu.core_type = #tpu.core_type<tc>, window_params = [{transform_indices = @transform_0, window_bounds = array<i64: 1, 16, 16, 128>}, {pipeline_mode = #tpu.pipeline_mode<synchronous>, transform_indices = @transform_1, window_bounds = array<i64: 9, 128, 128>}, {pipeline_mode = #tpu.pipeline_mode<synchronous>, transform_indices = @transform_2, window_bounds = array<i64: 9, 128, 128>}, {pipeline_mode = #tpu.pipeline_mode<synchronous>, transform_indices = @transform_3, window_bounds = array<i64: 1, 128>}, {pipeline_mode = #tpu.pipeline_mode<synchronous>, transform_indices = @transform_4, window_bounds = array<i64: 1, 128>}, {transform_indices = @transform_5, window_bounds = array<i64: 1, 16, 16, 128>}]} {
    %cst = arith.constant 0.000000e+00 : bf16
    %0 = vector.broadcast %cst : bf16 to vector<1x1x18x128xbf16>
    %c0 = arith.constant 0 : index
    %c0_0 = arith.constant 0 : index
    %c0_1 = arith.constant 0 : index
    %c0_2 = arith.constant 0 : index
    %1 = vector.load %arg7[%c0, %c0_0, %c0_1, %c0_2] : memref<1x18x18x128xbf16, #tpu.memory_space<vmem>>, vector<1x1x18x128xbf16>
    tpu.vector_store %arg7[%c0, %c0_0, %c0_1, %c0_2], %0 {strides = array<i32>} : memref<1x18x18x128xbf16, #tpu.memory_space<vmem>>, vector<1x1x18x128xbf16>,
    %c0_3 = arith.constant 0 : index
    %c17 = arith.constant 17 : index
    %c0_4 = arith.constant 0 : index
    %c0_5 = arith.constant 0 : index
    %2 = vector.load %arg7[%c0_3, %c17, %c0_4, %c0_5] : memref<1x18x18x128xbf16, #tpu.memory_space<vmem>>, vector<1x1x18x128xbf16>
    tpu.vector_store %arg7[%c0_3, %c17, %c0_4, %c0_5], %0 {strides = array<i32>} : memref<1x18x18x128xbf16, #tpu.memory_space<vmem>>, vector<1x1x18x128xbf16>,
    %cst_6 = arith.constant 0.000000e+00 : bf16
    %3 = vector.broadcast %cst_6 : bf16 to vector<1x16x1x128xbf16>
    %c0_7 = arith.constant 0 : index
    %c1 = arith.constant 1 : index
    %c0_8 = arith.constant 0 : index
    %c0_9 = arith.constant 0 : index
    %4 = vector.load %arg7[%c0_7, %c1, %c0_8, %c0_9] : memref<1x18x18x128xbf16, #tpu.memory_space<vmem>>, vector<1x16x1x128xbf16>
    tpu.vector_store %arg7[%c0_7, %c1, %c0_8, %c0_9], %3 {strides = array<i32>} : memref<1x18x18x128xbf16, #tpu.memory_space<vmem>>, vector<1x16x1x128xbf16>,
    %c0_10 = arith.constant 0 : index
    %c1_11 = arith.constant 1 : index
    %c17_12 = arith.constant 17 : index
    %c0_13 = arith.constant 0 : index
    %5 = vector.load %arg7[%c0_10, %c1_11, %c17_12, %c0_13] : memref<1x18x18x128xbf16, #tpu.memory_space<vmem>>, vector<1x16x1x128xbf16>
    tpu.vector_store %arg7[%c0_10, %c1_11, %c17_12, %c0_13], %3 {strides = array<i32>} : memref<1x18x18x128xbf16, #tpu.memory_space<vmem>>, vector<1x16x1x128xbf16>,
    %cst_14 = arith.constant 0.000000e+00 : bf16
    %6 = vector.broadcast %cst_14 : bf16 to vector<1x1x18x128xbf16>
    %c0_15 = arith.constant 0 : index
    %c0_16 = arith.constant 0 : index
    %c0_17 = arith.constant 0 : index
    %c0_18 = arith.constant 0 : index
    %7 = vector.load %arg8[%c0_15, %c0_16, %c0_17, %c0_18] : memref<1x18x18x128xbf16, #tpu.memory_space<vmem>>, vector<1x1x18x128xbf16>
    tpu.vector_store %arg8[%c0_15, %c0_16, %c0_17, %c0_18], %6 {strides = array<i32>} : memref<1x18x18x128xbf16, #tpu.memory_space<vmem>>, vector<1x1x18x128xbf16>,
    %c0_19 = arith.constant 0 : index
    %c17_20 = arith.constant 17 : index
    %c0_21 = arith.constant 0 : index
    %c0_22 = arith.constant 0 : index
    %8 = vector.load %arg8[%c0_19, %c17_20, %c0_21, %c0_22] : memref<1x18x18x128xbf16, #tpu.memory_space<vmem>>, vector<1x1x18x128xbf16>
    tpu.vector_store %arg8[%c0_19, %c17_20, %c0_21, %c0_22], %6 {strides = array<i32>} : memref<1x18x18x128xbf16, #tpu.memory_space<vmem>>, vector<1x1x18x128xbf16>,
    %cst_23 = arith.constant 0.000000e+00 : bf16
    %9 = vector.broadcast %cst_23 : bf16 to vector<1x16x1x128xbf16>
    %c0_24 = arith.constant 0 : index
    %c1_25 = arith.constant 1 : index
    %c0_26 = arith.constant 0 : index
    %c0_27 = arith.constant 0 : index
    %10 = vector.load %arg8[%c0_24, %c1_25, %c0_26, %c0_27] : memref<1x18x18x128xbf16, #tpu.memory_space<vmem>>, vector<1x16x1x128xbf16>
    tpu.vector_store %arg8[%c0_24, %c1_25, %c0_26, %c0_27], %9 {strides = array<i32>} : memref<1x18x18x128xbf16, #tpu.memory_space<vmem>>, vector<1x16x1x128xbf16>,
    %c0_28 = arith.constant 0 : index
    %c1_29 = arith.constant 1 : index
    %c17_30 = arith.constant 17 : index
    %c0_31 = arith.constant 0 : index
    %11 = vector.load %arg8[%c0_28, %c1_29, %c17_30, %c0_31] : memref<1x18x18x128xbf16, #tpu.memory_space<vmem>>, vector<1x16x1x128xbf16>
    tpu.vector_store %arg8[%c0_28, %c1_29, %c17_30, %c0_31], %9 {strides = array<i32>} : memref<1x18x18x128xbf16, #tpu.memory_space<vmem>>, vector<1x16x1x128xbf16>,
    %c0_32 = arith.constant 0 : index
    %c0_33 = arith.constant 0 : index
    %c0_34 = arith.constant 0 : index
    %c0_35 = arith.constant 0 : index
    %12 = vector.load %arg1[%c0_32, %c0_33, %c0_34, %c0_35] : memref<1x16x16x128xbf16, #tpu.memory_space<vmem>>, vector<1x16x16x128xbf16>
    %c0_36 = arith.constant 0 : index
    %c1_37 = arith.constant 1 : index
    %c1_38 = arith.constant 1 : index
    %c0_39 = arith.constant 0 : index
    %13 = vector.load %arg7[%c0_36, %c1_37, %c1_38, %c0_39] : memref<1x18x18x128xbf16, #tpu.memory_space<vmem>>, vector<1x16x16x128xbf16>
    tpu.vector_store %arg7[%c0_36, %c1_37, %c1_38, %c0_39], %12 {strides = array<i32>} : memref<1x18x18x128xbf16, #tpu.memory_space<vmem>>, vector<1x16x16x128xbf16>,
    %c0_40 = arith.constant 0 : index
    %c0_41 = arith.constant 0 : index
    %c0_42 = arith.constant 0 : index
    %c0_43 = arith.constant 0 : index
    %14 = vector.load %arg7[%c0_40, %c0_41, %c0_42, %c0_43] : memref<1x18x18x128xbf16, #tpu.memory_space<vmem>>, vector<1x16x16x128xbf16>
    %15 = vector.shape_cast %14 : vector<1x16x16x128xbf16> to vector<256x128xbf16>
    %c0_44 = arith.constant 0 : index
    %c0_45 = arith.constant 0 : index
    %c0_46 = arith.constant 0 : index
    %16 = vector.load %arg2[%c0_44, %c0_45, %c0_46] : memref<9x128x128xbf16, #tpu.memory_space<vmem>>, vector<1x128x128xbf16>
    %17 = vector.shape_cast %16 : vector<1x128x128xbf16> to vector<128x128xbf16>
    %cst_47 = arith.constant dense<0.000000e+00> : vector<256x128xf32>
    %18 = tpu.matmul %15, %17, %cst_47 {dimension_numbers = #tpu.dot_dimension_numbers<[1], [0], [0], [1], [0, 0, 1, 1], [], []>} : vector<256x128xbf16>, vector<128x128xbf16>, vector<256x128xf32> -> vector<256x128xf32>
    %c0_48 = arith.constant 0 : index
    %c0_49 = arith.constant 0 : index
    %c1_50 = arith.constant 1 : index
    %c0_51 = arith.constant 0 : index
    %19 = vector.load %arg7[%c0_48, %c0_49, %c1_50, %c0_51] : memref<1x18x18x128xbf16, #tpu.memory_space<vmem>>, vector<1x16x16x128xbf16>
    %20 = vector.shape_cast %19 : vector<1x16x16x128xbf16> to vector<256x128xbf16>
    %c1_52 = arith.constant 1 : index
    %c0_53 = arith.constant 0 : index
    %c0_54 = arith.constant 0 : index
    %21 = vector.load %arg2[%c1_52, %c0_53, %c0_54] : memref<9x128x128xbf16, #tpu.memory_space<vmem>>, vector<1x128x128xbf16>
    %22 = vector.shape_cast %21 : vector<1x128x128xbf16> to vector<128x128xbf16>
    %cst_55 = arith.constant dense<0.000000e+00> : vector<256x128xf32>
    %23 = tpu.matmul %20, %22, %cst_55 {dimension_numbers = #tpu.dot_dimension_numbers<[1], [0], [0], [1], [0, 0, 1, 1], [], []>} : vector<256x128xbf16>, vector<128x128xbf16>, vector<256x128xf32> -> vector<256x128xf32>
    %24 = arith.addf %18, %23 : vector<256x128xf32>
    %c0_56 = arith.constant 0 : index
    %c0_57 = arith.constant 0 : index
    %c2 = arith.constant 2 : index
    %c0_58 = arith.constant 0 : index
    %25 = vector.load %arg7[%c0_56, %c0_57, %c2, %c0_58] : memref<1x18x18x128xbf16, #tpu.memory_space<vmem>>, vector<1x16x16x128xbf16>
    %26 = vector.shape_cast %25 : vector<1x16x16x128xbf16> to vector<256x128xbf16>
    %c2_59 = arith.constant 2 : index
    %c0_60 = arith.constant 0 : index
    %c0_61 = arith.constant 0 : index
    %27 = vector.load %arg2[%c2_59, %c0_60, %c0_61] : memref<9x128x128xbf16, #tpu.memory_space<vmem>>, vector<1x128x128xbf16>
    %28 = vector.shape_cast %27 : vector<1x128x128xbf16> to vector<128x128xbf16>
    %cst_62 = arith.constant dense<0.000000e+00> : vector<256x128xf32>
    %29 = tpu.matmul %26, %28, %cst_62 {dimension_numbers = #tpu.dot_dimension_numbers<[1], [0], [0], [1], [0, 0, 1, 1], [], []>} : vector<256x128xbf16>, vector<128x128xbf16>, vector<256x128xf32> -> vector<256x128xf32>
    %30 = arith.addf %24, %29 : vector<256x128xf32>
    %c0_63 = arith.constant 0 : index
    %c1_64 = arith.constant 1 : index
    %c0_65 = arith.constant 0 : index
    %c0_66 = arith.constant 0 : index
    %31 = vector.load %arg7[%c0_63, %c1_64, %c0_65, %c0_66] : memref<1x18x18x128xbf16, #tpu.memory_space<vmem>>, vector<1x16x16x128xbf16>
    %32 = vector.shape_cast %31 : vector<1x16x16x128xbf16> to vector<256x128xbf16>
    %c3 = arith.constant 3 : index
    %c0_67 = arith.constant 0 : index
    %c0_68 = arith.constant 0 : index
    %33 = vector.load %arg2[%c3, %c0_67, %c0_68] : memref<9x128x128xbf16, #tpu.memory_space<vmem>>, vector<1x128x128xbf16>
    %34 = vector.shape_cast %33 : vector<1x128x128xbf16> to vector<128x128xbf16>
    %cst_69 = arith.constant dense<0.000000e+00> : vector<256x128xf32>
    %35 = tpu.matmul %32, %34, %cst_69 {dimension_numbers = #tpu.dot_dimension_numbers<[1], [0], [0], [1], [0, 0, 1, 1], [], []>} : vector<256x128xbf16>, vector<128x128xbf16>, vector<256x128xf32> -> vector<256x128xf32>
    %36 = arith.addf %30, %35 : vector<256x128xf32>
    %c0_70 = arith.constant 0 : index
    %c1_71 = arith.constant 1 : index
    %c1_72 = arith.constant 1 : index
    %c0_73 = arith.constant 0 : index
    %37 = vector.load %arg7[%c0_70, %c1_71, %c1_72, %c0_73] : memref<1x18x18x128xbf16, #tpu.memory_space<vmem>>, vector<1x16x16x128xbf16>
    %38 = vector.shape_cast %37 : vector<1x16x16x128xbf16> to vector<256x128xbf16>
    %c4 = arith.constant 4 : index
    %c0_74 = arith.constant 0 : index
    %c0_75 = arith.constant 0 : index
    %39 = vector.load %arg2[%c4, %c0_74, %c0_75] : memref<9x128x128xbf16, #tpu.memory_space<vmem>>, vector<1x128x128xbf16>
    %40 = vector.shape_cast %39 : vector<1x128x128xbf16> to vector<128x128xbf16>
    %cst_76 = arith.constant dense<0.000000e+00> : vector<256x128xf32>
    %41 = tpu.matmul %38, %40, %cst_76 {dimension_numbers = #tpu.dot_dimension_numbers<[1], [0], [0], [1], [0, 0, 1, 1], [], []>} : vector<256x128xbf16>, vector<128x128xbf16>, vector<256x128xf32> -> vector<256x128xf32>
    %42 = arith.addf %36, %41 : vector<256x128xf32>
    %c0_77 = arith.constant 0 : index
    %c1_78 = arith.constant 1 : index
    %c2_79 = arith.constant 2 : index
    %c0_80 = arith.constant 0 : index
    %43 = vector.load %arg7[%c0_77, %c1_78, %c2_79, %c0_80] : memref<1x18x18x128xbf16, #tpu.memory_space<vmem>>, vector<1x16x16x128xbf16>
    %44 = vector.shape_cast %43 : vector<1x16x16x128xbf16> to vector<256x128xbf16>
    %c5 = arith.constant 5 : index
    %c0_81 = arith.constant 0 : index
    %c0_82 = arith.constant 0 : index
    %45 = vector.load %arg2[%c5, %c0_81, %c0_82] : memref<9x128x128xbf16, #tpu.memory_space<vmem>>, vector<1x128x128xbf16>
    %46 = vector.shape_cast %45 : vector<1x128x128xbf16> to vector<128x128xbf16>
    %cst_83 = arith.constant dense<0.000000e+00> : vector<256x128xf32>
    %47 = tpu.matmul %44, %46, %cst_83 {dimension_numbers = #tpu.dot_dimension_numbers<[1], [0], [0], [1], [0, 0, 1, 1], [], []>} : vector<256x128xbf16>, vector<128x128xbf16>, vector<256x128xf32> -> vector<256x128xf32>
    %48 = arith.addf %42, %47 : vector<256x128xf32>
    %c0_84 = arith.constant 0 : index
    %c2_85 = arith.constant 2 : index
    %c0_86 = arith.constant 0 : index
    %c0_87 = arith.constant 0 : index
    %49 = vector.load %arg7[%c0_84, %c2_85, %c0_86, %c0_87] : memref<1x18x18x128xbf16, #tpu.memory_space<vmem>>, vector<1x16x16x128xbf16>
    %50 = vector.shape_cast %49 : vector<1x16x16x128xbf16> to vector<256x128xbf16>
    %c6 = arith.constant 6 : index
    %c0_88 = arith.constant 0 : index
    %c0_89 = arith.constant 0 : index
    %51 = vector.load %arg2[%c6, %c0_88, %c0_89] : memref<9x128x128xbf16, #tpu.memory_space<vmem>>, vector<1x128x128xbf16>
    %52 = vector.shape_cast %51 : vector<1x128x128xbf16> to vector<128x128xbf16>
    %cst_90 = arith.constant dense<0.000000e+00> : vector<256x128xf32>
    %53 = tpu.matmul %50, %52, %cst_90 {dimension_numbers = #tpu.dot_dimension_numbers<[1], [0], [0], [1], [0, 0, 1, 1], [], []>} : vector<256x128xbf16>, vector<128x128xbf16>, vector<256x128xf32> -> vector<256x128xf32>
    %54 = arith.addf %48, %53 : vector<256x128xf32>
    %c0_91 = arith.constant 0 : index
    %c2_92 = arith.constant 2 : index
    %c1_93 = arith.constant 1 : index
    %c0_94 = arith.constant 0 : index
    %55 = vector.load %arg7[%c0_91, %c2_92, %c1_93, %c0_94] : memref<1x18x18x128xbf16, #tpu.memory_space<vmem>>, vector<1x16x16x128xbf16>
    %56 = vector.shape_cast %55 : vector<1x16x16x128xbf16> to vector<256x128xbf16>
    %c7 = arith.constant 7 : index
    %c0_95 = arith.constant 0 : index
    %c0_96 = arith.constant 0 : index
    %57 = vector.load %arg2[%c7, %c0_95, %c0_96] : memref<9x128x128xbf16, #tpu.memory_space<vmem>>, vector<1x128x128xbf16>
    %58 = vector.shape_cast %57 : vector<1x128x128xbf16> to vector<128x128xbf16>
    %cst_97 = arith.constant dense<0.000000e+00> : vector<256x128xf32>
    %59 = tpu.matmul %56, %58, %cst_97 {dimension_numbers = #tpu.dot_dimension_numbers<[1], [0], [0], [1], [0, 0, 1, 1], [], []>} : vector<256x128xbf16>, vector<128x128xbf16>, vector<256x128xf32> -> vector<256x128xf32>
    %60 = arith.addf %54, %59 : vector<256x128xf32>
    %c0_98 = arith.constant 0 : index
    %c2_99 = arith.constant 2 : index
    %c2_100 = arith.constant 2 : index
    %c0_101 = arith.constant 0 : index
    %61 = vector.load %arg7[%c0_98, %c2_99, %c2_100, %c0_101] : memref<1x18x18x128xbf16, #tpu.memory_space<vmem>>, vector<1x16x16x128xbf16>
    %62 = vector.shape_cast %61 : vector<1x16x16x128xbf16> to vector<256x128xbf16>
    %c8 = arith.constant 8 : index
    %c0_102 = arith.constant 0 : index
    %c0_103 = arith.constant 0 : index
    %63 = vector.load %arg2[%c8, %c0_102, %c0_103] : memref<9x128x128xbf16, #tpu.memory_space<vmem>>, vector<1x128x128xbf16>
    %64 = vector.shape_cast %63 : vector<1x128x128xbf16> to vector<128x128xbf16>
    %cst_104 = arith.constant dense<0.000000e+00> : vector<256x128xf32>
    %65 = tpu.matmul %62, %64, %cst_104 {dimension_numbers = #tpu.dot_dimension_numbers<[1], [0], [0], [1], [0, 0, 1, 1], [], []>} : vector<256x128xbf16>, vector<128x128xbf16>, vector<256x128xf32> -> vector<256x128xf32>
    %66 = arith.addf %60, %65 : vector<256x128xf32>
    %c0_105 = arith.constant 0 : index
    %c0_106 = arith.constant 0 : index
    %67 = vector.load %arg4[%c0_105, %c0_106] : memref<1x128xf32, #tpu.memory_space<vmem>>, vector<1x128xf32>
    %68 = vector.broadcast %67 : vector<1x128xf32> to vector<256x128xf32>
    %69 = arith.addf %66, %68 : vector<256x128xf32>
    %cst_107 = arith.constant 0.000000e+00 : f32
    %70 = vector.broadcast %cst_107 : f32 to vector<256x128xf32>
    %71 = arith.maximumf %69, %70 : vector<256x128xf32>
    %72 = vector.shape_cast %71 : vector<256x128xf32> to vector<1x16x16x128xf32>
    %73 = arith.truncf %72 : vector<1x16x16x128xf32> to vector<1x16x16x128xbf16>
    %c0_108 = arith.constant 0 : index
    %c1_109 = arith.constant 1 : index
    %c1_110 = arith.constant 1 : index
    %c0_111 = arith.constant 0 : index
    %74 = vector.load %arg8[%c0_108, %c1_109, %c1_110, %c0_111] : memref<1x18x18x128xbf16, #tpu.memory_space<vmem>>, vector<1x16x16x128xbf16>
    tpu.vector_store %arg8[%c0_108, %c1_109, %c1_110, %c0_111], %73 {strides = array<i32>} : memref<1x18x18x128xbf16, #tpu.memory_space<vmem>>, vector<1x16x16x128xbf16>,
    %c0_112 = arith.constant 0 : index
    %c0_113 = arith.constant 0 : index
    %c0_114 = arith.constant 0 : index
    %c0_115 = arith.constant 0 : index
    %75 = vector.load %arg8[%c0_112, %c0_113, %c0_114, %c0_115] : memref<1x18x18x128xbf16, #tpu.memory_space<vmem>>, vector<1x16x16x128xbf16>
    %76 = vector.shape_cast %75 : vector<1x16x16x128xbf16> to vector<256x128xbf16>
    %c0_116 = arith.constant 0 : index
    %c0_117 = arith.constant 0 : index
    %c0_118 = arith.constant 0 : index
    %77 = vector.load %arg3[%c0_116, %c0_117, %c0_118] : memref<9x128x128xbf16, #tpu.memory_space<vmem>>, vector<1x128x128xbf16>
    %78 = vector.shape_cast %77 : vector<1x128x128xbf16> to vector<128x128xbf16>
    %cst_119 = arith.constant dense<0.000000e+00> : vector<256x128xf32>
    %79 = tpu.matmul %76, %78, %cst_119 {dimension_numbers = #tpu.dot_dimension_numbers<[1], [0], [0], [1], [0, 0, 1, 1], [], []>} : vector<256x128xbf16>, vector<128x128xbf16>, vector<256x128xf32> -> vector<256x128xf32>
    %c0_120 = arith.constant 0 : index
    %c0_121 = arith.constant 0 : index
    %c1_122 = arith.constant 1 : index
    %c0_123 = arith.constant 0 : index
    %80 = vector.load %arg8[%c0_120, %c0_121, %c1_122, %c0_123] : memref<1x18x18x128xbf16, #tpu.memory_space<vmem>>, vector<1x16x16x128xbf16>
    %81 = vector.shape_cast %80 : vector<1x16x16x128xbf16> to vector<256x128xbf16>
    %c1_124 = arith.constant 1 : index
    %c0_125 = arith.constant 0 : index
    %c0_126 = arith.constant 0 : index
    %82 = vector.load %arg3[%c1_124, %c0_125, %c0_126] : memref<9x128x128xbf16, #tpu.memory_space<vmem>>, vector<1x128x128xbf16>
    %83 = vector.shape_cast %82 : vector<1x128x128xbf16> to vector<128x128xbf16>
    %cst_127 = arith.constant dense<0.000000e+00> : vector<256x128xf32>
    %84 = tpu.matmul %81, %83, %cst_127 {dimension_numbers = #tpu.dot_dimension_numbers<[1], [0], [0], [1], [0, 0, 1, 1], [], []>} : vector<256x128xbf16>, vector<128x128xbf16>, vector<256x128xf32> -> vector<256x128xf32>
    %85 = arith.addf %79, %84 : vector<256x128xf32>
    %c0_128 = arith.constant 0 : index
    %c0_129 = arith.constant 0 : index
    %c2_130 = arith.constant 2 : index
    %c0_131 = arith.constant 0 : index
    %86 = vector.load %arg8[%c0_128, %c0_129, %c2_130, %c0_131] : memref<1x18x18x128xbf16, #tpu.memory_space<vmem>>, vector<1x16x16x128xbf16>
    %87 = vector.shape_cast %86 : vector<1x16x16x128xbf16> to vector<256x128xbf16>
    %c2_132 = arith.constant 2 : index
    %c0_133 = arith.constant 0 : index
    %c0_134 = arith.constant 0 : index
    %88 = vector.load %arg3[%c2_132, %c0_133, %c0_134] : memref<9x128x128xbf16, #tpu.memory_space<vmem>>, vector<1x128x128xbf16>
    %89 = vector.shape_cast %88 : vector<1x128x128xbf16> to vector<128x128xbf16>
    %cst_135 = arith.constant dense<0.000000e+00> : vector<256x128xf32>
    %90 = tpu.matmul %87, %89, %cst_135 {dimension_numbers = #tpu.dot_dimension_numbers<[1], [0], [0], [1], [0, 0, 1, 1], [], []>} : vector<256x128xbf16>, vector<128x128xbf16>, vector<256x128xf32> -> vector<256x128xf32>
    %91 = arith.addf %85, %90 : vector<256x128xf32>
    %c0_136 = arith.constant 0 : index
    %c1_137 = arith.constant 1 : index
    %c0_138 = arith.constant 0 : index
    %c0_139 = arith.constant 0 : index
    %92 = vector.load %arg8[%c0_136, %c1_137, %c0_138, %c0_139] : memref<1x18x18x128xbf16, #tpu.memory_space<vmem>>, vector<1x16x16x128xbf16>
    %93 = vector.shape_cast %92 : vector<1x16x16x128xbf16> to vector<256x128xbf16>
    %c3_140 = arith.constant 3 : index
    %c0_141 = arith.constant 0 : index
    %c0_142 = arith.constant 0 : index
    %94 = vector.load %arg3[%c3_140, %c0_141, %c0_142] : memref<9x128x128xbf16, #tpu.memory_space<vmem>>, vector<1x128x128xbf16>
    %95 = vector.shape_cast %94 : vector<1x128x128xbf16> to vector<128x128xbf16>
    %cst_143 = arith.constant dense<0.000000e+00> : vector<256x128xf32>
    %96 = tpu.matmul %93, %95, %cst_143 {dimension_numbers = #tpu.dot_dimension_numbers<[1], [0], [0], [1], [0, 0, 1, 1], [], []>} : vector<256x128xbf16>, vector<128x128xbf16>, vector<256x128xf32> -> vector<256x128xf32>
    %97 = arith.addf %91, %96 : vector<256x128xf32>
    %c0_144 = arith.constant 0 : index
    %c1_145 = arith.constant 1 : index
    %c1_146 = arith.constant 1 : index
    %c0_147 = arith.constant 0 : index
    %98 = vector.load %arg8[%c0_144, %c1_145, %c1_146, %c0_147] : memref<1x18x18x128xbf16, #tpu.memory_space<vmem>>, vector<1x16x16x128xbf16>
    %99 = vector.shape_cast %98 : vector<1x16x16x128xbf16> to vector<256x128xbf16>
    %c4_148 = arith.constant 4 : index
    %c0_149 = arith.constant 0 : index
    %c0_150 = arith.constant 0 : index
    %100 = vector.load %arg3[%c4_148, %c0_149, %c0_150] : memref<9x128x128xbf16, #tpu.memory_space<vmem>>, vector<1x128x128xbf16>
    %101 = vector.shape_cast %100 : vector<1x128x128xbf16> to vector<128x128xbf16>
    %cst_151 = arith.constant dense<0.000000e+00> : vector<256x128xf32>
    %102 = tpu.matmul %99, %101, %cst_151 {dimension_numbers = #tpu.dot_dimension_numbers<[1], [0], [0], [1], [0, 0, 1, 1], [], []>} : vector<256x128xbf16>, vector<128x128xbf16>, vector<256x128xf32> -> vector<256x128xf32>
    %103 = arith.addf %97, %102 : vector<256x128xf32>
    %c0_152 = arith.constant 0 : index
    %c1_153 = arith.constant 1 : index
    %c2_154 = arith.constant 2 : index
    %c0_155 = arith.constant 0 : index
    %104 = vector.load %arg8[%c0_152, %c1_153, %c2_154, %c0_155] : memref<1x18x18x128xbf16, #tpu.memory_space<vmem>>, vector<1x16x16x128xbf16>
    %105 = vector.shape_cast %104 : vector<1x16x16x128xbf16> to vector<256x128xbf16>
    %c5_156 = arith.constant 5 : index
    %c0_157 = arith.constant 0 : index
    %c0_158 = arith.constant 0 : index
    %106 = vector.load %arg3[%c5_156, %c0_157, %c0_158] : memref<9x128x128xbf16, #tpu.memory_space<vmem>>, vector<1x128x128xbf16>
    %107 = vector.shape_cast %106 : vector<1x128x128xbf16> to vector<128x128xbf16>
    %cst_159 = arith.constant dense<0.000000e+00> : vector<256x128xf32>
    %108 = tpu.matmul %105, %107, %cst_159 {dimension_numbers = #tpu.dot_dimension_numbers<[1], [0], [0], [1], [0, 0, 1, 1], [], []>} : vector<256x128xbf16>, vector<128x128xbf16>, vector<256x128xf32> -> vector<256x128xf32>
    %109 = arith.addf %103, %108 : vector<256x128xf32>
    %c0_160 = arith.constant 0 : index
    %c2_161 = arith.constant 2 : index
    %c0_162 = arith.constant 0 : index
    %c0_163 = arith.constant 0 : index
    %110 = vector.load %arg8[%c0_160, %c2_161, %c0_162, %c0_163] : memref<1x18x18x128xbf16, #tpu.memory_space<vmem>>, vector<1x16x16x128xbf16>
    %111 = vector.shape_cast %110 : vector<1x16x16x128xbf16> to vector<256x128xbf16>
    %c6_164 = arith.constant 6 : index
    %c0_165 = arith.constant 0 : index
    %c0_166 = arith.constant 0 : index
    %112 = vector.load %arg3[%c6_164, %c0_165, %c0_166] : memref<9x128x128xbf16, #tpu.memory_space<vmem>>, vector<1x128x128xbf16>
    %113 = vector.shape_cast %112 : vector<1x128x128xbf16> to vector<128x128xbf16>
    %cst_167 = arith.constant dense<0.000000e+00> : vector<256x128xf32>
    %114 = tpu.matmul %111, %113, %cst_167 {dimension_numbers = #tpu.dot_dimension_numbers<[1], [0], [0], [1], [0, 0, 1, 1], [], []>} : vector<256x128xbf16>, vector<128x128xbf16>, vector<256x128xf32> -> vector<256x128xf32>
    %115 = arith.addf %109, %114 : vector<256x128xf32>
    %c0_168 = arith.constant 0 : index
    %c2_169 = arith.constant 2 : index
    %c1_170 = arith.constant 1 : index
    %c0_171 = arith.constant 0 : index
    %116 = vector.load %arg8[%c0_168, %c2_169, %c1_170, %c0_171] : memref<1x18x18x128xbf16, #tpu.memory_space<vmem>>, vector<1x16x16x128xbf16>
    %117 = vector.shape_cast %116 : vector<1x16x16x128xbf16> to vector<256x128xbf16>
    %c7_172 = arith.constant 7 : index
    %c0_173 = arith.constant 0 : index
    %c0_174 = arith.constant 0 : index
    %118 = vector.load %arg3[%c7_172, %c0_173, %c0_174] : memref<9x128x128xbf16, #tpu.memory_space<vmem>>, vector<1x128x128xbf16>
    %119 = vector.shape_cast %118 : vector<1x128x128xbf16> to vector<128x128xbf16>
    %cst_175 = arith.constant dense<0.000000e+00> : vector<256x128xf32>
    %120 = tpu.matmul %117, %119, %cst_175 {dimension_numbers = #tpu.dot_dimension_numbers<[1], [0], [0], [1], [0, 0, 1, 1], [], []>} : vector<256x128xbf16>, vector<128x128xbf16>, vector<256x128xf32> -> vector<256x128xf32>
    %121 = arith.addf %115, %120 : vector<256x128xf32>
    %c0_176 = arith.constant 0 : index
    %c2_177 = arith.constant 2 : index
    %c2_178 = arith.constant 2 : index
    %c0_179 = arith.constant 0 : index
    %122 = vector.load %arg8[%c0_176, %c2_177, %c2_178, %c0_179] : memref<1x18x18x128xbf16, #tpu.memory_space<vmem>>, vector<1x16x16x128xbf16>
    %123 = vector.shape_cast %122 : vector<1x16x16x128xbf16> to vector<256x128xbf16>
    %c8_180 = arith.constant 8 : index
    %c0_181 = arith.constant 0 : index
    %c0_182 = arith.constant 0 : index
    %124 = vector.load %arg3[%c8_180, %c0_181, %c0_182] : memref<9x128x128xbf16, #tpu.memory_space<vmem>>, vector<1x128x128xbf16>
    %125 = vector.shape_cast %124 : vector<1x128x128xbf16> to vector<128x128xbf16>
    %cst_183 = arith.constant dense<0.000000e+00> : vector<256x128xf32>
    %126 = tpu.matmul %123, %125, %cst_183 {dimension_numbers = #tpu.dot_dimension_numbers<[1], [0], [0], [1], [0, 0, 1, 1], [], []>} : vector<256x128xbf16>, vector<128x128xbf16>, vector<256x128xf32> -> vector<256x128xf32>
    %127 = arith.addf %121, %126 : vector<256x128xf32>
    %c0_184 = arith.constant 0 : index
    %c0_185 = arith.constant 0 : index
    %128 = vector.load %arg5[%c0_184, %c0_185] : memref<1x128xf32, #tpu.memory_space<vmem>>, vector<1x128xf32>
    %129 = vector.broadcast %128 : vector<1x128xf32> to vector<256x128xf32>
    %130 = arith.addf %127, %129 : vector<256x128xf32>
    %131 = vector.shape_cast %12 : vector<1x16x16x128xbf16> to vector<256x128xbf16>
    %132 = arith.extf %131 : vector<256x128xbf16> to vector<256x128xf32>
    %133 = arith.addf %130, %132 : vector<256x128xf32>
    %cst_186 = arith.constant 0.000000e+00 : f32
    %134 = vector.broadcast %cst_186 : f32 to vector<256x128xf32>
    %135 = arith.maximumf %133, %134 : vector<256x128xf32>
    %136 = vector.shape_cast %135 : vector<256x128xf32> to vector<1x16x16x128xf32>
    %137 = arith.truncf %136 : vector<1x16x16x128xf32> to vector<1x16x16x128xbf16>
    %c0_187 = arith.constant 0 : index
    %c0_188 = arith.constant 0 : index
    %c0_189 = arith.constant 0 : index
    %c0_190 = arith.constant 0 : index
    %138 = vector.load %arg6[%c0_187, %c0_188, %c0_189, %c0_190] : memref<1x16x16x128xbf16, #tpu.memory_space<vmem>>, vector<1x16x16x128xbf16>
    tpu.vector_store %arg6[%c0_187, %c0_188, %c0_189, %c0_190], %137 {strides = array<i32>} : memref<1x16x16x128xbf16, #tpu.memory_space<vmem>>, vector<1x16x16x128xbf16>,
    return
  }
  func.func @transform_0(%arg0: i32) -> (i32, i32, i32, i32) {
    %c0_i32 = arith.constant 0 : i32
    %c0_i32_0 = arith.constant 0 : i32
    %c0_i32_1 = arith.constant 0 : i32
    %c0_i32_2 = arith.constant 0 : i32
    return %arg0, %c0_i32, %c0_i32_0, %c0_i32_1 : i32, i32, i32, i32
  }
  func.func @transform_1(%arg0: i32) -> (i32, i32, i32) {
    %c0_i32 = arith.constant 0 : i32
    %c0_i32_0 = arith.constant 0 : i32
    %c0_i32_1 = arith.constant 0 : i32
    %c0_i32_2 = arith.constant 0 : i32
    return %c0_i32, %c0_i32_0, %c0_i32_1 : i32, i32, i32
  }
  func.func @transform_2(%arg0: i32) -> (i32, i32, i32) {
    %c0_i32 = arith.constant 0 : i32
    %c0_i32_0 = arith.constant 0 : i32
    %c0_i32_1 = arith.constant 0 : i32
    %c0_i32_2 = arith.constant 0 : i32
    return %c0_i32, %c0_i32_0, %c0_i32_1 : i32, i32, i32
  }
  func.func @transform_3(%arg0: i32) -> (i32, i32) {
    %c0_i32 = arith.constant 0 : i32
    %c0_i32_0 = arith.constant 0 : i32
    %c0_i32_1 = arith.constant 0 : i32
    return %c0_i32, %c0_i32_0 : i32, i32
  }
  func.func @transform_4(%arg0: i32) -> (i32, i32) {
    %c0_i32 = arith.constant 0 : i32
    %c0_i32_0 = arith.constant 0 : i32
    %c0_i32_1 = arith.constant 0 : i32
    return %c0_i32, %c0_i32_0 : i32, i32
  }
  func.func @transform_5(%arg0: i32) -> (i32, i32, i32, i32) {
    %c0_i32 = arith.constant 0 : i32
    %c0_i32_0 = arith.constant 0 : i32
    %c0_i32_1 = arith.constant 0 : i32
    %c0_i32_2 = arith.constant 0 : i32
    return %arg0, %c0_i32, %c0_i32_0, %c0_i32_1 : i32, i32, i32, i32
  }
}

</mosaic_0001>

<bundles_post_ra>
// kernel: tpu_custom_call.1
= control target key start
LH: loop header
LB: loop body
LE: loop exit
PB: predicated region body
PF: predicated region fallthrough
CT: control target
= control target key end

     0   :  { %10 = vsyncpa [#allocation5], 0  ;;  %s15502_s0 = inlined_call_operand.hbm [shape: bf16[2,16,16,128], index: 0, kind: input, shape index: {}]   ;;  %s15503_s1 = inlined_call_operand.hbm [shape: bf16[9,128,128], index: 1, kind: input, shape index: {}]   ;;  %s15504_s2 = inlined_call_operand.hbm [shape: bf16[9,128,128], index: 2, kind: input, shape index: {}]   ;;  %s15505_s3 = inlined_call_operand.vmem [shape: f32[1,128], index: 3, kind: input, shape index: {}]   ;;  %s15506_s4 = inlined_call_operand.vmem [shape: f32[1,128], index: 4, kind: input, shape index: {}]   ;;  %s15507_s5 = inlined_call_operand.hbm [shape: bf16[2,16,16,128], index: 5, kind: output, shape index: {}]  }
   0x1   :  { %12 = vsyncpa [#allocation5 + $0x1], 0 }
   0x2   :  { %13 = vsyncpa [#allocation8], 0 }
   0x3   :  { %14 = vsyncpa [#allocation6], 0 }
   0x4   :  { %16 = vsyncpa [#allocation6 + $0x1], 0  ;;  %s11882_s18 = smov 0   ;;  %s11884_s19 = smov 0  }
   0x5   :  { %s11886_s20 = smov 0   ;;  %s11888_s21 = smov 0  }
   0x6 LB: > { %s11903_s22 = sadd.s32 4294967295, %s11843_s21   ;;  %s10110_s23 = sadd.s32 4294967294, %s11843_s21   ;;  %s11843_s21 = sphi %s11888_s21, %s15761_s21   ;;  %s11839_s20 = sphi %s11886_s20, %s15760_s20   ;;  %s11835_s19 = sphi %s11884_s19, %s15759_s19   ;;  %s11831_s18 = sphi %s11882_s18, %s15758_s18  }
   0x7   : > { %p42_p0 = scmp.ne.s32.totalorder %s11835_s19, %s11831_s18  ;;  %p43_p1 = scmp.eq.s32.totalorder %s11903_s22, 0 }
   0x8   : > { %p150_p2 = scmp.eq.s32.totalorder %s11903_s22, 1  ;;  %p156_p3 = scmp.eq.s32.totalorder %s10110_s23, 1 }
   0x9   : > { %p11912_p4 = por %p43_p1, %p42_p0  ;;  %p10111_p5 = scmp.ge.s32.totalorder %s11843_s21, 1 }
   0xa   : > { %p11917_p6 = por %p156_p3, %p42_p0  ;;  %p163_p7 = scmp.lt.s32.totalorder %s11843_s21, 3 }
   0xb   : > { %s174_s28 = sshll.u32 %s15503_s1, 4  ;;  %s11845_s30 = smov [#allocation7]   ;;  %s175_s28 = int_to_ptr.hbm [resolvable:$true] %s174_s28 }
   0xc   : > { %p11925_p8 = pnand %p10111_p5, %p163_p7  ;;  %s176_s6 = sshll.u32 %s11845_s30, 4  ;;  %s177_s6 = int_to_ptr.vmem [resolvable:$true] %s176_s6 }
   0xd   : > { %s188_s9 = sshll.u32 %s15504_s2, 4  ;;  %s15508_s10 = smov 64   ;;  %s189_s9 = int_to_ptr.hbm [resolvable:$true] %s188_s9 }
   0xe   : > { %p11549_p9 = pneg %p11925_p8  ;;  %s11847_s11 = smov 4  }
   0xf   : > { %s11848_s12 = smov [#allocation9]   ;;  %s11944_s14 = sadd.s32 1, %s11843_s21  }
  0x10   : > { %p11550_p10 = pnand %p11549_p9, %p43_p1  ;;  %s190_s13 = sshll.u32 %s11848_s12, 4  ;;  %s191_s13 = int_to_ptr.vmem [resolvable:$true] %s190_s13 }
  0x11   : > { %s29_s15 = sadd.s32 1, %s11839_s20  ;;  %s26_s16 = ssub.s32 %s11843_s21, %s11944_s14 }
  0x12   : > { %11552 = dma.hbm_to_vmem [thread:$0]  (!%p11550_p10), %s175_s28, 9216, %s177_s6, [#allocation8], %s15508_s10, %s15508_s10, %s11847_s11  }
  0x13   : > { %11555 = dma.hbm_to_vmem [thread:$0]  (!%p11550_p10), %s189_s9, 9216, %s191_s13, [#allocation8], %s15508_s10, %s15508_s10, %s11847_s11  }
  0x14   : > { %p36_p12 = scmp.ne.s32.totalorder %s11839_s20, %s11835_s19  ;;  %p27_p13 = scmp.eq.s32.totalorder %s26_s16, 0 }
  0x15   : > { %p37_p0 = scmp.eq.s32.totalorder %s11843_s21, 0  ;;  %p11566_p5 = scmp.lt.s32.totalorder %s11843_s21, 2 }
  0x16   : > { %p11954_p3 = por %p150_p2, %p36_p12  ;;  %s210_s26 = sand.u32 1, %s11839_s20  }
  0x17   : > { %s11960_s23 = scalar_select %p27_p13, %s11839_s20, %s29_s15  }
  0x18   : > { %p38_p7 = por %p37_p0, %p36_p12  ;;  %s10115_s27 = sshll.u32 %s210_s26, 7 }
  0x19   : > { %s11184_s28 = sshll.u32 %s11843_s21, 7  ;;  %s214_s8 = scalar_lea.vmem [#allocation4], %s10115_s27 }
  0x1a   : > { %s219_s7 = scalar_lea.hbm %s15502_s0, %s11184_s28  ;;  %s222_s9 = sshll.u32 %s214_s8, 4  ;;  %s223_s9 = int_to_ptr.vmem [resolvable:$true] %s222_s9 }
  0x1b   : > { %s220_s12 = sshll.u32 %s219_s7, 4  ;;  %p11967_p2 = pnand %p11566_p5, %p38_p7  ;;  %s221_s12 = int_to_ptr.hbm [resolvable:$true] %s220_s12 }
  0x1c   : > { %s211_s15 = scalar_lea.sflag [#allocation5], %s210_s26  ;;  %s11743_s16 = sshra.s32 %s221_s12, 4  ;;  %s11744_s16 = int_to_ptr.hbm [resolvable:$true] %s11743_s16 }
  0x1d   : > { %s11745_s10 = scalar_lea.hbm %s11744_s16, 128  ;;  %p11747_p10 = pneg %p11967_p2 }
  0x1e   : > { %p11746_p9 = scmp.ne.s32.totalorder %s11744_s16, %s11745_s10  ;;  %s11750_s30 = scalar_lea.hbm %s15502_s0, 256 }
  0x1f   : > { %p11751_p0 = scmp.lt.s32.totalorder %s11744_s16, %s15502_s0  ;;  %p11752_p5 = scmp.lt.s32.totalorder %s11750_s30, %s11745_s10 }
  0x20   : > { %p11748_p12 = pnand %p11747_p10, %p11746_p9 }
  0x21   : > { %p11753_p7 = por %p11752_p5, %p11751_p0 }
  0x22   : > { %p11749_p13 = pneg %p11748_p12 }
  0x24   : > { %p11754_p11 = pnand %p11753_p7, %p11749_p13 }
  0x26   : > { %11757 = shalt.err (!%p11754_p11)
}
  0x27   : > { %s15516_s26 = smov 64   ;;  %234 = sbr.rel (%p11925_p8) target bundleno = 1562 (0x61a), region = 40 }
  0x28   : > { %11559 = dma.hbm_to_vmem [thread:$0]  (!%p11967_p2), %s221_s12, 2048, %s223_s9, %s211_s15, %s15516_s26, %s15516_s26, %s11847_s11  }
  0x2c   : > { %s11987_s8 = sand.u32 1, %s11835_s19  }
  0x2d   : > { %s10119_s10 = sshll.u32 %s11987_s8, 7  ;;  %s237_s16 = scalar_lea.sflag [#allocation5], %s11987_s8 }
  0x2e   : > { %s11993_s28 = scalar_lea.vmem [#allocation4], %s10119_s10 }
  0x2f   : > { %11818 = dma.done.wait (%p11912_p4), %s237_s16, 2048  }
  0x30   : > { %11820 = vsyncadd (%p11912_p4), %s237_s16, 4294965248 }
  0x31   : > { %11822 = dma.done.wait (%p43_p1), [#allocation8], 18432  }
  0x32   : > { %11824 = vsyncadd (%p43_p1), [#allocation8], 4294948864  ;;  %v11849_v0 = vmov 0   ;;  %v11216_v1 = vld [vmem:[#allocation7 + $0x78] sm:$0xff]  ;;  %vm287_vm0 = vcmask 1040384   ;;  %v11215_v3 = vld [vmem:[#allocation7 + $0x70] sm:$0xff] }
  0x33   : > { %279 = vst [vmem:[#allocation2] sm:$0xf] %v11849_v0  ;;  %v11208_v2 = vld [vmem:[#allocation7 + $0x38] sm:$0xff]  ;;  %vm288_vm1 = vsmask.f32 256  ;;  %1540 = vmatpush.bf16.msra.mxu0 %v11216_v1  ;;  %11521 = vmatpush.bf16.msra.mxu2 %v11216_v1  ;;  %v11207_v4 = vld [vmem:[#allocation7 + $0x30] sm:$0xff] }
  0x34   : > { %280 = vst [vmem:[#allocation2 + $0x4] sm:$0xf] %v11849_v0  ;;  %11529 = vmatpush.bf16.msra.mxu3 %v11208_v2  ;;  %1773 = vmatpush.bf16.msra.mxu1 %v11208_v2  ;;  %vm338_vm2 = vsmask.f32 7938  ;;  %vm12005_vm3 = vmand %vm287_vm0, %vm288_vm1  ;;  %vm524_vm4 = vsmask.f32 4368 }
  0x35   : > { %281 = vst [vmem:[#allocation2 + $0x8] sm:$0x1] %v11849_v0  ;;  %v11214_v6 = vld [vmem:[#allocation7 + $0x68] sm:$0xff]  ;;  %vm1024_vm5 = vsmask.f32 3328  ;;  %vm12011_vm7 = vmand %vm287_vm0, %vm338_vm2  ;;  %v11213_v23 = vld [vmem:[#allocation7 + $0x60] sm:$0xff] }
  0x36   : > { %283 = vst [vmem:[#allocation2 + $0xcc] sm:$0xf] %v11849_v0  ;;  %vm1025_vm6 = vsmask.f32 7440  ;;  %v11206_v15 = vld [vmem:[#allocation7 + $0x28] sm:$0xff]  ;;  %v11205_v31 = vld [vmem:[#allocation7 + $0x20] sm:$0xff]  ;;  %vm12033_vm9 = vmor %vm288_vm1, %vm524_vm4 }
  0x37   : > { %284 = vst [vmem:[#allocation2 + $0xd0] sm:$0xf] %v11849_v0  ;;  %1541 = vmatpush.bf16.msra.mxu0 %v11215_v3  ;;  %11522 = vmatpush.bf16.msra.mxu2 %v11215_v3  ;;  %v311_v17 = vld [vmem:[#allocation2 + $0x60] sm:$0x1]  ;;  %v361_v22 = vld [vmem:[#allocation2 + $0x68] sm:$0x1]  ;;  %vm12048_vm11 = vmor %vm1024_vm5, %vm1025_vm6 }
  0x38   : > { %285 = vst [vmem:[#allocation2 + $0xd4] sm:$0x1] %v11849_v0  ;;  %11530 = vmatpush.bf16.msra.mxu3 %v11207_v4  ;;  %1774 = vmatpush.bf16.msra.mxu1 %v11207_v4  ;;  %v312_v24 = vsel %vm12005_vm3, 0, %v311_v17  ;;  %v362_v25 = vsel %vm12011_vm7, 0, %v361_v22  ;;  %v506_v26 = vld [vmem:[%s11993_s28 + $0x38] sm:$0xf] }
  0x39   : > { %388 = vst [vmem:[#allocation3] sm:$0xf] %v11849_v0  ;;  %v507_v28 = vld [vmem:[%s11993_s28 + $0x3c] sm:$0xf]  ;;  %v646_v29 = vshrl.u32 %v506_v26, 16  ;;  %v649_v30 = vshll.u32 %v506_v26, 16 }
  0x3a   : > { %389 = vst [vmem:[#allocation3 + $0x4] sm:$0xf] %v11849_v0  ;;  %v960_v7 = vld [vmem:[#allocation2] sm:$0xf]  ;;  %v654_v33 = vshrl.u32 %v507_v28, 16  ;;  %v657_v34 = vshll.u32 %v507_v28, 16 }
  0x3b   : > { %390 = vst [vmem:[#allocation3 + $0x8] sm:$0x1] %v11849_v0  ;;  %v961_v8 = vld [vmem:[#allocation2 + $0x4] sm:$0xf]  ;;  %v1028_v10 = vshrl.u32 %v960_v7, 16  ;;  %v1031_v11 = vshll.u32 %v960_v7, 16  ;;  %1542 = vmatpush.bf16.msra.mxu0 %v11214_v6  ;;  %11523 = vmatpush.bf16.msra.mxu2 %v11214_v6 }
  0x3c   : > { %392 = vst [vmem:[#allocation3 + $0xcc] sm:$0xf] %v11849_v0  ;;  %v1008_v9 = vld [vmem:[#allocation2 + $0x8] sm:$0x1]  ;;  %v1037_v12 = vshll.u32 %v961_v8, 16  ;;  %v1041_v13 = vshrl.u32 %v961_v8, 16  ;;  %11531 = vmatpush.bf16.msra.mxu3 %v11206_v15  ;;  %1775 = vmatpush.bf16.msra.mxu1 %v11206_v15 }
  0x3d   : > { %393 = vst [vmem:[#allocation3 + $0xd0] sm:$0xf] %v11849_v0  ;;  %v1047_v16 = vshll.u32 %v1008_v9, 16  ;;  %v1030_v18 = vrot.slane %v1028_v10, 4  ;;  %v1033_v19 = vrot.slane %v1031_v11, 5  ;;  %v11212_v35 = vld [vmem:[#allocation7 + $0x58] sm:$0xff] }
  0x3e   : > { %394 = vst [vmem:[#allocation3 + $0xd4] sm:$0x1] %v11849_v0  ;;  %v12015_v20 = vrot.slane %v1037_v12, 5  ;;  %v1043_v21 = vrot.slane %v1041_v13, 4  ;;  %v648_v37 = vrot.slane %v646_v29, 7  ;;  %vm846_vm8 = vcmask 1043456  }
  0x3f   : > { %v1034_v27 = vor.u32 %v1033_v19, %v1030_v18  ;;  %313 = vst [vmem:[#allocation2 + $0x60] sm:$0x1] %v312_v24  ;;  %v12024_v36 = vrot.slane %v1047_v16, 5  ;;  %v290_v38 = vld [vmem:[#allocation2 + $0xc] sm:$0x1]  ;;  %v656_v40 = vrot.slane %v654_v33, 7  ;;  %1543 = vmatpush.bf16.msra.mxu0 %v11213_v23  ;;  %11524 = vmatpush.bf16.msra.mxu2 %v11213_v23  ;;  %vm12042_vm10 = vmand %vm846_vm8, %vm338_vm2 }
  0x40   : > { %v1044_v32 = vor.u32 %v1043_v21, %v12015_v20  ;;  %363 = vst [vmem:[#allocation2 + $0x68] sm:$0x1] %v362_v25  ;;  %v11204_v39 = vld [vmem:[#allocation7 + $0x18] sm:$0xff]  ;;  %v291_v41 = vsel %vm12005_vm3, 0, %v290_v38  ;;  %v340_v42 = vld [vmem:[#allocation2 + $0x14] sm:$0x1]  ;;  %v651_v46 = vor.u32 %v649_v30, %v648_v37  ;;  %11532 = vmatpush.bf16.msra.mxu3 %v11205_v31  ;;  %1776 = vmatpush.bf16.msra.mxu1 %v11205_v31 }
  0x41   : > { %v492_v43 = vld [vmem:[%s11993_s28] sm:$0xf]  ;;  %v12029_v44 = vrot.slane %v1034_v27, 4  ;;  %v652_v47 = vrot.slane %v648_v37, 4  ;;  %v493_v48 = vld [vmem:[%s11993_s28 + $0x4] sm:$0xf]  ;;  %v659_v51 = vor.u32 %v657_v34, %v656_v40 }
  0x42   : > { %v314_v49 = vld [vmem:[#allocation2 + $0x6c] sm:$0x1]  ;;  %v12038_v50 = vrot.slane %v1044_v32, 4  ;;  %v661_v52 = vrot.slane %v656_v40, 4  ;;  %292 = vst [vmem:[#allocation2 + $0xc] sm:$0x1] %v291_v41 }
  0x43   : > { %v364_v54 = vld [vmem:[#allocation2 + $0x74] sm:$0x1]  ;;  %v11211_v55 = vld [vmem:[#allocation7 + $0x50] sm:$0xff]  ;;  %v341_v57 = vsel %vm12011_vm7, 0, %v340_v42  ;;  %v527_v58 = vshrl.u32 %v492_v43, 16  ;;  %v530_v59 = vshll.u32 %v492_v43, 16  ;;  %v660_v63 = vsel %vm12033_vm9, %v652_v47, %v659_v51  ;;  %1544 = vmatpush.bf16.msra.mxu0 %v11212_v35  ;;  %11525 = vmatpush.bf16.msra.mxu2 %v11212_v35 }
  0x44   : > { %v535_v60 = vshrl.u32 %v493_v48, 16  ;;  %v508_v61 = vld [vmem:[%s11993_s28 + $0x40] sm:$0xf]  ;;  %v11203_v62 = vld [vmem:[#allocation7 + $0x10] sm:$0xff]  ;;  %342 = vst [vmem:[#allocation2 + $0x14] sm:$0x1] %v341_v57  ;;  %11533 = vmatpush.bf16.msra.mxu3 %v11204_v39  ;;  %1777 = vmatpush.bf16.msra.mxu1 %v11204_v39  ;;  %v1040_v8 = vsel %vm12048_vm11, %v12029_v44, %v12015_v20  ;;  %v1050_v24 = vsel %vm12048_vm11, %v12038_v50, %v12024_v36 }
  0x45   : > { %v538_v1 = vshll.u32 %v493_v48, 16  ;;  %v315_v2 = vsel %vm12005_vm3, 0, %v314_v49  ;;  %900 = vst [vmem:[#allocation2 + $0x64] sm:$0xf] %v660_v63  ;;  %v529_v6 = vrot.slane %v527_v58, 7  ;;  %v365_v10 = vsel %vm12011_vm7, 0, %v364_v54 }
  0x46   : > { %v897_v0 = vld [vmem:[#allocation2 + $0x60] sm:$0xf]  ;;  %v537_v7 = vrot.slane %v535_v60, 7  ;;  %v509_v11 = vld [vmem:[%s11993_s28 + $0x44] sm:$0xf]  ;;  %v663_v12 = vshrl.u32 %v508_v61, 16  ;;  %v1428_v33 = vunpack.c.l.b16 %v1040_v8  ;;  %v1429_v36 = vunpack.c.l.b16 %v1050_v24 }
  0x47   : > { %v898_v3 = vsel %vm12042_vm10, %v651_v46, %v897_v0  ;;  %v901_v4 = vld [vmem:[#allocation2 + $0x68] sm:$0x1]  ;;  %v532_v13 = vor.u32 %v530_v59, %v529_v6  ;;  %v533_v15 = vrot.slane %v529_v6, 4  ;;  %v293_v18 = vld [vmem:[#allocation2 + $0x18] sm:$0x1]  ;;  %v666_v21 = vshll.u32 %v508_v61, 16  ;;  %1545 = vmatpush.bf16.msra.mxu0 %v11211_v55  ;;  %11526 = vmatpush.bf16.msra.mxu2 %v11211_v55 }
  0x48   : > { %899 = vst [vmem:[#allocation2 + $0x60] sm:$0xf] %v898_v3  ;;  %v902_v9 = vsel %vm12005_vm3, %v661_v52, %v901_v4  ;;  %v540_v16 = vor.u32 %v538_v1, %v537_v7  ;;  %v542_v17 = vrot.slane %v537_v7, 4  ;;  %v665_v19 = vrot.slane %v663_v12, 7  ;;  %v11210_v23 = vld [vmem:[#allocation7 + $0x48] sm:$0xff]  ;;  %11534 = vmatpush.bf16.msra.mxu3 %v11203_v62  ;;  %1778 = vmatpush.bf16.msra.mxu1 %v11203_v62  ;;  %v11209_v32 = vld [vmem:[#allocation7 + $0x40] sm:$0xff] }
  0x49   : > { %903 = vst [vmem:[#allocation2 + $0x68] sm:$0x1] %v902_v9  ;;  %v671_v22 = vshrl.u32 %v509_v11, 16  ;;  %v674_v20 = vshll.u32 %v509_v11, 16  ;;  %v848_v26 = vld [vmem:[#allocation2 + $0xc] sm:$0xf]  ;;  %v1460_v61 = vpack.c.b16 %v1429_v36, %v1428_v33 }
  0x4a   : > { %316 = vst [vmem:[#allocation2 + $0x6c] sm:$0x1] %v315_v2  ;;  %v541_v25 = vsel %vm12033_vm9, %v533_v15, %v540_v16  ;;  %v294_v27 = vsel %vm12005_vm3, 0, %v293_v18  ;;  %v11202_v28 = vld [vmem:[#allocation7 + $0x8] sm:$0xff]  ;;  %v849_v29 = vsel %vm12042_vm10, %v532_v13, %v848_v26  ;;  %v669_v30 = vrot.slane %v665_v19, 4  ;;  %v11201_v35 = vld [vmem:[#allocation7] sm:$0xff] }
  0x4b   : > { %366 = vst [vmem:[#allocation2 + $0x74] sm:$0x1] %v365_v10  ;;  %v673_v31 = vrot.slane %v671_v22, 7  ;;  %v852_v34 = vld [vmem:[#allocation2 + $0x14] sm:$0x1]  ;;  %v668_v39 = vor.u32 %v666_v21, %v665_v19  ;;  %1546 = vmatpush.bf16.msra.mxu0 %v11210_v23  ;;  %11527 = vmatpush.bf16.msra.mxu2 %v11210_v23  ;;  %v11224_v46 = vld [vmem:[#allocation7 + $0xb8] sm:$0xff] }
  0x4c   : > { %851 = vst [vmem:[#allocation2 + $0x10] sm:$0xf] %v541_v25  ;;  %v977_v37 = vld [vmem:[#allocation2 + $0x64] sm:$0xf]  ;;  %v853_v38 = vsel %vm12005_vm3, %v542_v17, %v852_v34  ;;  %v343_v41 = vld [vmem:[#allocation2 + $0x20] sm:$0x1]  ;;  %11535 = vmatpush.bf16.msra.mxu3 %v11202_v28  ;;  %1779 = vmatpush.bf16.msra.mxu1 %v11202_v28 }
  0x4d   : > { %850 = vst [vmem:[#allocation2 + $0xc] sm:$0xf] %v849_v29  ;;  %v676_v40 = vor.u32 %v674_v20, %v673_v31  ;;  %v1229_v43 = vshll.u32 %v977_v37, 16  ;;  %v1233_v44 = vshrl.u32 %v977_v37, 16  ;;  %v11248_v47 = vld [vmem:[#allocation7 + $0xf8] sm:$0xff]  ;;  %v678_v48 = vrot.slane %v673_v31, 4 }
  0x4e   : > { %295 = vst [vmem:[#allocation2 + $0x18] sm:$0x1] %v294_v27  ;;  %v11185_v58 = vld [vmem:[#allocation2] sm:$0xff]  ;;  %v344_v60 = vsel %vm12011_vm7, 0, %v343_v41  ;;  %v11256_v0 = vld [vmem:[#allocation7 + $0x138] sm:$0xff]  ;;  %vm1910_vm12 = vcmask 1042432  }
  0x4f   : > { %v976_v42 = vld [vmem:[#allocation2 + $0x60] sm:$0xf]  ;;  %854 = vst [vmem:[#allocation2 + $0x14] sm:$0x1] %v853_v38  ;;  %v677_v52 = vsel %vm12033_vm9, %v669_v30, %v676_v40  ;;  %v1231_v54 = vrot.slane %v1229_v43, 5  ;;  %v1235_v55 = vrot.slane %v1233_v44, 4  ;;  %1547 = vmatpush.bf16.msra.mxu0 %v11209_v32  ;;  %11528 = vmatpush.bf16.msra.mxu2 %v11209_v32 }
  0x50   : > { %v1016_v49 = vld [vmem:[#allocation2 + $0x68] sm:$0x1]  ;;  %v1220_v50 = vshrl.u32 %v976_v42, 16  ;;  %v1223_v51 = vshll.u32 %v976_v42, 16  ;;  %907 = vst [vmem:[#allocation2 + $0x70] sm:$0xf] %v677_v52  ;;  %11536 = vmatpush.bf16.msra.mxu3 %v11201_v35  ;;  %1780 = vmatpush.bf16.msra.mxu1 %v11201_v35 }
  0x51   : > { %v1239_v57 = vshll.u32 %v1016_v49, 16  ;;  %v904_v59 = vld [vmem:[#allocation2 + $0x6c] sm:$0xf]  ;;  %v1236_v3 = vor.u32 %v1235_v55, %v1231_v54  ;;  %v11193_v6 = vld [vmem:[#allocation2 + $0x60] sm:$0xff]  ;;  %345 = vst [vmem:[#allocation2 + $0x20] sm:$0x1] %v344_v60 }
  0x52   : > { %v1222_v62 = vrot.slane %v1220_v50, 4  ;;  %v1225_v63 = vrot.slane %v1223_v51, 5  ;;  %v905_v1 = vsel %vm12042_vm10, %v668_v39, %v904_v59  ;;  %v908_v2 = vld [vmem:[#allocation2 + $0x74] sm:$0x1]  ;;  %v11223_v9 = vld [vmem:[#allocation7 + $0xb0] sm:$0xff]  ;;  %1548 = vmatmul.bf16.vlgmr.msra.gmra.mxu0 %v1460_v61  ;;  %vm1911_vm13 = vcmask 1046532  }
  0x53   : > { %v1241_v4 = vrot.slane %v1239_v57, 5  ;;  %v963_v7 = vld [vmem:[#allocation2 + $0x10] sm:$0xf]  ;;  %906 = vst [vmem:[#allocation2 + $0x6c] sm:$0xf] %v905_v1  ;;  %v909_v8 = vsel %vm12005_vm3, %v678_v48, %v908_v2  ;;  %v1237_v15 = vrot.slane %v1236_v3, 4  ;;  %2154 = vmatpush.bf16.msrb.mxu2 %v11224_v46  ;;  %1821 = vmatmul.bf16.vlgmr.msra.gmra.mxu3 %v11193_v6  ;;  %vm12316_vm14 = vmor %vm1910_vm12, %vm1911_vm13 }
  0x54   : > { %v1226_v10 = vor.u32 %v1225_v63, %v1222_v62  ;;  %v962_v11 = vld [vmem:[#allocation2 + $0xc] sm:$0xf]  ;;  %v1061_v12 = vshll.u32 %v963_v7, 16  ;;  %v1065_v13 = vshrl.u32 %v963_v7, 16  ;;  %910 = vst [vmem:[#allocation2 + $0x74] sm:$0x1] %v909_v8  ;;  %2468 = vmatpush.bf16.msrb.mxu3 %v11248_v47  ;;  %1781 = vmatmul.bf16.vlgmr.msra.gmra.mxu1 %v11185_v58 }
  0x55   : > { %v1052_v16 = vshrl.u32 %v962_v11, 16  ;;  %v1055_v17 = vshll.u32 %v962_v11, 16  ;;  %v11247_v18 = vld [vmem:[#allocation7 + $0xf0] sm:$0xff]  ;;  %v494_v20 = vld [vmem:[%s11993_s28 + $0x8] sm:$0xf]  ;;  %v1242_v23 = vsel %vm12048_vm11, %v1237_v15, %v1241_v4  ;;  %3150 = vmatpush.bf16.msrb.mxu0 %v11256_v0  ;;  %v11416_v53 = vld [vmem:[#allocation9 + $0x1f8] sm:$0xff] }
  0x56   : > { %v1227_v19 = vrot.slane %v1226_v10, 4  ;;  %v1063_v21 = vrot.slane %v1061_v12, 5  ;;  %v1067_v22 = vrot.slane %v1065_v13, 4  ;;  %v1009_v24 = vld [vmem:[#allocation2 + $0x14] sm:$0x1]  ;;  %v1445_v28 = vunpack.c.l.b16 %v1242_v23  ;;  %v11255_v31 = vld [vmem:[#allocation7 + $0x130] sm:$0xff] }
  0x57   : > { %v1054_v25 = vrot.slane %v1052_v16, 4  ;;  %v1057_v26 = vrot.slane %v1055_v17, 5  ;;  %v1071_v30 = vshll.u32 %v1009_v24, 16  ;;  %v979_v34 = vld [vmem:[#allocation2 + $0x70] sm:$0xf]  ;;  %2155 = vmatpush.bf16.msrb.mxu2 %v11223_v9  ;;  %v544_v35 = vshrl.u32 %v494_v20, 16 }
  0x58   : > { %v1232_v27 = vsel %vm12048_vm11, %v1227_v19, %v1231_v54  ;;  %v1068_v29 = vor.u32 %v1067_v22, %v1063_v21  ;;  %2469 = vmatpush.bf16.msrb.mxu3 %v11247_v18  ;;  %v547_v36 = vshll.u32 %v494_v20, 16  ;;  %v1253_v40 = vshll.u32 %v979_v34, 16  ;;  %v495_v42 = vld [vmem:[%s11993_s28 + $0xc] sm:$0xf]  ;;  %v317_v54 = vld [vmem:[#allocation2 + $0x78] sm:$0x1] }
  0x59   : > { %v1444_v32 = vunpack.c.l.b16 %v1232_v27  ;;  %v1058_v33 = vor.u32 %v1057_v26, %v1054_v25  ;;  %v1073_v38 = vrot.slane %v1071_v30, 5  ;;  %v1257_v41 = vshrl.u32 %v979_v34, 16  ;;  %3151 = vmatpush.bf16.msrb.mxu0 %v11255_v31  ;;  %v855_v60 = vld [vmem:[#allocation2 + $0x18] sm:$0xf]  ;;  %v367_v61 = vld [vmem:[#allocation2 + $0x80] sm:$0x1] }
  0x5a   : > { %v1069_v37 = vrot.slane %v1068_v29, 4  ;;  %v978_v39 = vld [vmem:[#allocation2 + $0x6c] sm:$0xf]  ;;  %v1255_v50 = vrot.slane %v1253_v40, 5  ;;  %v546_v1 = vrot.slane %v544_v35, 7  ;;  %v552_v6 = vshrl.u32 %v495_v42, 16 }
  0x5b   : > { %v1468_v43 = vpack.c.b16 %v1445_v28, %v1444_v32  ;;  %v1059_v44 = vrot.slane %v1058_v33, 4  ;;  %v1017_v46 = vld [vmem:[#allocation2 + $0x74] sm:$0x1]  ;;  %v1244_v47 = vshrl.u32 %v978_v39, 16  ;;  %v1247_v48 = vshll.u32 %v978_v39, 16  ;;  %v11222_v9 = vld [vmem:[#allocation7 + $0xa8] sm:$0xff] }
  0x5c   : > { %v1074_v49 = vsel %vm12048_vm11, %v1069_v37, %v1073_v38  ;;  %v1259_v51 = vrot.slane %v1257_v41, 4  ;;  %v1263_v52 = vshll.u32 %v1017_v46, 16  ;;  %v510_v2 = vld [vmem:[%s11993_s28 + $0x48] sm:$0xf]  ;;  %v511_v3 = vld [vmem:[%s11993_s28 + $0x4c] sm:$0xf]  ;;  %v549_v15 = vor.u32 %v547_v36, %v546_v1  ;;  %2156 = vmatpush.bf16.msrb.mxu2 %v11222_v9 }
  0x5d   : > { %1588 = vmatmul.bf16.vlgmr.msra.gmra.mxu2 %v1468_v43  ;;  %v1064_v55 = vsel %vm12048_vm11, %v1059_v44, %v1063_v21  ;;  %v1431_v57 = vunpack.c.l.b16 %v1074_v49  ;;  %v1246_v58 = vrot.slane %v1244_v47, 4  ;;  %v1249_v59 = vrot.slane %v1247_v48, 5  ;;  %v11246_v10 = vld [vmem:[#allocation7 + $0xe8] sm:$0xff]  ;;  %v11186_v18 = vld [vmem:[#allocation2 + $0xc] sm:$0xff]  ;;  %v859_v21 = vld [vmem:[#allocation2 + $0x20] sm:$0x1] }
  0x5e   : > { %v1430_v62 = vunpack.c.l.b16 %v1064_v55  ;;  %v1260_v63 = vor.u32 %v1259_v51, %v1255_v50  ;;  %v1265_v0 = vrot.slane %v1263_v52, 5  ;;  %v555_v7 = vshll.u32 %v495_v42, 16  ;;  %v11254_v11 = vld [vmem:[#allocation7 + $0x128] sm:$0xff]  ;;  %2470 = vmatpush.bf16.msrb.mxu3 %v11246_v10  ;;  %v296_v27 = vld [vmem:[#allocation2 + $0x24] sm:$0x1]  ;;  %v11194_v29 = vld [vmem:[#allocation2 + $0x6c] sm:$0xff] }
  0x5f   : > { %v1250_v4 = vor.u32 %v1249_v59, %v1246_v58  ;;  %v318_v8 = vsel %vm12005_vm3, 0, %v317_v54  ;;  %v550_v16 = vrot.slane %v546_v1, 4  ;;  %v554_v19 = vrot.slane %v552_v6, 7  ;;  %3152 = vmatpush.bf16.msrb.mxu0 %v11254_v11  ;;  %v346_v32 = vld [vmem:[#allocation2 + $0x2c] sm:$0x1]  ;;  %s15268_s30 = scalar_lea.vmem [#allocation10], %s10119_s10 }
  0x60   : > { %v1461_v12 = vpack.c.b16 %v1431_v57, %v1430_v62  ;;  %v1261_v13 = vrot.slane %v1260_v63, 4  ;;  %319 = vst [vmem:[#allocation2 + $0x78] sm:$0x1] %v318_v8  ;;  %v368_v22 = vsel %vm12011_vm7, 0, %v367_v61  ;;  %v680_v20 = vshrl.u32 %v510_v2, 16  ;;  %s11425_s6 = sshll.u32 %s11903_s22, 7 }
  0x61   : > { %v1251_v17 = vrot.slane %v1250_v4, 4  ;;  %v856_v24 = vsel %vm12042_vm10, %v549_v15, %v855_v60  ;;  %369 = vst [vmem:[#allocation2 + $0x80] sm:$0x1] %v368_v22  ;;  %v683_v25 = vshll.u32 %v510_v2, 16  ;;  %v688_v26 = vshrl.u32 %v511_v3, 16  ;;  %s10014_s10 = scalar_lea.hbm %s15507_s5, %s11425_s6  ;;  %s10015_s16 = sshll.u32 %s15268_s30, 4  ;;  %s10016_s16 = int_to_ptr.vmem [resolvable:$true] %s10015_s16 }
  0x62   : > { %v1266_v23 = vsel %vm12048_vm11, %v1261_v13, %v1265_v0  ;;  %v557_v30 = vor.u32 %v555_v7, %v554_v19  ;;  %v559_v31 = vrot.slane %v554_v19, 4  ;;  %857 = vst [vmem:[#allocation2 + $0x18] sm:$0xf] %v856_v24  ;;  %v682_v34 = vrot.slane %v680_v20, 7  ;;  %v496_v37 = vld [vmem:[%s11993_s28 + $0x10] sm:$0xf]  ;;  %1553 = vmatmul.bf16.gmra.mxu0 %v1461_v12 }
  0x63   : > { %v1256_v28 = vsel %vm12048_vm11, %v1251_v17, %v1255_v50  ;;  %v1447_v33 = vunpack.c.l.b16 %v1266_v23  ;;  %v690_v35 = vrot.slane %v688_v26, 7  ;;  %v691_v36 = vshll.u32 %v511_v3, 16  ;;  %v497_v42 = vld [vmem:[%s11993_s28 + $0x14] sm:$0xf]  ;;  %1826 = vmatmul.bf16.gmra.mxu3 %v11194_v29  ;;  %v370_v58 = vld [vmem:[#allocation2 + $0x8c] sm:$0x1] }
  0x64   : > { %v1446_v38 = vunpack.c.l.b16 %v1256_v28  ;;  %v558_v39 = vsel %vm12033_vm9, %v550_v16, %v557_v30  ;;  %v860_v40 = vsel %vm12005_vm3, %v559_v31, %v859_v21  ;;  %v297_v41 = vsel %vm12005_vm3, 0, %v296_v27  ;;  %v320_v48 = vld [vmem:[#allocation2 + $0x84] sm:$0x1]  ;;  %1786 = vmatmul.bf16.gmra.mxu1 %v11186_v18  ;;  %v512_v59 = vld [vmem:[%s11993_s28 + $0x50] sm:$0xf]  ;;  %s10017_s24 = sshll.u32 %s10014_s10, 4  ;;  %s10018_s24 = int_to_ptr.hbm [resolvable:$true] %s10017_s24 }
  0x65   : > { %858 = vst [vmem:[#allocation2 + $0x1c] sm:$0xf] %v558_v39  ;;  %v685_v43 = vor.u32 %v683_v25, %v682_v34  ;;  %v686_v44 = vrot.slane %v682_v34, 4  ;;  %v693_v46 = vor.u32 %v691_v36, %v690_v35  ;;  %v347_v47 = vsel %vm12011_vm7, 0, %v346_v32  ;;  %s10003_s22 = scalar_lea.sflag [#allocation6], %s11987_s8  ;;  %s11793_s12 = scalar_lea.hbm %s15507_s5, 256 }
  0x66   : > { %861 = vst [vmem:[#allocation2 + $0x20] sm:$0x1] %v860_v40  ;;  %v695_v49 = vrot.slane %v690_v35, 4  ;;  %v561_v51 = vshrl.u32 %v496_v37, 16  ;;  %v564_v55 = vshll.u32 %v496_v37, 16  ;;  %v569_v57 = vshrl.u32 %v497_v42, 16 }
  0x67   : > { %v911_v50 = vld [vmem:[#allocation2 + $0x78] sm:$0xf]  ;;  %v694_v52 = vsel %vm12033_vm9, %v686_v44, %v693_v46  ;;  %298 = vst [vmem:[#allocation2 + $0x24] sm:$0x1] %v297_v41  ;;  %v1469_v60 = vpack.c.b16 %v1447_v33, %v1446_v38  ;;  %v572_v63 = vshll.u32 %v497_v42, 16  ;;  %v321_v7 = vsel %vm12005_vm3, 0, %v320_v48 }
  0x68   : > { %v912_v54 = vsel %vm12042_vm10, %v685_v43, %v911_v50  ;;  %v915_v61 = vld [vmem:[#allocation2 + $0x80] sm:$0x1]  ;;  %v563_v62 = vrot.slane %v561_v51, 7  ;;  %914 = vst [vmem:[#allocation2 + $0x7c] sm:$0xf] %v694_v52  ;;  %v571_v2 = vrot.slane %v569_v57, 7 }
  0x69   : > { %913 = vst [vmem:[#allocation2 + $0x78] sm:$0xf] %v912_v54  ;;  %v964_v0 = vld [vmem:[#allocation2 + $0x18] sm:$0xf]  ;;  %v916_v1 = vsel %vm12005_vm3, %v695_v49, %v915_v61  ;;  %v697_v11 = vshrl.u32 %v512_v59, 16  ;;  %v371_v16 = vsel %vm12011_vm7, 0, %v370_v58 }
  0x6a   : > { %v1076_v3 = vshrl.u32 %v964_v0, 16  ;;  %v1079_v4 = vshll.u32 %v964_v0, 16  ;;  %917 = vst [vmem:[#allocation2 + $0x80] sm:$0x1] %v916_v1  ;;  %v567_v6 = vrot.slane %v563_v62, 4  ;;  %v566_v8 = vor.u32 %v564_v55, %v563_v62  ;;  %v11221_v48 = vld [vmem:[#allocation7 + $0xa0] sm:$0xff] }
  0x6b   : > { %348 = vst [vmem:[#allocation2 + $0x2c] sm:$0x1] %v347_v47  ;;  %v574_v9 = vor.u32 %v572_v63, %v571_v2  ;;  %v576_v10 = vrot.slane %v571_v2, 4  ;;  %v700_v17 = vshll.u32 %v512_v59, 16  ;;  %v12135_v25 = vrot.slane %v697_v11, 7  ;;  %v11245_v57 = vld [vmem:[#allocation7 + $0xe0] sm:$0xff]  ;;  %2157 = vmatpush.bf16.msrb.mxu2 %v11221_v48 }
  0x6c   : > { %v965_v12 = vld [vmem:[#allocation2 + $0x1c] sm:$0xf]  ;;  %v1078_v13 = vrot.slane %v1076_v3, 4  ;;  %v1081_v15 = vrot.slane %v1079_v4, 5  ;;  %322 = vst [vmem:[#allocation2 + $0x84] sm:$0x1] %v321_v7  ;;  %2471 = vmatpush.bf16.msrb.mxu3 %v11245_v57 }
  0x6d   : > { %1593 = vmatmul.bf16.gmra.mxu2 %v1469_v60  ;;  %v1010_v18 = vld [vmem:[#allocation2 + $0x20] sm:$0x1]  ;;  %v1085_v19 = vshll.u32 %v965_v12, 16  ;;  %v1089_v21 = vshrl.u32 %v965_v12, 16  ;;  %v575_v22 = vsel %vm12033_vm9, %v567_v6, %v574_v9  ;;  %372 = vst [vmem:[#allocation2 + $0x8c] sm:$0x1] %v371_v16  ;;  %v702_v42 = vor.u32 %v700_v17, %v12135_v25 }
  0x6e   : > { %v1082_v20 = vor.u32 %v1081_v15, %v1078_v13  ;;  %v1095_v23 = vshll.u32 %v1010_v18, 16  ;;  %v862_v24 = vld [vmem:[#allocation2 + $0x24] sm:$0xf]  ;;  %865 = vst [vmem:[#allocation2 + $0x28] sm:$0xf] %v575_v22  ;;  %v11187_v41 = vld [vmem:[#allocation2 + $0x18] sm:$0xff] }
  0x6f   : > { %v1087_v26 = vrot.slane %v1085_v19, 5  ;;  %v1091_v27 = vrot.slane %v1089_v21, 4  ;;  %v863_v29 = vsel %vm12042_vm10, %v566_v8, %v862_v24  ;;  %v981_v32 = vld [vmem:[#allocation2 + $0x7c] sm:$0xf]  ;;  %v513_v35 = vld [vmem:[%s11993_s28 + $0x54] sm:$0xf] }
  0x70   : > { %v980_v28 = vld [vmem:[#allocation2 + $0x78] sm:$0xf]  ;;  %v1083_v30 = vrot.slane %v1082_v20, 4  ;;  %v1097_v31 = vrot.slane %v1095_v23, 5  ;;  %v1277_v38 = vshll.u32 %v981_v32, 16  ;;  %v1281_v39 = vshrl.u32 %v981_v32, 16 }
  0x71   : > { %v1268_v33 = vshrl.u32 %v980_v28, 16  ;;  %v1271_v34 = vshll.u32 %v980_v28, 16  ;;  %v1092_v36 = vor.u32 %v1091_v27, %v1087_v26  ;;  %v1018_v37 = vld [vmem:[#allocation2 + $0x80] sm:$0x1]  ;;  %v11195_v40 = vld [vmem:[#allocation2 + $0x78] sm:$0xff]  ;;  %v703_v61 = vrot.slane %v12135_v25, 4 }
  0x72   : > { %v1088_v43 = vsel %vm12048_vm11, %v1083_v30, %v1087_v26  ;;  %v1287_v47 = vshll.u32 %v1018_v37, 16  ;;  %864 = vst [vmem:[#allocation2 + $0x24] sm:$0xf] %v863_v29  ;;  %v299_v49 = vld [vmem:[#allocation2 + $0x30] sm:$0x1]  ;;  %v1279_v52 = vrot.slane %v1277_v38, 5 }
  0x73   : > { %v1270_v44 = vrot.slane %v1268_v33, 4  ;;  %v1273_v46 = vrot.slane %v1271_v34, 5  ;;  %v1093_v50 = vrot.slane %v1092_v36, 4  ;;  %v1432_v51 = vunpack.c.l.b16 %v1088_v43  ;;  %v866_v55 = vld [vmem:[#allocation2 + $0x2c] sm:$0x1]  ;;  %v11253_v63 = vld [vmem:[#allocation7 + $0x120] sm:$0xff]  ;;  %1831 = vmatmul.bf16.gmra.mxu3 %v11195_v40 }
  0x74   : > { %v1283_v54 = vrot.slane %v1281_v39, 4  ;;  %v1289_v59 = vrot.slane %v1287_v47, 5  ;;  %v867_v60 = vsel %vm12005_vm3, %v576_v10, %v866_v55  ;;  %v918_v62 = vld [vmem:[#allocation2 + $0x84] sm:$0xf]  ;;  %v705_v3 = vshrl.u32 %v513_v35, 16  ;;  %1791 = vmatmul.bf16.gmra.mxu1 %v11187_v41  ;;  %3153 = vmatpush.bf16.msrb.mxu0 %v11253_v63 }
  0x75   : > { %v1274_v58 = vor.u32 %v1273_v46, %v1270_v44  ;;  %v1098_v0 = vsel %vm12048_vm11, %v1093_v50, %v1097_v31  ;;  %868 = vst [vmem:[#allocation2 + $0x2c] sm:$0x1] %v867_v60  ;;  %v967_v2 = vld [vmem:[#allocation2 + $0x28] sm:$0xf]  ;;  %v708_v4 = vshll.u32 %v513_v35, 16  ;;  %v919_v13 = vsel %vm12042_vm10, %v702_v42, %v918_v62 }
  0x76   : > { %v1284_v1 = vor.u32 %v1283_v54, %v1279_v52  ;;  %v1433_v6 = vunpack.c.l.b16 %v1098_v0  ;;  %v1109_v8 = vshll.u32 %v967_v2, 16  ;;  %v1113_v9 = vshrl.u32 %v967_v2, 16  ;;  %v498_v10 = vld [vmem:[%s11993_s28 + $0x18] sm:$0xf]  ;;  %v349_v16 = vld [vmem:[#allocation2 + $0x38] sm:$0x1] }
  0x77   : > { %v1275_v7 = vrot.slane %v1274_v58, 4  ;;  %v707_v12 = vrot.slane %v705_v3, 7  ;;  %v300_v15 = vsel %vm12005_vm3, 0, %v299_v49  ;;  %920 = vst [vmem:[#allocation2 + $0x84] sm:$0xf] %v919_v13  ;;  %v350_v34 = vsel %vm12011_vm7, 0, %v349_v16 }
  0x78   : > { %v1285_v11 = vrot.slane %v1284_v1, 4  ;;  %v1462_v17 = vpack.c.b16 %v1433_v6, %v1432_v51  ;;  %v12155_v19 = vrot.slane %v1109_v8, 5  ;;  %v1115_v21 = vrot.slane %v1113_v9, 4  ;;  %v922_v22 = vld [vmem:[#allocation2 + $0x8c] sm:$0x1] }
  0x79   : > { %v1280_v18 = vsel %vm12048_vm11, %v1275_v7, %v1279_v52  ;;  %v966_v24 = vld [vmem:[#allocation2 + $0x24] sm:$0xf]  ;;  %v710_v25 = vor.u32 %v708_v4, %v707_v12  ;;  %v712_v26 = vrot.slane %v707_v12, 4  ;;  %301 = vst [vmem:[#allocation2 + $0x30] sm:$0x1] %v300_v15  ;;  %v578_v35 = vshrl.u32 %v498_v10, 16 }
  0x7a   : > { %v1290_v20 = vsel %vm12048_vm11, %v1285_v11, %v1289_v59  ;;  %v1448_v23 = vunpack.c.l.b16 %v1280_v18  ;;  %1558 = vmatmul.bf16.gmra.mxu0 %v1462_v17  ;;  %v1100_v28 = vshrl.u32 %v966_v24, 16  ;;  %v1103_v29 = vshll.u32 %v966_v24, 16  ;;  %v499_v31 = vld [vmem:[%s11993_s28 + $0x1c] sm:$0xf]  ;;  %v323_v36 = vld [vmem:[#allocation2 + $0x90] sm:$0x1] }
  0x7b   : > { %v1449_v27 = vunpack.c.l.b16 %v1290_v20  ;;  %v1116_v30 = vor.u32 %v1115_v21, %v12155_v19  ;;  %v711_v32 = vsel %vm12033_vm9, %v703_v61, %v710_v25  ;;  %v923_v33 = vsel %vm12005_vm3, %v712_v26, %v922_v22  ;;  %v373_v37 = vld [vmem:[#allocation2 + $0x98] sm:$0x1]  ;;  %v12168_v43 = vld [vmem:[%s11993_s28 + $0x58] sm:$0xf]  ;;  %351 = vst [vmem:[#allocation2 + $0x38] sm:$0x1] %v350_v34 }
  0x7c   : > { %v1011_v39 = vld [vmem:[#allocation2 + $0x2c] sm:$0x1]  ;;  %v1102_v40 = vrot.slane %v1100_v28, 4  ;;  %v1105_v41 = vrot.slane %v1103_v29, 5  ;;  %921 = vst [vmem:[#allocation2 + $0x88] sm:$0xf] %v711_v32 }
  0x7d   : > { %v1470_v38 = vpack.c.b16 %v1449_v27, %v1448_v23  ;;  %v1117_v42 = vrot.slane %v1116_v30, 4  ;;  %v1119_v44 = vshll.u32 %v1011_v39, 16  ;;  %v580_v46 = vrot.slane %v578_v35, 7  ;;  %924 = vst [vmem:[#allocation2 + $0x8c] sm:$0x1] %v923_v33  ;;  %v11188_v63 = vld [vmem:[#allocation2 + $0x24] sm:$0xff] }
  0x7e   : > { %v581_v47 = vshll.u32 %v498_v10, 16  ;;  %v586_v48 = vshrl.u32 %v499_v31, 16  ;;  %v1106_v49 = vor.u32 %v1105_v41, %v1102_v40  ;;  %v589_v50 = vshll.u32 %v499_v31, 16  ;;  %v982_v55 = vld [vmem:[#allocation2 + $0x84] sm:$0xf]  ;;  %v11220_v12 = vld [vmem:[#allocation7 + $0x98] sm:$0xff] }
  0x7f   : > { %1598 = vmatmul.bf16.gmra.mxu2 %v1470_v38  ;;  %v324_v51 = vsel %vm12005_vm3, 0, %v323_v36  ;;  %v374_v52 = vsel %vm12011_vm7, 0, %v373_v37  ;;  %v1121_v54 = vrot.slane %v1119_v44, 5  ;;  %v584_v58 = vrot.slane %v580_v46, 4  ;;  %v12175_v59 = vld [vmem:[%s11993_s28 + $0x5c] sm:$0xf] }
  0x80   : > { %v583_v57 = vor.u32 %v581_v47, %v580_v46  ;;  %v1107_v60 = vrot.slane %v1106_v49, 4  ;;  %v1292_v61 = vshrl.u32 %v982_v55, 16  ;;  %v1295_v62 = vshll.u32 %v982_v55, 16  ;;  %v869_v1 = vld [vmem:[#allocation2 + $0x30] sm:$0xf]  ;;  %v11244_v13 = vld [vmem:[#allocation7 + $0xd8] sm:$0xff]  ;;  %2158 = vmatpush.bf16.msrb.mxu2 %v11220_v12 }
  0x81   : > { %v588_v0 = vrot.slane %v586_v48, 7  ;;  %v1122_v2 = vsel %vm12048_vm11, %v1117_v42, %v1121_v54  ;;  %325 = vst [vmem:[#allocation2 + $0x90] sm:$0x1] %v324_v51  ;;  %v714_v4 = vshrl.u32 %v12168_v43, 16  ;;  %v717_v6 = vshll.u32 %v12168_v43, 16  ;;  %v11252_v21 = vld [vmem:[#allocation7 + $0x118] sm:$0xff]  ;;  %2472 = vmatpush.bf16.msrb.mxu3 %v11244_v13 }
  0x82   : > { %v870_v3 = vsel %vm12042_vm10, %v583_v57, %v869_v1  ;;  %v302_v7 = vld [vmem:[#allocation2 + $0x3c] sm:$0x1]  ;;  %v1112_v8 = vsel %vm12048_vm11, %v1107_v60, %v12155_v19  ;;  %v1435_v9 = vunpack.c.l.b16 %v1122_v2  ;;  %v1294_v10 = vrot.slane %v1292_v61, 4  ;;  %375 = vst [vmem:[#allocation2 + $0x98] sm:$0x1] %v374_v52  ;;  %3154 = vmatpush.bf16.msrb.mxu0 %v11252_v21 }
  0x83   : > { %v1297_v11 = vrot.slane %v1295_v62, 5  ;;  %871 = vst [vmem:[#allocation2 + $0x30] sm:$0xf] %v870_v3  ;;  %v1434_v15 = vunpack.c.l.b16 %v1112_v8  ;;  %v591_v16 = vor.u32 %v589_v50, %v588_v0  ;;  %v593_v17 = vrot.slane %v588_v0, 4  ;;  %v983_v22 = vld [vmem:[#allocation2 + $0x88] sm:$0xf] }
  0x84   : > { %v716_v18 = vrot.slane %v714_v4, 7  ;;  %v11196_v23 = vld [vmem:[#allocation2 + $0x84] sm:$0xff]  ;;  %v722_v24 = vshrl.u32 %v12175_v59, 16  ;;  %v725_v25 = vshll.u32 %v12175_v59, 16  ;;  %v303_v19 = vsel %vm12005_vm3, 0, %v302_v7  ;;  %1796 = vmatmul.bf16.gmra.mxu1 %v11188_v63 }
  0x85   : > { %v1298_v20 = vor.u32 %v1297_v11, %v1294_v10  ;;  %v352_v26 = vld [vmem:[#allocation2 + $0x44] sm:$0x1]  ;;  %v1019_v27 = vld [vmem:[#allocation2 + $0x8c] sm:$0x1]  ;;  %v1301_v28 = vshll.u32 %v983_v22, 16  ;;  %v1305_v29 = vshrl.u32 %v983_v22, 16  ;;  %v592_v30 = vsel %vm12033_vm9, %v584_v58, %v591_v16  ;;  %1836 = vmatmul.bf16.gmra.mxu3 %v11196_v23 }
  0x86   : > { %304 = vst [vmem:[#allocation2 + $0x3c] sm:$0x1] %v303_v19  ;;  %v1463_v31 = vpack.c.b16 %v1435_v9, %v1434_v15  ;;  %v1311_v33 = vshll.u32 %v1019_v27, 16  ;;  %v873_v34 = vld [vmem:[#allocation2 + $0x38] sm:$0x1]  ;;  %v719_v35 = vor.u32 %v717_v6, %v716_v18  ;;  %v720_v39 = vrot.slane %v716_v18, 4 }
  0x87   : > { %v1299_v32 = vrot.slane %v1298_v20, 4  ;;  %872 = vst [vmem:[#allocation2 + $0x34] sm:$0xf] %v592_v30  ;;  %v1303_v36 = vrot.slane %v1301_v28, 5  ;;  %v1307_v37 = vrot.slane %v1305_v29, 4  ;;  %v874_v38 = vsel %vm12005_vm3, %v593_v17, %v873_v34 }
  0x88   : > { %v500_v40 = vld [vmem:[%s11993_s28 + $0x20] sm:$0xf]  ;;  %v1313_v41 = vrot.slane %v1311_v33, 5  ;;  %875 = vst [vmem:[#allocation2 + $0x38] sm:$0x1] %v874_v38  ;;  %v724_v42 = vrot.slane %v722_v24, 7 }
  0x89   : > { %v925_v43 = vld [vmem:[#allocation2 + $0x90] sm:$0xf]  ;;  %v1304_v44 = vsel %vm12048_vm11, %v1299_v32, %v1303_v36  ;;  %v1308_v46 = vor.u32 %v1307_v37, %v1303_v36  ;;  %v353_v49 = vsel %vm12011_vm7, 0, %v352_v26  ;;  %v501_v50 = vld [vmem:[%s11993_s28 + $0x24] sm:$0xf]  ;;  %v595_v60 = vshrl.u32 %v500_v40, 16 }
  0x8a   : > { %v968_v47 = vld [vmem:[#allocation2 + $0x30] sm:$0xf]  ;;  %v926_v48 = vsel %vm12042_vm10, %v719_v35, %v925_v43  ;;  %1563 = vmatmul.bf16.gmra.mxu0 %v1463_v31  ;;  %v1450_v51 = vunpack.c.l.b16 %v1304_v44  ;;  %v727_v55 = vor.u32 %v725_v25, %v724_v42  ;;  %v929_v57 = vld [vmem:[#allocation2 + $0x98] sm:$0x1]  ;;  %v729_v59 = vrot.slane %v724_v42, 4 }
  0x8b   : > { %v1124_v52 = vshrl.u32 %v968_v47, 16  ;;  %v1127_v54 = vshll.u32 %v968_v47, 16  ;;  %927 = vst [vmem:[#allocation2 + $0x90] sm:$0xf] %v926_v48  ;;  %v1309_v58 = vrot.slane %v1308_v46, 4  ;;  %v598_v61 = vshll.u32 %v500_v40, 16 }
  0x8c   : > { %354 = vst [vmem:[#allocation2 + $0x44] sm:$0x1] %v353_v49  ;;  %v728_v0 = vsel %vm12033_vm9, %v720_v39, %v727_v55  ;;  %v603_v1 = vshrl.u32 %v501_v50, 16  ;;  %v930_v4 = vsel %vm12005_vm3, %v729_v59, %v929_v57  ;;  %v597_v6 = vrot.slane %v595_v60, 7  ;;  %v326_v28 = vld [vmem:[#allocation2 + $0x9c] sm:$0x1] }
  0x8d   : > { %v1126_v62 = vrot.slane %v1124_v52, 4  ;;  %v1129_v63 = vrot.slane %v1127_v54, 5  ;;  %v1314_v2 = vsel %vm12048_vm11, %v1309_v58, %v1313_v41  ;;  %928 = vst [vmem:[#allocation2 + $0x94] sm:$0xf] %v728_v0  ;;  %v876_v11 = vld [vmem:[#allocation2 + $0x3c] sm:$0xf] }
  0x8e   : > { %v969_v3 = vld [vmem:[#allocation2 + $0x34] sm:$0xf]  ;;  %v1451_v7 = vunpack.c.l.b16 %v1314_v2  ;;  %931 = vst [vmem:[#allocation2 + $0x98] sm:$0x1] %v930_v4  ;;  %v600_v13 = vor.u32 %v598_v61, %v597_v6  ;;  %v601_v15 = vrot.slane %v597_v6, 4  ;;  %v605_v16 = vrot.slane %v603_v1, 7 }
  0x8f   : > { %v1130_v8 = vor.u32 %v1129_v63, %v1126_v62  ;;  %v1133_v9 = vshll.u32 %v969_v3, 16  ;;  %v1137_v10 = vshrl.u32 %v969_v3, 16  ;;  %v1012_v12 = vld [vmem:[#allocation2 + $0x38] sm:$0x1]  ;;  %v606_v17 = vshll.u32 %v501_v50, 16  ;;  %v11189_v23 = vld [vmem:[#allocation2 + $0x30] sm:$0xff] }
  0x90   : > { %v1471_v18 = vpack.c.b16 %v1451_v7, %v1450_v51  ;;  %v1143_v24 = vshll.u32 %v1012_v12, 16  ;;  %v610_v26 = vrot.slane %v605_v16, 4  ;;  %v877_v27 = vsel %vm12042_vm10, %v600_v13, %v876_v11  ;;  %v376_v37 = vld [vmem:[#allocation2 + $0xa4] sm:$0x1]  ;;  %v516_v38 = vld [vmem:[%s11993_s28 + $0x60] sm:$0xf] }
  0x91   : > { %v1131_v21 = vrot.slane %v1130_v8, 4  ;;  %v1135_v22 = vrot.slane %v1133_v9, 5  ;;  %v1139_v20 = vrot.slane %v1137_v10, 4  ;;  %v608_v19 = vor.u32 %v606_v17, %v605_v16  ;;  %878 = vst [vmem:[#allocation2 + $0x3c] sm:$0xf] %v877_v27  ;;  %v11219_v55 = vld [vmem:[#allocation7 + $0x90] sm:$0xff] }
  0x92   : > { %v984_v25 = vld [vmem:[#allocation2 + $0x90] sm:$0xf]  ;;  %1603 = vmatmul.bf16.gmra.mxu2 %v1471_v18  ;;  %v1145_v34 = vrot.slane %v1143_v24, 5  ;;  %v517_v44 = vld [vmem:[%s11993_s28 + $0x64] sm:$0xf]  ;;  %v327_v54 = vsel %vm12005_vm3, 0, %v326_v28 }
  0x93   : > { %v1136_v29 = vsel %vm12048_vm11, %v1131_v21, %v1135_v22  ;;  %v1140_v30 = vor.u32 %v1139_v20, %v1135_v22  ;;  %v1316_v31 = vshrl.u32 %v984_v25, 16  ;;  %v1319_v32 = vshll.u32 %v984_v25, 16  ;;  %v880_v33 = vld [vmem:[#allocation2 + $0x44] sm:$0x1]  ;;  %v305_v58 = vld [vmem:[#allocation2 + $0x48] sm:$0x1]  ;;  %2159 = vmatpush.bf16.msrb.mxu2 %v11219_v55 }
  0x94   : > { %v609_v35 = vsel %vm12033_vm9, %v601_v15, %v608_v19  ;;  %v881_v36 = vsel %vm12005_vm3, %v610_v26, %v880_v33  ;;  %v985_v40 = vld [vmem:[#allocation2 + $0x94] sm:$0xf]  ;;  %v1436_v46 = vunpack.c.l.b16 %v1136_v29  ;;  %1801 = vmatmul.bf16.gmra.mxu1 %v11189_v23  ;;  %v11243_v57 = vld [vmem:[#allocation7 + $0xd0] sm:$0xff]  ;;  %328 = vst [vmem:[#allocation2 + $0x9c] sm:$0x1] %v327_v54  ;;  %v377_v62 = vsel %vm12011_vm7, 0, %v376_v37 }
  0x95   : > { %v1141_v39 = vrot.slane %v1140_v30, 4  ;;  %v1318_v41 = vrot.slane %v1316_v31, 4  ;;  %v1321_v42 = vrot.slane %v1319_v32, 5  ;;  %v11197_v43 = vld [vmem:[#allocation2 + $0x90] sm:$0xff]  ;;  %v1020_v47 = vld [vmem:[#allocation2 + $0x98] sm:$0x1]  ;;  %2473 = vmatpush.bf16.msrb.mxu3 %v11243_v57 }
  0x96   : > { %v1325_v48 = vshll.u32 %v985_v40, 16  ;;  %v1329_v49 = vshrl.u32 %v985_v40, 16  ;;  %879 = vst [vmem:[#allocation2 + $0x40] sm:$0xf] %v609_v35  ;;  %v1335_v52 = vshll.u32 %v1020_v47, 16  ;;  %1841 = vmatmul.bf16.gmra.mxu3 %v11197_v43  ;;  %v11251_v63 = vld [vmem:[#allocation7 + $0x110] sm:$0xff] }
  0x97   : > { %v1146_v50 = vsel %vm12048_vm11, %v1141_v39, %v1145_v34  ;;  %v1322_v51 = vor.u32 %v1321_v42, %v1318_v41  ;;  %882 = vst [vmem:[#allocation2 + $0x44] sm:$0x1] %v881_v36  ;;  %v731_v2 = vshrl.u32 %v516_v38, 16  ;;  %v734_v3 = vshll.u32 %v516_v38, 16  ;;  %3155 = vmatpush.bf16.msrb.mxu0 %v11251_v63  ;;  %v355_v25 = vld [vmem:[#allocation2 + $0x50] sm:$0x1] }
  0x98   : > { %v1437_v59 = vunpack.c.l.b16 %v1146_v50  ;;  %v1327_v60 = vrot.slane %v1325_v48, 5  ;;  %v1331_v61 = vrot.slane %v1329_v49, 4  ;;  %v1337_v1 = vrot.slane %v1335_v52, 5  ;;  %378 = vst [vmem:[#allocation2 + $0xa4] sm:$0x1] %v377_v62 }
  0x99   : > { %v1323_v0 = vrot.slane %v1322_v51, 4  ;;  %v970_v7 = vld [vmem:[#allocation2 + $0x3c] sm:$0xf]  ;;  %v739_v8 = vshrl.u32 %v517_v44, 16  ;;  %v742_v9 = vshll.u32 %v517_v44, 16  ;;  %v733_v13 = vrot.slane %v731_v2, 7 }
  0x9a   : > { %v1464_v4 = vpack.c.b16 %v1437_v59, %v1436_v46  ;;  %v1332_v6 = vor.u32 %v1331_v61, %v1327_v60  ;;  %v1148_v11 = vshrl.u32 %v970_v7, 16  ;;  %v1151_v12 = vshll.u32 %v970_v7, 16  ;;  %v502_v19 = vld [vmem:[%s11993_s28 + $0x28] sm:$0xf]  ;;  %v503_v31 = vld [vmem:[%s11993_s28 + $0x2c] sm:$0xf] }
  0x9b   : > { %v1328_v10 = vsel %vm12048_vm11, %v1323_v0, %v1327_v60  ;;  %v741_v17 = vrot.slane %v739_v8, 7  ;;  %v306_v18 = vsel %vm12005_vm3, 0, %v305_v58  ;;  %v736_v23 = vor.u32 %v734_v3, %v733_v13  ;;  %v932_v36 = vld [vmem:[#allocation2 + $0x9c] sm:$0xf]  ;;  %v329_v37 = vld [vmem:[#allocation2 + $0xa8] sm:$0x1] }
  0x9c   : > { %1568 = vmatmul.bf16.gmra.mxu0 %v1464_v4  ;;  %v1333_v15 = vrot.slane %v1332_v6, 4  ;;  %v1452_v16 = vunpack.c.l.b16 %v1328_v10  ;;  %v1150_v22 = vrot.slane %v1148_v11, 4  ;;  %v1153_v20 = vrot.slane %v1151_v12, 5  ;;  %307 = vst [vmem:[#allocation2 + $0x48] sm:$0x1] %v306_v18 }
  0x9d   : > { %v971_v21 = vld [vmem:[#allocation2 + $0x40] sm:$0xf]  ;;  %v737_v24 = vrot.slane %v733_v13, 4  ;;  %v744_v30 = vor.u32 %v742_v9, %v741_v17  ;;  %v746_v35 = vrot.slane %v741_v17, 4  ;;  %v933_v41 = vsel %vm12042_vm10, %v736_v23, %v932_v36  ;;  %v379_v43 = vld [vmem:[#allocation2 + $0xb0] sm:$0x1] }
  0x9e   : > { %v1338_v26 = vsel %vm12048_vm11, %v1333_v15, %v1337_v1  ;;  %v1013_v27 = vld [vmem:[#allocation2 + $0x44] sm:$0x1]  ;;  %v1157_v28 = vshll.u32 %v971_v21, 16  ;;  %v1161_v29 = vshrl.u32 %v971_v21, 16  ;;  %v1154_v33 = vor.u32 %v1153_v20, %v1150_v22  ;;  %934 = vst [vmem:[#allocation2 + $0x9c] sm:$0xf] %v933_v41 }
  0x9f   : > { %v1453_v32 = vunpack.c.l.b16 %v1338_v26  ;;  %v1167_v34 = vshll.u32 %v1013_v27, 16  ;;  %v745_v40 = vsel %vm12033_vm9, %v737_v24, %v744_v30  ;;  %v936_v42 = vld [vmem:[#allocation2 + $0xa4] sm:$0x1]  ;;  %v518_v49 = vld [vmem:[%s11993_s28 + $0x68] sm:$0xf]  ;;  %v356_v51 = vsel %vm12011_vm7, 0, %v355_v25 }
  0xa0   : > { %v1159_v38 = vrot.slane %v1157_v28, 5  ;;  %v1163_v39 = vrot.slane %v1161_v29, 4  ;;  %v1155_v46 = vrot.slane %v1154_v33, 4  ;;  %v937_v48 = vsel %vm12005_vm3, %v746_v35, %v936_v42  ;;  %935 = vst [vmem:[#allocation2 + $0xa0] sm:$0xf] %v745_v40  ;;  %v11190_v57 = vld [vmem:[#allocation2 + $0x3c] sm:$0xff] }
  0xa1   : > { %v1472_v44 = vpack.c.b16 %v1453_v32, %v1452_v16  ;;  %v1169_v47 = vrot.slane %v1167_v34, 5  ;;  %v612_v52 = vshrl.u32 %v502_v19, 16  ;;  %v615_v54 = vshll.u32 %v502_v19, 16  ;;  %938 = vst [vmem:[#allocation2 + $0xa4] sm:$0x1] %v937_v48  ;;  %v11218_v13 = vld [vmem:[#allocation7 + $0x88] sm:$0xff] }
  0xa2   : > { %v1164_v50 = vor.u32 %v1163_v39, %v1159_v38  ;;  %v1160_v55 = vsel %vm12048_vm11, %v1155_v46, %v1159_v38  ;;  %v620_v58 = vshrl.u32 %v503_v31, 16  ;;  %v623_v59 = vshll.u32 %v503_v31, 16  ;;  %357 = vst [vmem:[#allocation2 + $0x50] sm:$0x1] %v356_v51  ;;  %v519_v8 = vld [vmem:[%s11993_s28 + $0x6c] sm:$0xf]  ;;  %2160 = vmatpush.bf16.msrb.mxu2 %v11218_v13 }
  0xa3   : > { %1608 = vmatmul.bf16.gmra.mxu2 %v1472_v44  ;;  %v330_v60 = vsel %vm12005_vm3, 0, %v329_v37  ;;  %v614_v62 = vrot.slane %v612_v52, 7  ;;  %v380_v63 = vsel %vm12011_vm7, 0, %v379_v43  ;;  %v1438_v0 = vunpack.c.l.b16 %v1160_v55  ;;  %v883_v2 = vld [vmem:[#allocation2 + $0x48] sm:$0xf]  ;;  %v11242_v15 = vld [vmem:[#allocation7 + $0xc8] sm:$0xff] }
  0xa4   : > { %v1165_v61 = vrot.slane %v1164_v50, 4  ;;  %v622_v1 = vrot.slane %v620_v58, 7  ;;  %331 = vst [vmem:[#allocation2 + $0xa8] sm:$0x1] %v330_v60  ;;  %v748_v3 = vshrl.u32 %v518_v49, 16  ;;  %v751_v9 = vshll.u32 %v518_v49, 16  ;;  %1806 = vmatmul.bf16.gmra.mxu1 %v11190_v57  ;;  %2474 = vmatpush.bf16.msrb.mxu3 %v11242_v15 }
  0xa5   : > { %v617_v6 = vor.u32 %v615_v54, %v614_v62  ;;  %v618_v7 = vrot.slane %v614_v62, 4  ;;  %381 = vst [vmem:[#allocation2 + $0xb0] sm:$0x1] %v380_v63  ;;  %v11250_v16 = vld [vmem:[#allocation7 + $0x108] sm:$0xff]  ;;  %v756_v22 = vshrl.u32 %v519_v8, 16  ;;  %v759_v20 = vshll.u32 %v519_v8, 16 }
  0xa6   : > { %v1170_v4 = vsel %vm12048_vm11, %v1165_v61, %v1169_v47  ;;  %v625_v11 = vor.u32 %v623_v59, %v622_v1  ;;  %v750_v12 = vrot.slane %v748_v3, 7  ;;  %v986_v17 = vld [vmem:[#allocation2 + $0x9c] sm:$0xf]  ;;  %v627_v18 = vrot.slane %v622_v1, 4  ;;  %v11264_v23 = vld [vmem:[#allocation7 + $0x178] sm:$0xff]  ;;  %3156 = vmatpush.bf16.msrb.mxu0 %v11250_v16 }
  0xa7   : > { %v1439_v10 = vunpack.c.l.b16 %v1170_v4  ;;  %v884_v21 = vsel %vm12042_vm10, %v617_v6, %v883_v2  ;;  %v987_v25 = vld [vmem:[#allocation2 + $0xa0] sm:$0xf]  ;;  %v1340_v19 = vshrl.u32 %v986_v17, 16  ;;  %v1343_v26 = vshll.u32 %v986_v17, 16  ;;  %3576 = vmatpush.bf16.msrb.mxu1 %v11264_v23  ;;  %v308_v51 = vld [vmem:[#allocation2 + $0x54] sm:$0x1] }
  0xa8   : > { %v11198_v27 = vld [vmem:[#allocation2 + $0x9c] sm:$0xff]  ;;  %v626_v28 = vsel %vm12033_vm9, %v618_v7, %v625_v11  ;;  %v1021_v29 = vld [vmem:[#allocation2 + $0xa4] sm:$0x1]  ;;  %v1349_v30 = vshll.u32 %v987_v25, 16  ;;  %v1353_v31 = vshrl.u32 %v987_v25, 16  ;;  %v753_v32 = vor.u32 %v751_v9, %v750_v12 }
  0xa9   : > { %v1465_v24 = vpack.c.b16 %v1439_v10, %v1438_v0  ;;  %885 = vst [vmem:[#allocation2 + $0x48] sm:$0xf] %v884_v21  ;;  %v1342_v33 = vrot.slane %v1340_v19, 4  ;;  %v1345_v34 = vrot.slane %v1343_v26, 5  ;;  %v1359_v35 = vshll.u32 %v1021_v29, 16  ;;  %1846 = vmatmul.bf16.gmra.mxu3 %v11198_v27 }
  0xaa   : > { %886 = vst [vmem:[#allocation2 + $0x4c] sm:$0xf] %v626_v28  ;;  %v1351_v36 = vrot.slane %v1349_v30, 5  ;;  %v1355_v37 = vrot.slane %v1353_v31, 4  ;;  %v887_v38 = vld [vmem:[#allocation2 + $0x50] sm:$0x1] }
  0xab   : > { %v754_v39 = vrot.slane %v750_v12, 4  ;;  %v758_v40 = vrot.slane %v756_v22, 7  ;;  %v1346_v41 = vor.u32 %v1345_v34, %v1342_v33  ;;  %v1361_v42 = vrot.slane %v1359_v35, 5  ;;  %v939_v44 = vld [vmem:[#allocation2 + $0xa8] sm:$0xf] }
  0xac   : > { %1573 = vmatmul.bf16.gmra.mxu0 %v1465_v24  ;;  %v888_v43 = vsel %vm12005_vm3, %v627_v18, %v887_v38  ;;  %v943_v46 = vld [vmem:[#allocation2 + $0xb0] sm:$0x1]  ;;  %v1356_v47 = vor.u32 %v1355_v37, %v1351_v36  ;;  %v940_v50 = vsel %vm12042_vm10, %v753_v32, %v939_v44  ;;  %v309_v54 = vsel %vm12005_vm3, 0, %v308_v51  ;;  %v358_v55 = vld [vmem:[#allocation2 + $0x5c] sm:$0x1] }
  0xad   : > { %889 = vst [vmem:[#allocation2 + $0x50] sm:$0x1] %v888_v43  ;;  %v761_v48 = vor.u32 %v759_v20, %v758_v40  ;;  %v763_v49 = vrot.slane %v758_v40, 4  ;;  %v1347_v52 = vrot.slane %v1346_v41, 4  ;;  %v359_v60 = vsel %vm12011_vm7, 0, %v358_v55 }
  0xae   : > { %941 = vst [vmem:[#allocation2 + $0xa8] sm:$0xf] %v940_v50  ;;  %v1357_v57 = vrot.slane %v1356_v47, 4  ;;  %v504_v61 = vld [vmem:[%s11993_s28 + $0x30] sm:$0xf] }
  0xaf   : > { %v762_v58 = vsel %vm12033_vm9, %v754_v39, %v761_v48  ;;  %v944_v59 = vsel %vm12005_vm3, %v763_v49, %v943_v46  ;;  %310 = vst [vmem:[#allocation2 + $0x54] sm:$0x1] %v309_v54  ;;  %v1352_v62 = vsel %vm12048_vm11, %v1347_v52, %v1351_v36  ;;  %v505_v0 = vld [vmem:[%s11993_s28 + $0x34] sm:$0xf]  ;;  %v629_v11 = vshrl.u32 %v504_v61, 16 }
  0xb0   : > { %v972_v63 = vld [vmem:[#allocation2 + $0x48] sm:$0xf]  ;;  %942 = vst [vmem:[#allocation2 + $0xac] sm:$0xf] %v762_v58  ;;  %v1362_v1 = vsel %vm12048_vm11, %v1357_v57, %v1361_v42  ;;  %v1454_v2 = vunpack.c.l.b16 %v1352_v62  ;;  %v632_v15 = vshll.u32 %v504_v61, 16  ;;  %v637_v16 = vshrl.u32 %v505_v0, 16 }
  0xb1   : > { %v973_v3 = vld [vmem:[#allocation2 + $0x4c] sm:$0xf]  ;;  %v1172_v4 = vshrl.u32 %v972_v63, 16  ;;  %v1175_v6 = vshll.u32 %v972_v63, 16  ;;  %945 = vst [vmem:[#allocation2 + $0xb0] sm:$0x1] %v944_v59  ;;  %v1455_v7 = vunpack.c.l.b16 %v1362_v1 }
  0xb2   : > { %v1181_v8 = vshll.u32 %v973_v3, 16  ;;  %v1185_v9 = vshrl.u32 %v973_v3, 16  ;;  %v11191_v10 = vld [vmem:[#allocation2 + $0x48] sm:$0xff]  ;;  %360 = vst [vmem:[#allocation2 + $0x5c] sm:$0x1] %v359_v60  ;;  %v631_v20 = vrot.slane %v629_v11, 7 }
  0xb3   : > { %v1174_v12 = vrot.slane %v1172_v4, 4  ;;  %v1177_v13 = vrot.slane %v1175_v6, 5  ;;  %v1473_v17 = vpack.c.b16 %v1455_v7, %v1454_v2  ;;  %v639_v19 = vrot.slane %v637_v16, 7  ;;  %v332_v38 = vld [vmem:[#allocation2 + $0xb4] sm:$0x1]  ;;  %v11263_v3 = vld [vmem:[#allocation7 + $0x170] sm:$0xff] }
  0xb4   : > { %v1014_v18 = vld [vmem:[#allocation2 + $0x50] sm:$0x1]  ;;  %v1183_v21 = vrot.slane %v1181_v8, 5  ;;  %v1187_v22 = vrot.slane %v1185_v9, 4  ;;  %v640_v26 = vshll.u32 %v505_v0, 16  ;;  %1811 = vmatmul.bf16.gmra.mxu1 %v11191_v10  ;;  %v634_v30 = vor.u32 %v632_v15, %v631_v20  ;;  %v11262_v15 = vld [vmem:[#allocation7 + $0x168] sm:$0xff] }
  0xb5   : > { %v1178_v23 = vor.u32 %v1177_v13, %v1174_v12  ;;  %v1191_v24 = vshll.u32 %v1014_v18, 16  ;;  %v988_v25 = vld [vmem:[#allocation2 + $0xa8] sm:$0xf]  ;;  %1613 = vmatmul.bf16.gmra.mxu2 %v1473_v17  ;;  %v635_v35 = vrot.slane %v631_v20, 4  ;;  %v382_v39 = vld [vmem:[#allocation2 + $0xbc] sm:$0x1]  ;;  %3577 = vmatpush.bf16.msrb.mxu1 %v11263_v3 }
  0xb6   : > { %v1188_v27 = vor.u32 %v1187_v22, %v1183_v21  ;;  %v1364_v28 = vshrl.u32 %v988_v25, 16  ;;  %v1367_v29 = vshll.u32 %v988_v25, 16  ;;  %v642_v36 = vor.u32 %v640_v26, %v639_v19  ;;  %v890_v37 = vld [vmem:[#allocation2 + $0x54] sm:$0xf]  ;;  %v520_v51 = vld [vmem:[%s11993_s28 + $0x70] sm:$0xf] }
  0xb7   : > { %v1179_v31 = vrot.slane %v1178_v23, 4  ;;  %v1193_v32 = vrot.slane %v1191_v24, 5  ;;  %v989_v33 = vld [vmem:[#allocation2 + $0xac] sm:$0xf]  ;;  %v521_v58 = vld [vmem:[%s11993_s28 + $0x74] sm:$0xf]  ;;  %v891_v0 = vsel %vm12042_vm10, %v634_v30, %v890_v37 }
  0xb8   : > { %v11199_v34 = vld [vmem:[#allocation2 + $0xa8] sm:$0xff]  ;;  %v1189_v40 = vrot.slane %v1188_v27, 4  ;;  %v1022_v41 = vld [vmem:[#allocation2 + $0xb0] sm:$0x1]  ;;  %v1366_v42 = vrot.slane %v1364_v28, 4  ;;  %v1369_v43 = vrot.slane %v1367_v29, 5  ;;  %v643_v49 = vsel %vm12033_vm9, %v635_v35, %v642_v36 }
  0xb9   : > { %v1373_v44 = vshll.u32 %v989_v33, 16  ;;  %v1184_v46 = vsel %vm12048_vm11, %v1179_v31, %v1183_v21  ;;  %v1377_v47 = vshrl.u32 %v989_v33, 16  ;;  %v1383_v48 = vshll.u32 %v1022_v41, 16  ;;  %v894_v50 = vld [vmem:[#allocation2 + $0x5c] sm:$0x1]  ;;  %1851 = vmatmul.bf16.gmra.mxu3 %v11199_v34  ;;  %v11217_v9 = vld [vmem:[#allocation7 + $0x80] sm:$0xff]  ;;  %3578 = vmatpush.bf16.msrb.mxu1 %v11262_v15 }
  0xba   : > { %v1194_v52 = vsel %vm12048_vm11, %v1189_v40, %v1193_v32  ;;  %v1440_v54 = vunpack.c.l.b16 %v1184_v46  ;;  %v1370_v55 = vor.u32 %v1369_v43, %v1366_v42  ;;  %893 = vst [vmem:[#allocation2 + $0x58] sm:$0xf] %v643_v49  ;;  %v644_v62 = vrot.slane %v639_v19, 4  ;;  %v11241_v10 = vld [vmem:[#allocation7 + $0xc0] sm:$0xff]  ;;  %2161 = vmatpush.bf16.msrb.mxu2 %v11217_v9  ;;  %v2589_v32 = vld [vmem:[#allocation2 + $0xc] sm:$0xf] }
  0xbb   : > { %v1375_v57 = vrot.slane %v1373_v44, 5  ;;  %v1441_v59 = vunpack.c.l.b16 %v1194_v52  ;;  %v1379_v60 = vrot.slane %v1377_v47, 4  ;;  %v1385_v61 = vrot.slane %v1383_v48, 5  ;;  %892 = vst [vmem:[#allocation2 + $0x54] sm:$0xf] %v891_v0  ;;  %v11249_v21 = vld [vmem:[#allocation7 + $0x100] sm:$0xff]  ;;  %2475 = vmatpush.bf16.msrb.mxu3 %v11241_v10 }
  0xbc   : > { %v1371_v63 = vrot.slane %v1370_v55, 4  ;;  %v333_v1 = vsel %vm12005_vm3, 0, %v332_v38  ;;  %v383_v2 = vsel %vm12011_vm7, 0, %v382_v39  ;;  %v895_v7 = vsel %vm12005_vm3, %v644_v62, %v894_v50  ;;  %3157 = vmatpush.bf16.msrb.mxu0 %v11249_v21  ;;  %v11261_v31 = vld [vmem:[#allocation7 + $0x160] sm:$0xff]  ;;  %v11260_v52 = vld [vmem:[#allocation7 + $0x158] sm:$0xff]  ;;  %v11259_v9 = vld [vmem:[#allocation7 + $0x150] sm:$0xff] }
  0xbd   : > { %v1466_v4 = vpack.c.b16 %v1441_v59, %v1440_v54  ;;  %v1380_v6 = vor.u32 %v1379_v60, %v1375_v57  ;;  %v765_v8 = vshrl.u32 %v520_v51, 16  ;;  %896 = vst [vmem:[#allocation2 + $0x5c] sm:$0x1] %v895_v7  ;;  %v773_v12 = vshrl.u32 %v521_v58, 16  ;;  %v12294_v42 = vld [vmem:[#allocation2 + $0x10] sm:$0xf]  ;;  %3579 = vmatpush.bf16.msrb.mxu1 %v11261_v31 }
  0xbe   : > { %v1376_v11 = vsel %vm12048_vm11, %v1371_v63, %v1375_v57  ;;  %v776_v13 = vshll.u32 %v521_v58, 16  ;;  %334 = vst [vmem:[#allocation2 + $0xb4] sm:$0x1] %v333_v1  ;;  %v768_v18 = vshll.u32 %v520_v51, 16  ;;  %v12296_v47 = vld [vmem:[#allocation2 + $0x14] sm:$0x1] }
  0xbf   : > { %1578 = vmatmul.bf16.gmra.mxu0 %v1466_v4  ;;  %v1381_v16 = vrot.slane %v1380_v6, 4  ;;  %v767_v17 = vrot.slane %v765_v8, 7  ;;  %v1456_v22 = vunpack.c.l.b16 %v1376_v11  ;;  %384 = vst [vmem:[#allocation2 + $0xbc] sm:$0x1] %v383_v2  ;;  %v775_v20 = vrot.slane %v773_v12, 7  ;;  %v11296_v15 = vld [vmem:[#allocation7 + $0x1f8] sm:$0xff] }
  0xc0   : > { %v2638_v54 = vshrl.u32 %v2589_v32, 16  ;;  %v2647_v63 = vshll.u32 %v12294_v42, 16  ;;  %v2651_v0 = vshrl.u32 %v12294_v42, 16  ;;  %v2657_v1 = vshll.u32 %v12296_v47, 16  ;;  %4573 = vmatpush.bf16.msra.mxu3 %v11296_v15 }
  0xc1   : > { %v1386_v23 = vsel %vm12048_vm11, %v1381_v16, %v1385_v61  ;;  %v975_v24 = vld [vmem:[#allocation2 + $0x58] sm:$0xf]  ;;  %v771_v25 = vrot.slane %v767_v17, 4  ;;  %v778_v28 = vor.u32 %v776_v13, %v775_v20  ;;  %v770_v29 = vor.u32 %v768_v18, %v767_v17  ;;  %3580 = vmatpush.bf16.msrb.mxu1 %v11260_v52  ;;  %v11288_v13 = vld [vmem:[#allocation7 + $0x1b8] sm:$0xff] }
  0xc2   : > { %v1457_v19 = vunpack.c.l.b16 %v1386_v23  ;;  %v1205_v26 = vshll.u32 %v975_v24, 16  ;;  %v1209_v27 = vshrl.u32 %v975_v24, 16  ;;  %v780_v30 = vrot.slane %v775_v20, 4  ;;  %v974_v34 = vld [vmem:[#allocation2 + $0x54] sm:$0xf]  ;;  %3891 = vmatpush.bf16.msra.mxu2 %v11288_v13 }
  0xc3   : > { %v779_v37 = vsel %vm12033_vm9, %v771_v25, %v778_v28  ;;  %v11192_v38 = vld [vmem:[#allocation2 + $0x54] sm:$0xff]  ;;  %v1196_v40 = vshrl.u32 %v974_v34, 16  ;;  %v1199_v41 = vshll.u32 %v974_v34, 16  ;;  %v2640_v60 = vrot.slane %v2638_v54, 4  ;;  %v3271_v20 = vld [vmem:[#allocation2 + $0xc] sm:$0xe] }
  0xc4   : > { %v1474_v33 = vpack.c.b16 %v1457_v19, %v1456_v22  ;;  %v1207_v35 = vrot.slane %v1205_v26, 5  ;;  %v1211_v36 = vrot.slane %v1209_v27, 4  ;;  %v1015_v39 = vld [vmem:[#allocation2 + $0x5c] sm:$0x1]  ;;  %949 = vst [vmem:[#allocation2 + $0xb8] sm:$0xf] %v779_v37  ;;  %1816 = vmatmul.bf16.gmra.mxu1 %v11192_v38 }
  0xc5   : > { %v1215_v44 = vshll.u32 %v1015_v39, 16  ;;  %v946_v46 = vld [vmem:[#allocation2 + $0xb4] sm:$0xf]  ;;  %v1198_v48 = vrot.slane %v1196_v40, 4  ;;  %v1201_v49 = vrot.slane %v1199_v41, 5  ;;  %v2641_v61 = vshll.u32 %v2589_v32, 16  ;;  %3581 = vmatpush.bf16.msrb.mxu1 %v11259_v9 }
  0xc6   : > { %1618 = vmatmul.bf16.gmra.mxu2 %v1474_v33  ;;  %v1212_v43 = vor.u32 %v1211_v36, %v1207_v35  ;;  %v947_v50 = vsel %vm12042_vm10, %v770_v29, %v946_v46  ;;  %v950_v51 = vld [vmem:[#allocation2 + $0xbc] sm:$0x1]  ;;  %v12307_v7 = vrot.slane %v2647_v63, 5  ;;  %v2653_v8 = vrot.slane %v2651_v0, 4  ;;  %v11304_v22 = vld [vmem:[#allocation7 + $0x238] sm:$0xff]  ;;  %v11257_v46 = vld [vmem:[#allocation7 + $0x140] sm:$0xff] }
  0xc7   : > { %v1217_v57 = vrot.slane %v1215_v44, 5  ;;  %948 = vst [vmem:[#allocation2 + $0xb4] sm:$0xf] %v947_v50  ;;  %v951_v58 = vsel %vm12005_vm3, %v780_v30, %v950_v51  ;;  %v1202_v59 = vor.u32 %v1201_v49, %v1198_v48  ;;  %v2643_v3 = vrot.slane %v2641_v61, 5  ;;  %v11258_v26 = vld [vmem:[#allocation7 + $0x148] sm:$0xff]  ;;  %4999 = vmatpush.bf16.msra.mxu0 %v11304_v22 }
  0xc8   : > { %v1213_v55 = vrot.slane %v1212_v43, 4  ;;  %952 = vst [vmem:[#allocation2 + $0xbc] sm:$0x1] %v951_v58  ;;  %v2654_v18 = vor.u32 %v2653_v8, %v12307_v7  ;;  %v2659_v21 = vrot.slane %v2657_v1, 5  ;;  %v3337_v31 = vrot.slane %v12294_v42, 5 }
  0xc9   : > { %v1203_v2 = vrot.slane %v1202_v59, 4  ;;  %v2644_v17 = vor.u32 %v2643_v3, %v2640_v60  ;;  %v10427_v34 = vrot.slane %v3271_v20, 9  ;;  %3582 = vmatpush.bf16.msrb.mxu1 %v11258_v26  ;;  %v2592_v51 = vld [vmem:[#allocation2 + $0x18] sm:$0xf]  ;;  %v11611_v1 = vld [vmem:[#allocation2 + $0x4] sm:$0xf] }
  0xca   : > { %v1218_v62 = vsel %vm12048_vm11, %v1213_v55, %v1217_v57  ;;  %v2655_v41 = vrot.slane %v2654_v18, 4  ;;  %v3339_v50 = vrot.slane %v3337_v31, 4  ;;  %v2593_v55 = vld [vmem:[#allocation2 + $0x1c] sm:$0xf]  ;;  %v2662_v63 = vshrl.u32 %v2592_v51, 16  ;;  %v11225_v26 = vld [vmem:[#allocation2 + $0xc] sm:$0xff] }
  0xcb   : > { %v1443_v4 = vunpack.c.l.b16 %v1218_v62  ;;  %v991_v6 = vld [vmem:[#allocation2 + $0xb8] sm:$0xf]  ;;  %v1208_v10 = vsel %vm12048_vm11, %v1203_v2, %v1207_v35  ;;  %v3340_v35 = vrot.slane %v12296_v47, 5  ;;  %v2645_v40 = vrot.slane %v2644_v17, 4  ;;  %v1862_v8 = vld [vmem:[#allocation2] sm:$0xe] }
  0xcc   : > { %v1397_v11 = vshll.u32 %v991_v6, 16  ;;  %v1401_v12 = vshrl.u32 %v991_v6, 16  ;;  %v1442_v16 = vunpack.c.l.b16 %v1208_v10  ;;  %v3338_v47 = vsel %vm12316_vm14, %v10427_v34, %v3337_v31  ;;  %v2594_v22 = vld [vmem:[#allocation2 + $0x20] sm:$0x1] }
  0xcd   : > { %v3464_v54 = vunpack.c.l.b16 %v3338_v47  ;;  %v2650_v58 = vsel %vm12048_vm11, %v2645_v40, %v12307_v7  ;;  %v2660_v59 = vsel %vm12048_vm11, %v2655_v41, %v2659_v21  ;;  %v3341_v60 = vsel %vm12316_vm14, %v3339_v50, %v3340_v35  ;;  %3583 = vmatpush.bf16.msrb.mxu1 %v11257_v46 }
  0xce   : > { %v990_v23 = vld [vmem:[#allocation2 + $0xb4] sm:$0xf]  ;;  %v1399_v24 = vrot.slane %v1397_v11, 5  ;;  %v1403_v25 = vrot.slane %v1401_v12, 4  ;;  %v1467_v27 = vpack.c.b16 %v1443_v4, %v1442_v16  ;;  %v3465_v62 = vunpack.c.l.b16 %v3341_v60 }
  0xcf   : > { %v11200_v19 = vld [vmem:[#allocation2 + $0xb4] sm:$0xff]  ;;  %v1023_v28 = vld [vmem:[#allocation2 + $0xbc] sm:$0x1]  ;;  %v1388_v29 = vshrl.u32 %v990_v23, 16  ;;  %v1391_v30 = vshll.u32 %v990_v23, 16  ;;  %v1549_v38 = vpop.f32.mrf.mxu0  ;;  %v1915_v2 = vrot.slane %v11611_v1, 5  ;;  %v3038_v7 = vunpack.c.l.b16 %v2650_v58 }
  0xd0   : > { %v1404_v32 = vor.u32 %v1403_v25, %v1399_v24  ;;  %v1407_v33 = vshll.u32 %v1023_v28, 16  ;;  %1856 = vmatmul.bf16.gmra.mxu3 %v11200_v19  ;;  %1583 = vmatmul.bf16.gmra.mxu0 %v1467_v27  ;;  %v2665_v3 = vshll.u32 %v2592_v51, 16  ;;  %v2671_v4 = vshll.u32 %v2593_v55, 16  ;;  %v11612_v23 = vld [vmem:[#allocation2 + $0x8] sm:$0x1] }
  0xd1   : > { %v1390_v36 = vrot.slane %v1388_v29, 4  ;;  %v1393_v37 = vrot.slane %v1391_v30, 5  ;;  %v1782_v44 = vpop.f32.mrf.mxu1  ;;  %v3039_v9 = vunpack.c.l.b16 %v2660_v59  ;;  %v3496_v11 = vpack.c.b16 %v3465_v62, %v3464_v54  ;;  %v3272_v28 = vld [vmem:[#allocation2 + $0x18] sm:$0xe]  ;;  %v2595_v54 = vld [vmem:[#allocation2 + $0x24] sm:$0xf] }
  0xd2   : > { %v1405_v43 = vrot.slane %v1404_v32, 4  ;;  %v1409_v42 = vrot.slane %v1407_v33, 5  ;;  %v12322_v49 = vadd.f32 %v1782_v44, %v1549_v38  ;;  %v2664_v13 = vrot.slane %v2662_v63, 4 }
  0xd3   : > { %v1394_v48 = vor.u32 %v1393_v37, %v1390_v36  ;;  %v2667_v15 = vrot.slane %v2665_v3, 5  ;;  %v2673_v16 = vrot.slane %v2671_v4, 5  ;;  %v2675_v17 = vshrl.u32 %v2593_v55, 16 }
  0xd4   : > { %v1410_v52 = vsel %vm12048_vm11, %v1405_v43, %v1409_v42  ;;  %3584 = vmatmul.bf16.vlgmr.msrb.gmra.mxu1 %v3496_v11  ;;  %v10251_v20 = vrot.slane %v1862_v8, 9  ;;  %v1917_v19 = vrot.slane %v1915_v2, 4  ;;  %v3070_v27 = vpack.c.b16 %v3039_v9, %v3038_v7  ;;  %v11613_v8 = vld [vmem:[#allocation2 + $0x10] sm:$0xf] }
  0xd5   : > { %v1395_v57 = vrot.slane %v1394_v48, 4  ;;  %v1459_v61 = vunpack.c.l.b16 %v1410_v52  ;;  %v2677_v25 = vrot.slane %v2675_v17, 4  ;;  %v3344_v29 = vrot.slane %v2593_v55, 5 }
  0xd6   : > { %v1822_v10 = vpop.f32.mrf.mxu3  ;;  %v3347_v30 = vrot.slane %v2594_v22, 5  ;;  %v2668_v31 = vor.u32 %v2667_v15, %v2664_v13  ;;  %v2681_v33 = vshll.u32 %v2594_v22, 16  ;;  %v10428_v34 = vrot.slane %v3272_v28, 9  ;;  %v2597_v15 = vld [vmem:[#allocation2 + $0x2c] sm:$0x1]  ;;  %v11295_v28 = vld [vmem:[#allocation7 + $0x1f0] sm:$0xff] }
  0xd7   : > { %v1400_v0 = vsel %vm12048_vm11, %v1395_v57, %v1399_v24  ;;  %v12335_v12 = vpop.f32.mrf.mxu0  ;;  %v1918_v24 = vrot.slane %v11612_v23, 5  ;;  %v2678_v32 = vor.u32 %v2677_v25, %v2673_v16  ;;  %v3346_v36 = vrot.slane %v3344_v29, 4  ;;  %v2596_v57 = vld [vmem:[#allocation2 + $0x28] sm:$0xf]  ;;  %v11614_v23 = vld [vmem:[#allocation2 + $0x14] sm:$0x1]  ;;  %4574 = vmatpush.bf16.msra.mxu3 %v11295_v28 }
  0xd8   : > { %v1458_v6 = vunpack.c.l.b16 %v1400_v0  ;;  %v3345_v38 = vsel %vm12316_vm14, %v10428_v34, %v3344_v29  ;;  %v1916_v40 = vsel %vm12316_vm14, %v10251_v20, %v1915_v2  ;;  %v2669_v44 = vrot.slane %v2668_v31, 4  ;;  %v11226_v25 = vld [vmem:[#allocation2 + $0x18] sm:$0xff]  ;;  %v11303_v29 = vld [vmem:[#allocation7 + $0x230] sm:$0xff] }
  0xd9   : > { %v12337_v21 = vpop.f32.mrf.mxu1  ;;  %v3348_v43 = vsel %vm12316_vm14, %v3346_v36, %v3347_v30  ;;  %v1919_v42 = vsel %vm12316_vm14, %v1917_v19, %v1918_v24  ;;  %v2679_v46 = vrot.slane %v2678_v32, 4  ;;  %v2683_v47 = vrot.slane %v2681_v33, 5  ;;  %v3273_v34 = vld [vmem:[#allocation2 + $0x24] sm:$0xe]  ;;  %5000 = vmatpush.bf16.msra.mxu0 %v11303_v29  ;;  %v2600_v29 = vld [vmem:[#allocation2 + $0x38] sm:$0x1] }
  0xda   : > { %v1475_v18 = vpack.c.b16 %v1459_v61, %v1458_v6  ;;  %v3466_v51 = vunpack.c.l.b16 %v3345_v38  ;;  %v3467_v52 = vunpack.c.l.b16 %v3348_v43  ;;  %v2042_v58 = vunpack.c.l.b16 %v1916_v40  ;;  %v1863_v6 = vld [vmem:[#allocation2 + $0xc] sm:$0xe] }
  0xdb   : > { %v2043_v59 = vunpack.c.l.b16 %v1919_v42  ;;  %v2674_v60 = vsel %vm12048_vm11, %v2669_v44, %v2673_v16  ;;  %v2684_v61 = vsel %vm12048_vm11, %v2679_v46, %v2683_v47  ;;  %v2686_v62 = vshrl.u32 %v2595_v54, 16 }
  0xdc   : > { %1623 = vmatmul.bf16.gmra.mxu2 %v1475_v18  ;;  %v3497_v0 = vpack.c.b16 %v3467_v52, %v3466_v51  ;;  %v2689_v1 = vshll.u32 %v2595_v54, 16  ;;  %v2695_v2 = vshll.u32 %v2596_v57, 16  ;;  %v2699_v3 = vshrl.u32 %v2596_v57, 16  ;;  %v2598_v52 = vld [vmem:[#allocation2 + $0x30] sm:$0xf] }
  0xdd   : > { %v2074_v4 = vpack.c.b16 %v2043_v59, %v2042_v58  ;;  %v1922_v7 = vrot.slane %v11613_v8, 5  ;;  %v3041_v11 = vunpack.c.l.b16 %v2684_v61  ;;  %v2688_v16 = vrot.slane %v2686_v62, 4  ;;  %v2599_v54 = vld [vmem:[#allocation2 + $0x34] sm:$0xf] }
  0xde   : > { %v12345_v41 = vpop.f32.mrf.mxu3  ;;  %v2691_v17 = vrot.slane %v2689_v1, 5  ;;  %v2697_v18 = vrot.slane %v2695_v2, 5  ;;  %v2701_v22 = vrot.slane %v2699_v3, 4  ;;  %v10252_v20 = vrot.slane %v1863_v6, 9 }
  0xdf   : > { %15529 = vst [vmem:[#allocation14_spill] sm:$0xff] %v12345_v41  ;;  %v1554_v48 = vpop.f32.mrf.mxu0  ;;  %v1925_v24 = vrot.slane %v11614_v23, 5  ;;  %v1924_v19 = vrot.slane %v1922_v7, 4  ;;  %v3351_v30 = vrot.slane %v2596_v57, 5  ;;  %v3354_v31 = vrot.slane %v2597_v15, 5 }
  0xe0   : > { %v1589_v35 = vpop.f32.mrf.mxu2  ;;  %2476 = vmatmul.bf16.vlgmr.msrb.gmra.mxu3 %v11225_v26  ;;  %3158 = vmatmul.bf16.vlgmr.msrb.gmra.mxu0 %v3070_v27  ;;  %v11287_v27 = vld [vmem:[#allocation7 + $0x1b0] sm:$0xff]  ;;  %v2705_v33 = vshll.u32 %v2597_v15, 16  ;;  %v2692_v36 = vor.u32 %v2691_v17, %v2688_v16  ;;  %v2702_v38 = vor.u32 %v2701_v22, %v2697_v18  ;;  %v10429_v40 = vrot.slane %v3273_v34, 9  ;;  %v2621_v41 = vld [vmem:[#allocation2 + $0x8c] sm:$0x1] }
  0xe1   : > { %v12339_v37 = vadd.f32 %v1822_v10, %v1589_v35  ;;  %v1787_v50 = vpop.f32.mrf.mxu1  ;;  %v3040_v10 = vunpack.c.l.b16 %v2674_v60  ;;  %3892 = vmatpush.bf16.msra.mxu2 %v11287_v27  ;;  %v3353_v43 = vrot.slane %v3351_v30, 4  ;;  %v1923_v44 = vsel %vm12316_vm14, %v10252_v20, %v1922_v7 }
  0xe2   : > { %v12351_v55 = vadd.f32 %v1787_v50, %v1554_v48  ;;  %v1926_v46 = vsel %vm12316_vm14, %v1924_v19, %v1925_v24  ;;  %v3352_v48 = vsel %vm12316_vm14, %v10429_v40, %v3351_v30  ;;  %v2707_v51 = vrot.slane %v2705_v33, 5  ;;  %v1864_v24 = vld [vmem:[#allocation2 + $0x18] sm:$0xe]  ;;  %v11227_v33 = vld [vmem:[#allocation2 + $0x24] sm:$0xff] }
  0xe3   : > { %v3071_v32 = vpack.c.b16 %v3041_v11, %v3040_v10  ;;  %v3355_v50 = vsel %vm12316_vm14, %v3353_v43, %v3354_v31  ;;  %v2693_v58 = vrot.slane %v2692_v36, 4  ;;  %v2703_v59 = vrot.slane %v2702_v38, 4  ;;  %v3274_v43 = vld [vmem:[#allocation2 + $0x30] sm:$0xe] }
  0xe4   : > { %3589 = vmatmul.bf16.gmra.mxu1 %v3497_v0  ;;  %v3468_v60 = vunpack.c.l.b16 %v3352_v48  ;;  %v3469_v61 = vunpack.c.l.b16 %v3355_v50  ;;  %v2044_v62 = vunpack.c.l.b16 %v1923_v44  ;;  %v2045_v0 = vunpack.c.l.b16 %v1926_v46 }
  0xe5   : > { %v2710_v1 = vshrl.u32 %v2598_v52, 16  ;;  %v2713_v2 = vshll.u32 %v2598_v52, 16  ;;  %v2719_v3 = vshll.u32 %v2599_v54, 16  ;;  %v2698_v7 = vsel %vm12048_vm11, %v2693_v58, %v2697_v18  ;;  %v11616_v18 = vld [vmem:[#allocation2 + $0x20] sm:$0x1] }
  0xe6   : > { %v1827_v9 = vpop.f32.mrf.mxu3  ;;  %v3498_v10 = vpack.c.b16 %v3469_v61, %v3468_v60  ;;  %v2075_v11 = vpack.c.b16 %v2045_v0, %v2044_v62  ;;  %v3042_v27 = vunpack.c.l.b16 %v2698_v7  ;;  %v1932_v31 = vrot.slane %v11616_v18, 5  ;;  %v2602_v7 = vld [vmem:[#allocation2 + $0x40] sm:$0xf]  ;;  %v11617_v18 = vld [vmem:[#allocation2 + $0x28] sm:$0xf] }
  0xe7   : > { %v12361_v26 = vpop.f32.mrf.mxu0  ;;  %v2712_v17 = vrot.slane %v2710_v1, 4  ;;  %v2715_v22 = vrot.slane %v2713_v2, 5  ;;  %v2721_v20 = vrot.slane %v2719_v3, 5  ;;  %v2729_v36 = vshll.u32 %v2600_v29, 16 }
  0xe8   : > { %v12357_v63 = vpop.f32.mrf.mxu2  ;;  %v3358_v44 = vrot.slane %v2599_v54, 5  ;;  %v3361_v46 = vrot.slane %v2600_v29, 5  ;;  %v10430_v50 = vrot.slane %v3274_v43, 9  ;;  %v1865_v29 = vld [vmem:[#allocation2 + $0x24] sm:$0xe] }
  0xe9   : > { %15530 = vst [vmem:[#allocation15_spill] sm:$0xff] %v12357_v63  ;;  %v12359_v13 = vpop.f32.mrf.mxu1  ;;  %v2716_v34 = vor.u32 %v2715_v22, %v2712_v17  ;;  %v2731_v60 = vrot.slane %v2729_v36, 5 }
  0xea   : > { %v3359_v61 = vsel %vm12316_vm14, %v10430_v50, %v3358_v44 }
  0xeb   : > { %v2717_v58 = vrot.slane %v2716_v34, 4  ;;  %v3470_v3 = vunpack.c.l.b16 %v3359_v61  ;;  %v11286_v61 = vld [vmem:[#allocation7 + $0x1a8] sm:$0xff] }
  0xec   : > { %2162 = vmatmul.bf16.vlgmr.msrb.gmra.mxu2 %v2074_v4  ;;  %v2723_v4 = vshrl.u32 %v2599_v54, 16 }
  0xed   : > { %3893 = vmatpush.bf16.msra.mxu2 %v11286_v61 }
  0xee   : > { %v12369_v47 = vpop.f32.mrf.mxu3  ;;  %v2725_v23 = vrot.slane %v2723_v4, 4 }
  0xef   : > { %15532 = vst [vmem:[#allocation17_spill] sm:$0xff] %v12369_v47  ;;  %v12547_v47 = vld [vmem:[#allocation2 + $0x88] sm:$0xf] }
  0xf0   : > { %v1594_v35 = vpop.f32.mrf.mxu2  ;;  %2481 = vmatmul.bf16.gmra.mxu3 %v11226_v25  ;;  %3163 = vmatmul.bf16.gmra.mxu0 %v3071_v32  ;;  %v11615_v25 = vld [vmem:[#allocation2 + $0x1c] sm:$0xf]  ;;  %v10253_v32 = vrot.slane %v1864_v24, 9  ;;  %v2747_v24 = vshrl.u32 %v2602_v7, 16 }
  0xf1   : > { %v12363_v42 = vadd.f32 %v1827_v9, %v1594_v35  ;;  %v1792_v57 = vpop.f32.mrf.mxu1  ;;  %v2708_v9 = vsel %vm12048_vm11, %v2703_v59, %v2707_v51  ;;  %v1929_v19 = vrot.slane %v11615_v25, 5  ;;  %v2726_v35 = vor.u32 %v2725_v23, %v2721_v20 }
  0xf2   : > { %v3043_v28 = vunpack.c.l.b16 %v2708_v9  ;;  %v3360_v51 = vrot.slane %v3358_v44, 4 }
  0xf3   : > { %15531 = vst [vmem:[#allocation16_spill] sm:$0xff] %v12363_v42  ;;  %v1931_v38 = vrot.slane %v1929_v19, 4  ;;  %v2727_v59 = vrot.slane %v2726_v35, 4  ;;  %v1930_v62 = vsel %vm12316_vm14, %v10253_v32, %v1929_v19  ;;  %v2603_v35 = vld [vmem:[#allocation2 + $0x44] sm:$0x1] }
  0xf4   : > { %3594 = vmatmul.bf16.gmra.mxu1 %v3498_v10  ;;  %v3072_v40 = vpack.c.b16 %v3043_v28, %v3042_v27  ;;  %v3362_v1 = vsel %vm12316_vm14, %v3360_v51, %v3361_v46  ;;  %v2046_v9 = vunpack.c.l.b16 %v1930_v62  ;;  %v11618_v46 = vld [vmem:[#allocation2 + $0x2c] sm:$0x1]  ;;  %v11228_v51 = vld [vmem:[#allocation2 + $0x30] sm:$0xff]  ;;  %v11294_v62 = vld [vmem:[#allocation7 + $0x1e8] sm:$0xff] }
  0xf5   : > { %v1933_v54 = vsel %vm12316_vm14, %v1931_v38, %v1932_v31  ;;  %v3471_v4 = vunpack.c.l.b16 %v3362_v1  ;;  %v2732_v17 = vsel %vm12048_vm11, %v2727_v59, %v2731_v60  ;;  %v1936_v31 = vrot.slane %v11617_v18, 5  ;;  %4575 = vmatpush.bf16.msra.mxu3 %v11294_v62 }
  0xf6   : > { %v1832_v16 = vpop.f32.mrf.mxu3  ;;  %v2047_v10 = vunpack.c.l.b16 %v1933_v54  ;;  %v1939_v50 = vrot.slane %v11618_v46, 5  ;;  %v2753_v60 = vshll.u32 %v2603_v35, 16  ;;  %v11302_v54 = vld [vmem:[#allocation7 + $0x228] sm:$0xff] }
  0xf7   : > { %v1559_v8 = vpop.f32.mrf.mxu0  ;;  %v3499_v19 = vpack.c.b16 %v3471_v4, %v3470_v3  ;;  %v3275_v3 = vld [vmem:[#allocation2 + $0x3c] sm:$0xe]  ;;  %v3365_v4 = vrot.slane %v2602_v7, 5  ;;  %5001 = vmatpush.bf16.msra.mxu0 %v11302_v54  ;;  %v11619_v54 = vld [vmem:[#allocation2 + $0x34] sm:$0xf] }
  0xf8   : > { %v12375_v6 = vpop.f32.mrf.mxu2  ;;  %v12381_v15 = vadd.f32 %v1792_v57, %v1559_v8  ;;  %v2601_v8 = vld [vmem:[#allocation2 + $0x3c] sm:$0xf]  ;;  %v2076_v28 = vpack.c.b16 %v2047_v10, %v2046_v9  ;;  %v10431_v10 = vrot.slane %v3275_v3, 9 }
  0xf9   : > { %15533 = vst [vmem:[#allocation18_spill] sm:$0xff] %v12375_v6  ;;  %v12383_v30 = vpop.f32.mrf.mxu1  ;;  %v2734_v22 = vshrl.u32 %v2601_v8, 16  ;;  %v2737_v23 = vshll.u32 %v2601_v8, 16  ;;  %v3368_v8 = vrot.slane %v2603_v35, 5 }
  0xfb   : > { %v2739_v36 = vrot.slane %v2737_v23, 5 }
  0xfc   : > { %2167 = vmatmul.bf16.gmra.mxu2 %v2075_v11  ;;  %v2722_v11 = vsel %vm12048_vm11, %v2717_v58, %v2721_v20  ;;  %v2736_v20 = vrot.slane %v2734_v22, 4  ;;  %v1938_v58 = vrot.slane %v1936_v31, 4 }
  0xfd   : > { %v3044_v32 = vunpack.c.l.b16 %v2722_v11  ;;  %v3367_v11 = vrot.slane %v3365_v4, 4 }
  0xfe   : > { %v12387_v57 = vpop.f32.mrf.mxu3  ;;  %v2740_v1 = vor.u32 %v2739_v36, %v2736_v20  ;;  %v1940_v22 = vsel %vm12316_vm14, %v1938_v58, %v1939_v50 }
  0xff   : > { %v12385_v48 = vpop.f32.mrf.mxu0  ;;  %15534 = vst [vmem:[#allocation19_spill] sm:$0xff] %v12387_v57  ;;  %v2049_v35 = vunpack.c.l.b16 %v1940_v22  ;;  %v2606_v22 = vld [vmem:[#allocation2 + $0x50] sm:$0x1] }
 0x100   : > { %2486 = vmatmul.bf16.gmra.mxu3 %v11227_v33  ;;  %3168 = vmatmul.bf16.gmra.mxu0 %v3072_v40  ;;  %v3045_v33 = vunpack.c.l.b16 %v2732_v17  ;;  %v2749_v40 = vrot.slane %v2747_v24, 4 }
 0x101   : > { %v1797_v2 = vpop.f32.mrf.mxu1 }
 0x102   : > { %v1599_v52 = vpop.f32.mrf.mxu2  ;;  %v3073_v59 = vpack.c.b16 %v3045_v33, %v3044_v32  ;;  %v2604_v32 = vld [vmem:[#allocation2 + $0x48] sm:$0xf] }
 0x103   : > { %v12395_v0 = vadd.f32 %v1832_v16, %v1599_v52  ;;  %v2743_v16 = vshll.u32 %v2602_v7, 16  ;;  %v10254_v52 = vrot.slane %v1865_v29, 9  ;;  %v2741_v7 = vrot.slane %v2740_v1, 4 }
 0x104   : > { %3599 = vmatmul.bf16.gmra.mxu1 %v3499_v19  ;;  %v3369_v19 = vsel %vm12316_vm14, %v3367_v11, %v3368_v8  ;;  %v2758_v50 = vshrl.u32 %v2604_v32, 16  ;;  %v1943_v1 = vrot.slane %v11619_v54, 5 }
 0x105   : > { %15535 = vst [vmem:[#allocation20_spill] sm:$0xff] %v12395_v0  ;;  %v2745_v38 = vrot.slane %v2743_v16, 5  ;;  %v1937_v17 = vsel %vm12316_vm14, %v10254_v52, %v1936_v31  ;;  %v3366_v16 = vsel %vm12316_vm14, %v10431_v10, %v3365_v4  ;;  %v3473_v18 = vunpack.c.l.b16 %v3369_v19  ;;  %v2605_v31 = vld [vmem:[#allocation2 + $0x4c] sm:$0xf] }
 0x106   : > { %v3472_v29 = vunpack.c.l.b16 %v3366_v16  ;;  %v2048_v33 = vunpack.c.l.b16 %v1937_v17  ;;  %v2761_v52 = vshll.u32 %v2604_v32, 16  ;;  %v2767_v58 = vshll.u32 %v2605_v31, 16  ;;  %v11233_v0 = vld [vmem:[#allocation2 + $0x6c] sm:$0xff] }
 0x107   : > { %v1564_v25 = vpop.f32.mrf.mxu0 }
 0x108   : > { %v12403_v27 = vadd.f32 %v1797_v2, %v1564_v25  ;;  %v1837_v34 = vpop.f32.mrf.mxu3  ;;  %v2750_v2 = vor.u32 %v2749_v40, %v2745_v38  ;;  %v2755_v25 = vrot.slane %v2753_v60, 5  ;;  %v2746_v40 = vsel %vm12048_vm11, %v2741_v7, %v2745_v38 }
 0x109   : > { %v12407_v44 = vpop.f32.mrf.mxu1  ;;  %v2077_v61 = vpack.c.b16 %v2049_v35, %v2048_v33  ;;  %v3046_v3 = vunpack.c.l.b16 %v2746_v40  ;;  %v2760_v38 = vrot.slane %v2758_v50, 4  ;;  %v2763_v10 = vrot.slane %v2761_v52, 5 }
 0x10a   : > { %v12405_v43 = vpop.f32.mrf.mxu2  ;;  %v2751_v24 = vrot.slane %v2750_v2, 4  ;;  %v2769_v11 = vrot.slane %v2767_v58, 5  ;;  %v2777_v35 = vshll.u32 %v2606_v22, 16  ;;  %v3372_v40 = vrot.slane %v2605_v31, 5 }
 0x10b   : > { %15536 = vst [vmem:[#allocation21_spill] sm:$0xff] %v12405_v43  ;;  %v2764_v32 = vor.u32 %v2763_v10, %v2760_v38 }
 0x10c   : > { %2172 = vmatmul.bf16.gmra.mxu2 %v2076_v28  ;;  %v2756_v46 = vsel %vm12048_vm11, %v2751_v24, %v2755_v25  ;;  %v1945_v24 = vrot.slane %v1943_v1, 4  ;;  %v11620_v25 = vld [vmem:[#allocation2 + $0x38] sm:$0x1]  ;;  %v3374_v58 = vrot.slane %v3372_v40, 4 }
 0x10d   : > { %v3047_v4 = vunpack.c.l.b16 %v2756_v46  ;;  %v1946_v19 = vrot.slane %v11620_v25, 5  ;;  %v2765_v54 = vrot.slane %v2764_v32, 4 }
 0x10f   : > { %v12409_v9 = vpop.f32.mrf.mxu0  ;;  %v1947_v50 = vsel %vm12316_vm14, %v1945_v24, %v1946_v19 }
 0x110   : > { %2491 = vmatmul.bf16.gmra.mxu3 %v11228_v51  ;;  %v1839_v23 = vpop.f32.mrf.mxu3  ;;  %3173 = vmatmul.bf16.gmra.mxu0 %v3073_v59  ;;  %v3500_v51 = vpack.c.b16 %v3473_v18, %v3472_v29  ;;  %v2771_v59 = vshrl.u32 %v2605_v31, 16  ;;  %v3074_v18 = vpack.c.b16 %v3047_v4, %v3046_v3  ;;  %v2779_v3 = vrot.slane %v2777_v35, 5  ;;  %v12437_v4 = vld [vmem:[#allocation2 + $0x58] sm:$0xf] }
 0x111   : > { %v1802_v28 = vpop.f32.mrf.mxu1  ;;  %v2051_v38 = vunpack.c.l.b16 %v1947_v50  ;;  %v2791_v19 = vshll.u32 %v12437_v4, 16  ;;  %v1867_v50 = vld [vmem:[#allocation2 + $0x3c] sm:$0xe] }
 0x112   : > { %v2773_v17 = vrot.slane %v2771_v59, 4  ;;  %v2607_v59 = vld [vmem:[#allocation2 + $0x54] sm:$0xf] }
 0x113   : > { %v2785_v24 = vshll.u32 %v2607_v59, 16 }
 0x114   : > { %3604 = vmatmul.bf16.gmra.mxu1 %v3500_v51  ;;  %v2774_v33 = vor.u32 %v2773_v17, %v2769_v11  ;;  %v3276_v51 = vld [vmem:[#allocation2 + $0x48] sm:$0xe] }
 0x115   : > { %v1604_v20 = vpop.f32.mrf.mxu2  ;;  %v10432_v52 = vrot.slane %v3276_v51, 9  ;;  %v11621_v51 = vld [vmem:[#allocation2 + $0x40] sm:$0xf] }
 0x116   : > { %v12419_v36 = vadd.f32 %v1837_v34, %v1604_v20  ;;  %v1866_v34 = vld [vmem:[#allocation2 + $0x30] sm:$0xe] }
 0x117   : > { %v10255_v7 = vrot.slane %v1866_v34, 9  ;;  %v2775_v34 = vrot.slane %v2774_v33, 4 }
 0x118   : > { %15537 = vst [vmem:[#allocation22_spill] sm:$0xff] %v12419_v36  ;;  %v2612_v36 = vld [vmem:[#allocation2 + $0x68] sm:$0x1] }
 0x119   : > { %v1569_v60 = vpop.f32.mrf.mxu0  ;;  %v1842_v2 = vpop.f32.mrf.mxu3  ;;  %v1944_v46 = vsel %vm12316_vm14, %v10255_v7, %v1943_v1  ;;  %v3373_v1 = vsel %vm12316_vm14, %v10432_v52, %v3372_v40  ;;  %v2780_v32 = vsel %vm12048_vm11, %v2775_v34, %v2779_v3  ;;  %v1950_v52 = vrot.slane %v11621_v51, 5  ;;  %v11230_v34 = vld [vmem:[#allocation2 + $0x48] sm:$0xff] }
 0x11a   : > { %v12425_v62 = vadd.f32 %v1802_v28, %v1569_v60  ;;  %v12427_v8 = vpop.f32.mrf.mxu1  ;;  %v11229_v28 = vld [vmem:[#allocation2 + $0x3c] sm:$0xff]  ;;  %v2050_v31 = vunpack.c.l.b16 %v1944_v46 }
 0x11c   : > { %2177 = vmatmul.bf16.gmra.mxu2 %v2077_v61  ;;  %v2078_v35 = vpack.c.b16 %v2051_v38, %v2050_v31  ;;  %v11622_v31 = vld [vmem:[#allocation2 + $0x44] sm:$0x1] }
 0x11d   : > { %v1606_v16 = vpop.f32.mrf.mxu2  ;;  %v1953_v38 = vrot.slane %v11622_v31, 5 }
 0x11e   : > { %v12429_v29 = vadd.f32 %v1839_v23, %v1606_v16  ;;  %v3375_v23 = vrot.slane %v2606_v22, 5  ;;  %v3474_v16 = vunpack.c.l.b16 %v3373_v1  ;;  %v2782_v22 = vshrl.u32 %v2607_v59, 16  ;;  %v2609_v1 = vld [vmem:[#allocation2 + $0x5c] sm:$0x1] }
 0x11f   : > { %v3049_v59 = vunpack.c.l.b16 %v2780_v32  ;;  %v11301_v32 = vld [vmem:[#allocation7 + $0x220] sm:$0xff] }
 0x120   : > { %15538 = vst [vmem:[#allocation23_spill] sm:$0xff] %v12429_v29  ;;  %2496 = vmatmul.bf16.gmra.mxu3 %v11229_v28  ;;  %3178 = vmatmul.bf16.gmra.mxu0 %v3074_v18  ;;  %v3376_v10 = vsel %vm12316_vm14, %v3374_v58, %v3375_v23  ;;  %v2795_v28 = vshrl.u32 %v12437_v4, 16  ;;  %v2770_v18 = vsel %vm12048_vm11, %v2765_v54, %v2769_v11  ;;  %v2787_v58 = vrot.slane %v2785_v24, 5  ;;  %v11285_v24 = vld [vmem:[#allocation7 + $0x1a0] sm:$0xff] }
 0x121   : > { %v12431_v20 = vpop.f32.mrf.mxu0  ;;  %v1844_v60 = vpop.f32.mrf.mxu3  ;;  %v3475_v7 = vunpack.c.l.b16 %v3376_v10  ;;  %v3048_v23 = vunpack.c.l.b16 %v2770_v18  ;;  %v12453_v10 = vrot.slane %v2791_v19, 5  ;;  %v10256_v54 = vrot.slane %v1867_v50, 9  ;;  %v11293_v18 = vld [vmem:[#allocation7 + $0x1e0] sm:$0xff]  ;;  %3894 = vmatpush.bf16.msra.mxu2 %v11285_v24  ;;  %5002 = vmatpush.bf16.msra.mxu0 %v11301_v32  ;;  %v2610_v24 = vld [vmem:[#allocation2 + $0x60] sm:$0xf] }
 0x122   : > { %v1807_v61 = vpop.f32.mrf.mxu1  ;;  %4576 = vmatpush.bf16.msra.mxu3 %v11293_v18  ;;  %v1868_v18 = vld [vmem:[#allocation2 + $0x48] sm:$0xe]  ;;  %v11623_v32 = vld [vmem:[#allocation2 + $0x4c] sm:$0xf] }
 0x123   : > { %v3501_v33 = vpack.c.b16 %v3475_v7, %v3474_v16  ;;  %v3075_v19 = vpack.c.b16 %v3049_v59, %v3048_v23 }
 0x125   : > { %3609 = vmatmul.bf16.gmra.mxu1 %v3501_v33  ;;  %v3379_v33 = vrot.slane %v12437_v4, 5 }
 0x126   : > { %v1609_v17 = vpop.f32.mrf.mxu2 }
 0x127   : > { %v12443_v25 = vadd.f32 %v1842_v2, %v1609_v17  ;;  %v2784_v2 = vrot.slane %v2782_v22, 4  ;;  %v2797_v17 = vrot.slane %v2795_v28, 4  ;;  %v2801_v22 = vshll.u32 %v2609_v1, 16 }
 0x129   : > { %15539 = vst [vmem:[#allocation24_spill] sm:$0xff] %v12443_v25  ;;  %v1574_v40 = vpop.f32.mrf.mxu0  ;;  %v2788_v7 = vor.u32 %v2787_v58, %v2784_v2  ;;  %v2798_v28 = vor.u32 %v2797_v17, %v12453_v10  ;;  %v2803_v2 = vrot.slane %v2801_v22, 5  ;;  %v3277_v58 = vld [vmem:[#allocation2 + $0x54] sm:$0xe]  ;;  %v3381_v17 = vrot.slane %v3379_v33, 4 }
 0x12a   : > { %v12451_v46 = vadd.f32 %v1807_v61, %v1574_v40  ;;  %v12455_v11 = vpop.f32.mrf.mxu1  ;;  %v1952_v61 = vrot.slane %v1950_v52, 4  ;;  %v10433_v59 = vrot.slane %v3277_v58, 9 }
 0x12b   : > { %v2789_v51 = vrot.slane %v2788_v7, 4  ;;  %v2799_v23 = vrot.slane %v2798_v28, 4 }
 0x12c   : > { %2182 = vmatmul.bf16.gmra.mxu2 %v2078_v35  ;;  %v1847_v16 = vpop.f32.mrf.mxu3  ;;  %v1951_v35 = vsel %vm12316_vm14, %v10256_v54, %v1950_v52  ;;  %v1954_v50 = vsel %vm12316_vm14, %v1952_v61, %v1953_v38  ;;  %v3380_v4 = vsel %vm12316_vm14, %v10433_v59, %v3379_v33  ;;  %v12471_v54 = vld [vmem:[#allocation2 + $0x64] sm:$0xf]  ;;  %v2806_v33 = vshrl.u32 %v2610_v24, 16 }
 0x12d   : > { %v2053_v61 = vunpack.c.l.b16 %v1954_v50  ;;  %v3476_v38 = vunpack.c.l.b16 %v3380_v4  ;;  %v2804_v28 = vsel %vm12048_vm11, %v2799_v23, %v2803_v2  ;;  %v2809_v59 = vshll.u32 %v2610_v24, 16 }
 0x12e   : > { %v1611_v3 = vpop.f32.mrf.mxu2  ;;  %v10257_v4 = vrot.slane %v1868_v18, 9 }
 0x12f   : > { %v12457_v40 = vadd.f32 %v1844_v60, %v1611_v3  ;;  %v3382_v3 = vrot.slane %v2609_v1, 5  ;;  %v2794_v1 = vsel %vm12048_vm11, %v2789_v51, %v12453_v10  ;;  %v3051_v10 = vunpack.c.l.b16 %v2804_v28 }
 0x130   : > { %2501 = vmatmul.bf16.gmra.mxu3 %v11230_v34  ;;  %3183 = vmatmul.bf16.gmra.mxu0 %v3075_v19  ;;  %v2052_v34 = vunpack.c.l.b16 %v1951_v35  ;;  %v1957_v19 = vrot.slane %v11623_v32, 5  ;;  %v2819_v35 = vshrl.u32 %v12471_v54, 16  ;;  %v3050_v29 = vunpack.c.l.b16 %v2794_v1 }
 0x131   : > { %15540 = vst [vmem:[#allocation25_spill] sm:$0xff] %v12457_v40  ;;  %v12465_v60 = vpop.f32.mrf.mxu0  ;;  %v3383_v52 = vsel %vm12316_vm14, %v3381_v17, %v3382_v3  ;;  %v2815_v17 = vshll.u32 %v12471_v54, 16  ;;  %v2808_v51 = vrot.slane %v2806_v33, 4  ;;  %v2811_v2 = vrot.slane %v2809_v59, 5 }
 0x132   : > { %v1812_v31 = vpop.f32.mrf.mxu1  ;;  %v3477_v7 = vunpack.c.l.b16 %v3383_v52  ;;  %v2079_v50 = vpack.c.b16 %v2053_v61, %v2052_v34  ;;  %v11624_v52 = vld [vmem:[#allocation2 + $0x50] sm:$0x1]  ;;  %v1959_v25 = vrot.slane %v1957_v19, 4  ;;  %v11231_v34 = vld [vmem:[#allocation2 + $0x54] sm:$0xff]  ;;  %v1958_v61 = vsel %vm12316_vm14, %v10257_v4, %v1957_v19 }
 0x133   : > { %v1960_v40 = vrot.slane %v11624_v52, 5  ;;  %v2817_v23 = vrot.slane %v2815_v17, 5  ;;  %v3076_v18 = vpack.c.b16 %v3051_v10, %v3050_v29  ;;  %v2812_v1 = vor.u32 %v2811_v2, %v2808_v51  ;;  %v2613_v17 = vld [vmem:[#allocation2 + $0x6c] sm:$0xf]  ;;  %v12489_v52 = vld [vmem:[#allocation2 + $0x70] sm:$0xf] }
 0x134   : > { %v1849_v22 = vpop.f32.mrf.mxu3  ;;  %v3502_v58 = vpack.c.b16 %v3477_v7, %v3476_v38  ;;  %v2821_v38 = vrot.slane %v2819_v35, 4  ;;  %v2825_v33 = vshll.u32 %v2612_v36, 16  ;;  %v3386_v59 = vrot.slane %v12471_v54, 5 }
 0x135   : > { %v3389_v29 = vrot.slane %v2612_v36, 5  ;;  %v2830_v51 = vshrl.u32 %v2613_v17, 16  ;;  %v2843_v36 = vshrl.u32 %v12489_v52, 16 }
 0x136   : > { %3614 = vmatmul.bf16.gmra.mxu1 %v3502_v58  ;;  %v2822_v28 = vor.u32 %v2821_v38, %v2817_v23  ;;  %v2827_v10 = vrot.slane %v2825_v33, 5 }
 0x138   : > { %v1614_v3 = vpop.f32.mrf.mxu2  ;;  %v2823_v4 = vrot.slane %v2822_v28, 4 }
 0x139   : > { %v12480_v32 = vadd.f32 %v1847_v16, %v1614_v3  ;;  %v1961_v16 = vsel %vm12316_vm14, %v1959_v25, %v1960_v40  ;;  %v2054_v3 = vunpack.c.l.b16 %v1958_v61  ;;  %v3388_v25 = vrot.slane %v3386_v59, 4 }
 0x13a   : > { %v1814_v7 = vpop.f32.mrf.mxu1  ;;  %v2813_v40 = vrot.slane %v2812_v1, 4  ;;  %v2839_v61 = vshll.u32 %v12489_v52, 16  ;;  %v2828_v33 = vsel %vm12048_vm11, %v2823_v4, %v2827_v10  ;;  %v11626_v4 = vld [vmem:[#allocation2 + $0x5c] sm:$0x1] }
 0x13b   : > { %15541 = vst [vmem:[#allocation26_spill] sm:$0xff] %v12480_v32  ;;  %v3390_v38 = vsel %vm12316_vm14, %v3388_v25, %v3389_v29  ;;  %v1869_v25 = vld [vmem:[#allocation2 + $0x54] sm:$0xe]  ;;  %v2832_v29 = vrot.slane %v2830_v51, 4  ;;  %v3053_v43 = vunpack.c.l.b16 %v2828_v33  ;;  %v1967_v10 = vrot.slane %v11626_v4, 5 }
 0x13c   : > { %v1579_v24 = vpop.f32.mrf.mxu0  ;;  %2187 = vmatmul.bf16.gmra.mxu2 %v2079_v50  ;;  %v1852_v58 = vpop.f32.mrf.mxu3  ;;  %v2055_v50 = vunpack.c.l.b16 %v1961_v16  ;;  %v2818_v28 = vsel %vm12048_vm11, %v2813_v40, %v2817_v23  ;;  %v2615_v23 = vld [vmem:[#allocation2 + $0x74] sm:$0x1]  ;;  %v10258_v40 = vrot.slane %v1869_v25, 9 }
 0x13d   : > { %v12482_v57 = vadd.f32 %v1812_v31, %v1579_v24  ;;  %v3278_v31 = vld [vmem:[#allocation2 + $0x60] sm:$0xe]  ;;  %v3052_v32 = vunpack.c.l.b16 %v2818_v28  ;;  %v3396_v4 = vrot.slane %v2615_v23, 5 }
 0x13e   : > { %v10434_v19 = vrot.slane %v3278_v31, 9  ;;  %v11625_v31 = vld [vmem:[#allocation2 + $0x58] sm:$0xf] }
 0x140   : > { %v1616_v35 = vpop.f32.mrf.mxu2  ;;  %2506 = vmatmul.bf16.gmra.mxu3 %v11231_v34  ;;  %3188 = vmatmul.bf16.gmra.mxu0 %v3076_v18  ;;  %v3387_v54 = vsel %vm12316_vm14, %v10434_v19, %v3386_v59  ;;  %v2833_v34 = vshll.u32 %v2613_v17, 16  ;;  %v3479_v18 = vunpack.c.l.b16 %v3390_v38  ;;  %v1964_v19 = vrot.slane %v11625_v31, 5 }
 0x141   : > { %v12491_v24 = vadd.f32 %v1849_v22, %v1616_v35  ;;  %v3478_v16 = vunpack.c.l.b16 %v3387_v54  ;;  %v2080_v35 = vpack.c.b16 %v2055_v50, %v2054_v3  ;;  %v2845_v54 = vrot.slane %v2843_v36, 4  ;;  %v11232_v50 = vld [vmem:[#allocation2 + $0x60] sm:$0xff] }
 0x142   : > { %v1817_v1 = vpop.f32.mrf.mxu1  ;;  %v1966_v3 = vrot.slane %v1964_v19, 4  ;;  %v3077_v36 = vpack.c.b16 %v3053_v43, %v3052_v32  ;;  %v1965_v33 = vsel %vm12316_vm14, %v10258_v40, %v1964_v19  ;;  %v3279_v43 = vld [vmem:[#allocation2 + $0x6c] sm:$0xe] }
 0x143   : > { %15542 = vst [vmem:[#allocation27_spill] sm:$0xff] %v12491_v24  ;;  %v3503_v59 = vpack.c.b16 %v3479_v18, %v3478_v16  ;;  %v11292_v18 = vld [vmem:[#allocation7 + $0x1d8] sm:$0xff] }
 0x144   : > { %v1581_v2 = vpop.f32.mrf.mxu0  ;;  %v1854_v24 = vpop.f32.mrf.mxu3  ;;  %4577 = vmatpush.bf16.msra.mxu3 %v11292_v18 }
 0x145   : > { %v12498_v22 = vadd.f32 %v1814_v7, %v1581_v2  ;;  %v2835_v7 = vrot.slane %v2833_v34, 5  ;;  %v12505_v2 = vrot.slane %v2839_v61, 5  ;;  %v2849_v34 = vshll.u32 %v2615_v23, 16  ;;  %v11284_v61 = vld [vmem:[#allocation7 + $0x198] sm:$0xff] }
 0x146   : > { %3619 = vmatmul.bf16.gmra.mxu1 %v3503_v59  ;;  %3895 = vmatpush.bf16.msra.mxu2 %v11284_v61  ;;  %v2616_v61 = vld [vmem:[#allocation2 + $0x78] sm:$0xf] }
 0x147   : > { %v2836_v16 = vor.u32 %v2835_v7, %v2832_v29  ;;  %v2846_v51 = vor.u32 %v2845_v54, %v12505_v2  ;;  %v2851_v7 = vrot.slane %v2849_v34, 5  ;;  %v2854_v34 = vshrl.u32 %v2616_v61, 16 }
 0x149   : > { %v1619_v17 = vpop.f32.mrf.mxu2  ;;  %v2837_v25 = vrot.slane %v2836_v16, 4  ;;  %v2847_v29 = vrot.slane %v2846_v51, 4 }
 0x14a   : > { %v12507_v38 = vadd.f32 %v1852_v58, %v1619_v17  ;;  %v1819_v59 = vpop.f32.mrf.mxu1  ;;  %v1968_v17 = vsel %vm12316_vm14, %v1966_v3, %v1967_v10  ;;  %v12523_v10 = vld [vmem:[#allocation2 + $0x7c] sm:$0xf]  ;;  %v2056_v3 = vunpack.c.l.b16 %v1965_v33 }
 0x14b   : > { %v2852_v23 = vsel %vm12048_vm11, %v2847_v29, %v2851_v7  ;;  %v2856_v7 = vrot.slane %v2854_v34, 4  ;;  %v3400_v34 = vrot.slane %v12523_v10, 5 }
 0x14c   : > { %15543 = vst [vmem:[#allocation28_spill] sm:$0xff] %v12507_v38  ;;  %2192 = vmatmul.bf16.gmra.mxu2 %v2080_v35  ;;  %v3393_v35 = vrot.slane %v12489_v52, 5  ;;  %v3055_v29 = vunpack.c.l.b16 %v2852_v23 }
 0x14d   : > { %v1584_v58 = vpop.f32.mrf.mxu0 }
 0x14e   : > { %v12510_v28 = vadd.f32 %v1817_v1, %v1584_v58  ;;  %v10435_v1 = vrot.slane %v3279_v43, 9  ;;  %v3395_v54 = vrot.slane %v3393_v35, 4  ;;  %v2867_v43 = vshrl.u32 %v12523_v10, 16 }
 0x150   : > { %2511 = vmatmul.bf16.gmra.mxu3 %v11232_v50  ;;  %3193 = vmatmul.bf16.gmra.mxu0 %v3077_v36  ;;  %v3394_v52 = vsel %vm12316_vm14, %v10435_v1, %v3393_v35  ;;  %v3397_v40 = vsel %vm12316_vm14, %v3395_v54, %v3396_v4  ;;  %v2057_v50 = vunpack.c.l.b16 %v1968_v17  ;;  %v11300_v36 = vld [vmem:[#allocation7 + $0x218] sm:$0xff]  ;;  %v2857_v35 = vshll.u32 %v2616_v61, 16  ;;  %v11627_v54 = vld [vmem:[#allocation2 + $0x64] sm:$0xf] }
 0x151   : > { %v1621_v31 = vpop.f32.mrf.mxu2  ;;  %v3480_v16 = vunpack.c.l.b16 %v3394_v52  ;;  %v3481_v51 = vunpack.c.l.b16 %v3397_v40  ;;  %v1971_v4 = vrot.slane %v11627_v54, 5  ;;  %5003 = vmatpush.bf16.msra.mxu0 %v11300_v36  ;;  %v2869_v61 = vrot.slane %v2867_v43, 4 }
 0x152   : > { %v12517_v32 = vadd.f32 %v1854_v24, %v1621_v31  ;;  %v2842_v24 = vsel %vm12048_vm11, %v2837_v25, %v12505_v2  ;;  %v2863_v31 = vshll.u32 %v12523_v10, 16  ;;  %v12534_v17 = vpop.f32.mrf.mxu1  ;;  %v2081_v1 = vpack.c.b16 %v2057_v50, %v2056_v3  ;;  %v1870_v2 = vld [vmem:[#allocation2 + $0x60] sm:$0xe] }
 0x153   : > { %v1857_v19 = vpop.f32.mrf.mxu3  ;;  %v3504_v58 = vpack.c.b16 %v3481_v51, %v3480_v16  ;;  %v3054_v25 = vunpack.c.l.b16 %v2842_v24  ;;  %v2859_v52 = vrot.slane %v2857_v35, 5  ;;  %v2618_v51 = vld [vmem:[#allocation2 + $0x80] sm:$0x1] }
 0x154   : > { %15544 = vst [vmem:[#allocation29_spill] sm:$0xff] %v12517_v32  ;;  %v2865_v40 = vrot.slane %v2863_v31, 5  ;;  %v10259_v32 = vrot.slane %v1870_v2, 9  ;;  %v2873_v24 = vshll.u32 %v2618_v51, 16 }
 0x155   : > { %v1586_v18 = vpop.f32.mrf.mxu0  ;;  %v3078_v3 = vpack.c.b16 %v3055_v29, %v3054_v25  ;;  %v2860_v36 = vor.u32 %v2859_v52, %v2856_v7  ;;  %v3402_v25 = vrot.slane %v3400_v34, 4  ;;  %v3403_v29 = vrot.slane %v2618_v51, 5  ;;  %v2619_v7 = vld [vmem:[#allocation2 + $0x84] sm:$0xf] }
 0x156   : > { %v12532_v33 = vadd.f32 %v1819_v59, %v1586_v18  ;;  %3624 = vmatmul.bf16.gmra.mxu1 %v3504_v58  ;;  %v1973_v59 = vrot.slane %v1971_v4, 4  ;;  %v11628_v18 = vld [vmem:[#allocation2 + $0x68] sm:$0x1]  ;;  %v2870_v54 = vor.u32 %v2869_v61, %v2865_v40  ;;  %v1972_v31 = vsel %vm12316_vm14, %v10259_v32, %v1971_v4 }
 0x157   : > { %v1974_v38 = vrot.slane %v11628_v18, 5  ;;  %v2861_v52 = vrot.slane %v2860_v36, 4  ;;  %v2875_v18 = vrot.slane %v2873_v24, 5  ;;  %v2887_v51 = vshll.u32 %v12547_v47, 16 }
 0x158   : > { %v2871_v61 = vrot.slane %v2870_v54, 4  ;;  %v2891_v36 = vshrl.u32 %v12547_v47, 16 }
 0x159   : > { %v1975_v43 = vsel %vm12316_vm14, %v1973_v59, %v1974_v38  ;;  %v2878_v59 = vshrl.u32 %v2619_v7, 16  ;;  %v2866_v24 = vsel %vm12048_vm11, %v2861_v52, %v2865_v40  ;;  %v12565_v63 = vrot.slane %v2887_v51, 5  ;;  %v11291_v51 = vld [vmem:[#allocation7 + $0x1d0] sm:$0xff] }
 0x15a   : > { %v12538_v58 = vpop.f32.mrf.mxu1  ;;  %v2059_v10 = vunpack.c.l.b16 %v1975_v43  ;;  %v3056_v6 = vunpack.c.l.b16 %v2866_v24  ;;  %v2893_v40 = vrot.slane %v2891_v36, 4  ;;  %4578 = vmatpush.bf16.msra.mxu3 %v11291_v51 }
 0x15b   : > { %v1859_v16 = vpop.f32.mrf.mxu3 }
 0x15c   : > { %2197 = vmatmul.bf16.gmra.mxu2 %v2081_v1  ;;  %v3280_v1 = vld [vmem:[#allocation2 + $0x78] sm:$0xe] }
 0x15d   : > { %v12536_v50 = vpop.f32.mrf.mxu0  ;;  %v10436_v2 = vrot.slane %v3280_v1, 9 }
 0x15f   : > { %v1624_v23 = vpop.f32.mrf.mxu2  ;;  %v3401_v32 = vsel %vm12316_vm14, %v10436_v2, %v3400_v34 }
 0x160   : > { %v12541_v35 = vadd.f32 %v1857_v19, %v1624_v23  ;;  %2516 = vmatmul.bf16.gmra.mxu3 %v11233_v0  ;;  %3198 = vmatmul.bf16.gmra.mxu0 %v3078_v3  ;;  %v2058_v19 = vunpack.c.l.b16 %v1972_v31  ;;  %v3404_v0 = vsel %vm12316_vm14, %v3402_v25, %v3403_v29  ;;  %v3482_v38 = vunpack.c.l.b16 %v3401_v32  ;;  %v1871_v29 = vld [vmem:[#allocation2 + $0x6c] sm:$0xe] }
 0x161   : > { %v3483_v4 = vunpack.c.l.b16 %v3404_v0  ;;  %v2881_v3 = vshll.u32 %v2619_v7, 16  ;;  %v2876_v31 = vsel %vm12048_vm11, %v2871_v61, %v2875_v18  ;;  %v11629_v7 = vld [vmem:[#allocation2 + $0x70] sm:$0xf]  ;;  %v2880_v0 = vrot.slane %v2878_v59, 4 }
 0x162   : > { %15545 = vst [vmem:[#allocation30_spill] sm:$0xff] %v12541_v35  ;;  %v2082_v1 = vpack.c.b16 %v2059_v10, %v2058_v19  ;;  %v12561_v2 = vpop.f32.mrf.mxu1  ;;  %v1978_v32 = vrot.slane %v11629_v7, 5  ;;  %v3057_v42 = vunpack.c.l.b16 %v2876_v31  ;;  %v10260_v61 = vrot.slane %v1871_v29, 9  ;;  %v11630_v19 = vld [vmem:[#allocation2 + $0x74] sm:$0x1]  ;;  %v11234_v10 = vld [vmem:[#allocation2 + $0x78] sm:$0xff] }
 0x163   : > { %v2477_v23 = vpop.f32.mrf.mxu3  ;;  %v3505_v34 = vpack.c.b16 %v3483_v4, %v3482_v38  ;;  %v2883_v35 = vrot.slane %v2881_v3, 5  ;;  %v2897_v4 = vshll.u32 %v2621_v41, 16  ;;  %v2894_v3 = vor.u32 %v2893_v40, %v12565_v63  ;;  %v3281_v7 = vld [vmem:[#allocation2 + $0x84] sm:$0xe] }
 0x164   : > { %v1980_v18 = vrot.slane %v1978_v32, 4  ;;  %v3079_v59 = vpack.c.b16 %v3057_v42, %v3056_v6  ;;  %v1979_v31 = vsel %vm12316_vm14, %v10260_v61, %v1978_v32  ;;  %v10437_v40 = vrot.slane %v3281_v7, 9  ;;  %v11336_v61 = vld [vmem:[#allocation9 + $0x78] sm:$0xff] }
 0x165   : > { %v12555_v54 = vpop.f32.mrf.mxu0  ;;  %v2884_v38 = vor.u32 %v2883_v35, %v2880_v0  ;;  %v2899_v6 = vrot.slane %v2897_v4, 5  ;;  %v2895_v0 = vrot.slane %v2894_v3, 4  ;;  %6229 = vmatpush.bf16.msra.mxu1 %v11336_v61 }
 0x166   : > { %3629 = vmatmul.bf16.gmra.mxu1 %v3505_v34 }
 0x167   : > { %v1626_v43 = vpop.f32.mrf.mxu2  ;;  %v2885_v42 = vrot.slane %v2884_v38, 4 }
 0x168   : > { %v12563_v25 = vadd.f32 %v1859_v16, %v1626_v43  ;;  %v1981_v16 = vrot.slane %v11630_v19, 5  ;;  %v11283_v43 = vld [vmem:[#allocation7 + $0x190] sm:$0xff] }
 0x169   : > { %3896 = vmatpush.bf16.msra.mxu2 %v11283_v43  ;;  %v3410_v43 = vrot.slane %v2621_v41, 5 }
 0x16a   : > { %15546 = vst [vmem:[#allocation31_spill] sm:$0xff] %v12563_v25  ;;  %v12574_v34 = vpop.f32.mrf.mxu1  ;;  %v1982_v35 = vsel %vm12316_vm14, %v1980_v18, %v1981_v16  ;;  %v2622_v25 = vld [vmem:[#allocation2 + $0x90] sm:$0xf] }
 0x16b   : > { %v12567_v52 = vpop.f32.mrf.mxu3  ;;  %v2061_v41 = vunpack.c.l.b16 %v1982_v35  ;;  %v2905_v3 = vshll.u32 %v2622_v25, 16 }
 0x16c   : > { %2202 = vmatmul.bf16.gmra.mxu2 %v2082_v1  ;;  %v3407_v1 = vrot.slane %v12547_v47, 5  ;;  %v1785_v47 = vadd.f32 %v12337_v21, %v12335_v12  ;;  %v2890_v12 = vsel %vm12048_vm11, %v2885_v42, %v12565_v63  ;;  %v2900_v21 = vsel %vm12048_vm11, %v2895_v0, %v2899_v6  ;;  %v11631_v6 = vld [vmem:[#allocation2 + $0x7c] sm:$0xf] }
 0x16d   : > { %v12570_v24 = vpop.f32.mrf.mxu0  ;;  %v1985_v0 = vrot.slane %v11631_v6, 5  ;;  %v3282_v6 = vld [vmem:[#allocation2 + $0x90] sm:$0xe] }
 0x16e   : > { %v3409_v19 = vrot.slane %v3407_v1, 4  ;;  %v3408_v18 = vsel %vm12316_vm14, %v10437_v40, %v3407_v1  ;;  %v1872_v1 = vld [vmem:[#allocation2 + $0x78] sm:$0xe] }
 0x16f   : > { %v2163_v36 = vpop.f32.mrf.mxu2 }
 0x170   : > { %v2243_v29 = vadd.f32 %v2163_v36, %v12322_v49  ;;  %2521 = vmatmul.bf16.gmra.mxu3 %v11234_v10  ;;  %3203 = vmatmul.bf16.gmra.mxu0 %v3079_v59  ;;  %v2060_v49 = vunpack.c.l.b16 %v1979_v31  ;;  %v3411_v16 = vsel %vm12316_vm14, %v3409_v19, %v3410_v43  ;;  %v12588_v10 = vld [vmem:[#allocation2 + $0x94] sm:$0xf]  ;;  %v2902_v59 = vshrl.u32 %v2622_v25, 16 }
 0x171   : > { %v3485_v4 = vunpack.c.l.b16 %v3411_v16  ;;  %v2911_v35 = vshll.u32 %v12588_v10, 16  ;;  %v2915_v7 = vshrl.u32 %v12588_v10, 16  ;;  %v10261_v25 = vrot.slane %v1872_v1, 9 }
 0x172   : > { %v2557_v32 = vadd.f32 %v2477_v23, %v2243_v29  ;;  %v3484_v23 = vunpack.c.l.b16 %v3408_v18  ;;  %v12603_v19 = vpop.f32.mrf.mxu1  ;;  %v2083_v42 = vpack.c.b16 %v2061_v41, %v2060_v49  ;;  %v3059_v43 = vunpack.c.l.b16 %v2900_v21  ;;  %v11632_v41 = vld [vmem:[#allocation2 + $0x80] sm:$0x1] }
 0x173   : > { %v12582_v36 = vpop.f32.mrf.mxu3  ;;  %v2907_v18 = vrot.slane %v2905_v3, 5  ;;  %v2913_v16 = vrot.slane %v2911_v35, 5  ;;  %v1987_v49 = vrot.slane %v1985_v0, 4 }
 0x174   : > { %v3239_v38 = vadd.f32 %v12536_v50, %v2557_v32  ;;  %v11299_v50 = vld [vmem:[#allocation7 + $0x210] sm:$0xff]  ;;  %v3506_v29 = vpack.c.b16 %v3485_v4, %v3484_v23  ;;  %v2904_v32 = vrot.slane %v2902_v59, 4  ;;  %v2624_v4 = vld [vmem:[#allocation2 + $0x98] sm:$0x1] }
 0x175   : > { %v12599_v31 = vpop.f32.mrf.mxu0  ;;  %5004 = vmatpush.bf16.msra.mxu0 %v11299_v50  ;;  %v11235_v50 = vld [vmem:[#allocation2 + $0x84] sm:$0xff] }
 0x176   : > { %v12597_v51 = vadd.f32 %v12534_v17, %v3239_v38  ;;  %v3058_v17 = vunpack.c.l.b16 %v2890_v12  ;;  %3634 = vmatmul.bf16.gmra.mxu1 %v3506_v29  ;;  %v2917_v38 = vrot.slane %v2915_v7, 4  ;;  %v1986_v12 = vsel %vm12316_vm14, %v10261_v25, %v1985_v0  ;;  %v2625_v0 = vld [vmem:[#allocation2 + $0x9c] sm:$0xf] }
 0x177   : > { %v2165_v40 = vpop.f32.mrf.mxu2  ;;  %v2908_v3 = vor.u32 %v2907_v18, %v2904_v32  ;;  %v2921_v29 = vshll.u32 %v2624_v4, 16  ;;  %v10438_v25 = vrot.slane %v3282_v6, 9  ;;  %v11633_v6 = vld [vmem:[#allocation2 + $0x88] sm:$0xf] }
 0x178   : > { %v2244_v63 = vadd.f32 %v2165_v40, %v1785_v47  ;;  %v1988_v40 = vrot.slane %v11632_v41, 5  ;;  %v3080_v21 = vpack.c.b16 %v3059_v43, %v3058_v17  ;;  %v2918_v1 = vor.u32 %v2917_v38, %v2913_v16 }
 0x179   : > { %v3417_v43 = vrot.slane %v2624_v4, 5  ;;  %v2923_v38 = vrot.slane %v2921_v29, 5 }
 0x17a   : > { %v2558_v61 = vadd.f32 %v12567_v52, %v2244_v63  ;;  %v12616_v7 = vpop.f32.mrf.mxu1  ;;  %v2919_v18 = vrot.slane %v2918_v1, 4 }
 0x17b   : > { %v12606_v23 = vpop.f32.mrf.mxu3 }
 0x17c   : > { %2207 = vmatmul.bf16.gmra.mxu2 %v2083_v42  ;;  %v3240_v47 = vadd.f32 %v12555_v54, %v2558_v61  ;;  %v3414_v54 = vrot.slane %v12588_v10, 5  ;;  %v1989_v42 = vsel %vm12316_vm14, %v1987_v49, %v1988_v40  ;;  %v2909_v61 = vrot.slane %v2908_v3, 4 }
 0x17d   : > { %v12614_v59 = vpop.f32.mrf.mxu0  ;;  %v2063_v10 = vunpack.c.l.b16 %v1989_v42  ;;  %v2926_v40 = vshrl.u32 %v2625_v0, 16 }
 0x17e   : > { %v12612_v52 = vadd.f32 %v12538_v58, %v3240_v47  ;;  %v2062_v58 = vunpack.c.l.b16 %v1986_v12  ;;  %v3416_v17 = vrot.slane %v3414_v54, 4  ;;  %v12623_v47 = vld [vmem:[#allocation2 + $0xa0] sm:$0xf]  ;;  %v3415_v49 = vsel %vm12316_vm14, %v10438_v25, %v3414_v54 }
 0x17f   : > { %v2168_v35 = vpop.f32.mrf.mxu2  ;;  %v3486_v4 = vunpack.c.l.b16 %v3415_v49  ;;  %v2935_v3 = vshll.u32 %v12623_v47, 16  ;;  %v2939_v1 = vshrl.u32 %v12623_v47, 16  ;;  %v2914_v54 = vsel %vm12048_vm11, %v2909_v61, %v2913_v16 }
 0x180   : > { %v2245_v63 = vadd.f32 %v2168_v35, %v12351_v55  ;;  %2526 = vmatmul.bf16.gmra.mxu3 %v11235_v50  ;;  %3208 = vmatmul.bf16.gmra.mxu0 %v3080_v21  ;;  %v3418_v41 = vsel %vm12316_vm14, %v3416_v17, %v3417_v43  ;;  %v1790_v21 = vadd.f32 %v12359_v13, %v12361_v26  ;;  %v1873_v17 = vld [vmem:[#allocation2 + $0x84] sm:$0xe]  ;;  %v2928_v43 = vrot.slane %v2926_v40, 4  ;;  %v11236_v40 = vld [vmem:[#allocation2 + $0x90] sm:$0xff] }
 0x181   : > { %v3487_v12 = vunpack.c.l.b16 %v3418_v41  ;;  %v2084_v25 = vpack.c.b16 %v2063_v10, %v2062_v58  ;;  %v2627_v41 = vld [vmem:[#allocation2 + $0xa4] sm:$0x1]  ;;  %v2941_v16 = vrot.slane %v2939_v1, 4  ;;  %v11634_v58 = vld [vmem:[#allocation2 + $0x8c] sm:$0x1] }
 0x182   : > { %v2559_v32 = vadd.f32 %v12582_v36, %v2245_v63  ;;  %v2929_v36 = vshll.u32 %v2625_v0, 16  ;;  %v1992_v0 = vrot.slane %v11633_v6, 5  ;;  %v12645_v13 = vpop.f32.mrf.mxu1  ;;  %v1995_v10 = vrot.slane %v11634_v58, 5 }
 0x183   : > { %v12625_v55 = vpop.f32.mrf.mxu3  ;;  %v3507_v63 = vpack.c.b16 %v3487_v12, %v3486_v4 }
 0x184   : > { %v3241_v50 = vadd.f32 %v12570_v24, %v2559_v32  ;;  %v2924_v24 = vsel %vm12048_vm11, %v2919_v18, %v2923_v38  ;;  %v3060_v32 = vunpack.c.l.b16 %v2914_v54  ;;  %v10262_v38 = vrot.slane %v1873_v17, 9  ;;  %v11282_v54 = vld [vmem:[#allocation7 + $0x188] sm:$0xff] }
 0x185   : > { %v12639_v35 = vpop.f32.mrf.mxu0  ;;  %v3061_v49 = vunpack.c.l.b16 %v2924_v24  ;;  %v1994_v4 = vrot.slane %v1992_v0, 4  ;;  %3897 = vmatpush.bf16.msra.mxu2 %v11282_v54  ;;  %v1874_v54 = vld [vmem:[#allocation2 + $0x90] sm:$0xe] }
 0x186   : > { %v12637_v29 = vadd.f32 %v12561_v2, %v3241_v50  ;;  %v2931_v2 = vrot.slane %v2929_v36, 5  ;;  %v12647_v50 = vrot.slane %v2935_v3, 5  ;;  %3639 = vmatmul.bf16.gmra.mxu1 %v3507_v63  ;;  %v11290_v63 = vld [vmem:[#allocation7 + $0x1c8] sm:$0xff] }
 0x187   : > { %v2170_v42 = vpop.f32.mrf.mxu2  ;;  %v3081_v24 = vpack.c.b16 %v3061_v49, %v3060_v32  ;;  %v1996_v17 = vsel %vm12316_vm14, %v1994_v4, %v1995_v10  ;;  %4579 = vmatpush.bf16.msra.mxu3 %v11290_v63 }
 0x188   : > { %v2246_v26 = vadd.f32 %v2170_v42, %v1790_v21  ;;  %v2932_v36 = vor.u32 %v2931_v2, %v2928_v43  ;;  %v2945_v21 = vshll.u32 %v2627_v41, 16  ;;  %v2942_v3 = vor.u32 %v2941_v16, %v12647_v50  ;;  %v3283_v2 = vld [vmem:[#allocation2 + $0x9c] sm:$0xe] }
 0x189   : > { %v10439_v49 = vrot.slane %v3283_v2, 9 }
 0x18a   : > { %v2560_v61 = vadd.f32 %v12606_v23, %v2246_v26  ;;  %v12661_v6 = vpop.f32.mrf.mxu1  ;;  %v3421_v26 = vrot.slane %v12623_v47, 5  ;;  %v2947_v43 = vrot.slane %v2945_v21, 5  ;;  %v2943_v32 = vrot.slane %v2942_v3, 4 }
 0x18b   : > { %v12650_v18 = vpop.f32.mrf.mxu3 }
 0x18c   : > { %2212 = vmatmul.bf16.gmra.mxu2 %v2084_v25  ;;  %v3242_v12 = vadd.f32 %v12599_v31, %v2560_v61  ;;  %v1993_v31 = vsel %vm12316_vm14, %v10262_v38, %v1992_v0  ;;  %v3423_v16 = vrot.slane %v3421_v26, 4  ;;  %v3424_v61 = vrot.slane %v2627_v41, 5  ;;  %v11335_v38 = vld [vmem:[#allocation9 + $0x70] sm:$0xff] }
 0x18d   : > { %v12657_v23 = vpop.f32.mrf.mxu0  ;;  %v2064_v47 = vunpack.c.l.b16 %v1993_v31  ;;  %v3422_v4 = vsel %vm12316_vm14, %v10439_v49, %v3421_v26  ;;  %6230 = vmatpush.bf16.msra.mxu1 %v11335_v38  ;;  %v10263_v49 = vrot.slane %v1874_v54, 9  ;;  %v335_v54 = vld [vmem:[#allocation2 + $0xc0] sm:$0x1] }
 0x18e   : > { %v12655_v1 = vadd.f32 %v12574_v34, %v3242_v12  ;;  %v2933_v34 = vrot.slane %v2932_v36, 4  ;;  %v2628_v12 = vld [vmem:[#allocation2 + $0xa8] sm:$0xf]  ;;  %v3425_v10 = vsel %vm12316_vm14, %v3423_v16, %v3424_v61  ;;  %v2065_v36 = vunpack.c.l.b16 %v1996_v17 }
 0x18f   : > { %v2173_v42 = vpop.f32.mrf.mxu2  ;;  %v3489_v21 = vunpack.c.l.b16 %v3425_v10  ;;  %v2953_v3 = vshll.u32 %v2628_v12, 16 }
 0x190   : > { %v2247_v25 = vadd.f32 %v2173_v42, %v12381_v15  ;;  %2531 = vmatmul.bf16.gmra.mxu3 %v11236_v40  ;;  %3213 = vmatmul.bf16.gmra.mxu0 %v3081_v24  ;;  %v1795_v15 = vadd.f32 %v12383_v30, %v12385_v48  ;;  %v12676_v40 = vld [vmem:[#allocation2 + $0xac] sm:$0xf]  ;;  %v2938_v30 = vsel %vm12048_vm11, %v2933_v34, %v12647_v50  ;;  %v2950_v24 = vshrl.u32 %v2628_v12, 16 }
 0x191   : > { %v2948_v48 = vsel %vm12048_vm11, %v2943_v32, %v2947_v43  ;;  %v2959_v26 = vshll.u32 %v12676_v40, 16  ;;  %v2085_v34 = vpack.c.b16 %v2065_v36, %v2064_v47  ;;  %v11635_v43 = vld [vmem:[#allocation2 + $0x94] sm:$0xf]  ;;  %v3062_v16 = vunpack.c.l.b16 %v2938_v30  ;;  %v11636_v36 = vld [vmem:[#allocation2 + $0x98] sm:$0x1] }
 0x192   : > { %v2561_v0 = vadd.f32 %v12625_v55, %v2247_v25  ;;  %v3488_v55 = vunpack.c.l.b16 %v3422_v4  ;;  %v2963_v25 = vshrl.u32 %v12676_v40, 16  ;;  %v12691_v2 = vpop.f32.mrf.mxu1  ;;  %v1999_v32 = vrot.slane %v11635_v43, 5 }
 0x193   : > { %v12670_v58 = vpop.f32.mrf.mxu3  ;;  %v2952_v61 = vrot.slane %v2950_v24, 4  ;;  %v12694_v12 = vrot.slane %v2959_v26, 5  ;;  %v336_v24 = vsel %vm12005_vm3, 0, %v335_v54 }
 0x194   : > { %v3243_v41 = vadd.f32 %v12614_v59, %v2561_v0  ;;  %v11298_v59 = vld [vmem:[#allocation7 + $0x208] sm:$0xff]  ;;  %v3508_v31 = vpack.c.b16 %v3489_v21, %v3488_v55  ;;  %v2955_v0 = vrot.slane %v2953_v3, 5  ;;  %v2965_v4 = vrot.slane %v2963_v25, 4  ;;  %337 = vst [vmem:[#allocation2 + $0xc0] sm:$0x1] %v336_v24 }
 0x195   : > { %v12687_v42 = vpop.f32.mrf.mxu0  ;;  %5005 = vmatpush.bf16.msra.mxu0 %v11298_v59  ;;  %v2001_v47 = vrot.slane %v1999_v32, 4  ;;  %v2002_v55 = vrot.slane %v11636_v36, 5  ;;  %v11237_v21 = vld [vmem:[#allocation2 + $0x9c] sm:$0xff]  ;;  %v2000_v30 = vsel %vm12316_vm14, %v10263_v49, %v1999_v32  ;;  %v522_v32 = vld [vmem:[%s11993_s28 + $0x78] sm:$0xf] }
 0x196   : > { %v12685_v63 = vadd.f32 %v12603_v19, %v3243_v41  ;;  %v3063_v19 = vunpack.c.l.b16 %v2948_v48  ;;  %3644 = vmatmul.bf16.gmra.mxu1 %v3508_v31  ;;  %v2630_v41 = vld [vmem:[#allocation2 + $0xb0] sm:$0x1]  ;;  %v2066_v43 = vunpack.c.l.b16 %v2000_v30  ;;  %v782_v54 = vshrl.u32 %v522_v32, 16  ;;  %v1875_v24 = vld [vmem:[#allocation2 + $0x9c] sm:$0xe] }
 0x197   : > { %v2175_v17 = vpop.f32.mrf.mxu2  ;;  %v2969_v31 = vshll.u32 %v2630_v41, 16  ;;  %v2003_v49 = vsel %vm12316_vm14, %v2001_v47, %v2002_v55 }
 0x198   : > { %15547 = vst [vmem:[#allocation32_spill] sm:$0xff] %v12685_v63  ;;  %v2248_v50 = vadd.f32 %v2175_v17, %v1795_v15  ;;  %v3082_v48 = vpack.c.b16 %v3063_v19, %v3062_v16  ;;  %v3428_v17 = vrot.slane %v12676_v40, 5  ;;  %v12717_v40 = vld [vmem:[#allocation2 + $0xb8] sm:$0xf]  ;;  %v785_v63 = vshll.u32 %v522_v32, 16 }
 0x19a   : > { %v2562_v38 = vadd.f32 %v12650_v18, %v2248_v50  ;;  %v2956_v18 = vor.u32 %v2955_v0, %v2952_v61  ;;  %v12709_v25 = vpop.f32.mrf.mxu1  ;;  %v2631_v50 = vld [vmem:[#allocation2 + $0xb4] sm:$0xf]  ;;  %v3430_v61 = vrot.slane %v3428_v17, 4  ;;  %v3431_v0 = vrot.slane %v2630_v41, 5 }
 0x19b   : > { %v12696_v10 = vpop.f32.mrf.mxu3  ;;  %v2974_v36 = vshrl.u32 %v2631_v50, 16  ;;  %v2067_v41 = vunpack.c.l.b16 %v2003_v49 }
 0x19c   : > { %2217 = vmatmul.bf16.gmra.mxu2 %v2085_v34  ;;  %v3244_v15 = vadd.f32 %v12639_v35, %v2562_v38  ;;  %v2966_v35 = vor.u32 %v2965_v4, %v12694_v12  ;;  %v2957_v16 = vrot.slane %v2956_v18, 4  ;;  %v3432_v55 = vsel %vm12316_vm14, %v3430_v61, %v3431_v0 }
 0x19d   : > { %v12706_v59 = vpop.f32.mrf.mxu0  ;;  %v1800_v18 = vadd.f32 %v12407_v44, %v12409_v9  ;;  %v784_v61 = vrot.slane %v782_v54, 7 }
 0x19e   : > { %v12704_v3 = vadd.f32 %v12616_v7, %v3244_v15  ;;  %v3284_v7 = vld [vmem:[#allocation2 + $0xa8] sm:$0xe]  ;;  %v2967_v4 = vrot.slane %v2966_v35, 4  ;;  %v2971_v15 = vrot.slane %v2969_v31, 5  ;;  %v2962_v35 = vsel %vm12048_vm11, %v2957_v16, %v12694_v12  ;;  %v523_v16 = vld [vmem:[%s11993_s28 + $0x7c] sm:$0xf] }
 0x19f   : > { %v2178_v26 = vpop.f32.mrf.mxu2  ;;  %v10440_v19 = vrot.slane %v3284_v7, 9  ;;  %v2983_v31 = vshll.u32 %v12717_v40, 16 }
 0x1a0   : > { %15548 = vst [vmem:[#allocation33_spill] sm:$0xff] %v12704_v3  ;;  %v2249_v34 = vadd.f32 %v2178_v26, %v12403_v27  ;;  %2536 = vmatmul.bf16.gmra.mxu3 %v11237_v21  ;;  %3218 = vmatmul.bf16.gmra.mxu0 %v3082_v48  ;;  %v2977_v21 = vshll.u32 %v2631_v50, 16  ;;  %v2987_v26 = vshrl.u32 %v12717_v40, 16  ;;  %v11637_v50 = vld [vmem:[#allocation2 + $0xa0] sm:$0xf]  ;;  %v2972_v49 = vsel %vm12048_vm11, %v2967_v4, %v2971_v15 }
 0x1a1   : > { %v3429_v47 = vsel %vm12316_vm14, %v10440_v19, %v3428_v17  ;;  %v2976_v19 = vrot.slane %v2974_v36, 4  ;;  %v12743_v3 = vrot.slane %v2983_v31, 5  ;;  %v790_v36 = vshrl.u32 %v523_v16, 16 }
 0x1a2   : > { %v2563_v38 = vadd.f32 %v12670_v58, %v2249_v34  ;;  %v3490_v48 = vunpack.c.l.b16 %v3429_v47  ;;  %v3491_v58 = vunpack.c.l.b16 %v3432_v55  ;;  %v2006_v34 = vrot.slane %v11637_v50, 5  ;;  %v12740_v7 = vpop.f32.mrf.mxu1  ;;  %v385_v55 = vld [vmem:[#allocation2 + $0xc8] sm:$0x1] }
 0x1a3   : > { %v12719_v27 = vpop.f32.mrf.mxu3  ;;  %v2979_v12 = vrot.slane %v2977_v21, 5  ;;  %v10264_v47 = vrot.slane %v1875_v24, 9  ;;  %v2989_v50 = vrot.slane %v2987_v26, 4  ;;  %v953_v21 = vld [vmem:[#allocation2 + $0xc0] sm:$0xf]  ;;  %v793_v24 = vshll.u32 %v523_v16, 16 }
 0x1a4   : > { %v3245_v30 = vadd.f32 %v12657_v23, %v2563_v38  ;;  %v3509_v44 = vpack.c.b16 %v3491_v58, %v3490_v48  ;;  %v2086_v38 = vpack.c.b16 %v2067_v41, %v2066_v43  ;;  %v2008_v15 = vrot.slane %v2006_v34, 4  ;;  %v11638_v48 = vld [vmem:[#allocation2 + $0xa4] sm:$0x1]  ;;  %v11238_v43 = vld [vmem:[#allocation2 + $0xa8] sm:$0xff] }
 0x1a5   : > { %v12736_v23 = vpop.f32.mrf.mxu0  ;;  %v2009_v58 = vrot.slane %v11638_v48, 5  ;;  %v2980_v41 = vor.u32 %v2979_v12, %v2976_v19  ;;  %v788_v26 = vrot.slane %v784_v61, 4  ;;  %v11289_v12 = vld [vmem:[#allocation7 + $0x1c0] sm:$0xff] }
 0x1a6   : > { %v12734_v17 = vadd.f32 %v12645_v13, %v3245_v30  ;;  %v3064_v13 = vunpack.c.l.b16 %v2962_v35  ;;  %v3065_v30 = vunpack.c.l.b16 %v2972_v49  ;;  %3649 = vmatmul.bf16.gmra.mxu1 %v3509_v44  ;;  %v386_v35 = vsel %vm12011_vm7, 0, %v385_v55  ;;  %4580 = vmatpush.bf16.msra.mxu3 %v11289_v12 }
 0x1a7   : > { %v2180_v9 = vpop.f32.mrf.mxu2  ;;  %v792_v49 = vrot.slane %v790_v36, 7  ;;  %387 = vst [vmem:[#allocation2 + $0xc8] sm:$0x1] %v386_v35 }
 0x1a8   : > { %15549 = vst [vmem:[#allocation34_spill] sm:$0xff] %v12734_v17  ;;  %v2250_v0 = vadd.f32 %v2180_v9, %v1800_v18  ;;  %v2633_v17 = vld [vmem:[#allocation2 + $0xbc] sm:$0x1]  ;;  %v787_v18 = vor.u32 %v785_v63, %v784_v61  ;;  %v3083_v44 = vpack.c.b16 %v3065_v30, %v3064_v13  ;;  %v2990_v9 = vor.u32 %v2989_v50, %v12743_v3 }
 0x1a9   : > { %v2993_v31 = vshll.u32 %v2633_v17, 16  ;;  %v795_v16 = vor.u32 %v793_v24, %v792_v49  ;;  %v2007_v61 = vsel %vm12316_vm14, %v10264_v47, %v2006_v34  ;;  %v2981_v13 = vrot.slane %v2980_v41, 4 }
 0x1aa   : > { %v2564_v4 = vadd.f32 %v12696_v10, %v2250_v0  ;;  %v11281_v10 = vld [vmem:[#allocation7 + $0x180] sm:$0xff]  ;;  %v954_v0 = vsel %vm12042_vm10, %v787_v18, %v953_v21  ;;  %v12763_v55 = vpop.f32.mrf.mxu1  ;;  %v3435_v30 = vrot.slane %v12717_v40, 5  ;;  %v797_v36 = vrot.slane %v792_v49, 4  ;;  %v11334_v18 = vld [vmem:[#allocation9 + $0x68] sm:$0xff] }
 0x1ab   : > { %v12746_v54 = vpop.f32.mrf.mxu3  ;;  %3898 = vmatpush.bf16.msra.mxu2 %v11281_v10  ;;  %955 = vst [vmem:[#allocation2 + $0xc0] sm:$0xf] %v954_v0  ;;  %v2995_v50 = vrot.slane %v2993_v31, 5  ;;  %v796_v48 = vsel %vm12033_vm9, %v788_v26, %v795_v16  ;;  %v2991_v21 = vrot.slane %v2990_v9, 4  ;;  %v2068_v41 = vunpack.c.l.b16 %v2007_v61  ;;  %6231 = vmatpush.bf16.msra.mxu1 %v11334_v18 }
 0x1ac   : > { %2222 = vmatmul.bf16.gmra.mxu2 %v2086_v38  ;;  %v3246_v32 = vadd.f32 %v12687_v42, %v2564_v4  ;;  %v2010_v38 = vsel %vm12316_vm14, %v2008_v15, %v2009_v58  ;;  %v3285_v4 = vld [vmem:[#allocation2 + $0xb4] sm:$0xe]  ;;  %v3437_v47 = vrot.slane %v3435_v30, 4  ;;  %v3438_v15 = vrot.slane %v2633_v17, 5  ;;  %956 = vst [vmem:[#allocation2 + $0xc4] sm:$0xf] %v796_v48 }
 0x1ad   : > { %v12757_v19 = vpop.f32.mrf.mxu0  ;;  %v10441_v34 = vrot.slane %v3285_v4, 9  ;;  %v2069_v40 = vunpack.c.l.b16 %v2010_v38  ;;  %v1876_v17 = vld [vmem:[#allocation2 + $0xa8] sm:$0xe]  ;;  %v2996_v9 = vsel %vm12048_vm11, %v2991_v21, %v2995_v50  ;;  %v1805_v0 = vadd.f32 %v12427_v8, %v12431_v20 }
 0x1ae   : > { %v12755_v63 = vadd.f32 %v12661_v6, %v3246_v32  ;;  %v3439_v32 = vsel %vm12316_vm14, %v3437_v47, %v3438_v15  ;;  %v957_v31 = vld [vmem:[#allocation2 + $0xc8] sm:$0x1]  ;;  %v3067_v20 = vunpack.c.l.b16 %v2996_v9 }
 0x1af   : > { %v2183_v42 = vpop.f32.mrf.mxu2  ;;  %v3436_v35 = vsel %vm12316_vm14, %v10441_v34, %v3435_v30  ;;  %v958_v49 = vsel %vm12005_vm3, %v797_v36, %v957_v31  ;;  %v2087_v12 = vpack.c.b16 %v2069_v40, %v2068_v41  ;;  %v11640_v36 = vld [vmem:[#allocation2 + $0xb0] sm:$0x1] }
 0x1b0   : > { %v2251_v6 = vadd.f32 %v2183_v42, %v12425_v62  ;;  %2541 = vmatmul.bf16.gmra.mxu3 %v11238_v43  ;;  %3223 = vmatmul.bf16.gmra.mxu0 %v3083_v44  ;;  %v11639_v43 = vld [vmem:[#allocation2 + $0xac] sm:$0xf]  ;;  %v3492_v26 = vunpack.c.l.b16 %v3436_v35  ;;  %v2986_v44 = vsel %vm12048_vm11, %v2981_v13, %v12743_v3  ;;  %959 = vst [vmem:[#allocation2 + $0xc8] sm:$0x1] %v958_v49  ;;  %v11297_v42 = vld [vmem:[#allocation7 + $0x200] sm:$0xff]  ;;  %v2016_v21 = vrot.slane %v11640_v36, 5 }
 0x1b1   : > { %v2013_v24 = vrot.slane %v11639_v43, 5  ;;  %v3066_v8 = vunpack.c.l.b16 %v2986_v44  ;;  %5006 = vmatpush.bf16.msra.mxu0 %v11297_v42 }
 0x1b2   : > { %v2565_v58 = vadd.f32 %v12719_v27, %v2251_v6  ;;  %v3493_v27 = vunpack.c.l.b16 %v3439_v32  ;;  %v2634_v38 = vld [vmem:[#allocation2 + $0xc0] sm:$0xf]  ;;  %v10265_v6 = vrot.slane %v1876_v17, 9  ;;  %v11239_v32 = vld [vmem:[#allocation2 + $0xb4] sm:$0xff] }
 0x1b3   : > { %v12770_v62 = vpop.f32.mrf.mxu3  ;;  %v2015_v4 = vrot.slane %v2013_v24, 4  ;;  %v12791_v3 = vpop.f32.mrf.mxu1  ;;  %v2998_v13 = vshrl.u32 %v2634_v38, 16  ;;  %v3001_v50 = vshll.u32 %v2634_v38, 16 }
 0x1b4   : > { %v3247_v10 = vadd.f32 %v12706_v59, %v2565_v58  ;;  %v3510_v61 = vpack.c.b16 %v3493_v27, %v3492_v26  ;;  %v3084_v26 = vpack.c.b16 %v3067_v20, %v3066_v8 }
 0x1b5   : > { %v12789_v16 = vpop.f32.mrf.mxu0  ;;  %v3000_v34 = vrot.slane %v2998_v13, 4  ;;  %v3003_v47 = vrot.slane %v3001_v50, 5  ;;  %v2017_v17 = vsel %vm12316_vm14, %v2015_v4, %v2016_v21 }
 0x1b6   : > { %v12787_v59 = vadd.f32 %v12691_v2, %v3247_v10  ;;  %v2635_v2 = vld [vmem:[#allocation2 + $0xc4] sm:$0xf]  ;;  %3654 = vmatmul.bf16.gmra.mxu1 %v3510_v61  ;;  %v2014_v10 = vsel %vm12316_vm14, %v10265_v6, %v2013_v24  ;;  %v2071_v38 = vunpack.c.l.b16 %v2017_v17  ;;  %v3286_v24 = vld [vmem:[#allocation2 + $0xc0] sm:$0xe] }
 0x1b7   : > { %v2185_v30 = vpop.f32.mrf.mxu2  ;;  %v3007_v15 = vshll.u32 %v2635_v2, 16  ;;  %v3011_v58 = vshrl.u32 %v2635_v2, 16  ;;  %v2636_v31 = vld [vmem:[#allocation2 + $0xc8] sm:$0x1]  ;;  %v3004_v27 = vor.u32 %v3003_v47, %v3000_v34  ;;  %v2070_v61 = vunpack.c.l.b16 %v2014_v10 }
 0x1b8   : > { %v2252_v48 = vadd.f32 %v2185_v30, %v1805_v0  ;;  %v3017_v44 = vshll.u32 %v2636_v31, 16  ;;  %v12806_v30 = vld [vmem:[#allocation2 + $0x1c] sm:$0xf]  ;;  %v10442_v4 = vrot.slane %v3286_v24, 9  ;;  %v3445_v50 = vrot.slane %v2636_v31, 5 }
 0x1b9   : > { %v3009_v18 = vrot.slane %v3007_v15, 5  ;;  %v3013_v43 = vrot.slane %v3011_v58, 4  ;;  %v3005_v6 = vrot.slane %v3004_v27, 4  ;;  %v4070_v47 = vshll.u32 %v12806_v30, 16  ;;  %v1877_v27 = vld [vmem:[#allocation2 + $0xb4] sm:$0xe] }
 0x1ba   : > { %v2566_v41 = vadd.f32 %v12746_v54, %v2252_v48  ;;  %v3019_v21 = vrot.slane %v3017_v44, 5 }
 0x1bb   : > { %v2504_v40 = vpop.f32.mrf.mxu3  ;;  %v3014_v54 = vor.u32 %v3013_v43, %v3009_v18  ;;  %v12803_v0 = vpop.f32.mrf.mxu1  ;;  %v4074_v43 = vshrl.u32 %v12806_v30, 16  ;;  %v3010_v10 = vsel %vm12048_vm11, %v3005_v6, %v3009_v18  ;;  %v10266_v6 = vrot.slane %v1877_v27, 9 }
 0x1bc   : > { %2227 = vmatmul.bf16.gmra.mxu2 %v2087_v12  ;;  %v12795_v35 = vadd.f32 %v12736_v23, %v2566_v41  ;;  %v3442_v12 = vrot.slane %v2635_v2, 5  ;;  %v4012_v23 = vld [vmem:[#allocation2 + $0x18] sm:$0xf] }
 0x1bd   : > { %v12801_v49 = vpop.f32.mrf.mxu0  ;;  %v3015_v36 = vrot.slane %v3014_v54, 4  ;;  %v4061_v8 = vshrl.u32 %v4012_v23, 16  ;;  %v4064_v34 = vshll.u32 %v4012_v23, 16  ;;  %v11641_v54 = vld [vmem:[#allocation2 + $0xb8] sm:$0xf]  ;;  %v4076_v24 = vrot.slane %v4074_v43, 4 }
 0x1be   : > { %v3444_v13 = vrot.slane %v3442_v12, 4  ;;  %v2020_v44 = vrot.slane %v11641_v54, 5  ;;  %v4014_v23 = vld [vmem:[#allocation2 + $0x20] sm:$0x1] }
 0x1bf   : > { %v2188_v9 = vpop.f32.mrf.mxu2  ;;  %v3020_v17 = vsel %vm12048_vm11, %v3015_v36, %v3019_v21  ;;  %v11642_v36 = vld [vmem:[#allocation2 + $0xbc] sm:$0x1]  ;;  %v4763_v27 = vrot.slane %v4014_v23, 5 }
 0x1c0   : > { %v2253_v42 = vadd.f32 %v2188_v9, %v12451_v46  ;;  %2546 = vmatmul.bf16.gmra.mxu3 %v11239_v32  ;;  %3228 = vmatmul.bf16.gmra.mxu0 %v3084_v26  ;;  %v3443_v46 = vsel %vm12316_vm14, %v10442_v4, %v3442_v12  ;;  %v3446_v2 = vsel %vm12316_vm14, %v3444_v13, %v3445_v50  ;;  %v4063_v12 = vrot.slane %v4061_v8, 4 }
 0x1c1   : > { %v3494_v58 = vunpack.c.l.b16 %v3443_v46  ;;  %v3495_v41 = vunpack.c.l.b16 %v3446_v2  ;;  %v3068_v4 = vunpack.c.l.b16 %v3010_v10  ;;  %v3069_v13 = vunpack.c.l.b16 %v3020_v17 }
 0x1c2   : > { %v2567_v48 = vadd.f32 %v12770_v62, %v2253_v42  ;;  %v1810_v62 = vadd.f32 %v12455_v11, %v12465_v60  ;;  %v4066_v11 = vrot.slane %v4064_v34, 5  ;;  %v4072_v42 = vrot.slane %v4070_v47, 5  ;;  %v11240_v34 = vld [vmem:[#allocation2 + $0xc0] sm:$0xff] }
 0x1c3   : > { %v2507_v20 = vpop.f32.mrf.mxu3  ;;  %v3511_v26 = vpack.c.b16 %v3495_v41, %v3494_v58  ;;  %v12827_v9 = vpop.f32.mrf.mxu1  ;;  %v2023_v21 = vrot.slane %v11642_v36, 5  ;;  %v4080_v2 = vshll.u32 %v4014_v23, 16  ;;  %v4760_v47 = vrot.slane %v12806_v30, 5 }
 0x1c4   : > { %v3249_v15 = vadd.f32 %v12757_v19, %v2567_v48  ;;  %v2022_v48 = vrot.slane %v2020_v44, 4  ;;  %v4067_v46 = vor.u32 %v4066_v11, %v4063_v12  ;;  %v11333_v12 = vld [vmem:[#allocation9 + $0x60] sm:$0xff]  ;;  %v4015_v11 = vld [vmem:[#allocation2 + $0x24] sm:$0xf] }
 0x1c5   : > { %v12821_v31 = vpop.f32.mrf.mxu0  ;;  %v4082_v10 = vrot.slane %v4080_v2, 5  ;;  %v4762_v30 = vrot.slane %v4760_v47, 4  ;;  %6232 = vmatpush.bf16.msra.mxu1 %v11333_v12 }
 0x1c6   : > { %v12819_v32 = vadd.f32 %v12740_v7, %v3249_v15  ;;  %v2088_v7 = vpack.c.b16 %v2071_v38, %v2070_v61  ;;  %3659 = vmatmul.bf16.gmra.mxu1 %v3511_v26  ;;  %v4077_v61 = vor.u32 %v4076_v24, %v4072_v42  ;;  %v4694_v38 = vld [vmem:[#allocation2 + $0x18] sm:$0xe]  ;;  %v3085_v15 = vpack.c.b16 %v3069_v13, %v3068_v4 }
 0x1c7   : > { %v2190_v19 = vpop.f32.mrf.mxu2  ;;  %v2024_v43 = vsel %vm12316_vm14, %v2022_v48, %v2023_v21  ;;  %v10603_v17 = vrot.slane %v4694_v38, 9 }
 0x1c8   : > { %v2254_v60 = vadd.f32 %v2190_v19, %v1810_v62  ;;  %v4068_v62 = vrot.slane %v4067_v46, 4  ;;  %v4078_v19 = vrot.slane %v4077_v61, 4 }
 0x1c9   : > { %v4761_v4 = vsel %vm12316_vm14, %v10603_v17, %v4760_v47  ;;  %v4017_v17 = vld [vmem:[#allocation2 + $0x2c] sm:$0x1] }
 0x1ca   : > { %v2568_v18 = vadd.f32 %v2504_v40, %v2254_v60  ;;  %v2021_v40 = vsel %vm12316_vm14, %v10266_v6, %v2020_v44  ;;  %v12842_v44 = vld [vmem:[#allocation2 + $0x28] sm:$0xf]  ;;  %v4083_v23 = vsel %vm12048_vm11, %v4078_v19, %v4082_v10  ;;  %v4088_v6 = vshll.u32 %v4015_v11, 16 }
 0x1cb   : > { %v2509_v50 = vpop.f32.mrf.mxu3  ;;  %v2072_v60 = vunpack.c.l.b16 %v2021_v40  ;;  %v4094_v48 = vshll.u32 %v12842_v44, 16  ;;  %v4098_v36 = vshrl.u32 %v12842_v44, 16  ;;  %v4887_v2 = vunpack.c.l.b16 %v4761_v4 }
 0x1cc   : > { %2232 = vmatmul.bf16.gmra.mxu2 %v2088_v7  ;;  %v12830_v8 = vadd.f32 %v12789_v16, %v2568_v18  ;;  %v12839_v16 = vpop.f32.mrf.mxu1  ;;  %v2073_v7 = vunpack.c.l.b16 %v2024_v43  ;;  %v4085_v18 = vshrl.u32 %v4015_v11, 16  ;;  %v4462_v47 = vunpack.c.l.b16 %v4083_v23 }
 0x1cd   : > { %v12833_v58 = vpop.f32.mrf.mxu0  ;;  %v4096_v43 = vrot.slane %v4094_v48, 5  ;;  %v4104_v12 = vshll.u32 %v4017_v17, 16  ;;  %v4767_v11 = vrot.slane %v12842_v44, 5 }
 0x1ce   : > { %v4087_v40 = vrot.slane %v4085_v18, 4 }
 0x1cf   : > { %v2193_v41 = vpop.f32.mrf.mxu2  ;;  %v4106_v23 = vrot.slane %v4104_v12, 5  ;;  %v4769_v48 = vrot.slane %v4767_v11, 4 }
 0x1d0   : > { %v2255_v26 = vadd.f32 %v2193_v41, %v12482_v57  ;;  %2551 = vmatmul.bf16.gmra.mxu3 %v11240_v34  ;;  %3233 = vmatmul.bf16.gmra.mxu0 %v3085_v15  ;;  %v4073_v57 = vsel %vm12048_vm11, %v4068_v62, %v4072_v42  ;;  %v2089_v42 = vpack.c.b16 %v2073_v7, %v2072_v60  ;;  %v4090_v41 = vrot.slane %v4088_v6, 5  ;;  %v4695_v7 = vld [vmem:[#allocation2 + $0x24] sm:$0xe] }
 0x1d1   : > { %v4461_v38 = vunpack.c.l.b16 %v4073_v57  ;;  %v4100_v62 = vrot.slane %v4098_v36, 4  ;;  %v10604_v6 = vrot.slane %v4695_v7, 9  ;;  %v4770_v36 = vrot.slane %v4017_v17, 5 }
 0x1d2   : > { %v2569_v54 = vadd.f32 %v2507_v20, %v2255_v26  ;;  %v4764_v20 = vsel %vm12316_vm14, %v4762_v30, %v4763_v27  ;;  %v4091_v27 = vor.u32 %v4090_v41, %v4087_v40 }
 0x1d3   : > { %v2512_v24 = vpop.f32.mrf.mxu3  ;;  %v4888_v15 = vunpack.c.l.b16 %v4764_v20  ;;  %v4493_v19 = vpack.c.b16 %v4462_v47, %v4461_v38  ;;  %v4768_v40 = vsel %vm12316_vm14, %v10604_v6, %v4767_v11  ;;  %v4771_v41 = vsel %vm12316_vm14, %v4769_v48, %v4770_v36  ;;  %v4696_v48 = vld [vmem:[#allocation2 + $0x30] sm:$0xe] }
 0x1d4   : > { %v3251_v13 = vadd.f32 %v12801_v49, %v2569_v54  ;;  %v12860_v34 = vpop.f32.mrf.mxu1  ;;  %v4101_v54 = vor.u32 %v4100_v62, %v4096_v43  ;;  %v4889_v12 = vunpack.c.l.b16 %v4768_v40  ;;  %v11332_v40 = vld [vmem:[#allocation9 + $0x58] sm:$0xff] }
 0x1d5   : > { %v12858_v49 = vpop.f32.mrf.mxu0  ;;  %v4919_v30 = vpack.c.b16 %v4888_v15, %v4887_v2  ;;  %6233 = vmatpush.bf16.msra.mxu1 %v11332_v40 }
 0x1d6   : > { %v12856_v21 = vadd.f32 %v12791_v3, %v3251_v13  ;;  %v12870_v13 = vld [vmem:[#allocation2 + $0x34] sm:$0xf]  ;;  %v4102_v57 = vrot.slane %v4101_v54, 4 }
 0x1d7   : > { %v2195_v46 = vpop.f32.mrf.mxu2  ;;  %v4118_v2 = vshll.u32 %v12870_v13, 16 }
 0x1d8   : > { %v2256_v61 = vadd.f32 %v2195_v46, %v12498_v22  ;;  %v4107_v47 = vsel %vm12048_vm11, %v4102_v57, %v4106_v23 }
 0x1d9   : > { %v4120_v17 = vrot.slane %v4118_v2, 5  ;;  %v4464_v54 = vunpack.c.l.b16 %v4107_v47 }
 0x1da   : > { %v2570_v10 = vadd.f32 %v2509_v50, %v2256_v61  ;;  %v4018_v50 = vld [vmem:[#allocation2 + $0x30] sm:$0xf] }
 0x1db   : > { %v2514_v3 = vpop.f32.mrf.mxu3  ;;  %v4109_v44 = vshrl.u32 %v4018_v50, 16 }
 0x1dc   : > { %2237 = vmatmul.bf16.gmra.mxu2 %v2089_v42  ;;  %v12864_v26 = vadd.f32 %v12821_v31, %v2570_v10  ;;  %v4092_v31 = vrot.slane %v4091_v27, 4  ;;  %v12872_v20 = vpop.f32.mrf.mxu1  ;;  %v4112_v42 = vshll.u32 %v4018_v50, 16 }
 0x1dd   : > { %v12866_v22 = vpop.f32.mrf.mxu0  ;;  %v4111_v10 = vrot.slane %v4109_v44, 4 }
 0x1de   : > { %v4097_v38 = vsel %vm12048_vm11, %v4092_v31, %v4096_v43 }
 0x1df   : > { %v2198_v60 = vpop.f32.mrf.mxu2  ;;  %v4463_v27 = vunpack.c.l.b16 %v4097_v38 }
 0x1e0   : > { %v2257_v4 = vadd.f32 %v2198_v60, %v12510_v28  ;;  %4581 = vmatmul.bf16.vlgmr.msra.gmra.mxu3 %v4493_v19  ;;  %5007 = vmatmul.bf16.vlgmr.msra.gmra.mxu0 %v4919_v30  ;;  %v4122_v28 = vshrl.u32 %v12870_v13, 16  ;;  %v11265_v30 = vld [vmem:[#allocation2 + $0x18] sm:$0xff]  ;;  %v4890_v60 = vunpack.c.l.b16 %v4771_v41 }
 0x1e1   : > { %v4021_v41 = vld [vmem:[#allocation2 + $0x3c] sm:$0xf] }
 0x1e2   : > { %v2571_v18 = vadd.f32 %v2512_v24, %v2257_v4  ;;  %v4124_v19 = vrot.slane %v4122_v28, 4  ;;  %v4920_v6 = vpack.c.b16 %v4890_v60, %v4889_v12 }
 0x1e3   : > { %v2517_v46 = vpop.f32.mrf.mxu3 }
 0x1e4   : > { %v3253_v61 = vadd.f32 %v12833_v58, %v2571_v18  ;;  %v4114_v58 = vrot.slane %v4112_v42, 5  ;;  %v12891_v50 = vpop.f32.mrf.mxu1  ;;  %v4125_v31 = vor.u32 %v4124_v19, %v4120_v17  ;;  %v4494_v18 = vpack.c.b16 %v4464_v54, %v4463_v27 }
 0x1e5   : > { %v12884_v15 = vpop.f32.mrf.mxu0  ;;  %v4136_v27 = vshll.u32 %v4021_v41, 16 }
 0x1e6   : > { %v12882_v24 = vadd.f32 %v12827_v9, %v3253_v61  ;;  %v4020_v9 = vld [vmem:[#allocation2 + $0x38] sm:$0x1]  ;;  %v4115_v11 = vor.u32 %v4114_v58, %v4111_v10  ;;  %v10605_v61 = vrot.slane %v4696_v48, 9 }
 0x1e7   : > { %v2200_v62 = vpop.f32.mrf.mxu2  ;;  %v4128_v57 = vshll.u32 %v4020_v9, 16  ;;  %v4777_v47 = vrot.slane %v4020_v9, 5  ;;  %v15550_v9 = vld [vmem:[#allocation15_spill] sm:$0xff] }
 0x1e8   : > { %v2258_v43 = vadd.f32 %v2200_v62, %v12532_v33  ;;  %v4774_v33 = vrot.slane %v12870_v13, 5  ;;  %v4116_v42 = vrot.slane %v4115_v11, 4  ;;  %v12900_v62 = vld [vmem:[#allocation2 + $0x40] sm:$0xf] }
 0x1e9   : > { %v4130_v2 = vrot.slane %v4128_v57, 5  ;;  %v4142_v54 = vshll.u32 %v12900_v62, 16 }
 0x1ea   : > { %v2572_v7 = vadd.f32 %v2514_v3, %v2258_v43  ;;  %v4126_v3 = vrot.slane %v4125_v31, 4  ;;  %v4776_v38 = vrot.slane %v4774_v33, 4  ;;  %v4121_v10 = vsel %vm12048_vm11, %v4116_v42, %v4120_v17 }
 0x1eb   : > { %v2519_v4 = vpop.f32.mrf.mxu3  ;;  %v4146_v17 = vshrl.u32 %v12900_v62, 16  ;;  %v4465_v31 = vunpack.c.l.b16 %v4121_v10  ;;  %v4138_v42 = vrot.slane %v4136_v27, 5 }
 0x1ec   : > { %3899 = vmatmul.bf16.vlgmr.msra.gmra.mxu2 %v11265_v30  ;;  %v12894_v23 = vadd.f32 %v12858_v49, %v2572_v7  ;;  %v4131_v19 = vsel %vm12048_vm11, %v4126_v3, %v4130_v2  ;;  %v4778_v43 = vsel %vm12316_vm14, %v4776_v38, %v4777_v47  ;;  %v4133_v30 = vshrl.u32 %v4021_v41, 16 }
 0x1ed   : > { %v12897_v36 = vpop.f32.mrf.mxu0  ;;  %v4892_v48 = vunpack.c.l.b16 %v4778_v43  ;;  %v4144_v3 = vrot.slane %v4142_v54, 5  ;;  %v4148_v2 = vrot.slane %v4146_v17, 4  ;;  %v4024_v54 = vld [vmem:[#allocation2 + $0x48] sm:$0xf]  ;;  %v12931_v17 = vld [vmem:[#allocation2 + $0x4c] sm:$0xf] }
 0x1ef   : > { %v2203_v44 = vpop.f32.mrf.mxu2  ;;  %v4149_v41 = vor.u32 %v4148_v2, %v4144_v3 }
 0x1f0   : > { %v2259_v28 = vadd.f32 %v2203_v44, %v12339_v37  ;;  %4586 = vmatmul.bf16.gmra.mxu3 %v4494_v18  ;;  %5012 = vmatmul.bf16.gmra.mxu0 %v4920_v6  ;;  %v4775_v37 = vsel %vm12316_vm14, %v10605_v61, %v4774_v33  ;;  %v11266_v18 = vld [vmem:[#allocation2 + $0x24] sm:$0xff]  ;;  %v4466_v33 = vunpack.c.l.b16 %v4131_v19  ;;  %v4135_v44 = vrot.slane %v4133_v30, 4  ;;  %v4697_v30 = vld [vmem:[#allocation2 + $0x3c] sm:$0xe] }
 0x1f1   : > { %v4891_v6 = vunpack.c.l.b16 %v4775_v37  ;;  %v4023_v61 = vld [vmem:[#allocation2 + $0x44] sm:$0x1]  ;;  %v4781_v19 = vrot.slane %v12900_v62, 5  ;;  %v4157_v62 = vshrl.u32 %v4024_v54, 16 }
 0x1f2   : > { %v2573_v49 = vadd.f32 %v2517_v46, %v2259_v28  ;;  %v12911_v46 = vpop.f32.mrf.mxu1  ;;  %v4495_v47 = vpack.c.b16 %v4466_v33, %v4465_v31  ;;  %v4139_v40 = vor.u32 %v4138_v42, %v4135_v44  ;;  %v4152_v10 = vshll.u32 %v4023_v61, 16 }
 0x1f3   : > { %v2522_v13 = vpop.f32.mrf.mxu3  ;;  %v4783_v31 = vrot.slane %v4781_v19, 4  ;;  %v4160_v33 = vshll.u32 %v4024_v54, 16 }
 0x1f4   : > { %v3255_v58 = vadd.f32 %v12866_v22, %v2573_v49  ;;  %v15551_v22 = vld [vmem:[#allocation14_spill] sm:$0xff]  ;;  %v4921_v49 = vpack.c.b16 %v4892_v48, %v4891_v6  ;;  %v4166_v6 = vshll.u32 %v12931_v17, 16  ;;  %v4170_v48 = vshrl.u32 %v12931_v17, 16 }
 0x1f5   : > { %v1825_v12 = vadd.f32 %v15551_v22, %v15550_v9  ;;  %v12920_v7 = vpop.f32.mrf.mxu0  ;;  %v4150_v9 = vrot.slane %v4149_v41, 4  ;;  %v4154_v22 = vrot.slane %v4152_v10, 5  ;;  %v4159_v10 = vrot.slane %v4157_v62, 4 }
 0x1f6   : > { %v12918_v60 = vadd.f32 %v12860_v34, %v3255_v58  ;;  %v4788_v62 = vrot.slane %v12931_v17, 5 }
 0x1f7   : > { %v2205_v11 = vpop.f32.mrf.mxu2  ;;  %v4155_v2 = vsel %vm12048_vm11, %v4150_v9, %v4154_v22  ;;  %v4026_v9 = vld [vmem:[#allocation2 + $0x50] sm:$0x1] }
 0x1f8   : > { %v2260_v57 = vadd.f32 %v2205_v11, %v1825_v12  ;;  %v10606_v11 = vrot.slane %v4697_v30, 9  ;;  %v4172_v30 = vrot.slane %v4170_v48, 4 }
 0x1fa   : > { %v2574_v28 = vadd.f32 %v2519_v4, %v2260_v57  ;;  %v12928_v43 = vpop.f32.mrf.mxu1  ;;  %v15552_v4 = vld [vmem:[#allocation16_spill] sm:$0xff]  ;;  %v4784_v57 = vrot.slane %v4023_v61, 5 }
 0x1fb   : > { %v2524_v38 = vpop.f32.mrf.mxu3 }
 0x1fc   : > { %3904 = vmatmul.bf16.gmra.mxu2 %v11266_v18  ;;  %v12923_v34 = vadd.f32 %v12884_v15, %v2574_v28  ;;  %v4140_v15 = vrot.slane %v4139_v40, 4  ;;  %v15553_v28 = vld [vmem:[#allocation18_spill] sm:$0xff]  ;;  %v4782_v40 = vsel %vm12316_vm14, %v10606_v11, %v4781_v19 }
 0x1fd   : > { %v12925_v58 = vpop.f32.mrf.mxu0 }
 0x1fe   : > { %v4145_v42 = vsel %vm12048_vm11, %v4140_v15, %v4144_v3  ;;  %v4162_v3 = vrot.slane %v4160_v33, 5  ;;  %v4468_v15 = vunpack.c.l.b16 %v4155_v2 }
 0x1ff   : > { %v2208_v37 = vpop.f32.mrf.mxu2  ;;  %v4467_v54 = vunpack.c.l.b16 %v4145_v42 }
 0x200   : > { %v2261_v27 = vadd.f32 %v2208_v37, %v15552_v4  ;;  %4591 = vmatmul.bf16.gmra.mxu3 %v4495_v47  ;;  %5017 = vmatmul.bf16.gmra.mxu0 %v4921_v49  ;;  %v4168_v37 = vrot.slane %v4166_v6, 5  ;;  %v4163_v19 = vor.u32 %v4162_v3, %v4159_v10  ;;  %v4698_v6 = vld [vmem:[#allocation2 + $0x48] sm:$0xe]  ;;  %v4790_v10 = vrot.slane %v4788_v62, 4 }
 0x201   : > { %v4791_v3 = vrot.slane %v4026_v9, 5 }
 0x202   : > { %v2575_v12 = vadd.f32 %v2522_v13, %v2261_v27  ;;  %v15554_v13 = vld [vmem:[#allocation17_spill] sm:$0xff]  ;;  %v11267_v27 = vld [vmem:[#allocation2 + $0x30] sm:$0xff]  ;;  %v4173_v11 = vor.u32 %v4172_v30, %v4168_v37  ;;  %v4164_v2 = vrot.slane %v4163_v19, 4  ;;  %v11331_v30 = vld [vmem:[#allocation9 + $0x50] sm:$0xff] }
 0x203   : > { %v2527_v18 = vpop.f32.mrf.mxu3  ;;  %v1830_v47 = vadd.f32 %v15554_v13, %v15553_v28  ;;  %v4176_v13 = vshll.u32 %v4026_v9, 16  ;;  %6234 = vmatpush.bf16.msra.mxu1 %v11331_v30 }
 0x204   : > { %v3257_v44 = vadd.f32 %v12897_v36, %v2575_v12  ;;  %v4785_v36 = vsel %vm12316_vm14, %v4783_v31, %v4784_v57  ;;  %v12951_v12 = vpop.f32.mrf.mxu1  ;;  %v4496_v57 = vpack.c.b16 %v4468_v15, %v4467_v54  ;;  %v4169_v15 = vsel %vm12048_vm11, %v4164_v2, %v4168_v37  ;;  %v15558_v37 = vld [vmem:[#allocation19_spill] sm:$0xff] }
 0x205   : > { %v12945_v49 = vpop.f32.mrf.mxu0  ;;  %v4894_v22 = vunpack.c.l.b16 %v4785_v36  ;;  %15555 = vst [vmem:[#allocation15_spill] sm:$0xff] %v12951_v12 }
 0x206   : > { %v12943_v61 = vadd.f32 %v12891_v50, %v3257_v44  ;;  %v4893_v50 = vunpack.c.l.b16 %v4782_v40  ;;  %v4178_v40 = vrot.slane %v4176_v13, 5 }
 0x207   : > { %v2210_v41 = vpop.f32.mrf.mxu2 }
 0x208   : > { %v2262_v4 = vadd.f32 %v2210_v41, %v1830_v47  ;;  %v4922_v33 = vpack.c.b16 %v4894_v22, %v4893_v50  ;;  %v4174_v47 = vrot.slane %v4173_v11, 4  ;;  %v10607_v41 = vrot.slane %v4698_v6, 9 }
 0x20a   : > { %v2576_v44 = vadd.f32 %v2524_v38, %v2262_v4  ;;  %v15556_v38 = vld [vmem:[#allocation20_spill] sm:$0xff]  ;;  %v4027_v4 = vld [vmem:[#allocation2 + $0x54] sm:$0xf]  ;;  %v4179_v22 = vsel %vm12048_vm11, %v4174_v47, %v4178_v40 }
 0x20b   : > { %v2529_v28 = vpop.f32.mrf.mxu3  ;;  %v4181_v9 = vshrl.u32 %v4027_v4, 16  ;;  %v4184_v19 = vshll.u32 %v4027_v4, 16  ;;  %v11268_v47 = vld [vmem:[#allocation2 + $0x3c] sm:$0xff]  ;;  %v4470_v40 = vunpack.c.l.b16 %v4179_v22 }
 0x20c   : > { %3909 = vmatmul.bf16.gmra.mxu2 %v11267_v27  ;;  %v12954_v31 = vadd.f32 %v12920_v7, %v2576_v44  ;;  %v12960_v27 = vld [vmem:[#allocation2 + $0x58] sm:$0xf]  ;;  %v3640_v54 = vpop.f32.mrf.mxu1  ;;  %v4789_v44 = vsel %vm12316_vm14, %v10607_v41, %v4788_v62  ;;  %v4469_v62 = vunpack.c.l.b16 %v4169_v15  ;;  %v4029_v4 = vld [vmem:[#allocation2 + $0x5c] sm:$0x1] }
 0x20d   : > { %v12957_v48 = vpop.f32.mrf.mxu0  ;;  %v4190_v11 = vshll.u32 %v12960_v27, 16  ;;  %v4194_v13 = vshrl.u32 %v12960_v27, 16  ;;  %v4183_v41 = vrot.slane %v4181_v9, 4  ;;  %v4200_v22 = vshll.u32 %v4029_v4, 16 }
 0x20f   : > { %v2213_v42 = vpop.f32.mrf.mxu2 }
 0x210   : > { %v2263_v36 = vadd.f32 %v2213_v42, %v15556_v38  ;;  %4596 = vmatmul.bf16.gmra.mxu3 %v4496_v57  ;;  %5022 = vmatmul.bf16.gmra.mxu0 %v4922_v33  ;;  %v15557_v57 = vld [vmem:[#allocation21_spill] sm:$0xff]  ;;  %v4895_v38 = vunpack.c.l.b16 %v4789_v44 }
 0x211   : > { %v1835_v33 = vadd.f32 %v15558_v37, %v15557_v57 }
 0x212   : > { %v2577_v7 = vadd.f32 %v2527_v18, %v2263_v36  ;;  %v4792_v18 = vsel %vm12316_vm14, %v4790_v10, %v4791_v3  ;;  %v4186_v10 = vrot.slane %v4184_v19, 5  ;;  %v4192_v3 = vrot.slane %v4190_v11, 5  ;;  %v4699_v19 = vld [vmem:[#allocation2 + $0x54] sm:$0xe] }
 0x213   : > { %v2532_v17 = vpop.f32.mrf.mxu3  ;;  %v4896_v36 = vunpack.c.l.b16 %v4792_v18  ;;  %v4795_v18 = vrot.slane %v12960_v27, 5 }
 0x214   : > { %v3259_v50 = vadd.f32 %v12925_v58, %v2577_v7  ;;  %v4196_v7 = vrot.slane %v4194_v13, 4  ;;  %v12983_v37 = vpop.f32.mrf.mxu1  ;;  %v4187_v15 = vor.u32 %v4186_v10, %v4183_v41  ;;  %v4030_v13 = vld [vmem:[#allocation2 + $0x60] sm:$0xf] }
 0x215   : > { %v12978_v6 = vpop.f32.mrf.mxu0  ;;  %v4923_v57 = vpack.c.b16 %v4896_v36, %v4895_v38  ;;  %15561 = vst [vmem:[#allocation18_spill] sm:$0xff] %v12983_v37  ;;  %v4797_v38 = vrot.slane %v4795_v18, 4  ;;  %v4798_v36 = vrot.slane %v4029_v4, 5  ;;  %v4205_v10 = vshrl.u32 %v4030_v13, 16 }
 0x216   : > { %v12976_v58 = vadd.f32 %v12928_v43, %v3259_v50  ;;  %v4497_v50 = vpack.c.b16 %v4470_v40, %v4469_v62  ;;  %v10608_v40 = vrot.slane %v4699_v19, 9 }
 0x217   : > { %v2215_v42 = vpop.f32.mrf.mxu2 }
 0x218   : > { %15559 = vst [vmem:[#allocation14_spill] sm:$0xff] %v12976_v58  ;;  %v2264_v2 = vadd.f32 %v2215_v42, %v1835_v33  ;;  %v4197_v33 = vor.u32 %v4196_v7, %v4192_v3  ;;  %v12989_v42 = vld [vmem:[#allocation2 + $0x64] sm:$0xf]  ;;  %v4208_v7 = vshll.u32 %v4030_v13, 16  ;;  %v4796_v4 = vsel %vm12316_vm14, %v10608_v40, %v4795_v18 }
 0x219   : > { %v4214_v27 = vshll.u32 %v12989_v42, 16 }
 0x21a   : > { %v2578_v30 = vadd.f32 %v2529_v28, %v2264_v2  ;;  %v15562_v28 = vld [vmem:[#allocation22_spill] sm:$0xff]  ;;  %v4198_v62 = vrot.slane %v4197_v33, 4  ;;  %v4202_v2 = vrot.slane %v4200_v22, 5  ;;  %v4799_v33 = vsel %vm12316_vm14, %v4797_v38, %v4798_v36 }
 0x21b   : > { %v2534_v12 = vpop.f32.mrf.mxu3  ;;  %v4898_v37 = vunpack.c.l.b16 %v4799_v33 }
 0x21c   : > { %3914 = vmatmul.bf16.gmra.mxu2 %v11268_v47  ;;  %v12981_v43 = vadd.f32 %v12945_v49, %v2578_v30  ;;  %v4188_v49 = vrot.slane %v4187_v15, 4  ;;  %v4218_v30 = vshrl.u32 %v12989_v42, 16  ;;  %v3645_v19 = vpop.f32.mrf.mxu1 }
 0x21d   : > { %v12985_v44 = vpop.f32.mrf.mxu0 }
 0x21e   : > { %15560 = vst [vmem:[#allocation16_spill] sm:$0xff] %v12981_v43  ;;  %v4220_v13 = vrot.slane %v4218_v30, 4 }
 0x21f   : > { %v2218_v9 = vpop.f32.mrf.mxu2 }
 0x220   : > { %v2265_v11 = vadd.f32 %v2218_v9, %v15562_v28  ;;  %4601 = vmatmul.bf16.gmra.mxu3 %v4497_v50  ;;  %5027 = vmatmul.bf16.gmra.mxu0 %v4923_v57  ;;  %v4193_v9 = vsel %vm12048_vm11, %v4188_v49, %v4192_v3  ;;  %v4203_v57 = vsel %vm12048_vm11, %v4198_v62, %v4202_v2  ;;  %v4207_v28 = vrot.slane %v4205_v10, 4  ;;  %v15564_v3 = vld [vmem:[#allocation23_spill] sm:$0xff]  ;;  %v4032_v2 = vld [vmem:[#allocation2 + $0x68] sm:$0x1] }
 0x221   : > { %v4471_v62 = vunpack.c.l.b16 %v4193_v9  ;;  %v4224_v58 = vshll.u32 %v4032_v2, 16  ;;  %v4802_v10 = vrot.slane %v12989_v42, 5  ;;  %v4033_v42 = vld [vmem:[#allocation2 + $0x6c] sm:$0xf] }
 0x222   : > { %v2579_v47 = vadd.f32 %v2532_v17, %v2265_v11  ;;  %v4216_v11 = vrot.slane %v4214_v27, 5  ;;  %v4700_v27 = vld [vmem:[#allocation2 + $0x60] sm:$0xe] }
 0x223   : > { %v2537_v41 = vpop.f32.mrf.mxu3  ;;  %v4226_v33 = vrot.slane %v4224_v58, 5 }
 0x224   : > { %v3261_v50 = vadd.f32 %v12957_v48, %v2579_v47  ;;  %v4210_v48 = vrot.slane %v4208_v7, 5  ;;  %v11269_v47 = vld [vmem:[#allocation2 + $0x48] sm:$0xff]  ;;  %v4221_v40 = vor.u32 %v4220_v13, %v4216_v11  ;;  %v4805_v13 = vrot.slane %v4032_v2, 5 }
 0x225   : > { %v13000_v17 = vpop.f32.mrf.mxu0 }
 0x226   : > { %v12998_v15 = vadd.f32 %v3640_v54, %v3261_v50  ;;  %v4472_v54 = vunpack.c.l.b16 %v4203_v57  ;;  %v4897_v50 = vunpack.c.l.b16 %v4796_v4  ;;  %v4211_v18 = vor.u32 %v4210_v48, %v4207_v28 }
 0x227   : > { %v2220_v22 = vpop.f32.mrf.mxu2  ;;  %v4222_v4 = vrot.slane %v4221_v40, 4  ;;  %v10609_v28 = vrot.slane %v4700_v27, 9  ;;  %v4804_v48 = vrot.slane %v4802_v10, 4  ;;  %v15569_v27 = vld [vmem:[#allocation25_spill] sm:$0xff] }
 0x228   : > { %15563 = vst [vmem:[#allocation17_spill] sm:$0xff] %v12998_v15  ;;  %v2266_v49 = vadd.f32 %v2220_v22, %v15564_v3  ;;  %v4498_v36 = vpack.c.b16 %v4472_v54, %v4471_v62  ;;  %v4924_v7 = vpack.c.b16 %v4898_v37, %v4897_v50  ;;  %v4212_v57 = vrot.slane %v4211_v18, 4  ;;  %v11330_v3 = vld [vmem:[#allocation9 + $0x48] sm:$0xff]  ;;  %v13016_v37 = vld [vmem:[#allocation2 + $0x70] sm:$0xf] }
 0x229   : > { %v4227_v62 = vsel %vm12048_vm11, %v4222_v4, %v4226_v33  ;;  %v4803_v54 = vsel %vm12316_vm14, %v10609_v28, %v4802_v10  ;;  %v4806_v2 = vsel %vm12316_vm14, %v4804_v48, %v4805_v13  ;;  %6235 = vmatpush.bf16.msra.mxu1 %v11330_v3  ;;  %v4232_v50 = vshll.u32 %v4033_v42, 16 }
 0x22a   : > { %v2580_v15 = vadd.f32 %v2534_v12, %v2266_v49  ;;  %v15566_v12 = vld [vmem:[#allocation24_spill] sm:$0xff]  ;;  %v4238_v18 = vshll.u32 %v13016_v37, 16  ;;  %v4242_v40 = vshrl.u32 %v13016_v37, 16  ;;  %v4474_v10 = vunpack.c.l.b16 %v4227_v62 }
 0x22b   : > { %v2539_v43 = vpop.f32.mrf.mxu3  ;;  %v4899_v4 = vunpack.c.l.b16 %v4803_v54  ;;  %v4900_v33 = vunpack.c.l.b16 %v4806_v2  ;;  %v4809_v54 = vrot.slane %v13016_v37, 5 }
 0x22c   : > { %3919 = vmatmul.bf16.gmra.mxu2 %v11269_v47  ;;  %v13008_v38 = vadd.f32 %v12978_v6, %v2580_v15  ;;  %v13014_v6 = vpop.f32.mrf.mxu1  ;;  %v4217_v47 = vsel %vm12048_vm11, %v4212_v57, %v4216_v11  ;;  %v11270_v57 = vld [vmem:[#allocation2 + $0x54] sm:$0xff]  ;;  %v4240_v28 = vrot.slane %v4238_v18, 5  ;;  %v4244_v48 = vrot.slane %v4242_v40, 4  ;;  %v13041_v40 = vld [vmem:[#allocation2 + $0x7c] sm:$0xf] }
 0x22d   : > { %v13011_v30 = vpop.f32.mrf.mxu0  ;;  %15567 = vst [vmem:[#allocation21_spill] sm:$0xff] %v13014_v6  ;;  %v4036_v18 = vld [vmem:[#allocation2 + $0x78] sm:$0xf]  ;;  %v4262_v37 = vshll.u32 %v13041_v40, 16 }
 0x22e   : > { %15565 = vst [vmem:[#allocation20_spill] sm:$0xff] %v13008_v38  ;;  %v4042_v38 = vld [vmem:[#allocation2 + $0x90] sm:$0xf] }
 0x22f   : > { %v2223_v9 = vpop.f32.mrf.mxu2 }
 0x230   : > { %v2267_v22 = vadd.f32 %v2223_v9, %v15566_v12  ;;  %4606 = vmatmul.bf16.gmra.mxu3 %v4498_v36  ;;  %5032 = vmatmul.bf16.gmra.mxu0 %v4924_v7  ;;  %v4473_v7 = vunpack.c.l.b16 %v4217_v47  ;;  %v4925_v47 = vpack.c.b16 %v4900_v33, %v4899_v4  ;;  %v4811_v4 = vrot.slane %v4809_v54, 4 }
 0x232   : > { %v2581_v15 = vadd.f32 %v2537_v41, %v2267_v22  ;;  %v4229_v41 = vshrl.u32 %v4033_v42, 16  ;;  %v4234_v22 = vrot.slane %v4232_v50, 5  ;;  %v15571_v50 = vld [vmem:[#allocation26_spill] sm:$0xff] }
 0x233   : > { %v2542_v49 = vpop.f32.mrf.mxu3 }
 0x234   : > { %v3263_v58 = vadd.f32 %v12985_v44, %v2581_v15  ;;  %v4231_v12 = vrot.slane %v4229_v41, 4  ;;  %v4035_v15 = vld [vmem:[#allocation2 + $0x74] sm:$0x1]  ;;  %v3650_v3 = vpop.f32.mrf.mxu1  ;;  %v4701_v41 = vld [vmem:[#allocation2 + $0x6c] sm:$0xe] }
 0x235   : > { %v13031_v11 = vpop.f32.mrf.mxu0  ;;  %v4812_v33 = vrot.slane %v4035_v15, 5 }
 0x236   : > { %v13029_v36 = vadd.f32 %v3645_v19, %v3263_v58  ;;  %v4499_v58 = vpack.c.b16 %v4474_v10, %v4473_v7  ;;  %v4235_v6 = vor.u32 %v4234_v22, %v4231_v12  ;;  %v10610_v10 = vrot.slane %v4701_v41, 9 }
 0x237   : > { %v2225_v44 = vpop.f32.mrf.mxu2  ;;  %v4253_v22 = vshrl.u32 %v4036_v18, 16 }
 0x238   : > { %15568 = vst [vmem:[#allocation19_spill] sm:$0xff] %v13029_v36  ;;  %v2268_v9 = vadd.f32 %v2225_v44, %v15569_v27  ;;  %v4245_v44 = vor.u32 %v4244_v48, %v4240_v28  ;;  %v4248_v27 = vshll.u32 %v4035_v15, 16  ;;  %v4256_v48 = vshll.u32 %v4036_v18, 16 }
 0x23a   : > { %v2582_v13 = vadd.f32 %v2539_v43, %v2268_v9  ;;  %v4246_v9 = vrot.slane %v4245_v44, 4  ;;  %v4250_v7 = vrot.slane %v4248_v27, 5  ;;  %v4810_v44 = vsel %vm12316_vm14, %v10610_v10, %v4809_v54 }
 0x23b   : > { %v2544_v42 = vpop.f32.mrf.mxu3  ;;  %v4813_v27 = vsel %vm12316_vm14, %v4811_v4, %v4812_v33 }
 0x23c   : > { %3924 = vmatmul.bf16.gmra.mxu2 %v11270_v57  ;;  %v13035_v19 = vadd.f32 %v13000_v17, %v2582_v13  ;;  %v4236_v17 = vrot.slane %v4235_v6, 4  ;;  %v4266_v13 = vshrl.u32 %v13041_v40, 16 }
 0x23d   : > { %v13037_v62 = vpop.f32.mrf.mxu0 }
 0x23e   : > { %15570 = vst [vmem:[#allocation22_spill] sm:$0xff] %v13035_v19  ;;  %v4241_v6 = vsel %vm12048_vm11, %v4236_v17, %v4240_v28  ;;  %v4268_v18 = vrot.slane %v4266_v13, 4  ;;  %v11271_v17 = vld [vmem:[#allocation2 + $0x60] sm:$0xff] }
 0x23f   : > { %v2228_v2 = vpop.f32.mrf.mxu2 }
 0x240   : > { %v2269_v43 = vadd.f32 %v2228_v2, %v15571_v50  ;;  %4611 = vmatmul.bf16.gmra.mxu3 %v4499_v58  ;;  %5037 = vmatmul.bf16.gmra.mxu0 %v4925_v47  ;;  %v13046_v2 = vpop.f32.mrf.mxu1  ;;  %v4258_v50 = vrot.slane %v4256_v48, 5  ;;  %v4702_v48 = vld [vmem:[#allocation2 + $0x78] sm:$0xe] }
 0x241   : > { %15572 = vst [vmem:[#allocation23_spill] sm:$0xff] %v13046_v2  ;;  %v4475_v2 = vunpack.c.l.b16 %v4241_v6 }
 0x242   : > { %v2583_v57 = vadd.f32 %v2542_v49, %v2269_v43  ;;  %v4251_v49 = vsel %vm12048_vm11, %v4246_v9, %v4250_v7  ;;  %v4264_v43 = vrot.slane %v4262_v37, 5  ;;  %v4901_v7 = vunpack.c.l.b16 %v4810_v44 }
 0x243   : > { %v2547_v12 = vpop.f32.mrf.mxu3  ;;  %v4476_v9 = vunpack.c.l.b16 %v4251_v49  ;;  %v4816_v37 = vrot.slane %v13041_v40, 5  ;;  %v13070_v40 = vld [vmem:[#allocation2 + $0x88] sm:$0xf] }
 0x244   : > { %v3265_v58 = vadd.f32 %v13011_v30, %v2583_v57  ;;  %v4255_v30 = vrot.slane %v4253_v22, 4  ;;  %v15574_v57 = vld [vmem:[#allocation27_spill] sm:$0xff]  ;;  %v4269_v54 = vor.u32 %v4268_v18, %v4264_v43  ;;  %v10611_v18 = vrot.slane %v4702_v48, 9 }
 0x245   : > { %v13054_v15 = vpop.f32.mrf.mxu0  ;;  %v4500_v33 = vpack.c.b16 %v4476_v9, %v4475_v2 }
 0x246   : > { %v13052_v47 = vadd.f32 %v3650_v3, %v3265_v58  ;;  %v4038_v3 = vld [vmem:[#allocation2 + $0x80] sm:$0x1]  ;;  %v4902_v58 = vunpack.c.l.b16 %v4813_v27  ;;  %v4259_v36 = vor.u32 %v4258_v50, %v4255_v30  ;;  %v4270_v27 = vrot.slane %v4269_v54, 4 }
 0x247   : > { %v2230_v41 = vpop.f32.mrf.mxu2  ;;  %v4272_v10 = vshll.u32 %v4038_v3, 16  ;;  %v15576_v30 = vld [vmem:[#allocation28_spill] sm:$0xff]  ;;  %v4819_v2 = vrot.slane %v4038_v3, 5  ;;  %v4817_v3 = vsel %vm12316_vm14, %v10611_v18, %v4816_v37  ;;  %v13088_v18 = vld [vmem:[#allocation2 + $0x8c] sm:$0x1] }
 0x248   : > { %15573 = vst [vmem:[#allocation24_spill] sm:$0xff] %v13052_v47  ;;  %v2270_v28 = vadd.f32 %v2230_v41, %v15574_v57  ;;  %v4926_v22 = vpack.c.b16 %v4902_v58, %v4901_v7  ;;  %v3655_v49 = vpop.f32.mrf.mxu1  ;;  %v4260_v44 = vrot.slane %v4259_v36, 4  ;;  %v4039_v41 = vld [vmem:[#allocation2 + $0x84] sm:$0xf] }
 0x249   : > { %v396_v57 = vld [vmem:[#allocation3 + $0xc] sm:$0x1]  ;;  %v4280_v36 = vshll.u32 %v4039_v41, 16 }
 0x24a   : > { %v2584_v47 = vadd.f32 %v2544_v42, %v2270_v28  ;;  %v4274_v42 = vrot.slane %v4272_v10, 5  ;;  %v4265_v7 = vsel %vm12048_vm11, %v4260_v44, %v4264_v43  ;;  %v4286_v10 = vshll.u32 %v13070_v40, 16 }
 0x24b   : > { %v2549_v19 = vpop.f32.mrf.mxu3 }
 0x24c   : > { %3929 = vmatmul.bf16.gmra.mxu2 %v11271_v17  ;;  %v13062_v4 = vadd.f32 %v13031_v11, %v2584_v47  ;;  %v4818_v11 = vrot.slane %v4816_v37, 4  ;;  %v397_v47 = vsel %vm12005_vm3, 0, %v396_v57  ;;  %v4277_v17 = vshrl.u32 %v4039_v41, 16  ;;  %v15578_v41 = vld [vmem:[#allocation29_spill] sm:$0xff] }
 0x24d   : > { %v13065_v13 = vpop.f32.mrf.mxu0  ;;  %398 = vst [vmem:[#allocation3 + $0xc] sm:$0x1] %v397_v47  ;;  %v4275_v58 = vsel %vm12048_vm11, %v4270_v27, %v4274_v42  ;;  %v4477_v27 = vunpack.c.l.b16 %v4265_v7  ;;  %v11272_v37 = vld [vmem:[#allocation2 + $0x6c] sm:$0xff]  ;;  %v13090_v57 = vrot.slane %v4286_v10, 5  ;;  %v5652_v7 = vld [vmem:[#allocation3] sm:$0xf] }
 0x24e   : > { %15575 = vst [vmem:[#allocation25_spill] sm:$0xff] %v13062_v4  ;;  %v4279_v43 = vrot.slane %v4277_v17, 4  ;;  %v4478_v42 = vunpack.c.l.b16 %v4275_v58  ;;  %v5653_v58 = vld [vmem:[#allocation3 + $0x4] sm:$0xf] }
 0x24f   : > { %v2233_v6 = vpop.f32.mrf.mxu2 }
 0x250   : > { %v2271_v50 = vadd.f32 %v2233_v6, %v15576_v30  ;;  %4616 = vmatmul.bf16.gmra.mxu3 %v4500_v33  ;;  %5042 = vmatmul.bf16.gmra.mxu0 %v4926_v22  ;;  %v4290_v33 = vshrl.u32 %v13070_v40, 16  ;;  %v4282_v6 = vrot.slane %v4280_v36, 5  ;;  %v4501_v17 = vpack.c.b16 %v4478_v42, %v4477_v27 }
 0x251   : > { %v4296_v36 = vshll.u32 %v13088_v18, 16 }
 0x252   : > { %v2585_v28 = vadd.f32 %v2547_v12, %v2271_v50  ;;  %v4820_v12 = vsel %vm12316_vm14, %v4818_v11, %v4819_v2  ;;  %v4292_v47 = vrot.slane %v4290_v33, 4  ;;  %v13092_v11 = vpop.f32.mrf.mxu1  ;;  %v4283_v2 = vor.u32 %v4282_v6, %v4279_v43  ;;  %v4703_v33 = vld [vmem:[#allocation2 + $0x84] sm:$0xe] }
 0x253   : > { %v2552_v9 = vpop.f32.mrf.mxu3  ;;  %v4904_v50 = vunpack.c.l.b16 %v4820_v12  ;;  %15579 = vst [vmem:[#allocation27_spill] sm:$0xff] %v13092_v11  ;;  %v5717_v12 = vshrl.u32 %v5652_v7, 16  ;;  %v5726_v43 = vshll.u32 %v5653_v58, 16  ;;  %v5730_v6 = vshrl.u32 %v5653_v58, 16 }
 0x254   : > { %v3267_v54 = vadd.f32 %v13037_v62, %v2585_v28  ;;  %v4903_v62 = vunpack.c.l.b16 %v4817_v3  ;;  %v4293_v10 = vor.u32 %v4292_v47, %v13090_v57  ;;  %v4284_v27 = vrot.slane %v4283_v2, 4  ;;  %v444_v47 = vld [vmem:[#allocation3 + $0x14] sm:$0x1] }
 0x255   : > { %v13085_v48 = vpop.f32.mrf.mxu0  ;;  %v5719_v42 = vrot.slane %v5717_v12, 4  ;;  %v4298_v11 = vrot.slane %v4296_v36, 5  ;;  %v10612_v4 = vrot.slane %v4703_v33, 9  ;;  %v13107_v36 = vld [vmem:[#allocation2 + $0x94] sm:$0xf] }
 0x256   : > { %v13083_v22 = vadd.f32 %v3655_v49, %v3267_v54  ;;  %v4927_v3 = vpack.c.b16 %v4904_v50, %v4903_v62  ;;  %v15581_v62 = vld [vmem:[#allocation30_spill] sm:$0xff] }
 0x257   : > { %v2235_v44 = vpop.f32.mrf.mxu2 }
 0x258   : > { %15577 = vst [vmem:[#allocation26_spill] sm:$0xff] %v13083_v22  ;;  %v2272_v30 = vadd.f32 %v2235_v44, %v15578_v41  ;;  %v4823_v44 = vrot.slane %v13070_v40, 5 }
 0x25a   : > { %v2586_v49 = vadd.f32 %v2549_v19, %v2272_v30  ;;  %v5720_v19 = vshll.u32 %v5652_v7, 16  ;;  %v445_v7 = vsel %vm12011_vm7, 0, %v444_v47  ;;  %v4825_v58 = vrot.slane %v4823_v44, 4 }
 0x25b   : > { %v13094_v28 = vpop.f32.mrf.mxu3  ;;  %446 = vst [vmem:[#allocation3 + $0x14] sm:$0x1] %v445_v7 }
 0x25c   : > { %3934 = vmatmul.bf16.gmra.mxu2 %v11272_v37  ;;  %v13098_v54 = vadd.f32 %v13054_v15, %v2586_v49  ;;  %v5700_v37 = vld [vmem:[#allocation3 + $0x8] sm:$0x1]  ;;  %v5722_v22 = vrot.slane %v5720_v19, 5  ;;  %v5728_v15 = vrot.slane %v5726_v43, 5  ;;  %v5732_v49 = vrot.slane %v5730_v6, 4  ;;  %v3660_v43 = vpop.f32.mrf.mxu1  ;;  %v11329_v6 = vld [vmem:[#allocation9 + $0x40] sm:$0xff] }
 0x25d   : > { %v13102_v41 = vpop.f32.mrf.mxu0  ;;  %v5736_v40 = vshll.u32 %v5700_v37, 16  ;;  %6236 = vmatpush.bf16.msra.mxu1 %v11329_v6  ;;  %v11273_v6 = vld [vmem:[#allocation2 + $0x78] sm:$0xff] }
 0x25e   : > { %15580 = vst [vmem:[#allocation28_spill] sm:$0xff] %v13098_v54  ;;  %v4294_v54 = vrot.slane %v4293_v10, 4  ;;  %v5723_v2 = vor.u32 %v5722_v22, %v5719_v42  ;;  %v5733_v12 = vor.u32 %v5732_v49, %v5728_v15  ;;  %v4826_v10 = vrot.slane %v13088_v18, 5 }
 0x25f   : > { %v2238_v30 = vpop.f32.mrf.mxu2  ;;  %v5738_v33 = vrot.slane %v5736_v40, 5  ;;  %v4301_v22 = vshrl.u32 %v4042_v38, 16  ;;  %v4304_v42 = vshll.u32 %v4042_v38, 16  ;;  %v4824_v18 = vsel %vm12316_vm14, %v10612_v4, %v4823_v44 }
 0x260   : > { %v2273_v50 = vadd.f32 %v2238_v30, %v15581_v62  ;;  %4621 = vmatmul.bf16.gmra.mxu3 %v4501_v17  ;;  %5047 = vmatmul.bf16.gmra.mxu0 %v4927_v3  ;;  %v4289_v17 = vsel %vm12048_vm11, %v4284_v27, %v13090_v57  ;;  %v5724_v30 = vrot.slane %v5723_v2, 4  ;;  %v5734_v37 = vrot.slane %v5733_v12, 4  ;;  %v13132_v12 = vld [vmem:[#allocation2 + $0x98] sm:$0x1] }
 0x261   : > { %v4310_v62 = vshll.u32 %v13107_v36, 16  ;;  %v4314_v57 = vshrl.u32 %v13107_v36, 16  ;;  %v4479_v7 = vunpack.c.l.b16 %v4289_v17  ;;  %v4303_v4 = vrot.slane %v4301_v22, 4 }
 0x262   : > { %v2587_v19 = vadd.f32 %v2552_v9, %v2273_v50  ;;  %v4299_v9 = vsel %vm12048_vm11, %v4294_v54, %v4298_v11  ;;  %v5729_v27 = vsel %vm12048_vm11, %v5724_v30, %v5728_v15  ;;  %v5739_v50 = vsel %vm12048_vm11, %v5734_v37, %v5738_v33  ;;  %v15583_v15 = vld [vmem:[#allocation31_spill] sm:$0xff] }
 0x263   : > { %v13113_v3 = vpop.f32.mrf.mxu3  ;;  %v4827_v11 = vsel %vm12316_vm14, %v4825_v58, %v4826_v10  ;;  %v6117_v54 = vunpack.c.l.b16 %v5729_v27  ;;  %v6118_v47 = vunpack.c.l.b16 %v5739_v50  ;;  %v4480_v2 = vunpack.c.l.b16 %v4299_v9 }
 0x264   : > { %v3269_v49 = vadd.f32 %v13065_v13, %v2587_v19  ;;  %v4306_v44 = vrot.slane %v4304_v42, 5  ;;  %v4316_v30 = vrot.slane %v4314_v57, 4  ;;  %v4905_v37 = vunpack.c.l.b16 %v4824_v18  ;;  %v4704_v18 = vld [vmem:[#allocation2 + $0x90] sm:$0xe] }
 0x265   : > { %v13128_v13 = vpop.f32.mrf.mxu0  ;;  %v6149_v33 = vpack.c.b16 %v6118_v47, %v6117_v54  ;;  %v4320_v17 = vshll.u32 %v13132_v12, 16  ;;  %v10613_v47 = vrot.slane %v4704_v18, 9 }
 0x266   : > { %v13126_v38 = vadd.f32 %v3660_v43, %v3269_v49  ;;  %v4312_v43 = vrot.slane %v4310_v62, 5  ;;  %v4906_v49 = vunpack.c.l.b16 %v4827_v11  ;;  %v4307_v22 = vor.u32 %v4306_v44, %v4303_v4 }
 0x267   : > { %v2240_v40 = vpop.f32.mrf.mxu2  ;;  %6237 = vmatmul.bf16.vlgmr.msra.gmra.mxu1 %v6149_v33  ;;  %v4502_v62 = vpack.c.b16 %v4480_v2, %v4479_v7  ;;  %v447_v2 = vld [vmem:[#allocation3 + $0x20] sm:$0x1] }
 0x268   : > { %15582 = vst [vmem:[#allocation29_spill] sm:$0xff] %v13126_v38  ;;  %v2274_v19 = vadd.f32 %v2240_v40, %v15583_v15  ;;  %v399_v38 = vld [vmem:[#allocation3 + $0x18] sm:$0x1]  ;;  %v4317_v57 = vor.u32 %v4316_v30, %v4312_v43  ;;  %v4928_v27 = vpack.c.b16 %v4906_v49, %v4905_v37  ;;  %v4308_v54 = vrot.slane %v4307_v22, 4  ;;  %v4045_v40 = vld [vmem:[#allocation2 + $0x9c] sm:$0xf] }
 0x269   : > { %v400_v10 = vsel %vm12005_vm3, 0, %v399_v38  ;;  %v4322_v38 = vrot.slane %v4320_v17, 5  ;;  %v13147_v15 = vld [vmem:[#allocation2 + $0xa0] sm:$0xf]  ;;  %v4325_v44 = vshrl.u32 %v4045_v40, 16  ;;  %v4328_v7 = vshll.u32 %v4045_v40, 16 }
 0x26a   : > { %v2588_v58 = vadd.f32 %v13094_v28, %v2274_v19  ;;  %401 = vst [vmem:[#allocation3 + $0x18] sm:$0x1] %v400_v10  ;;  %v4830_v28 = vrot.slane %v13107_v36, 5  ;;  %v4833_v36 = vrot.slane %v13132_v12, 5  ;;  %v4338_v33 = vshrl.u32 %v13147_v15, 16  ;;  %v11328_v17 = vld [vmem:[#allocation9 + $0x38] sm:$0xff] }
 0x26b   : > { %v13139_v9 = vpop.f32.mrf.mxu3  ;;  %v13157_v37 = vld [vmem:[%s15505_s3] ss:$0 sm:$0xff]  ;;  %v4327_v49 = vrot.slane %v4325_v44, 4  ;;  %v11344_v12 = vld [vmem:[#allocation9 + $0xb8] sm:$0xff]  ;;  %v4313_v22 = vsel %vm12048_vm11, %v4308_v54, %v4312_v43  ;;  %6462 = vmatpush.bf16.msrb.mxu2 %v11328_v17  ;;  %v402_v17 = vld [vmem:[#allocation3 + $0x24] sm:$0x1] }
 0x26c   : > { %3939 = vmatmul.bf16.gmra.mxu2 %v11273_v6  ;;  %v13142_v42 = vadd.f32 %v13085_v48, %v2588_v58  ;;  %v4318_v48 = vrot.slane %v4317_v57, 4  ;;  %v4832_v19 = vrot.slane %v4830_v28, 4  ;;  %v4334_v6 = vshll.u32 %v13147_v15, 16  ;;  %6840 = vmatpush.bf16.msrb.mxu3 %v11344_v12 }
 0x26d   : > { %v13145_v50 = vpop.f32.mrf.mxu0  ;;  %v4330_v58 = vrot.slane %v4328_v7, 5  ;;  %v4340_v18 = vrot.slane %v4338_v33, 4  ;;  %v4481_v44 = vunpack.c.l.b16 %v4313_v22  ;;  %v4837_v12 = vrot.slane %v13147_v15, 5 }
 0x26e   : > { %15584 = vst [vmem:[#allocation30_spill] sm:$0xff] %v13142_v42  ;;  %v4336_v57 = vrot.slane %v4334_v6, 5  ;;  %v4834_v43 = vsel %vm12316_vm14, %v4832_v19, %v4833_v36  ;;  %v4705_v36 = vld [vmem:[#allocation2 + $0x9c] sm:$0xe] }
 0x26f   : > { %v3900_v11 = vpop.f32.mrf.mxu2  ;;  %v4331_v54 = vor.u32 %v4330_v58, %v4327_v49 }
 0x270   : > { %v3980_v4 = vadd.f32 %v3900_v11, %v12597_v51  ;;  %4626 = vmatmul.bf16.gmra.mxu3 %v4502_v62  ;;  %5052 = vmatmul.bf16.gmra.mxu0 %v4928_v27  ;;  %v448_v51 = vsel %vm12011_vm7, 0, %v447_v2  ;;  %v4323_v62 = vsel %vm12048_vm11, %v4318_v48, %v4322_v38  ;;  %v4047_v27 = vld [vmem:[#allocation2 + $0xa4] sm:$0x1]  ;;  %v4341_v6 = vor.u32 %v4340_v18, %v4336_v57 }
 0x271   : > { %449 = vst [vmem:[#allocation3 + $0x20] sm:$0x1] %v448_v51  ;;  %v4482_v7 = vunpack.c.l.b16 %v4323_v62  ;;  %v11274_v2 = vld [vmem:[#allocation2 + $0x84] sm:$0xff]  ;;  %v4344_v33 = vshll.u32 %v4047_v27, 16  ;;  %v4908_v51 = vunpack.c.l.b16 %v4834_v43  ;;  %v4332_v19 = vrot.slane %v4331_v54, 4 }
 0x272   : > { %v4662_v30 = vadd.f32 %v13113_v3, %v3980_v4  ;;  %v4831_v4 = vsel %vm12316_vm14, %v10613_v47, %v4830_v28  ;;  %v403_v47 = vsel %vm12005_vm3, 0, %v402_v17  ;;  %v11368_v62 = vld [vmem:[#allocation9 + $0xf8] sm:$0xff]  ;;  %v4342_v18 = vrot.slane %v4341_v6, 4 }
 0x273   : > { %v13161_v10 = vpop.f32.mrf.mxu3  ;;  %v4503_v58 = vpack.c.b16 %v4482_v7, %v4481_v44  ;;  %404 = vst [vmem:[#allocation3 + $0x24] sm:$0x1] %v403_v47  ;;  %v4839_v43 = vrot.slane %v4837_v12, 4  ;;  %7154 = vmatpush.bf16.msrb.mxu0 %v11368_v62  ;;  %v4337_v44 = vsel %vm12048_vm11, %v4332_v19, %v4336_v57 }
 0x274   : > { %v5088_v3 = vadd.f32 %v13102_v41, %v4662_v30  ;;  %v4907_v30 = vunpack.c.l.b16 %v4831_v4  ;;  %v10614_v4 = vrot.slane %v4705_v36, 9 }
 0x275   : > { %v13169_v40 = vpop.f32.mrf.mxu0 }
 0x276   : > { %v5124_v11 = vadd.f32 %v13157_v37, %v5088_v3  ;;  %v4929_v15 = vpack.c.b16 %v4908_v51, %v4907_v30  ;;  %v450_v30 = vld [vmem:[#allocation3 + $0x2c] sm:$0x1]  ;;  %v13194_v51 = vunpack.c.l.b16 %v4337_v44  ;;  %v4838_v17 = vsel %vm12316_vm14, %v10614_v4, %v4837_v12 }
 0x277   : > { %v3902_v41 = vpop.f32.mrf.mxu2  ;;  %v451_v36 = vsel %vm12011_vm7, 0, %v450_v30  ;;  %v4909_v4 = vunpack.c.l.b16 %v4838_v17 }
 0x278   : > { %v5156_v38 = vmax.f32 %v5124_v11, 0.0  ;;  %v3981_v48 = vadd.f32 %v3902_v41, %v12612_v52  ;;  %v4346_v11 = vrot.slane %v4344_v33, 5  ;;  %452 = vst [vmem:[#allocation3 + $0x2c] sm:$0x1] %v451_v36 }
 0x27a   : > { %v5188_v3 = vpack.c.bf16 %v5156_v38, %v5156_v38  ;;  %v4663_v28 = vadd.f32 %v13139_v9, %v3981_v48  ;;  %v4840_v9 = vrot.slane %v4047_v27, 5  ;;  %v4347_v27 = vsel %vm12048_vm11, %v4342_v18, %v4346_v11 }
 0x27b   : > { %v13180_v49 = vpop.f32.mrf.mxu3  ;;  %v13209_v12 = vunpack.c.l.b16 %v4347_v27  ;;  %v5544_v27 = vld [vmem:[#allocation3 + $0x14] sm:$0x1] }
 0x27c   : > { %v5221_v52 = vshrl.u32 %v5188_v3, 16  ;;  %v5089_v22 = vadd.f32 %v13128_v13, %v4663_v28  ;;  %3944 = vmatmul.bf16.gmra.mxu2 %v11274_v2  ;;  %v5224_v38 = vshll.u32 %v5188_v3, 16  ;;  %v5540_v13 = vld [vmem:[#allocation3 + $0xc] sm:$0xf]  ;;  %v4841_v57 = vsel %vm12316_vm14, %v4839_v43, %v4840_v9  ;;  %v4048_v3 = vld [vmem:[#allocation2 + $0xa8] sm:$0xf] }
 0x27d   : > { %v13186_v48 = vpop.f32.mrf.mxu0  ;;  %v13200_v28 = vld [vmem:[#allocation2 + $0xac] sm:$0xf]  ;;  %v4352_v62 = vshll.u32 %v4048_v3, 16  ;;  %v4910_v43 = vunpack.c.l.b16 %v4841_v57  ;;  %v13214_v9 = vld [vmem:[#allocation2 + $0xb0] sm:$0x1]  ;;  %v4504_v17 = vpack.c.b16 %v13209_v12, %v13194_v51 }
 0x27e   : > { %v13183_v41 = vrot.slane %v5221_v52, 7  ;;  %v5125_v54 = vadd.f32 %v13157_v37, %v5089_v22  ;;  %v11376_v52 = vld [vmem:[#allocation9 + $0x138] sm:$0xff]  ;;  %v4349_v22 = vshrl.u32 %v4048_v3, 16  ;;  %v4358_v18 = vshll.u32 %v13200_v28, 16 }
 0x27f   : > { %v3905_v7 = vpop.f32.mrf.mxu2  ;;  %7836 = vmatpush.bf16.msrb.mxu1 %v11376_v52  ;;  %v4368_v3 = vshll.u32 %v13214_v9, 16  ;;  %v11275_v52 = vld [vmem:[#allocation2 + $0x90] sm:$0xff] }
 0x280   : > { %v5226_v2 = vor.u32 %v5224_v38, %v13183_v41  ;;  %v5157_v6 = vmax.f32 %v5125_v54, 0.0  ;;  %v3982_v33 = vadd.f32 %v3905_v7, %v12637_v29  ;;  %4631 = vmatmul.bf16.gmra.mxu3 %v4503_v58  ;;  %5057 = vmatmul.bf16.gmra.mxu0 %v4929_v15  ;;  %v4351_v38 = vrot.slane %v4349_v22, 4  ;;  %v4706_v22 = vld [vmem:[#allocation2 + $0xa8] sm:$0xe] }
 0x281   : > { %v4354_v54 = vrot.slane %v4352_v62, 5  ;;  %v4360_v44 = vrot.slane %v4358_v18, 5  ;;  %v4930_v62 = vpack.c.b16 %v4910_v43, %v4909_v4  ;;  %v405_v18 = vld [vmem:[#allocation3 + $0x30] sm:$0x1] }
 0x282   : > { %v5541_v29 = vsel %vm12042_vm10, %v5226_v2, %v5540_v13  ;;  %v5189_v47 = vpack.c.bf16 %v5157_v6, %v5157_v6  ;;  %v4664_v19 = vadd.f32 %v13161_v10, %v3982_v33  ;;  %v4362_v10 = vshrl.u32 %v13200_v28, 16 }
 0x283   : > { %5542 = vst [vmem:[#allocation3 + $0xc] sm:$0xf] %v5541_v29  ;;  %v13207_v58 = vpop.f32.mrf.mxu3  ;;  %v4355_v57 = vor.u32 %v4354_v54, %v4351_v38  ;;  %v406_v4 = vsel %vm12005_vm3, 0, %v405_v18 }
 0x284   : > { %v5229_v11 = vshrl.u32 %v5189_v47, 16  ;;  %v5090_v15 = vadd.f32 %v13145_v50, %v4664_v19  ;;  %v5232_v7 = vshll.u32 %v5189_v47, 16  ;;  %v4364_v33 = vrot.slane %v4362_v10, 4  ;;  %407 = vst [vmem:[#allocation3 + $0x30] sm:$0x1] %v406_v4 }
 0x285   : > { %v13217_v6 = vpop.f32.mrf.mxu0  ;;  %v5227_v50 = vrot.slane %v13183_v41, 4  ;;  %v4844_v41 = vrot.slane %v13200_v28, 5 }
 0x286   : > { %v5231_v13 = vrot.slane %v5229_v11, 7  ;;  %v5126_v2 = vadd.f32 %v13157_v37, %v5090_v15  ;;  %v4356_v11 = vrot.slane %v4355_v57, 4  ;;  %v4365_v15 = vor.u32 %v4364_v33, %v4360_v44 }
 0x287   : > { %v3907_v30 = vpop.f32.mrf.mxu2  ;;  %v4846_v57 = vrot.slane %v4844_v41, 4 }
 0x288   : > { %v5234_v29 = vor.u32 %v5232_v7, %v5231_v13  ;;  %v5236_v19 = vrot.slane %v5231_v13, 4  ;;  %v5158_v36 = vmax.f32 %v5126_v2, 0.0  ;;  %v3983_v47 = vadd.f32 %v3907_v30, %v12655_v1 }
 0x289   : > { %v4370_v13 = vrot.slane %v4368_v3, 5  ;;  %v10615_v7 = vrot.slane %v4706_v22, 9  ;;  %v4366_v30 = vrot.slane %v4365_v15, 4  ;;  %v15585_v15 = vld [vmem:[#allocation32_spill] sm:$0xff] }
 0x28a   : > { %v5235_v10 = vsel %vm12033_vm9, %v5227_v50, %v5234_v29  ;;  %v5545_v51 = vsel %vm12005_vm3, %v5236_v19, %v5544_v27  ;;  %v5190_v12 = vpack.c.bf16 %v5158_v36, %v5158_v36  ;;  %v4665_v38 = vadd.f32 %v13180_v49, %v3983_v47  ;;  %v5654_v54 = vld [vmem:[#allocation3 + $0xc] sm:$0xf] }
 0x28b   : > { %5543 = vst [vmem:[#allocation3 + $0x10] sm:$0xf] %v5235_v10  ;;  %v13230_v1 = vpop.f32.mrf.mxu3  ;;  %v5741_v43 = vshrl.u32 %v5654_v54, 16  ;;  %v5744_v33 = vshll.u32 %v5654_v54, 16  ;;  %v4361_v50 = vsel %vm12048_vm11, %v4356_v11, %v4360_v44  ;;  %v4847_v47 = vrot.slane %v13214_v9, 5 }
 0x28c   : > { %5546 = vst [vmem:[#allocation3 + $0x14] sm:$0x1] %v5545_v51  ;;  %v5238_v28 = vshrl.u32 %v5190_v12, 16  ;;  %v5091_v2 = vadd.f32 %v13169_v40, %v4665_v38  ;;  %3949 = vmatmul.bf16.gmra.mxu2 %v11275_v52  ;;  %v5241_v49 = vshll.u32 %v5190_v12, 16  ;;  %v13245_v40 = vadd.f32 %v12709_v25, %v12795_v35  ;;  %v5547_v52 = vld [vmem:[#allocation3 + $0x18] sm:$0xf] }
 0x28d   : > { %v5743_v27 = vrot.slane %v5741_v43, 4  ;;  %v13240_v3 = vpop.f32.mrf.mxu0  ;;  %v5746_v36 = vrot.slane %v5744_v33, 5  ;;  %v4371_v22 = vsel %vm12048_vm11, %v4366_v30, %v4370_v13  ;;  %v4845_v51 = vsel %vm12316_vm14, %v10615_v7, %v4844_v41  ;;  %v4051_v13 = vld [vmem:[#allocation2 + $0xb4] sm:$0xf]  ;;  %v7275_v45 = vld [vmem:[#allocation3 + $0xc] sm:$0xf] }
 0x28e   : > { %v13237_v29 = vrot.slane %v5238_v28, 7  ;;  %v5127_v19 = vadd.f32 %v13157_v37, %v5091_v2  ;;  %v13253_v12 = vunpack.c.l.b16 %v4361_v50  ;;  %v13255_v25 = vunpack.c.l.b16 %v4371_v22 }
 0x28f   : > { %v3910_v44 = vpop.f32.mrf.mxu2  ;;  %v5747_v9 = vor.u32 %v5746_v36, %v5743_v27  ;;  %v4848_v35 = vsel %vm12316_vm14, %v4846_v57, %v4847_v47  ;;  %v4911_v2 = vunpack.c.l.b16 %v4845_v51  ;;  %v11327_v57 = vld [vmem:[#allocation9 + $0x30] sm:$0xff] }
 0x290   : > { %v5243_v18 = vor.u32 %v5241_v49, %v13237_v29  ;;  %v5159_v11 = vmax.f32 %v5127_v19, 0.0  ;;  %v3984_v10 = vadd.f32 %v3910_v44, %v15585_v15  ;;  %4636 = vmatmul.bf16.gmra.mxu3 %v4504_v17  ;;  %5062 = vmatmul.bf16.gmra.mxu0 %v4930_v62  ;;  %v5244_v38 = vrot.slane %v13237_v29, 4  ;;  %v11343_v36 = vld [vmem:[#allocation9 + $0xb0] sm:$0xff]  ;;  %v13273_v15 = vld [vmem:[#allocation2 + $0xb8] sm:$0xf] }
 0x291   : > { %v5748_v7 = vrot.slane %v5747_v9, 4  ;;  %v4912_v33 = vunpack.c.l.b16 %v4848_v35  ;;  %6463 = vmatpush.bf16.msrb.mxu2 %v11327_v57  ;;  %6841 = vmatpush.bf16.msrb.mxu3 %v11343_v36  ;;  %v4382_v47 = vshll.u32 %v13273_v15, 16  ;;  %v13286_v36 = vld [vmem:[#allocation2 + $0xb4] sm:$0xe] }
 0x292   : > { %v5548_v54 = vsel %vm12042_vm10, %v5243_v18, %v5547_v52  ;;  %v5191_v4 = vpack.c.bf16 %v5159_v11, %v5159_v11  ;;  %v4666_v17 = vadd.f32 %v13207_v58, %v3984_v10  ;;  %v5655_v43 = vld [vmem:[#allocation3 + $0x10] sm:$0xf]  ;;  %v453_v58 = vld [vmem:[#allocation3 + $0x38] sm:$0x1]  ;;  %v4373_v52 = vshrl.u32 %v4051_v13, 16 }
 0x293   : > { %5549 = vst [vmem:[#allocation3 + $0x18] sm:$0xf] %v5548_v54  ;;  %v13263_v62 = vpop.f32.mrf.mxu3  ;;  %v5701_v41 = vld [vmem:[#allocation3 + $0x14] sm:$0x1]  ;;  %v5750_v28 = vshll.u32 %v5655_v43, 16  ;;  %v5754_v30 = vshrl.u32 %v5655_v43, 16  ;;  %v4931_v35 = vpack.c.b16 %v4912_v33, %v4911_v2 }
 0x294   : > { %v5246_v50 = vshrl.u32 %v5191_v4, 16  ;;  %v5249_v49 = vshll.u32 %v5191_v4, 16  ;;  %v5092_v27 = vadd.f32 %v13186_v48, %v4666_v17  ;;  %v5760_v19 = vshll.u32 %v5701_v41, 16  ;;  %v5551_v10 = vld [vmem:[#allocation3 + $0x20] sm:$0x1] }
 0x295   : > { %v5752_v29 = vrot.slane %v5750_v28, 5  ;;  %v5756_v18 = vrot.slane %v5754_v30, 4  ;;  %v13269_v11 = vpop.f32.mrf.mxu0  ;;  %v454_v48 = vsel %vm12011_vm7, 0, %v453_v58  ;;  %v4375_v54 = vrot.slane %v4373_v52, 4  ;;  %v15586_v28 = vld [vmem:[#allocation33_spill] sm:$0xff] }
 0x296   : > { %v5248_v44 = vrot.slane %v5246_v50, 7  ;;  %v5128_v22 = vadd.f32 %v13157_v37, %v5092_v27  ;;  %455 = vst [vmem:[#allocation3 + $0x38] sm:$0x1] %v454_v48  ;;  %v4376_v4 = vshll.u32 %v4051_v13, 16  ;;  %v11276_v27 = vld [vmem:[#allocation2 + $0x9c] sm:$0xff]  ;;  %v5762_v57 = vrot.slane %v5760_v19, 5 }
 0x297   : > { %v3912_v51 = vpop.f32.mrf.mxu2  ;;  %v5753_v9 = vsel %vm12048_vm11, %v5748_v7, %v5752_v29  ;;  %v5757_v30 = vor.u32 %v5756_v18, %v5752_v29 }
 0x298   : > { %v5251_v17 = vor.u32 %v5249_v49, %v5248_v44  ;;  %v5253_v43 = vrot.slane %v5248_v44, 4  ;;  %v5160_v41 = vmax.f32 %v5128_v22, 0.0  ;;  %v3985_v50 = vadd.f32 %v3912_v51, %v15586_v28  ;;  %v13284_v49 = vld [vmem:[#allocation2 + $0xbc] sm:$0x1]  ;;  %v408_v44 = vld [vmem:[#allocation3 + $0x3c] sm:$0x1] }
 0x299   : > { %v4378_v58 = vrot.slane %v4376_v4, 5  ;;  %v5758_v29 = vrot.slane %v5757_v30, 4  ;;  %v6119_v19 = vunpack.c.l.b16 %v5753_v9  ;;  %v409_v51 = vsel %vm12005_vm3, 0, %v408_v44 }
 0x29a   : > { %v5252_v42 = vsel %vm12033_vm9, %v5244_v38, %v5251_v17  ;;  %v5552_v7 = vsel %vm12005_vm3, %v5253_v43, %v5551_v10  ;;  %v5192_v2 = vpack.c.bf16 %v5160_v41, %v5160_v41  ;;  %v4667_v13 = vadd.f32 %v13230_v1, %v3985_v50  ;;  %v5656_v33 = vld [vmem:[#allocation3 + $0x18] sm:$0xf]  ;;  %v11367_v1 = vld [vmem:[#allocation9 + $0xf0] sm:$0xff]  ;;  %410 = vst [vmem:[#allocation3 + $0x3c] sm:$0x1] %v409_v51 }
 0x29b   : > { %5550 = vst [vmem:[#allocation3 + $0x1c] sm:$0xf] %v5252_v42  ;;  %v13288_v52 = vpop.f32.mrf.mxu3  ;;  %v5765_v22 = vshrl.u32 %v5656_v33, 16  ;;  %v4379_v18 = vor.u32 %v4378_v58, %v4375_v54  ;;  %v5763_v42 = vsel %vm12048_vm11, %v5758_v29, %v5762_v57  ;;  %v5768_v4 = vshll.u32 %v5656_v33, 16  ;;  %7155 = vmatpush.bf16.msrb.mxu0 %v11367_v1  ;;  %v5554_v50 = vld [vmem:[#allocation3 + $0x24] sm:$0xf] }
 0x29c   : > { %5553 = vst [vmem:[#allocation3 + $0x20] sm:$0x1] %v5552_v7  ;;  %v5255_v38 = vshrl.u32 %v5192_v2, 16  ;;  %v5258_v48 = vshll.u32 %v5192_v2, 16  ;;  %v5093_v10 = vadd.f32 %v13217_v6, %v4667_v13  ;;  %3954 = vmatmul.bf16.gmra.mxu2 %v11276_v27  ;;  %v6120_v41 = vunpack.c.l.b16 %v5763_v42  ;;  %v15587_v29 = vld [vmem:[#allocation34_spill] sm:$0xff] }
 0x29d   : > { %v5767_v9 = vrot.slane %v5765_v22, 4  ;;  %v4380_v17 = vrot.slane %v4379_v18, 4  ;;  %v13298_v28 = vpop.f32.mrf.mxu0  ;;  %v4384_v6 = vrot.slane %v4382_v47, 5  ;;  %v5770_v30 = vrot.slane %v5768_v4, 5 }
 0x29e   : > { %v13295_v43 = vrot.slane %v5255_v38, 7  ;;  %v5129_v54 = vadd.f32 %v13157_v37, %v5093_v10  ;;  %v4386_v58 = vshrl.u32 %v13273_v15, 16  ;;  %v4392_v57 = vshll.u32 %v13284_v49, 16 }
 0x29f   : > { %v3915_v27 = vpop.f32.mrf.mxu2  ;;  %v10616_v7 = vrot.slane %v13286_v36, 9  ;;  %v15588_v22 = vpack.c.b16 %v13255_v25, %v13253_v12  ;;  %v6150_v47 = vpack.c.b16 %v6120_v41, %v6119_v19  ;;  %v5771_v18 = vor.u32 %v5770_v30, %v5767_v9  ;;  %v11375_v41 = vld [vmem:[#allocation9 + $0x130] sm:$0xff]  ;;  %v456_v30 = vld [vmem:[#allocation3 + $0x44] sm:$0x1] }
 0x2a0   : > { %v5260_v2 = vor.u32 %v5258_v48, %v13295_v43  ;;  %v5261_v13 = vrot.slane %v13295_v43, 4  ;;  %v5161_v33 = vmax.f32 %v5129_v54, 0.0  ;;  %v3986_v44 = vadd.f32 %v3915_v27, %v15587_v29  ;;  %5067 = vmatmul.bf16.gmra.mxu0 %v4931_v35  ;;  %7837 = vmatpush.bf16.msrb.mxu1 %v11375_v41 }
 0x2a1   : > { %4641 = vmatmul.bf16.gmra.mxu3 %v15588_v22  ;;  %v4385_v38 = vsel %vm12048_vm11, %v4380_v17, %v4384_v6  ;;  %v4388_v10 = vrot.slane %v4386_v58, 4  ;;  %v4394_v42 = vrot.slane %v4392_v57, 5  ;;  %6242 = vmatmul.bf16.gmra.mxu1 %v6150_v47  ;;  %v5772_v35 = vrot.slane %v5771_v18, 4 }
 0x2a2   : > { %v5555_v36 = vsel %vm12042_vm10, %v5260_v2, %v5554_v50  ;;  %v5193_v48 = vpack.c.bf16 %v5161_v33, %v5161_v33  ;;  %v4668_v1 = vadd.f32 %v13263_v62, %v3986_v44  ;;  %v13314_v51 = vld [vmem:[#allocation3 + $0x1c] sm:$0xf]  ;;  %v13319_v4 = vunpack.c.l.b16 %v4385_v38 }
 0x2a3   : > { %5556 = vst [vmem:[#allocation3 + $0x24] sm:$0xf] %v5555_v36  ;;  %v13316_v12 = vpop.f32.mrf.mxu3  ;;  %v5702_v25 = vld [vmem:[#allocation3 + $0x20] sm:$0x1]  ;;  %v5774_v19 = vshll.u32 %v13314_v51, 16  ;;  %v4389_v9 = vor.u32 %v4388_v10, %v4384_v6  ;;  %v5778_v62 = vshrl.u32 %v13314_v51, 16 }
 0x2a4   : > { %v5263_v17 = vshrl.u32 %v5193_v48, 16  ;;  %v5266_v43 = vshll.u32 %v5193_v48, 16  ;;  %v5094_v54 = vadd.f32 %v13240_v3, %v4668_v1  ;;  %v5784_v27 = vshll.u32 %v5702_v25, 16  ;;  %v5558_v3 = vld [vmem:[#allocation3 + $0x2c] sm:$0x1]  ;;  %v11277_v25 = vld [vmem:[#allocation2 + $0xa8] sm:$0xff] }
 0x2a5   : > { %v5776_v50 = vrot.slane %v5774_v19, 5  ;;  %v4390_v58 = vrot.slane %v4389_v9, 4  ;;  %v4851_v57 = vrot.slane %v13273_v15, 5  ;;  %v5780_v29 = vrot.slane %v5778_v62, 4  ;;  %v13325_v6 = vpop.f32.mrf.mxu0 }
 0x2a6   : > { %v5265_v2 = vrot.slane %v5263_v17, 7  ;;  %v5130_v33 = vadd.f32 %v13157_v37, %v5094_v54  ;;  %v457_v44 = vsel %vm12011_vm7, 0, %v456_v30  ;;  %v5786_v18 = vrot.slane %v5784_v27, 5 }
 0x2a7   : > { %v3917_v22 = vpop.f32.mrf.mxu2  ;;  %v5777_v47 = vsel %vm12048_vm11, %v5772_v35, %v5776_v50  ;;  %458 = vst [vmem:[#allocation3 + $0x44] sm:$0x1] %v457_v44  ;;  %v4395_v15 = vsel %vm12048_vm11, %v4390_v58, %v4394_v42  ;;  %v4852_v38 = vsel %vm12316_vm14, %v10616_v7, %v4851_v57  ;;  %v5781_v19 = vor.u32 %v5780_v29, %v5776_v50 }
 0x2a8   : > { %v5268_v10 = vor.u32 %v5266_v43, %v5265_v2  ;;  %v5270_v36 = vrot.slane %v5265_v2, 4  ;;  %v5162_v48 = vmax.f32 %v5130_v33, 0.0  ;;  %v3987_v1 = vadd.f32 %v3917_v22, %v12755_v63  ;;  %v4054_v43 = vld [vmem:[#allocation2 + $0xc0] sm:$0xf] }
 0x2a9   : > { %v6121_v9 = vunpack.c.l.b16 %v5777_v47  ;;  %v4488_v17 = vunpack.c.l.b16 %v4395_v15  ;;  %v4853_v54 = vrot.slane %v4851_v57, 4  ;;  %v5782_v27 = vrot.slane %v5781_v19, 4  ;;  %v411_v57 = vld [vmem:[#allocation3 + $0x48] sm:$0x1] }
 0x2aa   : > { %v5269_v35 = vsel %vm12033_vm9, %v5261_v13, %v5268_v10  ;;  %v5559_v62 = vsel %vm12005_vm3, %v5270_v36, %v5558_v3  ;;  %v5194_v42 = vpack.c.bf16 %v5162_v48, %v5162_v48  ;;  %v4669_v41 = vadd.f32 %v13288_v52, %v3987_v1  ;;  %v5658_v7 = vld [vmem:[#allocation3 + $0x24] sm:$0xf] }
 0x2ab   : > { %5557 = vst [vmem:[#allocation3 + $0x28] sm:$0xf] %v5269_v35  ;;  %v13341_v30 = vpop.f32.mrf.mxu3  ;;  %v4506_v63 = vpack.c.b16 %v4488_v17, %v13319_v4  ;;  %v4854_v50 = vrot.slane %v13284_v49, 5  ;;  %v4913_v58 = vunpack.c.l.b16 %v4852_v38  ;;  %v412_v52 = vsel %vm12005_vm3, 0, %v411_v57  ;;  %v5561_v38 = vld [vmem:[#allocation3 + $0x30] sm:$0xf] }
 0x2ac   : > { %5560 = vst [vmem:[#allocation3 + $0x2c] sm:$0x1] %v5559_v62  ;;  %v5272_v13 = vshrl.u32 %v5194_v42, 16  ;;  %v5275_v2 = vshll.u32 %v5194_v42, 16  ;;  %v5095_v33 = vadd.f32 %v13269_v11, %v4669_v41  ;;  %3959 = vmatmul.bf16.gmra.mxu2 %v11277_v25  ;;  %v5787_v29 = vsel %vm12048_vm11, %v5782_v27, %v5786_v18 }
 0x2ad   : > { %v4855_v44 = vsel %vm12316_vm14, %v4853_v54, %v4854_v50  ;;  %413 = vst [vmem:[#allocation3 + $0x48] sm:$0x1] %v412_v52  ;;  %v5789_v4 = vshrl.u32 %v5658_v7, 16  ;;  %v5792_v49 = vshll.u32 %v5658_v7, 16  ;;  %v6122_v47 = vunpack.c.l.b16 %v5787_v29  ;;  %v13355_v15 = vpop.f32.mrf.mxu0 }
 0x2ae   : > { %v13352_v3 = vrot.slane %v5272_v13, 7  ;;  %v5131_v22 = vadd.f32 %v13157_v37, %v5095_v33  ;;  %v4914_v11 = vunpack.c.l.b16 %v4855_v44  ;;  %v4397_v1 = vshrl.u32 %v4054_v43, 16 }
 0x2af   : > { %v3920_v10 = vpop.f32.mrf.mxu2  ;;  %v5791_v36 = vrot.slane %v5789_v4, 4  ;;  %v5794_v48 = vrot.slane %v5792_v49, 5  ;;  %v4400_v18 = vshll.u32 %v4054_v43, 16  ;;  %v6151_v35 = vpack.c.b16 %v6122_v47, %v6121_v9  ;;  %v13365_v43 = vld [vmem:[#allocation2 + $0xc4] sm:$0xf] }
 0x2b0   : > { %v5277_v25 = vor.u32 %v5275_v2, %v13352_v3  ;;  %v5278_v19 = vrot.slane %v13352_v3, 4  ;;  %v5163_v17 = vmax.f32 %v5131_v22, 0.0  ;;  %v3988_v54 = vadd.f32 %v3920_v10, %v12787_v59  ;;  %v459_v4 = vld [vmem:[#allocation3 + $0x50] sm:$0x1]  ;;  %v5565_v47 = vld [vmem:[#allocation3 + $0x38] sm:$0x1] }
 0x2b1   : > { %4646 = vmatmul.bf16.gmra.mxu3 %v4506_v63  ;;  %v4932_v62 = vpack.c.b16 %v4914_v11, %v4913_v58  ;;  %v5795_v42 = vor.u32 %v5794_v48, %v5791_v36  ;;  %v4399_v41 = vrot.slane %v4397_v1, 4  ;;  %v4402_v13 = vrot.slane %v4400_v18, 5  ;;  %6247 = vmatmul.bf16.gmra.mxu1 %v6151_v35  ;;  %v11366_v36 = vld [vmem:[#allocation9 + $0xe8] sm:$0xff] }
 0x2b2   : > { %v5562_v7 = vsel %vm12042_vm10, %v5277_v25, %v5561_v38  ;;  %v5195_v27 = vpack.c.bf16 %v5163_v17, %v5163_v17  ;;  %v4670_v50 = vadd.f32 %v13316_v12, %v3988_v54  ;;  %v13363_v57 = vld [vmem:[#allocation3 + $0x28] sm:$0xf]  ;;  %v13369_v2 = vadd.f32 %v12763_v55, %v12830_v8  ;;  %v11326_v8 = vld [vmem:[#allocation9 + $0x28] sm:$0xff]  ;;  %7156 = vmatpush.bf16.msrb.mxu0 %v11366_v36  ;;  %v5568_v36 = vld [vmem:[#allocation3 + $0x3c] sm:$0xf] }
 0x2b3   : > { %v13373_v59 = vadd.f32 %v12803_v0, %v12864_v26  ;;  %5563 = vst [vmem:[#allocation3 + $0x30] sm:$0xf] %v5562_v7  ;;  %5072 = vmatmul.bf16.gmra.mxu0 %v4932_v62  ;;  %v13375_v9 = vpop.f32.mrf.mxu3  ;;  %v13377_v63 = vld [vmem:[#allocation3 + $0x2c] sm:$0x1]  ;;  %v5796_v12 = vrot.slane %v5795_v42, 4  ;;  %v5798_v58 = vshll.u32 %v13363_v57, 16  ;;  %v4403_v49 = vor.u32 %v4402_v13, %v4399_v41  ;;  %6464 = vmatpush.bf16.msrb.mxu2 %v11326_v8 }
 0x2b4   : > { %v5280_v33 = vshrl.u32 %v5195_v27, 16  ;;  %v5283_v52 = vshll.u32 %v5195_v27, 16  ;;  %v5096_v29 = vadd.f32 %v13298_v28, %v4670_v50  ;;  %v5802_v55 = vshrl.u32 %v13363_v57, 16  ;;  %v11342_v26 = vld [vmem:[#allocation9 + $0xa8] sm:$0xff]  ;;  %v4056_v7 = vld [vmem:[#allocation2 + $0xc8] sm:$0x1] }
 0x2b5   : > { %v5800_v44 = vrot.slane %v5798_v58, 5  ;;  %v5808_v0 = vshll.u32 %v13377_v63, 16  ;;  %v4406_v3 = vshll.u32 %v13365_v43, 16  ;;  %v13385_v10 = vpop.f32.mrf.mxu0  ;;  %v460_v28 = vsel %vm12011_vm7, 0, %v459_v4  ;;  %6842 = vmatpush.bf16.msrb.mxu3 %v11342_v26  ;;  %v11278_v41 = vld [vmem:[#allocation2 + $0xb4] sm:$0xff] }
 0x2b6   : > { %v5282_v22 = vrot.slane %v5280_v33, 7  ;;  %v5132_v11 = vadd.f32 %v13157_v37, %v5096_v29  ;;  %v5804_v38 = vrot.slane %v5802_v55, 4  ;;  %461 = vst [vmem:[#allocation3 + $0x50] sm:$0x1] %v460_v28  ;;  %v4404_v25 = vrot.slane %v4403_v49, 4 }
 0x2b7   : > { %v3922_v48 = vpop.f32.mrf.mxu2  ;;  %v5801_v1 = vsel %vm12048_vm11, %v5796_v12, %v5800_v44  ;;  %v5810_v18 = vrot.slane %v5808_v0, 5  ;;  %v4408_v17 = vrot.slane %v4406_v3, 5  ;;  %v4410_v12 = vshrl.u32 %v13365_v43, 16  ;;  %v4708_v58 = vld [vmem:[#allocation2 + $0xc0] sm:$0xe] }
 0x2b8   : > { %v5285_v54 = vor.u32 %v5283_v52, %v5282_v22  ;;  %v5287_v35 = vrot.slane %v5282_v22, 4  ;;  %v5164_v62 = vmax.f32 %v5132_v11, 0.0  ;;  %v3989_v42 = vadd.f32 %v3922_v48, %v13245_v40 }
 0x2b9   : > { %v5805_v27 = vor.u32 %v5804_v38, %v5800_v44  ;;  %v6123_v50 = vunpack.c.l.b16 %v5801_v1  ;;  %v4409_v13 = vsel %vm12048_vm11, %v4404_v25, %v4408_v17  ;;  %v4412_v44 = vrot.slane %v4410_v12, 4  ;;  %v414_v38 = vld [vmem:[#allocation3 + $0x54] sm:$0x1] }
 0x2ba   : > { %v5286_v33 = vsel %vm12033_vm9, %v5278_v19, %v5285_v54  ;;  %v5566_v52 = vsel %vm12005_vm3, %v5287_v35, %v5565_v47  ;;  %v5196_v29 = vpack.c.bf16 %v5164_v62, %v5164_v62  ;;  %v4671_v40 = vadd.f32 %v13341_v30, %v3989_v42  ;;  %v11341_v42 = vld [vmem:[#allocation9 + $0xa0] sm:$0xff] }
 0x2bb   : > { %5564 = vst [vmem:[#allocation3 + $0x34] sm:$0xf] %v5286_v33  ;;  %v5806_v55 = vrot.slane %v5805_v27, 4  ;;  %v13400_v8 = vpop.f32.mrf.mxu3  ;;  %v4416_v0 = vshll.u32 %v4056_v7, 16  ;;  %v13402_v26 = vunpack.c.l.b16 %v4409_v13  ;;  %v10617_v19 = vrot.slane %v4708_v58, 9  ;;  %6843 = vmatpush.bf16.msrb.mxu3 %v11341_v42 }
 0x2bc   : > { %5567 = vst [vmem:[#allocation3 + $0x38] sm:$0x1] %v5566_v52  ;;  %v5289_v4 = vshrl.u32 %v5196_v29, 16  ;;  %v5292_v49 = vshll.u32 %v5196_v29, 16  ;;  %v5097_v3 = vadd.f32 %v13325_v6, %v4671_v40  ;;  %3964 = vmatmul.bf16.gmra.mxu2 %v11278_v41  ;;  %v4413_v47 = vor.u32 %v4412_v44, %v4408_v17  ;;  %v11365_v41 = vld [vmem:[#allocation9 + $0xe0] sm:$0xff] }
 0x2bd   : > { %v5811_v22 = vsel %vm12048_vm11, %v5806_v55, %v5810_v18  ;;  %v4418_v30 = vrot.slane %v4416_v0, 5  ;;  %v4858_v11 = vrot.slane %v13365_v43, 5  ;;  %v13411_v25 = vpop.f32.mrf.mxu0  ;;  %v4861_v54 = vrot.slane %v4056_v7, 5  ;;  %v11325_v43 = vld [vmem:[#allocation9 + $0x20] sm:$0xff]  ;;  %v5660_v7 = vld [vmem:[#allocation3 + $0x30] sm:$0xf]  ;;  %7157 = vmatpush.bf16.msrb.mxu0 %v11365_v41 }
 0x2be   : > { %v13408_v28 = vrot.slane %v5289_v4, 7  ;;  %v5133_v48 = vadd.f32 %v13157_v37, %v5097_v3  ;;  %v6124_v1 = vunpack.c.l.b16 %v5811_v22  ;;  %v4414_v35 = vrot.slane %v4413_v47, 4  ;;  %6465 = vmatpush.bf16.msrb.mxu2 %v11325_v43 }
 0x2bf   : > { %v3925_v6 = vpop.f32.mrf.mxu2  ;;  %v4859_v62 = vsel %vm12316_vm14, %v10617_v19, %v4858_v11  ;;  %v4860_v18 = vrot.slane %v4858_v11, 4  ;;  %v415_v17 = vsel %vm12005_vm3, 0, %v414_v38  ;;  %v5813_v47 = vshrl.u32 %v5660_v7, 16 }
 0x2c0   : > { %v5294_v27 = vor.u32 %v5292_v49, %v13408_v28  ;;  %v5295_v13 = vrot.slane %v13408_v28, 4  ;;  %v5165_v12 = vmax.f32 %v5133_v48, 0.0  ;;  %v3990_v58 = vadd.f32 %v3925_v6, %v12819_v32  ;;  %416 = vst [vmem:[#allocation3 + $0x54] sm:$0x1] %v415_v17  ;;  %v11374_v48 = vld [vmem:[#allocation9 + $0x128] sm:$0xff] }
 0x2c1   : > { %v6152_v33 = vpack.c.b16 %v6124_v1, %v6123_v50  ;;  %v4419_v52 = vsel %vm12048_vm11, %v4414_v35, %v4418_v30  ;;  %v4862_v29 = vsel %vm12316_vm14, %v4860_v18, %v4861_v54  ;;  %v4915_v40 = vunpack.c.l.b16 %v4859_v62  ;;  %v13429_v50 = vld [vmem:[#allocation2 + $0xcc] sm:$0xf]  ;;  %v462_v1 = vld [vmem:[#allocation3 + $0x5c] sm:$0x1]  ;;  %7838 = vmatpush.bf16.msrb.mxu1 %v11374_v48 }
 0x2c2   : > { %v5569_v55 = vsel %vm12042_vm10, %v5294_v27, %v5568_v36  ;;  %v5197_v44 = vpack.c.bf16 %v5165_v12, %v5165_v12  ;;  %v4672_v0 = vadd.f32 %v13375_v9, %v3990_v58  ;;  %v4490_v4 = vunpack.c.l.b16 %v4419_v52  ;;  %v13427_v32 = vld [vmem:[#allocation3 + $0x34] sm:$0xf]  ;;  %v11279_v12 = vld [vmem:[#allocation2 + $0xc0] sm:$0xff] }
 0x2c3   : > { %v13433_v49 = vadd.f32 %v12839_v16, %v12894_v23  ;;  %5570 = vst [vmem:[#allocation3 + $0x3c] sm:$0xf] %v5569_v55  ;;  %6252 = vmatmul.bf16.gmra.mxu1 %v6152_v33  ;;  %v4916_v3 = vunpack.c.l.b16 %v4862_v29  ;;  %v13435_v19 = vpop.f32.mrf.mxu3  ;;  %v5704_v22 = vld [vmem:[#allocation3 + $0x38] sm:$0x1]  ;;  %v5816_v30 = vshll.u32 %v5660_v7, 16  ;;  %v11324_v54 = vld [vmem:[#allocation9 + $0x18] sm:$0xff] }
 0x2c4   : > { %v5297_v11 = vshrl.u32 %v5197_v44, 16  ;;  %v5300_v9 = vshll.u32 %v5197_v44, 16  ;;  %v5098_v38 = vadd.f32 %v13355_v15, %v4672_v0  ;;  %v4507_v36 = vpack.c.b16 %v4490_v4, %v13402_v26  ;;  %v11340_v62 = vld [vmem:[#allocation9 + $0x98] sm:$0xff]  ;;  %v5572_v26 = vld [vmem:[#allocation3 + $0x44] sm:$0x1]  ;;  %6466 = vmatpush.bf16.msrb.mxu2 %v11324_v54  ;;  %v11323_v54 = vld [vmem:[#allocation9 + $0x10] sm:$0xff] }
 0x2c5   : > { %v4933_v6 = vpack.c.b16 %v4916_v3, %v4915_v40  ;;  %v5815_v16 = vrot.slane %v5813_v47, 4  ;;  %v5818_v23 = vrot.slane %v5816_v30, 5  ;;  %v5822_v35 = vshll.u32 %v13427_v32, 16  ;;  %v11364_v18 = vld [vmem:[#allocation9 + $0xd8] sm:$0xff]  ;;  %v13442_v15 = vpop.f32.mrf.mxu0  ;;  %v13448_v44 = vld [vmem:[#allocation2 + $0xd0] sm:$0xf]  ;;  %6844 = vmatpush.bf16.msrb.mxu3 %v11340_v62 }
 0x2c6   : > { %v5299_v17 = vrot.slane %v5297_v11, 7  ;;  %v5134_v43 = vadd.f32 %v13157_v37, %v5098_v38  ;;  %4651 = vmatmul.bf16.gmra.mxu3 %v4507_v36  ;;  %v5826_v42 = vshrl.u32 %v13427_v32, 16  ;;  %v5832_v41 = vshll.u32 %v5704_v22, 16  ;;  %7158 = vmatpush.bf16.msrb.mxu0 %v11364_v18  ;;  %v4709_v38 = vld [vmem:[#allocation2 + $0xcc] sm:$0xe] }
 0x2c7   : > { %v3927_v27 = vpop.f32.mrf.mxu2  ;;  %5077 = vmatmul.bf16.gmra.mxu0 %v4933_v6  ;;  %v5819_v58 = vor.u32 %v5818_v23, %v5815_v16  ;;  %v5824_v7 = vrot.slane %v5822_v35, 5  ;;  %v463_v33 = vsel %vm12011_vm7, 0, %v462_v1  ;;  %v4421_v52 = vshrl.u32 %v13429_v50, 16  ;;  %v11339_v6 = vld [vmem:[#allocation9 + $0x90] sm:$0xff] }
 0x2c8   : > { %v5302_v37 = vor.u32 %v5300_v9, %v5299_v17  ;;  %v5304_v29 = vrot.slane %v5299_v17, 4  ;;  %v5166_v40 = vmax.f32 %v5134_v43, 0.0  ;;  %v3991_v55 = vadd.f32 %v3927_v27, %v13369_v2  ;;  %464 = vst [vmem:[#allocation3 + $0x5c] sm:$0x1] %v463_v33  ;;  %v13457_v9 = vld [vmem:[#allocation2 + $0xd4] sm:$0x1]  ;;  %6467 = vmatpush.bf16.msrb.mxu2 %v11323_v54 }
 0x2c9   : > { %v5820_v0 = vrot.slane %v5819_v58, 4  ;;  %v5828_v4 = vrot.slane %v5826_v42, 4  ;;  %v5834_v3 = vrot.slane %v5832_v41, 5  ;;  %v4423_v22 = vrot.slane %v4421_v52, 4  ;;  %6845 = vmatpush.bf16.msrb.mxu3 %v11339_v6  ;;  %v11363_v42 = vld [vmem:[#allocation9 + $0xd0] sm:$0xff] }
 0x2ca   : > { %v5303_v47 = vsel %vm12033_vm9, %v5295_v13, %v5302_v37  ;;  %v5573_v30 = vsel %vm12005_vm3, %v5304_v29, %v5572_v26  ;;  %v5198_v11 = vpack.c.bf16 %v5166_v40, %v5166_v40  ;;  %v4673_v2 = vadd.f32 %v13400_v8, %v3991_v55  ;;  %v13472_v41 = vld [vmem:[%s15505_s3] ss:$0 sm:$0xff]  ;;  %7159 = vmatpush.bf16.msrb.mxu0 %v11363_v42  ;;  %v11322_v40 = vld [vmem:[#allocation9 + $0x8] sm:$0xff] }
 0x2cb   : > { %5571 = vst [vmem:[#allocation3 + $0x40] sm:$0xf] %v5303_v47  ;;  %v5825_v36 = vsel %vm12048_vm11, %v5820_v0, %v5824_v7  ;;  %v5829_v48 = vor.u32 %v5828_v4, %v5824_v7  ;;  %v13461_v1 = vpop.f32.mrf.mxu3  ;;  %v4424_v28 = vshll.u32 %v13429_v50, 16  ;;  %v4430_v13 = vshll.u32 %v13448_v44, 16  ;;  %v5575_v58 = vld [vmem:[#allocation3 + $0x48] sm:$0xf] }
 0x2cc   : > { %5574 = vst [vmem:[#allocation3 + $0x44] sm:$0x1] %v5573_v30  ;;  %v5306_v16 = vshrl.u32 %v5198_v11, 16  ;;  %v5309_v23 = vshll.u32 %v5198_v11, 16  ;;  %v5099_v8 = vadd.f32 %v13385_v10, %v4673_v2  ;;  %3969 = vmatmul.bf16.gmra.mxu2 %v11279_v12  ;;  %v6125_v35 = vunpack.c.l.b16 %v5825_v36  ;;  %v11338_v55 = vld [vmem:[#allocation9 + $0x88] sm:$0xff] }
 0x2cd   : > { %v5830_v62 = vrot.slane %v5829_v48, 4  ;;  %v4426_v18 = vrot.slane %v4424_v28, 5  ;;  %v4432_v17 = vrot.slane %v4430_v13, 5  ;;  %v4434_v43 = vshrl.u32 %v13448_v44, 16  ;;  %v13475_v10 = vpop.f32.mrf.mxu0  ;;  %v11362_v11 = vld [vmem:[#allocation9 + $0xc8] sm:$0xff]  ;;  %6468 = vmatpush.bf16.msrb.mxu2 %v11322_v40  ;;  %6846 = vmatpush.bf16.msrb.mxu3 %v11338_v55 }
 0x2ce   : > { %v13467_v50 = vrot.slane %v5306_v16, 7  ;;  %v5135_v26 = vadd.f32 %v13472_v41, %v5099_v8  ;;  %v4440_v27 = vshll.u32 %v13457_v9, 16  ;;  %v10618_v12 = vrot.slane %v4709_v38, 9  ;;  %v417_v13 = vld [vmem:[#allocation3 + $0x60] sm:$0x1]  ;;  %7160 = vmatpush.bf16.msrb.mxu0 %v11362_v11 }
 0x2cf   : > { %v3930_v7 = vpop.f32.mrf.mxu2  ;;  %v5835_v33 = vsel %vm12048_vm11, %v5830_v62, %v5834_v3  ;;  %v4427_v52 = vor.u32 %v4426_v18, %v4423_v22  ;;  %v4436_v37 = vrot.slane %v4434_v43, 4  ;;  %v4865_v29 = vrot.slane %v13448_v44, 5  ;;  %v5662_v8 = vld [vmem:[#allocation3 + $0x3c] sm:$0xf] }
 0x2d0   : > { %v5311_v0 = vor.u32 %v5309_v23, %v13467_v50  ;;  %v5312_v4 = vrot.slane %v13467_v50, 4  ;;  %v5167_v47 = vmax.f32 %v5135_v26, 0.0  ;;  %v3992_v30 = vadd.f32 %v3930_v7, %v12856_v21  ;;  %v11321_v50 = vld [vmem:[#allocation9] sm:$0xff] }
 0x2d1   : > { %v6126_v2 = vunpack.c.l.b16 %v5835_v33  ;;  %v4428_v38 = vrot.slane %v4427_v52, 4  ;;  %v4437_v36 = vor.u32 %v4436_v37, %v4432_v17  ;;  %v4442_v48 = vrot.slane %v4440_v27, 5  ;;  %v11337_v26 = vld [vmem:[#allocation9 + $0x80] sm:$0xff]  ;;  %6469 = vmatpush.bf16.msrb.mxu2 %v11321_v50 }
 0x2d2   : > { %v5576_v44 = vsel %vm12042_vm10, %v5311_v0, %v5575_v58  ;;  %v5199_v3 = vpack.c.bf16 %v5167_v47, %v5167_v47  ;;  %v4674_v22 = vadd.f32 %v13435_v19, %v3992_v30  ;;  %v4866_v28 = vsel %vm12316_vm14, %v10618_v12, %v4865_v29  ;;  %v13494_v42 = vld [vmem:[#allocation3 + $0x40] sm:$0xf]  ;;  %v11361_v58 = vld [vmem:[#allocation9 + $0xc0] sm:$0xff]  ;;  %6847 = vmatpush.bf16.msrb.mxu3 %v11337_v26 }
 0x2d3   : > { %5577 = vst [vmem:[#allocation3 + $0x48] sm:$0xf] %v5576_v44  ;;  %v6153_v54 = vpack.c.b16 %v6126_v2, %v6125_v35  ;;  %v4433_v21 = vsel %vm12048_vm11, %v4428_v38, %v4432_v17  ;;  %v4438_v6 = vrot.slane %v4437_v36, 4  ;;  %v4867_v16 = vrot.slane %v4865_v29, 4  ;;  %v13491_v23 = vpop.f32.mrf.mxu3  ;;  %v5579_v29 = vld [vmem:[#allocation3 + $0x50] sm:$0x1]  ;;  %7161 = vmatpush.bf16.msrb.mxu0 %v11361_v58 }
 0x2d4   : > { %v5314_v62 = vshrl.u32 %v5199_v3, 16  ;;  %v5317_v18 = vshll.u32 %v5199_v3, 16  ;;  %v5100_v43 = vadd.f32 %v13411_v25, %v4674_v22  ;;  %v4491_v19 = vunpack.c.l.b16 %v4433_v21  ;;  %v11280_v36 = vld [vmem:[#allocation2 + $0xcc] sm:$0xff]  ;;  %v13509_v3 = vld [vmem:[#allocation3 + $0x44] sm:$0x1] }
 0x2d5   : > { %6257 = vmatmul.bf16.gmra.mxu1 %v6153_v54  ;;  %v4443_v35 = vsel %vm12048_vm11, %v4438_v6, %v4442_v48  ;;  %v4868_v17 = vrot.slane %v13457_v9, 5  ;;  %v4917_v27 = vunpack.c.l.b16 %v4866_v28  ;;  %v418_v12 = vsel %vm12005_vm3, 0, %v417_v13  ;;  %v13502_v37 = vpop.f32.mrf.mxu0 }
 0x2d6   : > { %v5316_v7 = vrot.slane %v5314_v62, 7  ;;  %v5136_v33 = vadd.f32 %v13472_v41, %v5100_v43  ;;  %v4492_v25 = vunpack.c.l.b16 %v4443_v35  ;;  %419 = vst [vmem:[#allocation3 + $0x60] sm:$0x1] %v418_v12  ;;  %v5837_v52 = vshrl.u32 %v5662_v8, 16 }
 0x2d7   : > { %v3932_v40 = vpop.f32.mrf.mxu2  ;;  %v4869_v9 = vsel %vm12316_vm14, %v4867_v16, %v4868_v17  ;;  %v5840_v55 = vshll.u32 %v5662_v8, 16  ;;  %v5846_v0 = vshll.u32 %v13494_v42, 16  ;;  %v5850_v47 = vshrl.u32 %v13494_v42, 16  ;;  %v465_v16 = vld [vmem:[#allocation3 + $0x68] sm:$0x1]  ;;  %9259 = vmatpush.bf16.msra.mxu0 %v11416_v53 }
 0x2d8   : > { %v5319_v30 = vor.u32 %v5317_v18, %v5316_v7  ;;  %v5321_v11 = vrot.slane %v5316_v7, 4  ;;  %v5168_v2 = vmax.f32 %v5136_v33, 0.0  ;;  %v3993_v38 = vadd.f32 %v3932_v40, %v13373_v59  ;;  %v6551_v8 = vld [vmem:[#allocation3] sm:$0xe]  ;;  %v5582_v40 = vld [vmem:[#allocation3 + $0x54] sm:$0xf] }
 0x2d9   : > { %v4508_v48 = vpack.c.b16 %v4492_v25, %v4491_v19  ;;  %v4918_v44 = vunpack.c.l.b16 %v4869_v9  ;;  %v5839_v22 = vrot.slane %v5837_v52, 4  ;;  %v5842_v28 = vrot.slane %v5840_v55, 5 }
 0x2da   : > { %v5320_v13 = vsel %vm12033_vm9, %v5312_v4, %v5319_v30  ;;  %v5580_v54 = vsel %vm12005_vm3, %v5321_v11, %v5579_v29  ;;  %v5200_v21 = vpack.c.bf16 %v5168_v2, %v5168_v2  ;;  %v4675_v6 = vadd.f32 %v13461_v1, %v3993_v38  ;;  %v13518_v50 = vld [vmem:[#allocation3 + $0x48] sm:$0xf]  ;;  %v11644_v29 = vld [vmem:[#allocation3 + $0x4] sm:$0xf] }
 0x2db   : > { %5578 = vst [vmem:[#allocation3 + $0x4c] sm:$0xf] %v5320_v13  ;;  %4656 = vmatmul.bf16.gmra.mxu3 %v4508_v48  ;;  %v4934_v59 = vpack.c.b16 %v4918_v44, %v4917_v27  ;;  %v5843_v62 = vor.u32 %v5842_v28, %v5839_v22  ;;  %v5848_v18 = vrot.slane %v5846_v0, 5  ;;  %v5852_v43 = vrot.slane %v5850_v47, 4  ;;  %v13516_v19 = vpop.f32.mrf.mxu3  ;;  %v11645_v47 = vld [vmem:[#allocation3 + $0x8] sm:$0x1] }
 0x2dc   : > { %5581 = vst [vmem:[#allocation3 + $0x50] sm:$0x1] %v5580_v54  ;;  %v5323_v4 = vshrl.u32 %v5200_v21, 16  ;;  %v5326_v26 = vshll.u32 %v5200_v21, 16  ;;  %v5101_v35 = vadd.f32 %v13442_v15, %v4675_v6  ;;  %3974 = vmatmul.bf16.gmra.mxu2 %v11280_v36  ;;  %v5856_v1 = vshll.u32 %v13509_v3, 16 }
 0x2dd   : > { %5082 = vmatmul.bf16.gmra.mxu0 %v4934_v59  ;;  %v5844_v17 = vrot.slane %v5843_v62, 4  ;;  %v5853_v12 = vor.u32 %v5852_v43, %v5848_v18  ;;  %v466_v27 = vsel %vm12011_vm7, 0, %v465_v16  ;;  %v10779_v58 = vrot.slane %v6551_v8, 9  ;;  %v13527_v52 = vpop.f32.mrf.mxu0  ;;  %v420_v44 = vld [vmem:[#allocation3 + $0x6c] sm:$0x1] }
 0x2de   : > { %v13524_v7 = vrot.slane %v5323_v4, 7  ;;  %v5137_v33 = vadd.f32 %v13472_v41, %v5101_v35  ;;  %v5858_v25 = vrot.slane %v5856_v1, 5  ;;  %467 = vst [vmem:[#allocation3 + $0x68] sm:$0x1] %v466_v27  ;;  %v6601_v15 = vrot.slane %v11644_v29, 5 }
 0x2df   : > { %v3935_v9 = vpop.f32.mrf.mxu2  ;;  %v5849_v55 = vsel %vm12048_vm11, %v5844_v17, %v5848_v18  ;;  %v5854_v0 = vrot.slane %v5853_v12, 4  ;;  %v6604_v30 = vrot.slane %v11645_v47, 5  ;;  %v5861_v11 = vshrl.u32 %v13518_v50, 16  ;;  %v11373_v12 = vld [vmem:[#allocation9 + $0x120] sm:$0xff] }
 0x2e0   : > { %v5328_v2 = vor.u32 %v5326_v26, %v13524_v7  ;;  %v5329_v38 = vrot.slane %v13524_v7, 4  ;;  %v5169_v36 = vmax.f32 %v5137_v33, 0.0  ;;  %v3994_v48 = vadd.f32 %v3935_v9, %v12882_v24  ;;  %v468_v9 = vld [vmem:[#allocation3 + $0x74] sm:$0x1]  ;;  %7839 = vmatpush.bf16.msrb.mxu1 %v11373_v12 }
 0x2e1   : > { %v5859_v22 = vsel %vm12048_vm11, %v5854_v0, %v5858_v25  ;;  %v6127_v28 = vunpack.c.l.b16 %v5849_v55  ;;  %v6602_v13 = vsel %vm12316_vm14, %v10779_v58, %v6601_v15  ;;  %v6603_v54 = vrot.slane %v6601_v15, 4  ;;  %v5586_v0 = vld [vmem:[#allocation3 + $0x5c] sm:$0x1] }
 0x2e2   : > { %v5583_v21 = vsel %vm12042_vm10, %v5328_v2, %v5582_v40  ;;  %v5201_v6 = vpack.c.bf16 %v5169_v36, %v5169_v36  ;;  %v4676_v16 = vadd.f32 %v13491_v23, %v3994_v48  ;;  %v6128_v8 = vunpack.c.l.b16 %v5859_v22  ;;  %v13542_v59 = vld [vmem:[#allocation3 + $0x4c] sm:$0xf] }
 0x2e3   : > { %5584 = vst [vmem:[#allocation3 + $0x54] sm:$0xf] %v5583_v21  ;;  %v6605_v24 = vsel %vm12316_vm14, %v6603_v54, %v6604_v30  ;;  %v6728_v62 = vunpack.c.l.b16 %v6602_v13  ;;  %v421_v18 = vsel %vm12005_vm3, 0, %v420_v44  ;;  %v13548_v43 = vpop.f32.mrf.mxu3  ;;  %v13550_v4 = vld [vmem:[#allocation3 + $0x50] sm:$0x1]  ;;  %v5863_v26 = vrot.slane %v5861_v11, 4 }
 0x2e4   : > { %v5331_v35 = vshrl.u32 %v5201_v6, 16  ;;  %v5334_v1 = vshll.u32 %v5201_v6, 16  ;;  %v5102_v23 = vadd.f32 %v13475_v10, %v4676_v16  ;;  %v6154_v17 = vpack.c.b16 %v6128_v8, %v6127_v28  ;;  %422 = vst [vmem:[#allocation3 + $0x6c] sm:$0x1] %v421_v18  ;;  %v11646_v10 = vld [vmem:[#allocation3 + $0x10] sm:$0xf] }
 0x2e5   : > { %v6729_v27 = vunpack.c.l.b16 %v6605_v24  ;;  %v5864_v58 = vshll.u32 %v13518_v50, 16  ;;  %v5870_v7 = vshll.u32 %v13542_v59, 16  ;;  %v5874_v33 = vshrl.u32 %v13542_v59, 16  ;;  %v13558_v40 = vpop.f32.mrf.mxu0  ;;  %v11305_v28 = vld [vmem:[#allocation3] sm:$0xff] }
 0x2e6   : > { %v5333_v25 = vrot.slane %v5331_v35, 7  ;;  %v5138_v29 = vadd.f32 %v13472_v41, %v5102_v23  ;;  %6262 = vmatmul.bf16.gmra.mxu1 %v6154_v17  ;;  %v5880_v15 = vshll.u32 %v13550_v4, 16  ;;  %v6608_v55 = vrot.slane %v11646_v10, 5  ;;  %v5589_v10 = vld [vmem:[#allocation3 + $0x60] sm:$0xf] }
 0x2e7   : > { %v3937_v47 = vpop.f32.mrf.mxu2  ;;  %v6760_v30 = vpack.c.b16 %v6729_v27, %v6728_v62  ;;  %v5866_v11 = vrot.slane %v5864_v58, 5  ;;  %v5872_v50 = vrot.slane %v5870_v7, 5  ;;  %v5876_v2 = vrot.slane %v5874_v33, 4  ;;  %v6552_v62 = vld [vmem:[#allocation3 + $0xc] sm:$0xe] }
 0x2e8   : > { %v5336_v36 = vor.u32 %v5334_v1, %v5333_v25  ;;  %v5338_v48 = vrot.slane %v5333_v25, 4  ;;  %v5170_v44 = vmax.f32 %v5138_v29, 0.0  ;;  %v3995_v22 = vadd.f32 %v3937_v47, %v13433_v49  ;;  %v11345_v49 = vld [vmem:[#allocation3 + $0xc] sm:$0xff]  ;;  %v11647_v58 = vld [vmem:[#allocation3 + $0x14] sm:$0x1] }
 0x2e9   : > { %v5867_v13 = vor.u32 %v5866_v11, %v5863_v26  ;;  %v5877_v54 = vor.u32 %v5876_v2, %v5872_v50  ;;  %v469_v21 = vsel %vm12011_vm7, 0, %v468_v9  ;;  %v5882_v35 = vrot.slane %v5880_v15, 5  ;;  %v423_v33 = vld [vmem:[#allocation3 + $0x78] sm:$0x1] }
 0x2ea   : > { %v5337_v6 = vsel %vm12033_vm9, %v5329_v38, %v5336_v36  ;;  %v5587_v16 = vsel %vm12005_vm3, %v5338_v48, %v5586_v0  ;;  %v5202_v8 = vpack.c.bf16 %v5170_v44, %v5170_v44  ;;  %v4677_v24 = vadd.f32 %v13516_v19, %v3995_v22  ;;  %470 = vst [vmem:[#allocation3 + $0x74] sm:$0x1] %v469_v21 }
 0x2eb   : > { %5585 = vst [vmem:[#allocation3 + $0x58] sm:$0xf] %v5337_v6  ;;  %6848 = vmatmul.bf16.vlgmr.msrb.gmra.mxu3 %v6760_v30  ;;  %v5868_v18 = vrot.slane %v5867_v13, 4  ;;  %v5878_v26 = vrot.slane %v5877_v54, 4  ;;  %v13568_v1 = vpop.f32.mrf.mxu3  ;;  %v6610_v17 = vrot.slane %v6608_v55, 4  ;;  %v10780_v27 = vrot.slane %v6552_v62, 9 }
 0x2ec   : > { %5588 = vst [vmem:[#allocation3 + $0x5c] sm:$0x1] %v5587_v16  ;;  %v5340_v23 = vshrl.u32 %v5202_v8, 16  ;;  %v5103_v38 = vadd.f32 %v13502_v37, %v4677_v24  ;;  %6470 = vmatmul.bf16.vlgmr.msrb.gmra.mxu2 %v11305_v28  ;;  %v6611_v7 = vrot.slane %v11647_v58, 5  ;;  %v5343_v29 = vshll.u32 %v5202_v8, 16 }
 0x2ed   : > { %7162 = vmatmul.bf16.vlgmr.msrb.gmra.mxu0 %v11345_v49  ;;  %v5873_v19 = vsel %vm12048_vm11, %v5868_v18, %v5872_v50  ;;  %v5883_v12 = vsel %vm12048_vm11, %v5878_v26, %v5882_v35  ;;  %v13578_v37 = vpop.f32.mrf.mxu0  ;;  %v6609_v30 = vsel %vm12316_vm14, %v10780_v27, %v6608_v55  ;;  %v424_v50 = vsel %vm12005_vm3, 0, %v423_v33  ;;  %v5593_v58 = vld [vmem:[#allocation3 + $0x68] sm:$0x1] }
 0x2ee   : > { %v13575_v25 = vrot.slane %v5340_v23, 7  ;;  %v5139_v15 = vadd.f32 %v13472_v41, %v5103_v38  ;;  %v6130_v9 = vunpack.c.l.b16 %v5883_v12  ;;  %v6129_v47 = vunpack.c.l.b16 %v5873_v19  ;;  %425 = vst [vmem:[#allocation3 + $0x78] sm:$0x1] %v424_v50  ;;  %v471_v38 = vld [vmem:[#allocation3 + $0x80] sm:$0x1] }
 0x2ef   : > { %v3940_v0 = vpop.f32.mrf.mxu2  ;;  %v6612_v11 = vsel %vm12316_vm14, %v6610_v17, %v6611_v7  ;;  %v6615_v44 = vrot.slane %v13314_v51, 5  ;;  %v3682_v21 = vadd.f32 %v12872_v20, %v12923_v34  ;;  %v6730_v6 = vunpack.c.l.b16 %v6609_v30  ;;  %v6553_v30 = vld [vmem:[#allocation3 + $0x18] sm:$0xe] }
 0x2f0   : > { %v5345_v2 = vor.u32 %v5343_v29, %v13575_v25  ;;  %v5171_v36 = vmax.f32 %v5139_v15, 0.0  ;;  %v3996_v48 = vadd.f32 %v3940_v0, %v12918_v60  ;;  %v5346_v22 = vrot.slane %v13575_v25, 4  ;;  %v5666_v60 = vld [vmem:[#allocation3 + $0x54] sm:$0xf] }
 0x2f1   : > { %v6155_v54 = vpack.c.b16 %v6130_v9, %v6129_v47  ;;  %v6731_v16 = vunpack.c.l.b16 %v6612_v11  ;;  %v5885_v26 = vshrl.u32 %v5666_v60, 16  ;;  %v5888_v23 = vshll.u32 %v5666_v60, 16  ;;  %v11306_v60 = vld [vmem:[#allocation3 + $0xc] sm:$0xff] }
 0x2f2   : > { %v5590_v28 = vsel %vm12042_vm10, %v5345_v2, %v5589_v10  ;;  %v5203_v55 = vpack.c.bf16 %v5171_v36, %v5171_v36  ;;  %v4678_v13 = vadd.f32 %v13548_v43, %v3996_v48  ;;  %v13597_v24 = vld [vmem:[#allocation3 + $0x58] sm:$0xf]  ;;  %v6617_v43 = vrot.slane %v6615_v44, 4  ;;  %v11648_v36 = vld [vmem:[#allocation3 + $0x20] sm:$0x1] }
 0x2f3   : > { %5591 = vst [vmem:[#allocation3 + $0x60] sm:$0xf] %v5590_v28  ;;  %v13595_v8 = vpop.f32.mrf.mxu3  ;;  %v13600_v18 = vld [vmem:[#allocation3 + $0x5c] sm:$0x1]  ;;  %v5894_v20 = vshll.u32 %v13597_v24, 16  ;;  %v5898_v34 = vshrl.u32 %v13597_v24, 16  ;;  %v6761_v11 = vpack.c.b16 %v6731_v16, %v6730_v6 }
 0x2f4   : > { %v5348_v62 = vshrl.u32 %v5203_v55, 16  ;;  %v5104_v49 = vadd.f32 %v13527_v52, %v4678_v13  ;;  %v5351_v35 = vshll.u32 %v5203_v55, 16  ;;  %v5887_v12 = vrot.slane %v5885_v26, 4 }
 0x2f5   : > { %v13607_v27 = vpop.f32.mrf.mxu0  ;;  %v472_v52 = vsel %vm12011_vm7, 0, %v471_v38  ;;  %v5890_v33 = vrot.slane %v5888_v23, 5  ;;  %v5896_v25 = vrot.slane %v5894_v20, 5  ;;  %v5900_v29 = vrot.slane %v5898_v34, 4  ;;  %v426_v20 = vld [vmem:[#allocation3 + $0x84] sm:$0x1] }
 0x2f6   : > { %v5350_v17 = vrot.slane %v5348_v62, 7  ;;  %v5140_v19 = vadd.f32 %v13472_v41, %v5104_v49  ;;  %6267 = vmatmul.bf16.gmra.mxu1 %v6155_v54  ;;  %v5904_v15 = vshll.u32 %v13600_v18, 16  ;;  %473 = vst [vmem:[#allocation3 + $0x80] sm:$0x1] %v472_v52  ;;  %v6618_v48 = vrot.slane %v11648_v36, 5  ;;  %v11346_v62 = vld [vmem:[#allocation3 + $0x18] sm:$0xff] }
 0x2f7   : > { %v3942_v7 = vpop.f32.mrf.mxu2  ;;  %v5891_v50 = vor.u32 %v5890_v33, %v5887_v12  ;;  %v5901_v2 = vor.u32 %v5900_v29, %v5896_v25  ;;  %v10781_v26 = vrot.slane %v6553_v30, 9  ;;  %v6622_v51 = vrot.slane %v13363_v57, 5 }
 0x2f8   : > { %v5353_v9 = vor.u32 %v5351_v35, %v5350_v17  ;;  %v5355_v10 = vrot.slane %v5350_v17, 4  ;;  %v5172_v0 = vmax.f32 %v5140_v19, 0.0  ;;  %v3997_v47 = vadd.f32 %v3942_v7, %v3682_v21  ;;  %v5596_v7 = vld [vmem:[#allocation3 + $0x6c] sm:$0xf] }
 0x2f9   : > { %v5892_v21 = vrot.slane %v5891_v50, 4  ;;  %v5902_v49 = vrot.slane %v5901_v2, 4  ;;  %v5906_v6 = vrot.slane %v5904_v15, 5  ;;  %v6619_v23 = vsel %vm12316_vm14, %v6617_v43, %v6618_v48 }
 0x2fa   : > { %v5354_v28 = vsel %vm12033_vm9, %v5346_v22, %v5353_v9  ;;  %v5594_v55 = vsel %vm12005_vm3, %v5355_v10, %v5593_v58  ;;  %v5204_v13 = vpack.c.bf16 %v5172_v0, %v5172_v0  ;;  %v4679_v54 = vadd.f32 %v13568_v1, %v3997_v47  ;;  %v6554_v58 = vld [vmem:[#allocation3 + $0x24] sm:$0xe]  ;;  %v5668_v48 = vld [vmem:[#allocation3 + $0x60] sm:$0xf] }
 0x2fb   : > { %5592 = vst [vmem:[#allocation3 + $0x64] sm:$0xf] %v5354_v28  ;;  %6853 = vmatmul.bf16.gmra.mxu3 %v6761_v11  ;;  %v13617_v16 = vpop.f32.mrf.mxu3  ;;  %v5897_v1 = vsel %vm12048_vm11, %v5892_v21, %v5896_v25  ;;  %v5907_v34 = vsel %vm12048_vm11, %v5902_v49, %v5906_v6  ;;  %v6616_v38 = vsel %vm12316_vm14, %v10781_v26, %v6615_v44  ;;  %v6733_v25 = vunpack.c.l.b16 %v6619_v23  ;;  %v13659_v6 = vpop.f32.mrf.mxu1 }
 0x2fc   : > { %5595 = vst [vmem:[#allocation3 + $0x68] sm:$0x1] %v5594_v55  ;;  %v5357_v35 = vshrl.u32 %v5204_v13, 16  ;;  %v5105_v22 = vadd.f32 %v13558_v40, %v4679_v54  ;;  %6475 = vmatmul.bf16.gmra.mxu2 %v11306_v60  ;;  %v427_v40 = vsel %vm12005_vm3, 0, %v426_v20  ;;  %v5360_v19 = vshll.u32 %v5204_v13, 16  ;;  %v11372_v60 = vld [vmem:[#allocation9 + $0x118] sm:$0xff] }
 0x2fd   : > { %7167 = vmatmul.bf16.gmra.mxu0 %v11346_v62  ;;  %v6132_v12 = vunpack.c.l.b16 %v5907_v34  ;;  %v13635_v52 = vpop.f32.mrf.mxu0  ;;  %428 = vst [vmem:[#allocation3 + $0x84] sm:$0x1] %v427_v40  ;;  %v6131_v9 = vunpack.c.l.b16 %v5897_v1  ;;  %v6732_v10 = vunpack.c.l.b16 %v6616_v38  ;;  %v10782_v0 = vrot.slane %v6554_v58, 9  ;;  %v474_v20 = vld [vmem:[#allocation3 + $0x8c] sm:$0x1]  ;;  %7840 = vmatpush.bf16.msrb.mxu1 %v11372_v60 }
 0x2fe   : > { %v13632_v17 = vrot.slane %v5357_v35, 7  ;;  %v5141_v43 = vadd.f32 %v13472_v41, %v5105_v22  ;;  %v3684_v2 = vadd.f32 %v12911_v46, %v12954_v31  ;;  %v6624_v62 = vrot.slane %v6622_v51, 4  ;;  %v5600_v1 = vld [vmem:[#allocation3 + $0x74] sm:$0x1] }
 0x2ff   : > { %v3945_v33 = vpop.f32.mrf.mxu2  ;;  %v6156_v50 = vpack.c.b16 %v6132_v12, %v6131_v9  ;;  %v6762_v57 = vpack.c.b16 %v6733_v25, %v6732_v10  ;;  %v5912_v31 = vshll.u32 %v5668_v48, 16 }
 0x300   : > { %v5362_v44 = vor.u32 %v5360_v19, %v13632_v17  ;;  %v5173_v29 = vmax.f32 %v5141_v43, 0.0  ;;  %v3998_v15 = vadd.f32 %v3945_v33, %v12943_v61  ;;  %v13651_v61 = vsel %vm12316_vm14, %v10782_v0, %v6622_v51 }
 0x301   : > { %v5363_v46 = vrot.slane %v13632_v17, 4  ;;  %v5914_v38 = vrot.slane %v5912_v31, 5  ;;  %v475_v51 = vsel %vm12011_vm7, 0, %v474_v20  ;;  %v6734_v31 = vunpack.c.l.b16 %v13651_v61 }
 0x302   : > { %v5597_v47 = vsel %vm12042_vm10, %v5362_v44, %v5596_v7  ;;  %v5205_v30 = vpack.c.bf16 %v5173_v29, %v5173_v29  ;;  %v4680_v11 = vadd.f32 %v13595_v8, %v3998_v15  ;;  %v13647_v28 = vld [vmem:[#allocation3 + $0x64] sm:$0xf]  ;;  %v5909_v8 = vshrl.u32 %v5668_v48, 16  ;;  %v13668_v29 = vld [vmem:[#allocation3 + $0x30] sm:$0xe] }
 0x303   : > { %5598 = vst [vmem:[#allocation3 + $0x6c] sm:$0xf] %v5597_v47  ;;  %v13645_v36 = vpop.f32.mrf.mxu3  ;;  %v13654_v54 = vld [vmem:[#allocation3 + $0x68] sm:$0x1]  ;;  %v5918_v21 = vshll.u32 %v13647_v28, 16  ;;  %v5922_v49 = vshrl.u32 %v13647_v28, 16 }
 0x304   : > { %v5365_v55 = vshrl.u32 %v5205_v30, 16  ;;  %v5106_v13 = vadd.f32 %v13578_v37, %v4680_v11  ;;  %v5368_v35 = vshll.u32 %v5205_v30, 16  ;;  %v5911_v37 = vrot.slane %v5909_v8, 4  ;;  %v11307_v47 = vld [vmem:[#allocation3 + $0x18] sm:$0xff]  ;;  %476 = vst [vmem:[#allocation3 + $0x8c] sm:$0x1] %v475_v51 }
 0x305   : > { %v13662_v23 = vpop.f32.mrf.mxu0  ;;  %v5920_v40 = vrot.slane %v5918_v21, 5  ;;  %v5924_v17 = vrot.slane %v5922_v49, 4  ;;  %v5928_v19 = vshll.u32 %v13654_v54, 16  ;;  %v6625_v44 = vrot.slane %v13377_v63, 5  ;;  %v6556_v30 = vld [vmem:[#allocation3 + $0x3c] sm:$0xe] }
 0x306   : > { %v5367_v26 = vrot.slane %v5365_v55, 7  ;;  %v5142_v22 = vadd.f32 %v13472_v41, %v5106_v13  ;;  %6272 = vmatmul.bf16.gmra.mxu1 %v6156_v50  ;;  %v5915_v33 = vor.u32 %v5914_v38, %v5911_v37  ;;  %v11347_v11 = vld [vmem:[#allocation3 + $0x24] sm:$0xff]  ;;  %v10783_v60 = vrot.slane %v13668_v29, 9  ;;  %v5603_v37 = vld [vmem:[#allocation3 + $0x78] sm:$0xf] }
 0x307   : > { %v3947_v34 = vpop.f32.mrf.mxu2  ;;  %v5925_v25 = vor.u32 %v5924_v17, %v5920_v40  ;;  %v5930_v63 = vrot.slane %v5928_v19, 5  ;;  %v6626_v8 = vsel %vm12316_vm14, %v6624_v62, %v6625_v44  ;;  %v10784_v61 = vrot.slane %v6556_v30, 9  ;;  %v15589_v19 = vld [vmem:[#allocation14_spill] sm:$0xff] }
 0x308   : > { %v5370_v43 = vor.u32 %v5368_v35, %v5367_v26  ;;  %v5372_v12 = vrot.slane %v5367_v26, 4  ;;  %v5174_v58 = vmax.f32 %v5142_v22, 0.0  ;;  %v3999_v7 = vadd.f32 %v3947_v34, %v3684_v2  ;;  %v13690_v26 = vpop.f32.mrf.mxu1 }
 0x309   : > { %v5916_v50 = vrot.slane %v5915_v33, 4  ;;  %v5926_v2 = vrot.slane %v5925_v25, 4  ;;  %v6629_v34 = vrot.slane %v13427_v32, 5  ;;  %v6636_v38 = vrot.slane %v13494_v42, 5 }
 0x30a   : > { %v5371_v15 = vsel %vm12033_vm9, %v5363_v46, %v5370_v43  ;;  %v5601_v9 = vsel %vm12005_vm3, %v5372_v12, %v5600_v1  ;;  %v5206_v10 = vpack.c.bf16 %v5174_v58, %v5174_v58  ;;  %v4681_v0 = vadd.f32 %v13617_v16, %v3999_v7  ;;  %v429_v16 = vld [vmem:[#allocation3 + $0x90] sm:$0x1] }
 0x30b   : > { %5599 = vst [vmem:[#allocation3 + $0x70] sm:$0xf] %v5371_v15  ;;  %6858 = vmatmul.bf16.gmra.mxu3 %v6762_v57  ;;  %v13675_v48 = vpop.f32.mrf.mxu3  ;;  %v5921_v57 = vsel %vm12048_vm11, %v5916_v50, %v5920_v40  ;;  %v5931_v46 = vsel %vm12048_vm11, %v5926_v2, %v5930_v63  ;;  %v430_v21 = vsel %vm12005_vm3, 0, %v429_v16  ;;  %v6735_v1 = vunpack.c.l.b16 %v6626_v8 }
 0x30c   : > { %5602 = vst [vmem:[#allocation3 + $0x74] sm:$0x1] %v5601_v9  ;;  %v5374_v55 = vshrl.u32 %v5206_v10, 16  ;;  %v5107_v13 = vadd.f32 %v13607_v27, %v4681_v0  ;;  %6480 = vmatmul.bf16.gmra.mxu2 %v11307_v47  ;;  %v5377_v49 = vshll.u32 %v5206_v10, 16  ;;  %v6134_v35 = vunpack.c.l.b16 %v5931_v46  ;;  %v15590_v9 = vld [vmem:[#allocation16_spill] sm:$0xff]  ;;  %v15591_v10 = vld [vmem:[#allocation15_spill] sm:$0xff] }
 0x30d   : > { %7172 = vmatmul.bf16.gmra.mxu0 %v11347_v11  ;;  %v13693_v22 = vpop.f32.mrf.mxu0  ;;  %431 = vst [vmem:[#allocation3 + $0x90] sm:$0x1] %v430_v21  ;;  %v6133_v12 = vunpack.c.l.b16 %v5921_v57  ;;  %v6637_v7 = vsel %vm12316_vm14, %v10784_v61, %v6636_v38  ;;  %v6638_v33 = vrot.slane %v6636_v38, 4  ;;  %v6639_v25 = vrot.slane %v13509_v3, 5  ;;  %v5670_v11 = vld [vmem:[#allocation3 + $0x6c] sm:$0xf] }
 0x30e   : > { %v13688_v27 = vrot.slane %v5374_v55, 7  ;;  %v5143_v62 = vadd.f32 %v13472_v41, %v5107_v13  ;;  %v3686_v0 = vadd.f32 %v15591_v10, %v15590_v9  ;;  %v6763_v47 = vpack.c.b16 %v6735_v1, %v6734_v31  ;;  %v11308_v10 = vld [vmem:[#allocation3 + $0x24] sm:$0xff] }
 0x30f   : > { %v3950_v20 = vpop.f32.mrf.mxu2  ;;  %v6157_v15 = vpack.c.b16 %v6134_v35, %v6133_v12  ;;  %v6640_v3 = vsel %vm12316_vm14, %v6638_v33, %v6639_v25  ;;  %v6738_v13 = vunpack.c.l.b16 %v6637_v7  ;;  %v5936_v16 = vshll.u32 %v5670_v11, 16 }
 0x310   : > { %v5379_v40 = vor.u32 %v5377_v49, %v13688_v27  ;;  %v5175_v17 = vmax.f32 %v5143_v62, 0.0  ;;  %v4000_v43 = vadd.f32 %v3950_v20, %v15589_v19  ;;  %v5380_v58 = vrot.slane %v13688_v27, 4  ;;  %v477_v62 = vld [vmem:[#allocation3 + $0x98] sm:$0x1]  ;;  %v13723_v19 = vpop.f32.mrf.mxu1 }
 0x311   : > { %v6739_v35 = vunpack.c.l.b16 %v6640_v3  ;;  %v5938_v20 = vrot.slane %v5936_v16, 5  ;;  %v478_v25 = vsel %vm12011_vm7, 0, %v477_v62  ;;  %v6643_v32 = vrot.slane %v13542_v59, 5  ;;  %v5610_v62 = vld [vmem:[#allocation3 + $0x84] sm:$0xf] }
 0x312   : > { %v5604_v51 = vsel %vm12042_vm10, %v5379_v40, %v5603_v37  ;;  %v5207_v44 = vpack.c.bf16 %v5175_v17, %v5175_v17  ;;  %v4682_v42 = vadd.f32 %v13645_v36, %v4000_v43  ;;  %v13710_v50 = vld [vmem:[#allocation3 + $0x70] sm:$0xf]  ;;  %v5933_v36 = vshrl.u32 %v5670_v11, 16  ;;  %479 = vst [vmem:[#allocation3 + $0x98] sm:$0x1] %v478_v25 }
 0x313   : > { %5605 = vst [vmem:[#allocation3 + $0x78] sm:$0xf] %v5604_v51  ;;  %v13708_v30 = vpop.f32.mrf.mxu3  ;;  %v13715_v55 = vld [vmem:[#allocation3 + $0x74] sm:$0x1]  ;;  %v5942_v57 = vshll.u32 %v13710_v50, 16  ;;  %v5946_v46 = vshrl.u32 %v13710_v50, 16  ;;  %v13727_v51 = vpack.c.b16 %v6739_v35, %v6738_v13 }
 0x314   : > { %v5382_v2 = vshrl.u32 %v5207_v44, 16  ;;  %v5108_v63 = vadd.f32 %v13635_v52, %v4682_v42  ;;  %v5385_v8 = vshll.u32 %v5207_v44, 16  ;;  %v5935_v27 = vrot.slane %v5933_v36, 4  ;;  %v5607_v52 = vld [vmem:[#allocation3 + $0x80] sm:$0x1]  ;;  %v11348_v11 = vld [vmem:[#allocation3 + $0x30] sm:$0xff] }
 0x315   : > { %v13720_v49 = vpop.f32.mrf.mxu0  ;;  %v5944_v1 = vrot.slane %v5942_v57, 5  ;;  %v5948_v61 = vrot.slane %v5946_v46, 4  ;;  %v5952_v38 = vshll.u32 %v13715_v55, 16  ;;  %v432_v57 = vld [vmem:[#allocation3 + $0x9c] sm:$0x1] }
 0x316   : > { %v5384_v31 = vrot.slane %v5382_v2, 7  ;;  %v5144_v21 = vadd.f32 %v13472_v41, %v5108_v63  ;;  %6277 = vmatmul.bf16.gmra.mxu1 %v6157_v15  ;;  %v5939_v7 = vor.u32 %v5938_v20, %v5935_v27  ;;  %v6645_v20 = vrot.slane %v6643_v32, 4 }
 0x317   : > { %v3952_v37 = vpop.f32.mrf.mxu2  ;;  %v5949_v33 = vor.u32 %v5948_v61, %v5944_v1  ;;  %v5954_v63 = vrot.slane %v5952_v38, 5 }
 0x318   : > { %v5387_v40 = vor.u32 %v5385_v8, %v5384_v31  ;;  %v5389_v17 = vrot.slane %v5384_v31, 4  ;;  %v5176_v43 = vmax.f32 %v5144_v21, 0.0  ;;  %v4001_v12 = vadd.f32 %v3952_v37, %v3686_v0  ;;  %v6557_v0 = vld [vmem:[#allocation3 + $0x48] sm:$0xe] }
 0x319   : > { %v5940_v3 = vrot.slane %v5939_v7, 4  ;;  %v5950_v2 = vrot.slane %v5949_v33, 4  ;;  %v10785_v37 = vrot.slane %v6557_v0, 9 }
 0x31a   : > { %v5388_v44 = vsel %vm12033_vm9, %v5380_v58, %v5387_v40  ;;  %v5608_v42 = vsel %vm12005_vm3, %v5389_v17, %v5607_v52  ;;  %v5208_v15 = vpack.c.bf16 %v5176_v43, %v5176_v43  ;;  %v4683_v9 = vadd.f32 %v13675_v48, %v4001_v12  ;;  %v15592_v40 = vld [vmem:[#allocation17_spill] sm:$0xff] }
 0x31b   : > { %5606 = vst [vmem:[#allocation3 + $0x7c] sm:$0xf] %v5388_v44  ;;  %6863 = vmatmul.bf16.gmra.mxu3 %v6763_v47  ;;  %v13734_v36 = vpop.f32.mrf.mxu3  ;;  %v6631_v58 = vrot.slane %v6629_v34, 4  ;;  %v13745_v48 = vsel %vm12316_vm14, %v10783_v60, %v6629_v34  ;;  %v11649_v47 = vld [vmem:[#allocation3 + $0x38] sm:$0x1]  ;;  %v5945_v46 = vsel %vm12048_vm11, %v5940_v3, %v5944_v1  ;;  %v5955_v31 = vsel %vm12048_vm11, %v5950_v2, %v5954_v63 }
 0x31c   : > { %5609 = vst [vmem:[#allocation3 + $0x80] sm:$0x1] %v5608_v42  ;;  %v5391_v13 = vshrl.u32 %v5208_v15, 16  ;;  %v5109_v8 = vadd.f32 %v13662_v23, %v4683_v9  ;;  %6485 = vmatmul.bf16.gmra.mxu2 %v11308_v10  ;;  %v6632_v16 = vrot.slane %v11649_v47, 5  ;;  %v433_v23 = vsel %vm12005_vm3, 0, %v432_v57  ;;  %v15593_v9 = vld [vmem:[#allocation20_spill] sm:$0xff] }
 0x31d   : > { %7177 = vmatmul.bf16.gmra.mxu0 %v11348_v11  ;;  %v5394_v21 = vshll.u32 %v5208_v15, 16  ;;  %v6136_v34 = vunpack.c.l.b16 %v5955_v31  ;;  %v13757_v27 = vpop.f32.mrf.mxu0  ;;  %434 = vst [vmem:[#allocation3 + $0x9c] sm:$0x1] %v433_v23  ;;  %v6135_v52 = vunpack.c.l.b16 %v5945_v46  ;;  %v6646_v1 = vrot.slane %v13550_v4, 5  ;;  %v15594_v10 = vld [vmem:[#allocation18_spill] sm:$0xff] }
 0x31e   : > { %v13754_v29 = vrot.slane %v5391_v13, 7  ;;  %v5145_v60 = vadd.f32 %v13472_v41, %v5109_v8  ;;  %v13761_v59 = vpop.f32.mrf.mxu1  ;;  %v6633_v43 = vsel %vm12316_vm14, %v6631_v58, %v6632_v16  ;;  %v6644_v33 = vsel %vm12316_vm14, %v10785_v37, %v6643_v32  ;;  %v5672_v63 = vld [vmem:[#allocation3 + $0x78] sm:$0xf] }
 0x31f   : > { %v3955_v35 = vpop.f32.mrf.mxu2  ;;  %v6158_v7 = vpack.c.b16 %v6136_v34, %v6135_v52  ;;  %v6647_v25 = vsel %vm12316_vm14, %v6645_v20, %v6646_v1  ;;  %v3688_v11 = vadd.f32 %v15594_v10, %v15593_v9  ;;  %v6736_v0 = vunpack.c.l.b16 %v13745_v48  ;;  %v11309_v9 = vld [vmem:[#allocation3 + $0x30] sm:$0xff] }
 0x320   : > { %v5396_v61 = vor.u32 %v5394_v21, %v13754_v29  ;;  %v5177_v38 = vmax.f32 %v5145_v60, 0.0  ;;  %v4002_v17 = vadd.f32 %v3955_v35, %v15592_v40  ;;  %v5397_v12 = vrot.slane %v13754_v29, 4  ;;  %v480_v60 = vld [vmem:[#allocation3 + $0xa4] sm:$0x1]  ;;  %v6558_v10 = vld [vmem:[#allocation3 + $0x54] sm:$0xe] }
 0x321   : > { %v6741_v15 = vunpack.c.l.b16 %v6647_v25  ;;  %v6737_v3 = vunpack.c.l.b16 %v6633_v43  ;;  %v5957_v16 = vshrl.u32 %v5672_v63, 16  ;;  %v6740_v57 = vunpack.c.l.b16 %v6644_v33 }
 0x322   : > { %v5611_v4 = vsel %vm12042_vm10, %v5396_v61, %v5610_v62  ;;  %v5209_v44 = vpack.c.bf16 %v5177_v38, %v5177_v38  ;;  %v4684_v42 = vadd.f32 %v13708_v30, %v4002_v17  ;;  %v13779_v58 = vld [vmem:[#allocation3 + $0x7c] sm:$0xf]  ;;  %v11371_v30 = vld [vmem:[#allocation9 + $0x110] sm:$0xff]  ;;  %v5960_v31 = vshll.u32 %v5672_v63, 16 }
 0x323   : > { %5612 = vst [vmem:[#allocation3 + $0x84] sm:$0xf] %v5611_v4  ;;  %v13782_v47 = vld [vmem:[#allocation3 + $0x80] sm:$0x1]  ;;  %v5966_v23 = vshll.u32 %v13779_v58, 16  ;;  %v5970_v48 = vshrl.u32 %v13779_v58, 16  ;;  %v13787_v34 = vpack.c.b16 %v6741_v15, %v6740_v57  ;;  %7841 = vmatpush.bf16.msrb.mxu1 %v11371_v30  ;;  %v6764_v43 = vpack.c.b16 %v6737_v3, %v6736_v0 }
 0x324   : > { %v13777_v2 = vpop.f32.mrf.mxu3  ;;  %v5399_v13 = vshrl.u32 %v5209_v44, 16  ;;  %v5110_v8 = vadd.f32 %v13693_v22, %v4684_v42  ;;  %v5402_v46 = vshll.u32 %v5209_v44, 16  ;;  %v5959_v21 = vrot.slane %v5957_v16, 4  ;;  %v5614_v22 = vld [vmem:[#allocation3 + $0x8c] sm:$0x1] }
 0x325   : > { %v5962_v35 = vrot.slane %v5960_v31, 5  ;;  %v5968_v52 = vrot.slane %v5966_v23, 5  ;;  %v5972_v37 = vrot.slane %v5970_v48, 4  ;;  %v5976_v20 = vshll.u32 %v13782_v47, 16  ;;  %v435_v16 = vld [vmem:[#allocation3 + $0xa8] sm:$0x1] }
 0x326   : > { %v5401_v32 = vrot.slane %v5399_v13, 7  ;;  %v5146_v29 = vadd.f32 %v13472_v41, %v5110_v8  ;;  %6282 = vmatmul.bf16.gmra.mxu1 %v6158_v7  ;;  %v13790_v40 = vpop.f32.mrf.mxu1  ;;  %v13792_v41 = vpop.f32.mrf.mxu0  ;;  %v481_v25 = vsel %vm12011_vm7, 0, %v480_v60  ;;  %v436_v57 = vsel %vm12005_vm3, 0, %v435_v16 }
 0x327   : > { %v3957_v62 = vpop.f32.mrf.mxu2  ;;  %v5963_v7 = vor.u32 %v5962_v35, %v5959_v21  ;;  %v5973_v33 = vor.u32 %v5972_v37, %v5968_v52  ;;  %482 = vst [vmem:[#allocation3 + $0xa4] sm:$0x1] %v481_v25  ;;  %v5978_v63 = vrot.slane %v5976_v20, 5  ;;  %v6653_v35 = vrot.slane %v13600_v18, 5  ;;  %v15595_v20 = vld [vmem:[#allocation19_spill] sm:$0xff] }
 0x328   : > { %v5404_v1 = vor.u32 %v5402_v46, %v5401_v32  ;;  %v5406_v61 = vrot.slane %v5401_v32, 4  ;;  %v5178_v38 = vmax.f32 %v5146_v29, 0.0  ;;  %v4003_v17 = vadd.f32 %v3957_v62, %v3688_v11  ;;  %v11349_v11 = vld [vmem:[#allocation3 + $0x3c] sm:$0xff]  ;;  %437 = vst [vmem:[#allocation3 + $0xa8] sm:$0x1] %v436_v57 }
 0x329   : > { %v5964_v0 = vrot.slane %v5963_v7, 4  ;;  %v5974_v3 = vrot.slane %v5973_v33, 4  ;;  %v6650_v46 = vrot.slane %v13597_v24, 5  ;;  %v5617_v29 = vld [vmem:[#allocation3 + $0x90] sm:$0xf] }
 0x32a   : > { %v5405_v4 = vsel %vm12033_vm9, %v5397_v12, %v5404_v1  ;;  %v5615_v44 = vsel %vm12005_vm3, %v5406_v61, %v5614_v22  ;;  %v5210_v42 = vpack.c.bf16 %v5178_v38, %v5178_v38  ;;  %v4685_v15 = vadd.f32 %v13734_v36, %v4003_v17 }
 0x32b   : > { %5613 = vst [vmem:[#allocation3 + $0x88] sm:$0xf] %v5405_v4  ;;  %6868 = vmatmul.bf16.gmra.mxu3 %v6764_v43  ;;  %v5969_v36 = vsel %vm12048_vm11, %v5964_v0, %v5968_v52  ;;  %v5979_v30 = vsel %vm12048_vm11, %v5974_v3, %v5978_v63  ;;  %v10786_v22 = vrot.slane %v6558_v10, 9  ;;  %v6652_v62 = vrot.slane %v6650_v46, 4 }
 0x32c   : > { %5616 = vst [vmem:[#allocation3 + $0x8c] sm:$0x1] %v5615_v44  ;;  %v5408_v13 = vshrl.u32 %v5210_v42, 16  ;;  %v5111_v8 = vadd.f32 %v13720_v49, %v4685_v15  ;;  %6490 = vmatmul.bf16.gmra.mxu2 %v11309_v9  ;;  %v13802_v12 = vpop.f32.mrf.mxu3  ;;  %v5411_v23 = vshll.u32 %v5210_v42, 16  ;;  %v13814_v49 = vld [vmem:[%s15505_s3] ss:$0 sm:$0xff]  ;;  %v6138_v32 = vunpack.c.l.b16 %v5979_v30 }
 0x32d   : > { %7182 = vmatmul.bf16.gmra.mxu0 %v11349_v11  ;;  %v6137_v60 = vunpack.c.l.b16 %v5969_v36  ;;  %v6651_v17 = vsel %vm12316_vm14, %v10786_v22, %v6650_v46  ;;  %v6654_v43 = vsel %vm12316_vm14, %v6652_v62, %v6653_v35  ;;  %v15596_v44 = vld [vmem:[#allocation22_spill] sm:$0xff]  ;;  %v15597_v42 = vld [vmem:[#allocation21_spill] sm:$0xff]  ;;  %v5674_v9 = vld [vmem:[#allocation3 + $0x84] sm:$0xf] }
 0x32e   : > { %v5410_v31 = vrot.slane %v5408_v13, 7  ;;  %v5147_v48 = vadd.f32 %v13814_v49, %v5111_v8  ;;  %v13818_v37 = vpop.f32.mrf.mxu1  ;;  %v6743_v4 = vunpack.c.l.b16 %v6654_v43  ;;  %v3690_v15 = vadd.f32 %v15597_v42, %v15596_v44  ;;  %v6559_v44 = vld [vmem:[#allocation3 + $0x60] sm:$0xe]  ;;  %v11350_v42 = vld [vmem:[#allocation3 + $0x48] sm:$0xff] }
 0x32f   : > { %v3960_v21 = vpop.f32.mrf.mxu2  ;;  %v6159_v38 = vpack.c.b16 %v6138_v32, %v6137_v60  ;;  %v5981_v63 = vshrl.u32 %v5674_v9, 16  ;;  %v6742_v13 = vunpack.c.l.b16 %v6651_v17  ;;  %v5984_v16 = vshll.u32 %v5674_v9, 16 }
 0x330   : > { %v5413_v52 = vor.u32 %v5411_v23, %v5410_v31  ;;  %v5179_v24 = vmax.f32 %v5147_v48, 0.0  ;;  %v4004_v1 = vadd.f32 %v3960_v21, %v15595_v20  ;;  %v5414_v61 = vrot.slane %v5410_v31, 4  ;;  %v13828_v25 = vpop.f32.mrf.mxu0  ;;  %v483_v23 = vld [vmem:[#allocation3 + $0xb0] sm:$0x1] }
 0x331   : > { %v5983_v31 = vrot.slane %v5981_v63, 4  ;;  %v13842_v48 = vpack.c.b16 %v6743_v4, %v6742_v13  ;;  %v484_v17 = vsel %vm12011_vm7, 0, %v483_v23  ;;  %v11310_v4 = vld [vmem:[#allocation3 + $0x3c] sm:$0xff]  ;;  %v438_v13 = vld [vmem:[#allocation3 + $0xb4] sm:$0x1] }
 0x332   : > { %v5618_v7 = vsel %vm12042_vm10, %v5413_v52, %v5617_v29  ;;  %v5211_v33 = vpack.c.bf16 %v5179_v24, %v5179_v24  ;;  %v4686_v18 = vadd.f32 %v13777_v2, %v4004_v1  ;;  %v13832_v10 = vld [vmem:[#allocation3 + $0x88] sm:$0xf]  ;;  %v5986_v29 = vrot.slane %v5984_v16, 5  ;;  %485 = vst [vmem:[#allocation3 + $0xb0] sm:$0x1] %v484_v17 }
 0x333   : > { %5619 = vst [vmem:[#allocation3 + $0x90] sm:$0xf] %v5618_v7  ;;  %v13835_v3 = vld [vmem:[#allocation3 + $0x8c] sm:$0x1]  ;;  %v5990_v2 = vshll.u32 %v13832_v10, 16  ;;  %v5994_v36 = vshrl.u32 %v13832_v10, 16 }
 0x334   : > { %v5416_v11 = vshrl.u32 %v5211_v33, 16  ;;  %v5112_v0 = vadd.f32 %v13757_v27, %v4686_v18  ;;  %v5419_v8 = vshll.u32 %v5211_v33, 16  ;;  %v13840_v46 = vpop.f32.mrf.mxu3  ;;  %v5621_v27 = vld [vmem:[#allocation3 + $0x98] sm:$0x1]  ;;  %v6000_v22 = vshll.u32 %v13835_v3, 16 }
 0x335   : > { %v5992_v21 = vrot.slane %v5990_v2, 5  ;;  %v5996_v60 = vrot.slane %v5994_v36, 4  ;;  %v5987_v1 = vor.u32 %v5986_v29, %v5983_v31  ;;  %v6657_v16 = vrot.slane %v13647_v28, 5 }
 0x336   : > { %v5418_v30 = vrot.slane %v5416_v11, 7  ;;  %v5148_v57 = vadd.f32 %v13814_v49, %v5112_v0  ;;  %6287 = vmatmul.bf16.gmra.mxu1 %v6159_v38  ;;  %v13845_v24 = vpop.f32.mrf.mxu1  ;;  %v6002_v11 = vrot.slane %v6000_v22, 5  ;;  %v6660_v29 = vrot.slane %v13654_v54, 5 }
 0x337   : > { %v3962_v32 = vpop.f32.mrf.mxu2  ;;  %v5997_v38 = vor.u32 %v5996_v60, %v5992_v21 }
 0x338   : > { %v5421_v62 = vor.u32 %v5419_v8, %v5418_v30  ;;  %v5423_v35 = vrot.slane %v5418_v30, 4  ;;  %v5180_v52 = vmax.f32 %v5148_v57, 0.0  ;;  %v4005_v20 = vadd.f32 %v3962_v32, %v3690_v15  ;;  %v13856_v63 = vpop.f32.mrf.mxu0  ;;  %v5624_v57 = vld [vmem:[#allocation3 + $0x9c] sm:$0xf] }
 0x339   : > { %v5988_v15 = vrot.slane %v5987_v1, 4  ;;  %v5998_v9 = vrot.slane %v5997_v38, 4  ;;  %v6659_v32 = vrot.slane %v6657_v16, 4 }
 0x33a   : > { %v5422_v43 = vsel %vm12033_vm9, %v5414_v61, %v5421_v62  ;;  %v5622_v7 = vsel %vm12005_vm3, %v5423_v35, %v5621_v27  ;;  %v5212_v33 = vpack.c.bf16 %v5180_v52, %v5180_v52  ;;  %v4687_v18 = vadd.f32 %v13802_v12, %v4005_v20  ;;  %v15598_v62 = vld [vmem:[#allocation24_spill] sm:$0xff] }
 0x33b   : > { %5620 = vst [vmem:[#allocation3 + $0x94] sm:$0xf] %v5422_v43  ;;  %6873 = vmatmul.bf16.gmra.mxu3 %v13727_v51  ;;  %v5993_v12 = vsel %vm12048_vm11, %v5988_v15, %v5992_v21  ;;  %v6003_v8 = vsel %vm12048_vm11, %v5998_v9, %v6002_v11  ;;  %v439_v51 = vsel %vm12005_vm3, 0, %v438_v13  ;;  %v10787_v27 = vrot.slane %v6559_v44, 9  ;;  %v5676_v44 = vld [vmem:[#allocation3 + $0x90] sm:$0xf] }
 0x33c   : > { %5623 = vst [vmem:[#allocation3 + $0x98] sm:$0x1] %v5622_v7  ;;  %v5425_v0 = vshrl.u32 %v5212_v33, 16  ;;  %v5113_v61 = vadd.f32 %v13792_v41, %v4687_v18  ;;  %6495 = vmatmul.bf16.gmra.mxu2 %v11310_v4  ;;  %v5428_v36 = vshll.u32 %v5212_v33, 16  ;;  %v6140_v30 = vunpack.c.l.b16 %v6003_v8  ;;  %v4649_v28 = vpop.f32.mrf.mxu3  ;;  %v15599_v33 = vld [vmem:[#allocation25_spill] sm:$0xff]  ;;  %v15600_v18 = vld [vmem:[#allocation23_spill] sm:$0xff] }
 0x33d   : > { %7187 = vmatmul.bf16.gmra.mxu0 %v11350_v42  ;;  %440 = vst [vmem:[#allocation3 + $0xb4] sm:$0x1] %v439_v51  ;;  %v6139_v23 = vunpack.c.l.b16 %v5993_v12  ;;  %v6658_v1 = vsel %vm12316_vm14, %v10787_v27, %v6657_v16  ;;  %v6661_v38 = vsel %vm12316_vm14, %v6659_v32, %v6660_v29  ;;  %v3692_v4 = vadd.f32 %v15600_v18, %v15599_v33  ;;  %v11311_v18 = vld [vmem:[#allocation3 + $0x48] sm:$0xff] }
 0x33e   : > { %v5427_v2 = vrot.slane %v5425_v0, 7  ;;  %v5149_v41 = vadd.f32 %v13814_v49, %v5113_v61  ;;  %v6745_v7 = vunpack.c.l.b16 %v6661_v38  ;;  %v6005_v0 = vshrl.u32 %v5676_v44, 16  ;;  %v11370_v61 = vld [vmem:[#allocation9 + $0x108] sm:$0xff] }
 0x33f   : > { %v3965_v31 = vpop.f32.mrf.mxu2  ;;  %v6160_v20 = vpack.c.b16 %v6140_v30, %v6139_v23  ;;  %v6744_v13 = vunpack.c.l.b16 %v6658_v1  ;;  %v6008_v8 = vshll.u32 %v5676_v44, 16  ;;  %v486_v30 = vld [vmem:[#allocation3 + $0xbc] sm:$0x1]  ;;  %7842 = vmatpush.bf16.msrb.mxu1 %v11370_v61 }
 0x340   : > { %v5430_v21 = vor.u32 %v5428_v36, %v5427_v2  ;;  %v5181_v60 = vmax.f32 %v5149_v41, 0.0  ;;  %v13867_v22 = vpop.f32.mrf.mxu1  ;;  %v4006_v35 = vadd.f32 %v3965_v31, %v15598_v62  ;;  %v5431_v52 = vrot.slane %v5427_v2, 4 }
 0x341   : > { %v6007_v41 = vrot.slane %v6005_v0, 4  ;;  %v6010_v23 = vrot.slane %v6008_v8, 5 }
 0x342   : > { %v5625_v17 = vsel %vm12042_vm10, %v5430_v21, %v5624_v57  ;;  %v5213_v43 = vpack.c.bf16 %v5181_v60, %v5181_v60  ;;  %v4688_v54 = vadd.f32 %v13840_v46, %v4006_v35  ;;  %v13879_v42 = vld [vmem:[#allocation3 + $0x94] sm:$0xf]  ;;  %v5628_v57 = vld [vmem:[#allocation3 + $0xa4] sm:$0x1] }
 0x343   : > { %5626 = vst [vmem:[#allocation3 + $0x9c] sm:$0xf] %v5625_v17  ;;  %v13882_v11 = vld [vmem:[#allocation3 + $0x98] sm:$0x1]  ;;  %v6014_v46 = vshll.u32 %v13879_v42, 16  ;;  %v6018_v51 = vshrl.u32 %v13879_v42, 16  ;;  %v6011_v1 = vor.u32 %v6010_v23, %v6007_v41 }
 0x344   : > { %v5433_v15 = vshrl.u32 %v5213_v43, 16  ;;  %v5114_v9 = vadd.f32 %v13828_v25, %v4688_v54  ;;  %v5436_v12 = vshll.u32 %v5213_v43, 16  ;;  %v13887_v36 = vpop.f32.mrf.mxu0  ;;  %v13889_v25 = vpack.c.b16 %v6745_v7, %v6744_v13 }
 0x345   : > { %v6016_v27 = vrot.slane %v6014_v46, 5  ;;  %v6020_v32 = vrot.slane %v6018_v51, 4  ;;  %v6024_v29 = vshll.u32 %v13882_v11, 16  ;;  %v487_v17 = vsel %vm12011_vm7, 0, %v486_v30 }
 0x346   : > { %v5435_v16 = vrot.slane %v5433_v15, 7  ;;  %v5150_v2 = vadd.f32 %v13814_v49, %v5114_v9  ;;  %6292 = vmatmul.bf16.gmra.mxu1 %v6160_v20  ;;  %488 = vst [vmem:[#allocation3 + $0xbc] sm:$0x1] %v487_v17  ;;  %v6560_v15 = vld [vmem:[#allocation3 + $0x6c] sm:$0xe]  ;;  %v6012_v9 = vrot.slane %v6011_v1, 4 }
 0x347   : > { %v3967_v31 = vpop.f32.mrf.mxu2  ;;  %v6021_v38 = vor.u32 %v6020_v32, %v6016_v27  ;;  %v6026_v61 = vrot.slane %v6024_v29, 5  ;;  %v6664_v46 = vrot.slane %v13710_v50, 5 }
 0x348   : > { %v5438_v21 = vor.u32 %v5436_v12, %v5435_v16  ;;  %v5440_v60 = vrot.slane %v5435_v16, 4  ;;  %v5182_v62 = vmax.f32 %v5150_v2, 0.0  ;;  %v13892_v35 = vpop.f32.mrf.mxu1  ;;  %v4007_v20 = vadd.f32 %v3967_v31, %v3692_v4  ;;  %v11351_v4 = vld [vmem:[#allocation3 + $0x54] sm:$0xff]  ;;  %v441_v12 = vld [vmem:[#allocation3 + $0xc0] sm:$0x1] }
 0x349   : > { %v4652_v44 = vpop.f32.mrf.mxu3  ;;  %v6022_v0 = vrot.slane %v6021_v38, 4  ;;  %v10788_v31 = vrot.slane %v6560_v15, 9  ;;  %v6666_v23 = vrot.slane %v6664_v46, 4 }
 0x34a   : > { %v5439_v43 = vsel %vm12033_vm9, %v5431_v52, %v5438_v21  ;;  %v5629_v54 = vsel %vm12005_vm3, %v5440_v60, %v5628_v57  ;;  %v5214_v7 = vpack.c.bf16 %v5182_v62, %v5182_v62  ;;  %v4689_v33 = vadd.f32 %v4649_v28, %v4007_v20  ;;  %v15601_v21 = vld [vmem:[#allocation26_spill] sm:$0xff] }
 0x34b   : > { %5627 = vst [vmem:[#allocation3 + $0xa0] sm:$0xf] %v5439_v43  ;;  %6878 = vmatmul.bf16.gmra.mxu3 %v13787_v34  ;;  %v6017_v28 = vsel %vm12048_vm11, %v6012_v9, %v6016_v27  ;;  %v6027_v8 = vsel %vm12048_vm11, %v6022_v0, %v6026_v61  ;;  %v442_v34 = vsel %vm12005_vm3, 0, %v441_v12  ;;  %v6667_v27 = vrot.slane %v13715_v55, 5 }
 0x34c   : > { %5630 = vst [vmem:[#allocation3 + $0xa4] sm:$0x1] %v5629_v54  ;;  %v5442_v13 = vshrl.u32 %v5214_v7, 16  ;;  %v5115_v52 = vadd.f32 %v13856_v63, %v4689_v33  ;;  %6500 = vmatmul.bf16.gmra.mxu2 %v11311_v18  ;;  %v5445_v16 = vshll.u32 %v5214_v7, 16  ;;  %v6142_v41 = vunpack.c.l.b16 %v6027_v8  ;;  %v5631_v63 = vld [vmem:[#allocation3 + $0xa8] sm:$0xf]  ;;  %v5080_v62 = vpop.f32.mrf.mxu0 }
 0x34d   : > { %7192 = vmatmul.bf16.gmra.mxu0 %v11351_v4  ;;  %443 = vst [vmem:[#allocation3 + $0xc0] sm:$0x1] %v442_v34  ;;  %v6141_v57 = vunpack.c.l.b16 %v6017_v28  ;;  %v6665_v1 = vsel %vm12316_vm14, %v10788_v31, %v6664_v46  ;;  %v6668_v38 = vsel %vm12316_vm14, %v6666_v23, %v6667_v27  ;;  %v15602_v33 = vld [vmem:[#allocation28_spill] sm:$0xff]  ;;  %v15603_v18 = vld [vmem:[#allocation27_spill] sm:$0xff]  ;;  %v5678_v4 = vld [vmem:[#allocation3 + $0x9c] sm:$0xf] }
 0x34e   : > { %v5444_v51 = vrot.slane %v5442_v13, 7  ;;  %v5151_v2 = vadd.f32 %v13814_v49, %v5115_v52  ;;  %v6747_v7 = vunpack.c.l.b16 %v6668_v38  ;;  %v3694_v15 = vadd.f32 %v15603_v18, %v15602_v33 }
 0x34f   : > { %v3970_v30 = vpop.f32.mrf.mxu2  ;;  %v6161_v50 = vpack.c.b16 %v6142_v41, %v6141_v57  ;;  %v6029_v12 = vshrl.u32 %v5678_v4, 16  ;;  %v6746_v28 = vunpack.c.l.b16 %v6665_v1  ;;  %v6032_v34 = vshll.u32 %v5678_v4, 16  ;;  %v489_v41 = vld [vmem:[#allocation3 + $0xc8] sm:$0x1]  ;;  %v11312_v4 = vld [vmem:[#allocation3 + $0x54] sm:$0xff] }
 0x350   : > { %v5447_v32 = vor.u32 %v5445_v16, %v5444_v51  ;;  %v5183_v29 = vmax.f32 %v5151_v2, 0.0  ;;  %v4008_v60 = vadd.f32 %v3970_v30, %v15601_v21  ;;  %v5448_v20 = vrot.slane %v5444_v51, 4 }
 0x351   : > { %v4654_v13 = vpop.f32.mrf.mxu3  ;;  %v6031_v2 = vrot.slane %v6029_v12, 4  ;;  %v6034_v57 = vrot.slane %v6032_v34, 5  ;;  %v11369_v34 = vld [vmem:[#allocation9 + $0x100] sm:$0xff] }
 0x352   : > { %v5632_v17 = vsel %vm12042_vm10, %v5447_v32, %v5631_v63  ;;  %v5215_v43 = vpack.c.bf16 %v5183_v29, %v5183_v29  ;;  %v13918_v54 = vpop.f32.mrf.mxu1  ;;  %v4690_v55 = vadd.f32 %v4652_v44, %v4008_v60  ;;  %v13922_v9 = vld [vmem:[#allocation3 + $0xa0] sm:$0xf]  ;;  %v13930_v63 = vpack.c.b16 %v6747_v7, %v6746_v28  ;;  %7843 = vmatpush.bf16.msrb.mxu1 %v11369_v34 }
 0x353   : > { %5633 = vst [vmem:[#allocation3 + $0xa8] sm:$0xf] %v5632_v17  ;;  %v13925_v52 = vld [vmem:[#allocation3 + $0xa4] sm:$0x1]  ;;  %v6038_v44 = vshll.u32 %v13922_v9, 16  ;;  %v6042_v46 = vshrl.u32 %v13922_v9, 16  ;;  %v6035_v1 = vor.u32 %v6034_v57, %v6031_v2 }
 0x354   : > { %v5450_v0 = vshrl.u32 %v5215_v43, 16  ;;  %v5116_v61 = vadd.f32 %v13887_v36, %v4690_v55  ;;  %v5453_v8 = vshll.u32 %v5215_v43, 16  ;;  %v5635_v36 = vld [vmem:[#allocation3 + $0xb0] sm:$0x1]  ;;  %v6048_v27 = vshll.u32 %v13925_v52, 16 }
 0x355   : > { %v6040_v31 = vrot.slane %v6038_v44, 5  ;;  %v6044_v23 = vrot.slane %v6042_v46, 4  ;;  %v6561_v44 = vld [vmem:[#allocation3 + $0x78] sm:$0xe] }
 0x356   : > { %v5452_v51 = vrot.slane %v5450_v0, 7  ;;  %v5152_v16 = vadd.f32 %v13814_v49, %v5116_v61  ;;  %6297 = vmatmul.bf16.gmra.mxu1 %v6161_v50  ;;  %v490_v50 = vsel %vm12011_vm7, 0, %v489_v41  ;;  %v6036_v0 = vrot.slane %v6035_v1, 4  ;;  %v5638_v41 = vld [vmem:[#allocation3 + $0xb4] sm:$0xf] }
 0x357   : > { %v3972_v30 = vpop.f32.mrf.mxu2  ;;  %v6045_v38 = vor.u32 %v6044_v23, %v6040_v31  ;;  %491 = vst [vmem:[#allocation3 + $0xc8] sm:$0x1] %v490_v50  ;;  %v6050_v61 = vrot.slane %v6048_v27, 5  ;;  %v6671_v23 = vrot.slane %v13779_v58, 5 }
 0x358   : > { %v5455_v32 = vor.u32 %v5453_v8, %v5452_v51  ;;  %v5457_v29 = vrot.slane %v5452_v51, 4  ;;  %v5184_v21 = vmax.f32 %v5152_v16, 0.0  ;;  %v4009_v60 = vadd.f32 %v3972_v30, %v3694_v15  ;;  %v11352_v15 = vld [vmem:[#allocation3 + $0x60] sm:$0xff] }
 0x359   : > { %v6046_v14 = vrot.slane %v6045_v38, 4  ;;  %v6041_v8 = vsel %vm12048_vm11, %v6036_v0, %v6040_v31  ;;  %v6673_v1 = vrot.slane %v6671_v23, 4  ;;  %v6674_v38 = vrot.slane %v13782_v47, 5 }
 0x35a   : > { %v5456_v17 = vsel %vm12033_vm9, %v5448_v20, %v5455_v32  ;;  %v5636_v43 = vsel %vm12005_vm3, %v5457_v29, %v5635_v36  ;;  %v5216_v55 = vpack.c.bf16 %v5184_v21, %v5184_v21  ;;  %v13939_v7 = vpop.f32.mrf.mxu1  ;;  %v4691_v33 = vadd.f32 %v4654_v13, %v4009_v60  ;;  %v5083_v18 = vpop.f32.mrf.mxu0  ;;  %v5680_v28 = vld [vmem:[#allocation3 + $0xa8] sm:$0xf]  ;;  %v15604_v32 = vld [vmem:[#allocation29_spill] sm:$0xff] }
 0x35b   : > { %5634 = vst [vmem:[#allocation3 + $0xac] sm:$0xf] %v5456_v17  ;;  %6883 = vmatmul.bf16.gmra.mxu3 %v13842_v48  ;;  %v6051_v13 = vsel %vm12048_vm11, %v6046_v14, %v6050_v61  ;;  %v6053_v30 = vshrl.u32 %v5680_v28, 16  ;;  %v6056_v57 = vshll.u32 %v5680_v28, 16  ;;  %v10789_v21 = vrot.slane %v6561_v44, 9 }
 0x35c   : > { %5637 = vst [vmem:[#allocation3 + $0xb0] sm:$0x1] %v5636_v43  ;;  %v5459_v12 = vshrl.u32 %v5216_v55, 16  ;;  %v5117_v20 = vadd.f32 %v5080_v62, %v4691_v33  ;;  %6505 = vmatmul.bf16.gmra.mxu2 %v11312_v4  ;;  %v5462_v48 = vshll.u32 %v5216_v55, 16  ;;  %v6144_v2 = vunpack.c.l.b16 %v6051_v13 }
 0x35d   : > { %7197 = vmatmul.bf16.gmra.mxu0 %v11352_v15  ;;  %v6143_v62 = vunpack.c.l.b16 %v6041_v8  ;;  %v6672_v58 = vsel %vm12316_vm14, %v10789_v21, %v6671_v23  ;;  %v6055_v15 = vrot.slane %v6053_v30, 4  ;;  %v6058_v0 = vrot.slane %v6056_v57, 5  ;;  %v15605_v8 = vld [vmem:[#allocation30_spill] sm:$0xff] }
 0x35e   : > { %v5461_v46 = vrot.slane %v5459_v12, 7  ;;  %v5153_v51 = vadd.f32 %v13814_v49, %v5117_v20  ;;  %v4657_v16 = vpop.f32.mrf.mxu3  ;;  %v6675_v47 = vsel %vm12316_vm14, %v6673_v1, %v6674_v38  ;;  %v3696_v13 = vadd.f32 %v13659_v6, %v15605_v8 }
 0x35f   : > { %v3975_v36 = vpop.f32.mrf.mxu2  ;;  %v6162_v60 = vpack.c.b16 %v6144_v2, %v6143_v62  ;;  %v6748_v44 = vunpack.c.l.b16 %v6672_v58  ;;  %v11384_v62 = vld [vmem:[#allocation9 + $0x178] sm:$0xff]  ;;  %v6059_v23 = vor.u32 %v6058_v0, %v6055_v15 }
 0x360   : > { %v5464_v31 = vor.u32 %v5462_v48, %v5461_v46  ;;  %v5185_v27 = vmax.f32 %v5153_v51, 0.0  ;;  %v4010_v29 = vadd.f32 %v3975_v36, %v15604_v32  ;;  %v6749_v48 = vunpack.c.l.b16 %v6675_v47  ;;  %8262 = vmatpush.bf16.msra.mxu2 %v11384_v62  ;;  %v11353_v58 = vld [vmem:[#allocation3 + $0x6c] sm:$0xff]  ;;  %v5645_v62 = vld [vmem:[#allocation3 + $0xc0] sm:$0xf] }
 0x361   : > { %v5465_v30 = vrot.slane %v5461_v46, 4 }
 0x362   : > { %v5639_v50 = vsel %vm12042_vm10, %v5464_v31, %v5638_v41  ;;  %v5217_v17 = vpack.c.bf16 %v5185_v27, %v5185_v27  ;;  %v4692_v43 = vadd.f32 %v4657_v16, %v4010_v29  ;;  %v5085_v55 = vpop.f32.mrf.mxu0  ;;  %v13952_v33 = vld [vmem:[#allocation3 + $0xac] sm:$0xf]  ;;  %v13968_v27 = vpack.c.b16 %v6749_v48, %v6748_v44 }
 0x363   : > { %5640 = vst [vmem:[#allocation3 + $0xb4] sm:$0xf] %v5639_v50  ;;  %v13956_v4 = vpop.f32.mrf.mxu1  ;;  %v6062_v14 = vshll.u32 %v13952_v33, 16  ;;  %v13961_v20 = vld [vmem:[#allocation3 + $0xb0] sm:$0x1]  ;;  %v6066_v28 = vshrl.u32 %v13952_v33, 16 }
 0x364   : > { %v5467_v61 = vshrl.u32 %v5217_v17, 16  ;;  %v5118_v12 = vadd.f32 %v5083_v18, %v4692_v43  ;;  %v5470_v16 = vshll.u32 %v5217_v17, 16  ;;  %v5642_v18 = vld [vmem:[#allocation3 + $0xbc] sm:$0x1]  ;;  %v6072_v31 = vshll.u32 %v13961_v20, 16  ;;  %v11313_v43 = vld [vmem:[#allocation3 + $0x60] sm:$0xff] }
 0x365   : > { %v6064_v34 = vrot.slane %v6062_v14, 5  ;;  %v6068_v36 = vrot.slane %v6066_v28, 4  ;;  %v6060_v14 = vrot.slane %v6059_v23, 4 }
 0x366   : > { %v5469_v51 = vrot.slane %v5467_v61, 7  ;;  %v5154_v2 = vadd.f32 %v13814_v49, %v5118_v12  ;;  %6302 = vmatmul.bf16.gmra.mxu1 %v6162_v60  ;;  %v4659_v41 = vpop.f32.mrf.mxu3  ;;  %v6074_v61 = vrot.slane %v6072_v31, 5  ;;  %v11408_v12 = vld [vmem:[#allocation9 + $0x1b8] sm:$0xff] }
 0x367   : > { %v3977_v57 = vpop.f32.mrf.mxu2  ;;  %v6069_v1 = vor.u32 %v6068_v36, %v6064_v34  ;;  %8577 = vmatpush.bf16.msra.mxu3 %v11408_v12  ;;  %v11424_v12 = vld [vmem:[#allocation9 + $0x238] sm:$0xff] }
 0x368   : > { %v5472_v6 = vor.u32 %v5470_v16, %v5469_v51  ;;  %v5474_v32 = vrot.slane %v5469_v51, 4  ;;  %v5186_v29 = vmax.f32 %v5154_v2, 0.0  ;;  %v4011_v21 = vadd.f32 %v3977_v57, %v3696_v13  ;;  %9685 = vmatpush.bf16.msra.mxu1 %v11424_v12 }
 0x369   : > { %v6070_v47 = vrot.slane %v6069_v1, 4  ;;  %v6065_v13 = vsel %vm12048_vm11, %v6060_v14, %v6064_v34 }
 0x36a   : > { %v5473_v60 = vsel %vm12033_vm9, %v5465_v30, %v5472_v6  ;;  %v5643_v38 = vsel %vm12005_vm3, %v5474_v32, %v5642_v18  ;;  %v5218_v46 = vpack.c.bf16 %v5186_v29, %v5186_v29  ;;  %v4693_v50 = vadd.f32 %v4659_v41, %v4011_v21  ;;  %v13974_v17 = vpop.f32.mrf.mxu0  ;;  %v5682_v15 = vld [vmem:[#allocation3 + $0xb4] sm:$0xf] }
 0x36b   : > { %5641 = vst [vmem:[#allocation3 + $0xb8] sm:$0xf] %v5473_v60  ;;  %v13976_v0 = vpop.f32.mrf.mxu1  ;;  %6888 = vmatmul.bf16.gmra.mxu3 %v13889_v25  ;;  %v6075_v44 = vsel %vm12048_vm11, %v6070_v47, %v6074_v61  ;;  %v6077_v48 = vshrl.u32 %v5682_v15, 16  ;;  %v6080_v51 = vshll.u32 %v5682_v15, 16  ;;  %v6145_v23 = vunpack.c.l.b16 %v6065_v13 }
 0x36c   : > { %5644 = vst [vmem:[#allocation3 + $0xbc] sm:$0x1] %v5643_v38  ;;  %v5476_v28 = vshrl.u32 %v5218_v46, 16  ;;  %v5119_v8 = vadd.f32 %v5085_v55, %v4693_v50  ;;  %6510 = vmatmul.bf16.gmra.mxu2 %v11313_v43  ;;  %v5479_v25 = vshll.u32 %v5218_v46, 16  ;;  %v6146_v36 = vunpack.c.l.b16 %v6075_v44 }
 0x36d   : > { %7202 = vmatmul.bf16.gmra.mxu0 %v11353_v58  ;;  %v6079_v34 = vrot.slane %v6077_v48, 4  ;;  %v6082_v31 = vrot.slane %v6080_v51, 5 }
 0x36e   : > { %v5478_v16 = vrot.slane %v5476_v28, 7  ;;  %v5155_v2 = vadd.f32 %v13814_v49, %v5119_v8  ;;  %v6849_v41 = vpop.f32.mrf.mxu3  ;;  %v6163_v21 = vpack.c.b16 %v6146_v36, %v6145_v23  ;;  %v5649_v28 = vld [vmem:[#allocation3 + $0xc8] sm:$0x1] }
 0x36f   : > { %v6471_v30 = vpop.f32.mrf.mxu2  ;;  %v6083_v13 = vor.u32 %v6082_v31, %v6079_v34 }
 0x370   : > { %v5481_v55 = vor.u32 %v5479_v25, %v5478_v16  ;;  %v5187_v18 = vmax.f32 %v5155_v2, 0.0  ;;  %v6472_v57 = vadd.f32 %v6471_v30, %v13690_v26  ;;  %v5482_v48 = vrot.slane %v5478_v16, 4  ;;  %v11314_v16 = vld [vmem:[#allocation3 + $0x6c] sm:$0xff] }
 0x371   : > { %v6084_v34 = vrot.slane %v6083_v13, 4 }
 0x372   : > { %v5646_v6 = vsel %vm12042_vm10, %v5481_v55, %v5645_v62  ;;  %v5219_v32 = vpack.c.bf16 %v5187_v18, %v5187_v18  ;;  %v13987_v29 = vadd.f32 %v6849_v41, %v6472_v57  ;;  %v13989_v1 = vpop.f32.mrf.mxu0  ;;  %v13991_v49 = vld [vmem:[#allocation3 + $0xb8] sm:$0xf]  ;;  %v14001_v62 = vld [vmem:[#allocation3 + $0x10] sm:$0xf] }
 0x373   : > { %5647 = vst [vmem:[#allocation3 + $0xc0] sm:$0xf] %v5646_v6  ;;  %v13993_v60 = vpop.f32.mrf.mxu1  ;;  %v13995_v38 = vld [vmem:[#allocation3 + $0xbc] sm:$0x1]  ;;  %v6086_v26 = vshll.u32 %v13991_v49, 16  ;;  %v6090_v46 = vshrl.u32 %v13991_v49, 16 }
 0x374   : > { %v5484_v50 = vshrl.u32 %v5219_v32, 16  ;;  %v6096_v15 = vshll.u32 %v13995_v38, 16  ;;  %v5487_v47 = vshll.u32 %v5219_v32, 16  ;;  %v7333_v5 = vshll.u32 %v14001_v62, 16 }
 0x375   : > { %v6088_v43 = vrot.slane %v6086_v26, 5  ;;  %v6092_v58 = vrot.slane %v6090_v46, 4  ;;  %v7337_v6 = vshrl.u32 %v14001_v62, 16 }
 0x376   : > { %v5486_v14 = vrot.slane %v5484_v50, 7  ;;  %6307 = vmatmul.bf16.gmra.mxu1 %v6163_v21  ;;  %v6851_v61 = vpop.f32.mrf.mxu3  ;;  %v6098_v36 = vrot.slane %v6096_v15, 5  ;;  %v7327_v50 = vshll.u32 %v7275_v45, 16  ;;  %v7335_v15 = vrot.slane %v7333_v5, 5  ;;  %v11355_v5 = vld [vmem:[#allocation3 + $0x84] sm:$0xff] }
 0x377   : > { %v6473_v8 = vpop.f32.mrf.mxu2  ;;  %v6093_v44 = vor.u32 %v6092_v58, %v6088_v43  ;;  %v6089_v32 = vsel %vm12048_vm11, %v6084_v34, %v6088_v43  ;;  %v11315_v34 = vld [vmem:[#allocation3 + $0x78] sm:$0xff] }
 0x378   : > { %v5489_v51 = vor.u32 %v5487_v47, %v5486_v14  ;;  %v5491_v25 = vrot.slane %v5486_v14, 4  ;;  %v6474_v2 = vadd.f32 %v6473_v8, %v13723_v19  ;;  %v11354_v19 = vld [vmem:[#allocation3 + $0x78] sm:$0xff]  ;;  %v6147_v58 = vunpack.c.l.b16 %v6089_v32  ;;  %v14027_v8 = vld [vmem:[#allocation3 + $0x14] sm:$0x1] }
 0x379   : > { %v6094_v41 = vrot.slane %v6093_v44, 4  ;;  %v7339_v14 = vrot.slane %v7337_v6, 4  ;;  %v7329_v13 = vrot.slane %v7327_v50, 5  ;;  %v11407_v6 = vld [vmem:[#allocation9 + $0x1b0] sm:$0xff] }
 0x37a   : > { %v5490_v30 = vsel %vm12033_vm9, %v5482_v48, %v5489_v51  ;;  %v5650_v55 = vsel %vm12005_vm3, %v5491_v25, %v5649_v28  ;;  %v14007_v18 = vadd.f32 %v6851_v61, %v6474_v2  ;;  %v14009_v57 = vpop.f32.mrf.mxu0  ;;  %v7343_v51 = vshll.u32 %v14027_v8, 16  ;;  %8578 = vmatpush.bf16.msra.mxu3 %v11407_v6 }
 0x37b   : > { %15606 = vst [vmem:[#allocation31_spill] sm:$0xff] %v14009_v57  ;;  %v14011_v23 = vpop.f32.mrf.mxu1  ;;  %6893 = vmatmul.bf16.gmra.mxu3 %v13930_v63  ;;  %v6099_v31 = vsel %vm12048_vm11, %v6094_v41, %v6098_v36  ;;  %v7324_v63 = vshrl.u32 %v7275_v45, 16  ;;  %v7340_v44 = vor.u32 %v7339_v14, %v7335_v15  ;;  %v6681_v14 = vrot.slane %v13835_v3, 5 }
 0x37c   : > { %5648 = vst [vmem:[#allocation3 + $0xc4] sm:$0xf] %v5490_v30  ;;  %6515 = vmatmul.bf16.gmra.mxu2 %v11314_v16  ;;  %v6148_v26 = vunpack.c.l.b16 %v6099_v31  ;;  %v6678_v30 = vrot.slane %v13832_v10, 5  ;;  %v7345_v31 = vrot.slane %v7343_v51, 5 }
 0x37d   : > { %5651 = vst [vmem:[#allocation3 + $0xc8] sm:$0x1] %v5650_v55  ;;  %7207 = vmatmul.bf16.gmra.mxu0 %v11354_v19  ;;  %v7326_v43 = vrot.slane %v7324_v63, 4  ;;  %v7341_v36 = vrot.slane %v7340_v44, 4  ;;  %v7279_v55 = vld [vmem:[#allocation3 + $0x1c] sm:$0xf] }
 0x37e   : > { %v6854_v21 = vpop.f32.mrf.mxu3  ;;  %v6164_v61 = vpack.c.b16 %v6148_v26, %v6147_v58  ;;  %v7357_v10 = vshll.u32 %v7279_v55, 16  ;;  %v7361_v26 = vshrl.u32 %v7279_v55, 16 }
 0x37f   : > { %v6476_v46 = vpop.f32.mrf.mxu2  ;;  %v7330_v41 = vor.u32 %v7329_v13, %v7326_v43  ;;  %v7346_v32 = vsel %vm12048_vm11, %v7341_v36, %v7345_v31 }
 0x380   : > { %v6477_v53 = vadd.f32 %v6476_v46, %v13761_v59  ;;  %v11383_v59 = vld [vmem:[#allocation9 + $0x170] sm:$0xff]  ;;  %v6680_v46 = vrot.slane %v6678_v30, 4  ;;  %v14045_v44 = vrot.slane %v7357_v10, 5 }
 0x381   : > { %8263 = vmatpush.bf16.msra.mxu2 %v11383_v59 }
 0x382   : > { %v14021_v47 = vadd.f32 %v6854_v21, %v6477_v53  ;;  %v14023_v12 = vpop.f32.mrf.mxu0  ;;  %v7278_v21 = vld [vmem:[#allocation3 + $0x18] sm:$0xf]  ;;  %v6562_v53 = vld [vmem:[#allocation3 + $0x84] sm:$0xe] }
 0x383   : > { %15607 = vst [vmem:[#allocation32_spill] sm:$0xff] %v14023_v12  ;;  %v14025_v28 = vpop.f32.mrf.mxu1  ;;  %v7351_v13 = vshll.u32 %v7278_v21, 16  ;;  %v10790_v59 = vrot.slane %v6562_v53, 9 }
 0x385   : > { %v6679_v3 = vsel %vm12316_vm14, %v10790_v59, %v6678_v30  ;;  %v7353_v6 = vrot.slane %v7351_v13, 5 }
 0x386   : > { %6312 = vmatmul.bf16.gmra.mxu1 %v6164_v61  ;;  %v6856_v48 = vpop.f32.mrf.mxu3  ;;  %v7348_v61 = vshrl.u32 %v7278_v21, 16  ;;  %v6750_v10 = vunpack.c.l.b16 %v6679_v3  ;;  %v7281_v3 = vld [vmem:[#allocation3 + $0x24] sm:$0xf] }
 0x387   : > { %v6478_v25 = vpop.f32.mrf.mxu2 }
 0x388   : > { %v6479_v2 = vadd.f32 %v6478_v25, %v13790_v40  ;;  %v7331_v40 = vrot.slane %v7330_v41, 4  ;;  %v6682_v25 = vsel %vm12316_vm14, %v6680_v46, %v6681_v14  ;;  %v11423_v46 = vld [vmem:[#allocation9 + $0x230] sm:$0xff] }
 0x389   : > { %v6751_v31 = vunpack.c.l.b16 %v6682_v25  ;;  %9686 = vmatpush.bf16.msra.mxu1 %v11423_v46 }
 0x38a   : > { %v14032_v16 = vadd.f32 %v6856_v48, %v6479_v2  ;;  %v14034_v19 = vpop.f32.mrf.mxu0  ;;  %v7336_v50 = vsel %vm12048_vm11, %v7331_v40, %v7335_v15  ;;  %v7363_v48 = vrot.slane %v7361_v26, 4 }
 0x38b   : > { %15609 = vst [vmem:[#allocation34_spill] sm:$0xff] %v14034_v19  ;;  %v14036_v45 = vpop.f32.mrf.mxu1  ;;  %6898 = vmatmul.bf16.gmra.mxu3 %v13968_v27  ;;  %v7725_v27 = vunpack.c.l.b16 %v7346_v32  ;;  %v7724_v51 = vunpack.c.l.b16 %v7336_v50  ;;  %v7958_v32 = vld [vmem:[#allocation3 + $0x18] sm:$0xe]  ;;  %v6771_v30 = vpack.c.b16 %v6751_v31, %v6750_v10  ;;  %v7372_v10 = vshrl.u32 %v7281_v3, 16 }
 0x38c   : > { %15608 = vst [vmem:[#allocation33_spill] sm:$0xff] %v14032_v16  ;;  %6520 = vmatmul.bf16.gmra.mxu2 %v11315_v34  ;;  %v11415_v34 = vld [vmem:[#allocation9 + $0x1f0] sm:$0xff]  ;;  %v7364_v40 = vor.u32 %v7363_v48, %v14045_v44  ;;  %v10956_v53 = vrot.slane %v7958_v32, 9 }
 0x38d   : > { %7212 = vmatmul.bf16.gmra.mxu0 %v11355_v5  ;;  %v7756_v36 = vpack.c.b16 %v7725_v27, %v7724_v51  ;;  %v7350_v5 = vrot.slane %v7348_v61, 4  ;;  %v6685_v61 = vrot.slane %v13879_v42, 5 }
 0x38e   : > { %v6859_v63 = vpop.f32.mrf.mxu3  ;;  %9260 = vmatpush.bf16.msra.mxu0 %v11415_v34  ;;  %v7365_v14 = vrot.slane %v7364_v40, 4  ;;  %v11356_v34 = vld [vmem:[#allocation3 + $0x90] sm:$0xff] }
 0x38f   : > { %v6481_v58 = vpop.f32.mrf.mxu2  ;;  %v7354_v27 = vor.u32 %v7353_v6, %v7350_v5 }
 0x390   : > { %v6482_v43 = vadd.f32 %v6481_v58, %v13818_v37  ;;  %v7280_v37 = vld [vmem:[#allocation3 + $0x20] sm:$0x1] }
 0x391   : > { %v7367_v26 = vshll.u32 %v7280_v37, 16  ;;  %v8033_v51 = vrot.slane %v7280_v37, 5  ;;  %v7355_v6 = vrot.slane %v7354_v27, 4  ;;  %v6688_v27 = vrot.slane %v13882_v11, 5 }
 0x392   : > { %v14049_v2 = vadd.f32 %v6859_v63, %v6482_v43  ;;  %v14051_v15 = vpop.f32.mrf.mxu0  ;;  %v8030_v63 = vrot.slane %v7279_v55, 5  ;;  %v7282_v43 = vld [vmem:[#allocation3 + $0x28] sm:$0xf] }
 0x393   : > { %15611 = vst [vmem:[#allocation16_spill] sm:$0xff] %v14051_v15  ;;  %v14053_v41 = vpop.f32.mrf.mxu1  ;;  %v11316_v55 = vld [vmem:[#allocation3 + $0x84] sm:$0xff]  ;;  %v7381_v31 = vshll.u32 %v7282_v43, 16  ;;  %v7385_v5 = vshrl.u32 %v7282_v43, 16  ;;  %v7360_v46 = vsel %vm12048_vm11, %v7355_v6, %v14045_v44  ;;  %v7283_v44 = vld [vmem:[#allocation3 + $0x2c] sm:$0x1] }
 0x394   : > { %15610 = vst [vmem:[#allocation14_spill] sm:$0xff] %v14049_v2  ;;  %v8031_v13 = vsel %vm12316_vm14, %v10956_v53, %v8030_v63  ;;  %v8032_v48 = vrot.slane %v8030_v63, 4  ;;  %v6563_v63 = vld [vmem:[#allocation3 + $0x90] sm:$0xe]  ;;  %v8037_v11 = vrot.slane %v7282_v43, 5  ;;  %v11318_v2 = vld [vmem:[#allocation3 + $0x9c] sm:$0xff] }
 0x395   : > { %v8152_v40 = vunpack.c.l.b16 %v8031_v13  ;;  %v7959_v13 = vld [vmem:[#allocation3 + $0x24] sm:$0xe]  ;;  %v7285_v43 = vld [vmem:[#allocation3 + $0x34] sm:$0xf] }
 0x396   : > { %7844 = vmatmul.bf16.vlgmr.msrb.gmra.mxu1 %v7756_v36  ;;  %v6861_v21 = vpop.f32.mrf.mxu3  ;;  %v7369_v36 = vrot.slane %v7367_v26, 5  ;;  %v8034_v42 = vsel %vm12316_vm14, %v8032_v48, %v8033_v51  ;;  %v14078_v48 = vrot.slane %v7381_v31, 5  ;;  %v7409_v15 = vshrl.u32 %v7285_v43, 16 }
 0x397   : > { %v6483_v50 = vpop.f32.mrf.mxu2  ;;  %v8153_v32 = vunpack.c.l.b16 %v8034_v42  ;;  %v7374_v42 = vrot.slane %v7372_v10, 4  ;;  %v8039_v10 = vrot.slane %v8037_v11, 4 }
 0x398   : > { %v6484_v58 = vadd.f32 %v6483_v50, %v13845_v24  ;;  %v7370_v37 = vsel %vm12048_vm11, %v7365_v14, %v7369_v36  ;;  %v7375_v50 = vshll.u32 %v7281_v3, 16  ;;  %v7387_v14 = vrot.slane %v7385_v5, 4 }
 0x399   : > { %v14075_v53 = vpack.c.b16 %v8153_v32, %v8152_v40  ;;  %v10791_v36 = vrot.slane %v6563_v63, 9  ;;  %v10957_v40 = vrot.slane %v7959_v13, 9  ;;  %v7284_v63 = vld [vmem:[#allocation3 + $0x30] sm:$0xf]  ;;  %v11382_v13 = vld [vmem:[#allocation9 + $0x168] sm:$0xff] }
 0x39a   : > { %v14062_v59 = vadd.f32 %v6861_v21, %v6484_v58  ;;  %v14064_v25 = vpop.f32.mrf.mxu0  ;;  %v6687_v21 = vrot.slane %v6685_v61, 4  ;;  %v7388_v32 = vor.u32 %v7387_v14, %v14078_v48  ;;  %v7396_v14 = vshrl.u32 %v7284_v63, 16  ;;  %8264 = vmatpush.bf16.msra.mxu2 %v11382_v13 }
 0x39b   : > { %15613 = vst [vmem:[#allocation17_spill] sm:$0xff] %v14064_v25  ;;  %v14066_v24 = vpop.f32.mrf.mxu1  ;;  %6903 = vmatmul.bf16.gmra.mxu3 %v6771_v30  ;;  %v7727_v30 = vunpack.c.l.b16 %v7370_v37  ;;  %v7377_v37 = vrot.slane %v7375_v50, 5  ;;  %v7286_v25 = vld [vmem:[#allocation3 + $0x38] sm:$0x1] }
 0x39c   : > { %15612 = vst [vmem:[#allocation15_spill] sm:$0xff] %v14062_v59  ;;  %6525 = vmatmul.bf16.gmra.mxu2 %v11316_v55  ;;  %v7726_v55 = vunpack.c.l.b16 %v7360_v46  ;;  %v8047_v13 = vrot.slane %v7286_v25, 5 }
 0x39d   : > { %7217 = vmatmul.bf16.gmra.mxu0 %v11356_v34  ;;  %v6689_v34 = vsel %vm12316_vm14, %v6687_v21, %v6688_v27  ;;  %v8038_v21 = vsel %vm12316_vm14, %v10957_v40, %v8037_v11  ;;  %v7378_v27 = vor.u32 %v7377_v37, %v7374_v42  ;;  %v7389_v11 = vrot.slane %v7388_v32, 4  ;;  %v11357_v32 = vld [vmem:[#allocation3 + $0x9c] sm:$0xff] }
 0x39e   : > { %v6864_v26 = vpop.f32.mrf.mxu3  ;;  %v7757_v5 = vpack.c.b16 %v7727_v30, %v7726_v55  ;;  %v6753_v46 = vunpack.c.l.b16 %v6689_v34  ;;  %v7391_v55 = vshll.u32 %v7283_v44, 16  ;;  %v6692_v42 = vrot.slane %v13922_v9, 5 }
 0x39f   : > { %v6486_v58 = vpop.f32.mrf.mxu2 }
 0x3a0   : > { %v6487_v51 = vadd.f32 %v6486_v58, %v13867_v22  ;;  %v6686_v22 = vsel %vm12316_vm14, %v10791_v36, %v6685_v61  ;;  %v8154_v36 = vunpack.c.l.b16 %v8038_v21  ;;  %v7379_v21 = vrot.slane %v7378_v27, 4 }
 0x3a1   : > { %v6752_v50 = vunpack.c.l.b16 %v6686_v22 }
 0x3a2   : > { %v14083_v3 = vadd.f32 %v6864_v26, %v6487_v51  ;;  %v14085_v6 = vpop.f32.mrf.mxu0  ;;  %v8040_v26 = vrot.slane %v7283_v44, 5  ;;  %v7960_v51 = vld [vmem:[#allocation3 + $0x30] sm:$0xe] }
 0x3a3   : > { %15615 = vst [vmem:[#allocation18_spill] sm:$0xff] %v14085_v6  ;;  %v14087_v31 = vpop.f32.mrf.mxu1  ;;  %v6772_v40 = vpack.c.b16 %v6753_v46, %v6752_v50  ;;  %v10958_v22 = vrot.slane %v7960_v51, 9  ;;  %v11317_v44 = vld [vmem:[#allocation3 + $0x90] sm:$0xff]  ;;  %v7393_v46 = vrot.slane %v7391_v55, 5 }
 0x3a4   : > { %15614 = vst [vmem:[#allocation20_spill] sm:$0xff] %v14083_v3  ;;  %v8041_v30 = vsel %vm12316_vm14, %v8039_v10, %v8040_v26  ;;  %v8044_v3 = vrot.slane %v7285_v43, 5 }
 0x3a5   : > { %v8155_v34 = vunpack.c.l.b16 %v8041_v30  ;;  %v7405_v30 = vshll.u32 %v7285_v43, 16  ;;  %v7394_v27 = vsel %vm12048_vm11, %v7389_v11, %v7393_v46  ;;  %v6694_v43 = vrot.slane %v6692_v42, 4 }
 0x3a6   : > { %7849 = vmatmul.bf16.gmra.mxu1 %v7757_v5  ;;  %v6866_v58 = vpop.f32.mrf.mxu3  ;;  %v7399_v5 = vshll.u32 %v7284_v63, 16  ;;  %v11406_v63 = vld [vmem:[#allocation9 + $0x1a8] sm:$0xff]  ;;  %v8045_v9 = vsel %vm12316_vm14, %v10958_v22, %v8044_v3  ;;  %v8046_v50 = vrot.slane %v8044_v3, 4  ;;  %v7411_v3 = vrot.slane %v7409_v15, 4 }
 0x3a7   : > { %v6488_v61 = vpop.f32.mrf.mxu2  ;;  %v14098_v37 = vpack.c.b16 %v8155_v34, %v8154_v36  ;;  %8579 = vmatpush.bf16.msra.mxu3 %v11406_v63  ;;  %v14115_v36 = vrot.slane %v7405_v30, 5  ;;  %v7287_v34 = vld [vmem:[#allocation3 + $0x3c] sm:$0xf] }
 0x3a8   : > { %v6489_v6 = vadd.f32 %v6488_v61, %v13892_v35  ;;  %v7401_v51 = vrot.slane %v7399_v5, 5  ;;  %v8048_v61 = vsel %vm12316_vm14, %v8046_v50, %v8047_v13  ;;  %v7288_v5 = vld [vmem:[#allocation3 + $0x40] sm:$0xf]  ;;  %v7961_v63 = vld [vmem:[#allocation3 + $0x3c] sm:$0xe]  ;;  %v7420_v13 = vshrl.u32 %v7287_v34, 16 }
 0x3a9   : > { %v8157_v22 = vunpack.c.l.b16 %v8048_v61 }
 0x3aa   : > { %v14100_v10 = vadd.f32 %v6866_v58, %v6489_v6  ;;  %v14102_v26 = vpop.f32.mrf.mxu0  ;;  %v7384_v6 = vsel %vm12048_vm11, %v7379_v21, %v14078_v48  ;;  %v7398_v58 = vrot.slane %v7396_v14, 4  ;;  %v6564_v48 = vld [vmem:[#allocation3 + $0x9c] sm:$0xe]  ;;  %v6695_v14 = vrot.slane %v13925_v52, 5 }
 0x3ab   : > { %15617 = vst [vmem:[#allocation22_spill] sm:$0xff] %v14102_v26  ;;  %v14104_v35 = vpop.f32.mrf.mxu1  ;;  %6908 = vmatmul.bf16.gmra.mxu3 %v6772_v40  ;;  %v8156_v40 = vunpack.c.l.b16 %v8045_v9  ;;  %v7415_v21 = vshll.u32 %v7286_v25, 16  ;;  %v7728_v50 = vunpack.c.l.b16 %v7384_v6  ;;  %v10792_v26 = vrot.slane %v6564_v48, 9  ;;  %v14128_v25 = vld [vmem:[#allocation3 + $0x44] sm:$0x1] }
 0x3ac   : > { %15616 = vst [vmem:[#allocation19_spill] sm:$0xff] %v14100_v10  ;;  %6530 = vmatmul.bf16.gmra.mxu2 %v11317_v44  ;;  %v6696_v30 = vsel %vm12316_vm14, %v6694_v43, %v6695_v14  ;;  %v7402_v15 = vor.u32 %v7401_v51, %v7398_v58  ;;  %v7412_v52 = vor.u32 %v7411_v3, %v14115_v36  ;;  %v7429_v43 = vshll.u32 %v7288_v5, 16  ;;  %v14138_v3 = vld [vmem:[#allocation3 + $0x20] sm:$0x1] }
 0x3ad   : > { %7222 = vmatmul.bf16.gmra.mxu0 %v11357_v32  ;;  %v7729_v32 = vunpack.c.l.b16 %v7394_v27  ;;  %v14119_v46 = vpack.c.b16 %v8157_v22, %v8156_v40  ;;  %v14130_v27 = vld [vmem:[#allocation3 + $0x1c] sm:$0xf]  ;;  %v14134_v6 = vrot.slane %v7415_v21, 5  ;;  %v11414_v22 = vld [vmem:[#allocation9 + $0x1e8] sm:$0xff]  ;;  %v10959_v58 = vrot.slane %v7961_v63, 9 }
 0x3ae   : > { %v6869_v55 = vpop.f32.mrf.mxu3  ;;  %v8051_v51 = vrot.slane %v7288_v5, 5  ;;  %v6755_v48 = vunpack.c.l.b16 %v6696_v30  ;;  %v7433_v14 = vshrl.u32 %v7288_v5, 16  ;;  %9261 = vmatpush.bf16.msra.mxu0 %v11414_v22  ;;  %v8054_v21 = vrot.slane %v14128_v25, 5 }
 0x3af   : > { %v6491_v44 = vpop.f32.mrf.mxu2  ;;  %v14144_v30 = vrot.slane %v7429_v43, 5  ;;  %v7439_v22 = vshll.u32 %v14128_v25, 16  ;;  %v11358_v25 = vld [vmem:[#allocation3 + $0xa8] sm:$0xff] }
 0x3b0   : > { %v6492_v11 = vadd.f32 %v6491_v44, %v13918_v54  ;;  %v7423_v54 = vshll.u32 %v7287_v34, 16  ;;  %v6693_v44 = vsel %vm12316_vm14, %v10792_v26, %v6692_v42  ;;  %v8052_v34 = vsel %vm12316_vm14, %v10959_v58, %v8051_v51  ;;  %v11422_v42 = vld [vmem:[#allocation9 + $0x228] sm:$0xff] }
 0x3b1   : > { %v6754_v5 = vunpack.c.l.b16 %v6693_v44  ;;  %v7435_v59 = vrot.slane %v7433_v14, 4  ;;  %9687 = vmatpush.bf16.msra.mxu1 %v11422_v42  ;;  %v9449_v44 = vrot.slane %v14138_v3, 5  ;;  %v14157_v14 = vld [vmem:[#allocation3 + $0xc] sm:$0xe]  ;;  %v11405_v42 = vld [vmem:[#allocation9 + $0x1a0] sm:$0xff] }
 0x3b2   : > { %v14123_v9 = vadd.f32 %v6869_v55, %v6492_v11  ;;  %v14125_v61 = vpop.f32.mrf.mxu0  ;;  %v7758_v55 = vpack.c.b16 %v7729_v32, %v7728_v50  ;;  %v8053_v11 = vrot.slane %v8051_v51, 4  ;;  %v7413_v32 = vrot.slane %v7412_v52, 4  ;;  %v9380_v52 = vld [vmem:[#allocation3 + $0x18] sm:$0xe]  ;;  %8580 = vmatpush.bf16.msra.mxu3 %v11405_v42 }
 0x3b3   : > { %15619 = vst [vmem:[#allocation24_spill] sm:$0xff] %v14125_v61  ;;  %v14132_v40 = vpop.f32.mrf.mxu1  ;;  %v9446_v61 = vrot.slane %v14130_v27, 5  ;;  %v7422_v50 = vrot.slane %v7420_v13, 4  ;;  %v7425_v10 = vrot.slane %v7423_v54, 5  ;;  %v6699_v13 = vrot.slane %v13952_v33, 5 }
 0x3b4   : > { %15618 = vst [vmem:[#allocation21_spill] sm:$0xff] %v14123_v9  ;;  %v7403_v9 = vrot.slane %v7402_v15, 4  ;;  %v8055_v58 = vsel %vm12316_vm14, %v8053_v11, %v8054_v21  ;;  %v6773_v15 = vpack.c.b16 %v6755_v48, %v6754_v5  ;;  %v7418_v21 = vsel %vm12048_vm11, %v7413_v32, %v14134_v6  ;;  %v14176_v32 = vld [vmem:[#allocation3 + $0x28] sm:$0xf] }
 0x3b5   : > { %v8159_v19 = vunpack.c.l.b16 %v8055_v58  ;;  %v9448_v54 = vrot.slane %v9446_v61, 4  ;;  %v6701_v58 = vrot.slane %v6699_v13, 4  ;;  %v9453_v42 = vrot.slane %v14176_v32, 5 }
 0x3b6   : > { %7854 = vmatmul.bf16.gmra.mxu1 %v7758_v55  ;;  %v6871_v63 = vpop.f32.mrf.mxu3  ;;  %v8158_v55 = vunpack.c.l.b16 %v8052_v34  ;;  %v7408_v11 = vsel %vm12048_vm11, %v7403_v9, %v14115_v36  ;;  %v14173_v9 = vld [vmem:[#allocation3 + $0x4c] sm:$0xf] }
 0x3b7   : > { %v6493_v26 = vpop.f32.mrf.mxu2  ;;  %v9450_v36 = vsel %vm12316_vm14, %v9448_v54, %v9449_v44  ;;  %v7730_v5 = vunpack.c.l.b16 %v7408_v11  ;;  %v6565_v54 = vld [vmem:[#allocation3 + $0xa8] sm:$0xe]  ;;  %v9381_v44 = vld [vmem:[#allocation3 + $0x24] sm:$0xe]  ;;  %v6702_v11 = vrot.slane %v13961_v20, 5 }
 0x3b8   : > { %v6494_v51 = vadd.f32 %v6493_v26, %v13939_v7  ;;  %v7426_v7 = vor.u32 %v7425_v10, %v7422_v50  ;;  %v14159_v34 = vpack.c.b16 %v8159_v19, %v8158_v55  ;;  %v11413_v26 = vld [vmem:[#allocation9 + $0x1e0] sm:$0xff]  ;;  %v7436_v10 = vor.u32 %v7435_v59, %v14144_v30  ;;  %v14171_v19 = vld [vmem:[#allocation3 + $0x48] sm:$0xf] }
 0x3b9   : > { %v11131_v50 = vrot.slane %v9380_v52, 9  ;;  %v14180_v59 = vrot.slane %v7439_v22, 5  ;;  %9262 = vmatpush.bf16.msra.mxu0 %v11413_v26  ;;  %v7444_v6 = vshrl.u32 %v14171_v19, 16  ;;  %v10793_v26 = vrot.slane %v6565_v54, 9 }
 0x3ba   : > { %v14152_v43 = vadd.f32 %v6871_v63, %v6494_v51  ;;  %15621 = vst [vmem:[#allocation23_spill] sm:$0xff] %v14159_v34  ;;  %v14163_v33 = vpop.f32.mrf.mxu0  ;;  %v11381_v63 = vld [vmem:[#allocation9 + $0x160] sm:$0xff]  ;;  %v7962_v51 = vld [vmem:[#allocation3 + $0x48] sm:$0xe]  ;;  %v7437_v22 = vrot.slane %v7436_v10, 4  ;;  %v11132_v34 = vrot.slane %v9381_v44, 9 }
 0x3bb   : > { %v14161_v48 = vpop.f32.mrf.mxu1  ;;  %15622 = vst [vmem:[#allocation26_spill] sm:$0xff] %v14163_v33  ;;  %6913 = vmatmul.bf16.gmra.mxu3 %v6773_v15  ;;  %8265 = vmatpush.bf16.msra.mxu2 %v11381_v63  ;;  %v7731_v15 = vunpack.c.l.b16 %v7418_v21  ;;  %v9447_v52 = vsel %vm12316_vm14, %v11131_v50, %v9446_v61  ;;  %v14185_v63 = vld [vmem:[#allocation3 + $0x50] sm:$0x1]  ;;  %v8058_v21 = vrot.slane %v14173_v9, 5  ;;  %v9574_v33 = vunpack.c.l.b16 %v9450_v36  ;;  %v14193_v50 = vld [vmem:[#allocation3 + $0x2c] sm:$0x1] }
 0x3bc   : > { %15620 = vst [vmem:[#allocation25_spill] sm:$0xff] %v14152_v43  ;;  %6535 = vmatmul.bf16.gmra.mxu2 %v11318_v2  ;;  %v14178_v2 = vrot.slane %v7426_v7, 4  ;;  %v10960_v43 = vrot.slane %v7962_v51, 9  ;;  %v6703_v61 = vsel %vm12316_vm14, %v6701_v58, %v6702_v11  ;;  %v9573_v20 = vunpack.c.l.b16 %v9447_v52  ;;  %v11404_v58 = vld [vmem:[#allocation9 + $0x198] sm:$0xff] }
 0x3bd   : > { %7227 = vmatmul.bf16.gmra.mxu0 %v11358_v25  ;;  %v8060_v36 = vrot.slane %v8058_v21, 4  ;;  %v7759_v51 = vpack.c.b16 %v7731_v15, %v7730_v5  ;;  %v6700_v54 = vsel %vm12316_vm14, %v10793_v26, %v6699_v13  ;;  %v11412_v11 = vld [vmem:[#allocation9 + $0x1d8] sm:$0xff]  ;;  %v7447_v52 = vshll.u32 %v14171_v19, 16  ;;  %8581 = vmatpush.bf16.msra.mxu3 %v11404_v58 }
 0x3be   : > { %v6874_v55 = vpop.f32.mrf.mxu3  ;;  %v8059_v16 = vsel %vm12316_vm14, %v10960_v43, %v8058_v21  ;;  %v14205_v44 = vpack.c.b16 %v9574_v33, %v9573_v20  ;;  %v9454_v21 = vsel %vm12316_vm14, %v11132_v34, %v9453_v42  ;;  %v9456_v5 = vrot.slane %v14193_v50, 5  ;;  %9263 = vmatpush.bf16.msra.mxu0 %v11412_v11  ;;  %v14234_v11 = vld [vmem:[#allocation3 + $0x38] sm:$0x1] }
 0x3bf   : > { %v6496_v25 = vpop.f32.mrf.mxu2  ;;  %v6757_v13 = vunpack.c.l.b16 %v6703_v61  ;;  %v8023_v19 = vrot.slane %v14001_v62, 5  ;;  %v8160_v33 = vunpack.c.l.b16 %v8059_v16  ;;  %v7432_v34 = vsel %vm12048_vm11, %v14178_v2, %v14144_v30  ;;  %v11379_v61 = vld [vmem:[#allocation9 + $0x150] sm:$0xff] }
 0x3c0   : > { %v6497_v7 = vadd.f32 %v6496_v25, %v13956_v4  ;;  %v8061_v4 = vrot.slane %v14185_v63, 5  ;;  %v11380_v25 = vld [vmem:[#allocation9 + $0x158] sm:$0xff]  ;;  %15624 = vst [vmem:[#allocation27_spill] sm:$0xff] %v14205_v44  ;;  %v6756_v44 = vunpack.c.l.b16 %v6700_v54  ;;  %v9575_v54 = vunpack.c.l.b16 %v9454_v21 }
 0x3c1   : > { %8266 = vmatpush.bf16.msra.mxu2 %v11380_v25  ;;  %v14230_v2 = vrot.slane %v7444_v6, 4 }
 0x3c2   : > { %v14195_v12 = vadd.f32 %v6874_v55, %v6497_v7  ;;  %v14207_v55 = vld [vmem:[#allocation3 + $0x34] sm:$0xf]  ;;  %v8062_v43 = vsel %vm12316_vm14, %v8060_v36, %v8061_v4  ;;  %v9455_v7 = vrot.slane %v9453_v42, 4  ;;  %v14214_v15 = vpop.f32.mrf.mxu0  ;;  %v7442_v42 = vsel %vm12048_vm11, %v7437_v22, %v14180_v59  ;;  %v11403_v36 = vld [vmem:[#allocation9 + $0x190] sm:$0xff] }
 0x3c3   : > { %v14200_v10 = vpop.f32.mrf.mxu1  ;;  %15625 = vst [vmem:[#allocation29_spill] sm:$0xff] %v14214_v15  ;;  %v8161_v26 = vunpack.c.l.b16 %v8062_v43  ;;  %v11411_v4 = vld [vmem:[#allocation9 + $0x1d0] sm:$0xff]  ;;  %v15509_v58 = vrot.slane %v14207_v55, 5  ;;  %v7453_v59 = vshll.u32 %v14173_v9, 16  ;;  %v7457_v22 = vshrl.u32 %v14173_v9, 16  ;;  %8582 = vmatpush.bf16.msra.mxu3 %v11403_v36 }
 0x3c4   : > { %15623 = vst [vmem:[#allocation28_spill] sm:$0xff] %v14195_v12  ;;  %v9457_v62 = vsel %vm12316_vm14, %v9455_v7, %v9456_v5  ;;  %v6774_v43 = vpack.c.b16 %v6757_v13, %v6756_v44  ;;  %v15510_v7 = vrot.slane %v13991_v49, 5  ;;  %v7449_v5 = vrot.slane %v7447_v52, 5  ;;  %9264 = vmatpush.bf16.msra.mxu0 %v11411_v4  ;;  %v9382_v9 = vld [vmem:[#allocation3 + $0x30] sm:$0xe]  ;;  %v11378_v52 = vld [vmem:[#allocation9 + $0x148] sm:$0xff] }
 0x3c5   : > { %v9576_v25 = vunpack.c.l.b16 %v9457_v62  ;;  %8267 = vmatpush.bf16.msra.mxu2 %v11379_v61  ;;  %v14241_v6 = vunpack.c.l.b16 %v7442_v42  ;;  %v14246_v44 = vunpack.c.l.b16 %v7432_v34  ;;  %v11402_v13 = vld [vmem:[#allocation9 + $0x188] sm:$0xff]  ;;  %v15630_v36 = vrot.slane %v14157_v14, 9  ;;  %v11377_v62 = vld [vmem:[#allocation9 + $0x140] sm:$0xff] }
 0x3c6   : > { %7859 = vmatmul.bf16.gmra.mxu1 %v7759_v51  ;;  %v6876_v20 = vpop.f32.mrf.mxu3  ;;  %v14226_v51 = vpack.c.b16 %v8161_v26, %v8160_v33  ;;  %v11319_v26 = vld [vmem:[#allocation3 + $0xa8] sm:$0xff]  ;;  %v11410_v61 = vld [vmem:[#allocation9 + $0x1c8] sm:$0xff]  ;;  %v9462_v42 = vrot.slane %v15509_v58, 4  ;;  %v9463_v4 = vrot.slane %v14234_v11, 5  ;;  %v7463_v34 = vshll.u32 %v14185_v63, 16 }
 0x3c7   : > { %v6498_v16 = vpop.f32.mrf.mxu2  ;;  %v14237_v21 = vpack.c.b16 %v9576_v25, %v9575_v54  ;;  %v14257_v54 = vrot.slane %v7453_v59, 5  ;;  %v14259_v25 = vrot.slane %v7457_v22, 4  ;;  %v6708_v14 = vrot.slane %v15510_v7, 4  ;;  %v14265_v58 = vld [vmem:[#allocation3 + $0x58] sm:$0xf]  ;;  %8583 = vmatpush.bf16.msra.mxu3 %v11402_v13 }
 0x3c8   : > { %15626 = vst [vmem:[#allocation30_spill] sm:$0xff] %v14226_v51  ;;  %v6499_v30 = vadd.f32 %v6498_v16, %v13976_v0  ;;  %v11359_v0 = vld [vmem:[#allocation3 + $0xb4] sm:$0xff]  ;;  %v9464_v59 = vsel %vm12316_vm14, %v9462_v42, %v9463_v4  ;;  %v7760_v63 = vpack.c.b16 %v14241_v6, %v14246_v44  ;;  %9265 = vmatpush.bf16.msra.mxu0 %v11410_v61  ;;  %v8756_v4 = vshll.u32 %v14130_v27, 16  ;;  %v14278_v44 = vld [vmem:[#allocation3 + $0x5c] sm:$0x1] }
 0x3c9   : > { %15627 = vst [vmem:[#allocation35_spill] sm:$0xff] %v14237_v21  ;;  %8268 = vmatpush.bf16.msra.mxu2 %v11378_v52  ;;  %v7963_v21 = vld [vmem:[#allocation3 + $0x54] sm:$0xe]  ;;  %v8760_v6 = vshrl.u32 %v14130_v27, 16  ;;  %v15632_v7 = vrot.slane %v14207_v55, 5 }
 0x3ca   : > { %v14239_v33 = vadd.f32 %v6876_v20, %v6499_v30  ;;  %v14252_v20 = vsel %vm12316_vm14, %v15630_v36, %v8023_v19  ;;  %v8025_v30 = vrot.slane %v8023_v19, 4  ;;  %v7450_v36 = vor.u32 %v7449_v5, %v14230_v2  ;;  %v6566_v19 = vld [vmem:[#allocation3 + $0xb4] sm:$0xe]  ;;  %v14273_v52 = vpop.f32.mrf.mxu0 }
 0x3cb   : > { %v14244_v16 = vpop.f32.mrf.mxu1  ;;  %6918 = vmatmul.bf16.gmra.mxu3 %v6774_v43  ;;  %v8698_v43 = vld [vmem:[#allocation3 + $0x18] sm:$0xf]  ;;  %v8065_v2 = vrot.slane %v14265_v58, 5  ;;  %v11133_v5 = vrot.slane %v9382_v9, 9  ;;  %15631 = vst [vmem:[#allocation38_spill] sm:$0xff] %v14273_v52  ;;  %v10961_v12 = vrot.slane %v7963_v21, 9 }
 0x3cc   : > { %15628 = vst [vmem:[#allocation36_spill] sm:$0xff] %v14239_v33  ;;  %6540 = vmatmul.bf16.gmra.mxu2 %v11319_v26  ;;  %v11401_v26 = vld [vmem:[#allocation9 + $0x180] sm:$0xff]  ;;  %v6709_v33 = vrot.slane %v13995_v38, 5  ;;  %v8747_v42 = vshrl.u32 %v8698_v43, 16  ;;  %v8750_v61 = vshll.u32 %v8698_v43, 16  ;;  %v10794_v52 = vrot.slane %v6566_v19, 9 }
 0x3cd   : > { %15629 = vst [vmem:[#allocation37_spill] sm:$0xff] %v14244_v16  ;;  %7232 = vmatmul.bf16.gmra.mxu0 %v11359_v0  ;;  %v11409_v0 = vld [vmem:[#allocation9 + $0x1c0] sm:$0xff]  ;;  %v9461_v9 = vsel %vm12316_vm14, %v11133_v5, %v15632_v7  ;;  %v7451_v51 = vrot.slane %v7450_v36, 4  ;;  %8269 = vmatpush.bf16.msra.mxu2 %v11377_v62  ;;  %v9578_v16 = vunpack.c.l.b16 %v9464_v59  ;;  %v8067_v27 = vrot.slane %v8065_v2, 4  ;;  %v14298_v62 = vld [vmem:[#allocation3 + $0x40] sm:$0xf] }
 0x3ce   : > { %v6879_v22 = vpop.f32.mrf.mxu3  ;;  %v6710_v38 = vsel %vm12316_vm14, %v6708_v14, %v6709_v33  ;;  %8584 = vmatpush.bf16.msra.mxu3 %v11401_v26  ;;  %9266 = vmatpush.bf16.msra.mxu0 %v11409_v0  ;;  %v7460_v7 = vor.u32 %v14259_v25, %v14257_v54  ;;  %v14296_v43 = vrot.slane %v8756_v4, 5  ;;  %v8762_v33 = vrot.slane %v8760_v6, 4  ;;  %v9383_v5 = vld [vmem:[#allocation3 + $0x3c] sm:$0xe] }
 0x3cf   : > { %v6501_v15 = vpop.f32.mrf.mxu2  ;;  %v9577_v14 = vunpack.c.l.b16 %v9461_v9  ;;  %v15634_v36 = vrot.slane %v13991_v49, 5  ;;  %v6759_v26 = vunpack.c.l.b16 %v6710_v38  ;;  %v7456_v49 = vsel %vm12048_vm11, %v7451_v51, %v14257_v54 }
 0x3d0   : > { %v6502_v13 = vadd.f32 %v6501_v15, %v13993_v60  ;;  %v8066_v60 = vsel %vm12316_vm14, %v10961_v12, %v8065_v2  ;;  %v8068_v15 = vrot.slane %v14278_v44, 5  ;;  %v8749_v12 = vrot.slane %v8747_v42, 4 }
 0x3d1   : > { %v6707_v59 = vsel %vm12316_vm14, %v10794_v52, %v15634_v36  ;;  %v8162_v0 = vunpack.c.l.b16 %v8066_v60  ;;  %v14306_v25 = vpack.c.b16 %v9578_v16, %v9577_v14  ;;  %v7465_v6 = vrot.slane %v7463_v34, 5 }
 0x3d2   : > { %v14287_v57 = vadd.f32 %v6879_v22, %v6502_v13  ;;  %v8752_v22 = vrot.slane %v8750_v61, 5  ;;  %v8069_v19 = vsel %vm12316_vm14, %v8067_v27, %v8068_v15  ;;  %v15636_v52 = vrot.slane %v14027_v8, 5  ;;  %v11421_v13 = vld [vmem:[#allocation9 + $0x220] sm:$0xff]  ;;  %v8701_v61 = vld [vmem:[#allocation3 + $0x24] sm:$0xf] }
 0x3d3   : > { %v14292_v21 = vpop.f32.mrf.mxu1  ;;  %v8163_v2 = vunpack.c.l.b16 %v8069_v19  ;;  %15635 = vst [vmem:[#allocation40_spill] sm:$0xff] %v14306_v25  ;;  %v9467_v9 = vrot.slane %v14298_v62, 5  ;;  %v6758_v38 = vunpack.c.l.b16 %v6707_v59  ;;  %v7461_v60 = vrot.slane %v7460_v7, 4  ;;  %v14319_v27 = vld [vmem:[#allocation3 + $0x44] sm:$0x1]  ;;  %9688 = vmatpush.bf16.msra.mxu1 %v11421_v13  ;;  %v11320_v19 = vld [vmem:[#allocation3 + $0xb4] sm:$0xff] }
 0x3d4   : > { %15633 = vst [vmem:[#allocation39_spill] sm:$0xff] %v14287_v57  ;;  %v14315_v42 = vsel %vm12316_vm14, %v8025_v30, %v15636_v52  ;;  %v8753_v8 = vor.u32 %v8752_v22, %v8749_v12  ;;  %v8766_v54 = vshll.u32 %v14138_v3, 16  ;;  %v11134_v34 = vrot.slane %v9383_v5, 9  ;;  %v14325_v30 = vpop.f32.mrf.mxu0  ;;  %v11360_v22 = vld [vmem:[#allocation3 + $0xc0] sm:$0xff] }
 0x3d5   : > { %v14321_v15 = vpack.c.b16 %v8163_v2, %v8162_v0  ;;  %15638 = vst [vmem:[#allocation42_spill] sm:$0xff] %v14325_v30  ;;  %v6775_v14 = vpack.c.b16 %v6759_v26, %v6758_v38  ;;  %v14327_v36 = vunpack.c.l.b16 %v7456_v49  ;;  %v8151_v7 = vunpack.c.l.b16 %v14315_v42  ;;  %v7293_v42 = vld [vmem:[#allocation3 + $0x54] sm:$0xf] }
 0x3d6   : > { %7864 = vmatmul.bf16.gmra.mxu1 %v7760_v63  ;;  %v6881_v4 = vpop.f32.mrf.mxu3  ;;  %v8763_v63 = vor.u32 %v8762_v33, %v14296_v43  ;;  %v8771_v59 = vshrl.u32 %v8701_v61, 16  ;;  %v9468_v0 = vsel %vm12316_vm14, %v11134_v34, %v9467_v9  ;;  %v9470_v12 = vrot.slane %v14319_v27, 5 }
 0x3d7   : > { %v6503_v16 = vpop.f32.mrf.mxu2  ;;  %15637 = vst [vmem:[#allocation41_spill] sm:$0xff] %v14321_v15  ;;  %v7466_v26 = vsel %vm12048_vm11, %v7461_v60, %v7465_v6  ;;  %v8774_v5 = vshll.u32 %v8701_v61, 16  ;;  %v8780_v49 = vshll.u32 %v14176_v32, 16  ;;  %v8768_v52 = vrot.slane %v8766_v54, 5  ;;  %v7964_v6 = vld [vmem:[#allocation3 + $0x60] sm:$0xe] }
 0x3d8   : > { %v6504_v51 = vadd.f32 %v6503_v16, %v14011_v23  ;;  %v9469_v23 = vrot.slane %v9467_v9, 4  ;;  %v8764_v2 = vrot.slane %v8763_v63, 4  ;;  %v8784_v13 = vshrl.u32 %v14176_v32, 16  ;;  %v14352_v54 = vld [vmem:[#allocation3 + $0x4c] sm:$0xf] }
 0x3d9   : > { %v7477_v16 = vshll.u32 %v14265_v58, 16  ;;  %v7481_v38 = vshrl.u32 %v14265_v58, 16  ;;  %v9579_v61 = vunpack.c.l.b16 %v9468_v0  ;;  %v7735_v34 = vunpack.c.l.b16 %v7466_v26 }
 0x3da   : > { %v14330_v33 = vadd.f32 %v6881_v4, %v6504_v51  ;;  %v8754_v4 = vrot.slane %v8753_v8, 4  ;;  %v9471_v9 = vsel %vm12316_vm14, %v9469_v23, %v9470_v12  ;;  %v14345_v51 = vld [vmem:[#allocation3 + $0x64] sm:$0xf]  ;;  %v14350_v32 = vrot.slane %v8771_v59, 4  ;;  %v14361_v12 = vld [vmem:[#allocation3 + $0x68] sm:$0x1] }
 0x3db   : > { %v14335_v3 = vpop.f32.mrf.mxu1  ;;  %6923 = vmatmul.bf16.gmra.mxu3 %v6775_v14  ;;  %v9580_v60 = vunpack.c.l.b16 %v9471_v9  ;;  %v8072_v14 = vrot.slane %v14345_v51, 5  ;;  %v8769_v58 = vsel %vm12048_vm11, %v8764_v2, %v8768_v52  ;;  %v14357_v23 = vrot.slane %v8774_v5, 5 }
 0x3dc   : > { %15639 = vst [vmem:[#allocation43_spill] sm:$0xff] %v14330_v33  ;;  %6545 = vmatmul.bf16.gmra.mxu2 %v11320_v19  ;;  %v8759_v8 = vsel %vm12048_vm11, %v8754_v4, %v14296_v43  ;;  %v14359_v0 = vrot.slane %v8780_v49, 5  ;;  %v7468_v59 = vshrl.u32 %v7293_v42, 16  ;;  %v7471_v26 = vshll.u32 %v7293_v42, 16 }
 0x3dd   : > { %7237 = vmatmul.bf16.gmra.mxu0 %v11360_v22  ;;  %v14363_v22 = vpack.c.b16 %v9580_v60, %v9579_v61  ;;  %v10962_v4 = vrot.slane %v7964_v6, 9  ;;  %v14366_v9 = vrot.slane %v7477_v16, 5  ;;  %v7483_v25 = vrot.slane %v7481_v38, 4  ;;  %v14374_v61 = vpop.f32.mrf.mxu0  ;;  %v9384_v6 = vld [vmem:[#allocation3 + $0x48] sm:$0xe] }
 0x3de   : > { %v6884_v63 = vpop.f32.mrf.mxu3  ;;  %v8786_v30 = vrot.slane %v8784_v13, 4  ;;  %v9474_v33 = vrot.slane %v14352_v54, 5  ;;  %v8074_v49 = vrot.slane %v8072_v14, 4  ;;  %v8075_v52 = vrot.slane %v14361_v12, 5  ;;  %15642 = vst [vmem:[#allocation46_spill] sm:$0xff] %v14374_v61 }
 0x3df   : > { %v6506_v19 = vpop.f32.mrf.mxu2  ;;  %15640 = vst [vmem:[#allocation44_spill] sm:$0xff] %v14363_v22  ;;  %v8073_v5 = vsel %vm12316_vm14, %v10962_v4, %v8072_v14  ;;  %v7761_v42 = vpack.c.b16 %v7735_v34, %v14327_v36  ;;  %v15643_v16 = vunpack.c.l.b16 %v14252_v20  ;;  %v9147_v13 = vunpack.c.l.b16 %v8759_v8  ;;  %v14386_v22 = vld [vmem:[#allocation3 + $0x50] sm:$0x1] }
 0x3e0   : > { %v6507_v43 = vadd.f32 %v6506_v19, %v14025_v28  ;;  %v9148_v60 = vunpack.c.l.b16 %v8769_v58  ;;  %v7473_v19 = vrot.slane %v7471_v26, 5  ;;  %v7484_v14 = vor.u32 %v7483_v25, %v14366_v9  ;;  %v8704_v34 = vld [vmem:[#allocation3 + $0x30] sm:$0xf] }
 0x3e1   : > { %v8182_v38 = vpack.c.b16 %v8151_v7, %v15643_v16  ;;  %v8777_v4 = vor.u32 %v14357_v23, %v14350_v32  ;;  %v8164_v61 = vunpack.c.l.b16 %v8073_v5  ;;  %v8787_v7 = vor.u32 %v8786_v30, %v14359_v0  ;;  %v11385_v16 = vld [vmem:[#allocation3 + $0x18] sm:$0xff] }
 0x3e2   : > { %v14369_v2 = vadd.f32 %v6884_v63, %v6507_v43  ;;  %v7470_v63 = vrot.slane %v7468_v59, 4  ;;  %v8076_v43 = vsel %vm12316_vm14, %v8074_v49, %v8075_v52  ;;  %v8804_v8 = vshll.u32 %v14207_v55, 16 }
 0x3e3   : > { %v14376_v28 = vpop.f32.mrf.mxu1  ;;  %v8165_v36 = vunpack.c.l.b16 %v8076_v43  ;;  %v11135_v58 = vrot.slane %v9384_v6, 9  ;;  %v9476_v59 = vrot.slane %v9474_v33, 4  ;;  %v7487_v49 = vshll.u32 %v14278_v44, 16 }
 0x3e4   : > { %15641 = vst [vmem:[#allocation45_spill] sm:$0xff] %v14369_v2  ;;  %v8790_v25 = vshll.u32 %v14193_v50, 16  ;;  %v8808_v32 = vshrl.u32 %v14207_v55, 16  ;;  %v7474_v52 = vor.u32 %v7473_v19, %v7470_v63  ;;  %v9179_v6 = vpack.c.b16 %v9148_v60, %v9147_v13 }
 0x3e5   : > { %v14393_v23 = vpack.c.b16 %v8165_v36, %v8164_v61  ;;  %v9475_v30 = vsel %vm12316_vm14, %v11135_v58, %v9474_v33  ;;  %v7485_v43 = vrot.slane %v7484_v14, 4  ;;  %v8795_v2 = vshrl.u32 %v8704_v34, 16  ;;  %v7296_v36 = vld [vmem:[#allocation3 + $0x60] sm:$0xf]  ;;  %v14413_v58 = vld [vmem:[#allocation3 + $0x70] sm:$0xf] }
 0x3e6   : > { %7869 = vmatmul.bf16.gmra.mxu1 %v7761_v42  ;;  %v6886_v20 = vpop.f32.mrf.mxu3  ;;  %v9477_v42 = vrot.slane %v14386_v22, 5  ;;  %v8798_v57 = vshll.u32 %v8704_v34, 16  ;;  %v8788_v50 = vrot.slane %v8787_v7, 4  ;;  %v14401_v15 = vrot.slane %v8804_v8, 5 }
 0x3e7   : > { %v6508_v26 = vpop.f32.mrf.mxu2  ;;  %v7489_v61 = vrot.slane %v7487_v49, 5  ;;  %v8810_v33 = vrot.slane %v8808_v32, 4  ;;  %v9581_v63 = vunpack.c.l.b16 %v9475_v30  ;;  %v7475_v13 = vrot.slane %v7474_v52, 4  ;;  %v14423_v32 = vld [vmem:[#allocation3 + $0x58] sm:$0xf] }
 0x3e8   : > { %v6509_v5 = vadd.f32 %v6508_v26, %v14036_v45  ;;  %v9478_v55 = vsel %vm12316_vm14, %v9476_v59, %v9477_v42  ;;  %v8778_v60 = vrot.slane %v8777_v4, 4  ;;  %v8792_v14 = vrot.slane %v8790_v25, 5  ;;  %v7965_v59 = vld [vmem:[#allocation3 + $0x6c] sm:$0xe] }
 0x3e9   : > { %v9582_v19 = vunpack.c.l.b16 %v9478_v55  ;;  %v7490_v7 = vsel %vm12048_vm11, %v7485_v43, %v7489_v61  ;;  %v7501_v34 = vshll.u32 %v14345_v51, 16  ;;  %v7505_v8 = vshrl.u32 %v14345_v51, 16 }
 0x3ea   : > { %v14399_v44 = vadd.f32 %v6886_v20, %v6509_v5  ;;  %v14407_v20 = vpop.f32.mrf.mxu0  ;;  %v7480_v4 = vsel %vm12048_vm11, %v7475_v13, %v14366_v9  ;;  %v8783_v49 = vsel %vm12048_vm11, %v8778_v60, %v14359_v0  ;;  %v8797_v25 = vrot.slane %v8795_v2, 4 }
 0x3eb   : > { %v14405_v45 = vpop.f32.mrf.mxu1  ;;  %8585 = vmatmul.bf16.vlgmr.msra.gmra.mxu3 %v11385_v16  ;;  %15644 = vst [vmem:[#allocation47_spill] sm:$0xff] %v14407_v20  ;;  %v14415_v26 = vpack.c.b16 %v9582_v19, %v9581_v63  ;;  %v8079_v5 = vrot.slane %v14413_v58, 5  ;;  %v8793_v52 = vsel %vm12048_vm11, %v8788_v50, %v8792_v14  ;;  %v7492_v30 = vshrl.u32 %v7296_v36, 16 }
 0x3ec   : > { %8270 = vmatmul.bf16.vlgmr.msra.gmra.mxu2 %v8182_v38  ;;  %v8800_v42 = vrot.slane %v8798_v57, 5  ;;  %v8811_v16 = vor.u32 %v8810_v33, %v14401_v15  ;;  %v7737_v43 = vunpack.c.l.b16 %v7490_v7  ;;  %v7495_v55 = vshll.u32 %v7296_v36, 16  ;;  %v9385_v7 = vld [vmem:[#allocation3 + $0x54] sm:$0xe] }
 0x3ed   : > { %9267 = vmatmul.bf16.vlgmr.msra.gmra.mxu0 %v9179_v6  ;;  %15645 = vst [vmem:[#allocation48_spill] sm:$0xff] %v14415_v26  ;;  %v14429_v6 = vld [vmem:[#allocation3 + $0x74] sm:$0x1]  ;;  %v10963_v0 = vrot.slane %v7965_v59, 9  ;;  %v7736_v2 = vunpack.c.l.b16 %v7480_v4  ;;  %v14432_v61 = vrot.slane %v7501_v34, 5  ;;  %v7507_v63 = vrot.slane %v7505_v8, 4 }
 0x3ee   : > { %v6889_v38 = vpop.f32.mrf.mxu3  ;;  %v9481_v19 = vrot.slane %v14423_v32, 5  ;;  %v8081_v50 = vrot.slane %v8079_v5, 4  ;;  %v8082_v33 = vrot.slane %v14429_v6, 5  ;;  %v9150_v14 = vunpack.c.l.b16 %v8793_v52  ;;  %v11420_v52 = vld [vmem:[#allocation9 + $0x218] sm:$0xff] }
 0x3ef   : > { %v6511_v51 = vpop.f32.mrf.mxu2  ;;  %v8080_v57 = vsel %vm12316_vm14, %v10963_v0, %v8079_v5  ;;  %v8814_v36 = vshll.u32 %v14234_v11, 16  ;;  %v7762_v34 = vpack.c.b16 %v7737_v43, %v7736_v2  ;;  %v7494_v59 = vrot.slane %v7492_v30, 4  ;;  %9689 = vmatpush.bf16.msra.mxu1 %v11420_v52 }
 0x3f0   : > { %v6512_v9 = vadd.f32 %v6511_v51, %v14053_v41  ;;  %v9149_v41 = vunpack.c.l.b16 %v8783_v49  ;;  %v7497_v8 = vrot.slane %v7495_v55, 5  ;;  %v7508_v4 = vor.u32 %v7507_v63, %v14432_v61 }
 0x3f1   : > { %v8801_v51 = vor.u32 %v8800_v42, %v8797_v25  ;;  %v8166_v5 = vunpack.c.l.b16 %v8080_v57  ;;  %v8812_v49 = vrot.slane %v8811_v16, 4  ;;  %v11136_v11 = vrot.slane %v9385_v7, 9 }
 0x3f2   : > { %v14435_v13 = vadd.f32 %v6889_v38, %v6512_v9  ;;  %v8083_v38 = vsel %vm12316_vm14, %v8081_v50, %v8082_v33  ;;  %v14446_v9 = vld [vmem:[#allocation3 + $0x5c] sm:$0x1]  ;;  %v9483_v20 = vrot.slane %v9481_v19, 4  ;;  %v14448_v43 = vpop.f32.mrf.mxu0  ;;  %v9180_v55 = vpack.c.b16 %v9150_v14, %v9149_v41  ;;  %v11386_v33 = vld [vmem:[#allocation3 + $0x24] sm:$0xff] }
 0x3f3   : > { %v14440_v60 = vpop.f32.mrf.mxu1  ;;  %v8167_v0 = vunpack.c.l.b16 %v8083_v38  ;;  %15647 = vst [vmem:[#allocation50_spill] sm:$0xff] %v14448_v43  ;;  %v7511_v2 = vshll.u32 %v14361_v12, 16  ;;  %v8816_v50 = vrot.slane %v8814_v36, 5  ;;  %v7498_v42 = vor.u32 %v7497_v8, %v7494_v59 }
 0x3f4   : > { %15646 = vst [vmem:[#allocation49_spill] sm:$0xff] %v14435_v13  ;;  %v8707_v13 = vld [vmem:[#allocation3 + $0x3c] sm:$0xf]  ;;  %v9482_v16 = vsel %vm12316_vm14, %v11136_v11, %v9481_v19  ;;  %v9484_v57 = vrot.slane %v14446_v9, 5  ;;  %v7509_v7 = vrot.slane %v7508_v4, 4  ;;  %v8828_v14 = vshll.u32 %v14298_v62, 16 }
 0x3f5   : > { %v14451_v63 = vpack.c.b16 %v8167_v0, %v8166_v5  ;;  %v8819_v38 = vshrl.u32 %v8707_v13, 16  ;;  %v8822_v43 = vshll.u32 %v8707_v13, 16  ;;  %v8817_v12 = vsel %vm12048_vm11, %v8812_v49, %v8816_v50  ;;  %v14475_v49 = vld [vmem:[#allocation3 + $0x7c] sm:$0xf] }
 0x3f6   : > { %7874 = vmatmul.bf16.gmra.mxu1 %v7762_v34  ;;  %v6891_v26 = vpop.f32.mrf.mxu3  ;;  %v8802_v34 = vrot.slane %v8801_v51, 4  ;;  %v7513_v19 = vrot.slane %v7511_v2, 5  ;;  %v8832_v59 = vshrl.u32 %v14298_v62, 16  ;;  %v9583_v8 = vunpack.c.l.b16 %v9482_v16  ;;  %v7299_v51 = vld [vmem:[#allocation3 + $0x6c] sm:$0xf] }
 0x3f7   : > { %v6513_v30 = vpop.f32.mrf.mxu2  ;;  %v7525_v5 = vshll.u32 %v14413_v58, 16  ;;  %v7529_v0 = vshrl.u32 %v14413_v58, 16  ;;  %v7966_v62 = vld [vmem:[#allocation3 + $0x78] sm:$0xe]  ;;  %v8086_v2 = vrot.slane %v14475_v49, 5  ;;  %v8824_v58 = vrot.slane %v8822_v43, 5 }
 0x3f8   : > { %v6514_v25 = vadd.f32 %v6513_v30, %v14066_v24  ;;  %v9485_v24 = vsel %vm12316_vm14, %v9483_v20, %v9484_v57  ;;  %v8807_v13 = vsel %vm12048_vm11, %v8802_v34, %v14401_v15  ;;  %v7514_v20 = vsel %vm12048_vm11, %v7509_v7, %v7513_v19  ;;  %v14489_v57 = vld [vmem:[#allocation3 + $0x80] sm:$0x1] }
 0x3f9   : > { %v9584_v4 = vunpack.c.l.b16 %v9485_v24  ;;  %v14482_v15 = vunpack.c.l.b16 %v8817_v12  ;;  %v8821_v30 = vrot.slane %v8819_v38, 4  ;;  %v8834_v16 = vrot.slane %v8832_v59, 4 }
 0x3fa   : > { %v14457_v41 = vadd.f32 %v6891_v26, %v6514_v25  ;;  %v7499_v26 = vrot.slane %v7498_v42, 4  ;;  %v7516_v25 = vshrl.u32 %v7299_v51, 16  ;;  %v14487_v42 = vrot.slane %v8828_v14, 5  ;;  %v14492_v12 = vpop.f32.mrf.mxu0 }
 0x3fb   : > { %v14464_v36 = vpop.f32.mrf.mxu1  ;;  %8590 = vmatmul.bf16.gmra.mxu3 %v11386_v33  ;;  %v14477_v52 = vpack.c.b16 %v9584_v4, %v9583_v8  ;;  %v7739_v7 = vunpack.c.l.b16 %v7514_v20  ;;  %v7519_v34 = vshll.u32 %v7299_v51, 16  ;;  %15649 = vst [vmem:[#allocation52_spill] sm:$0xff] %v14492_v12  ;;  %v14494_v24 = vrot.slane %v7525_v5, 5 }
 0x3fc   : > { %8275 = vmatmul.bf16.gmra.mxu2 %v14075_v53  ;;  %v7504_v11 = vsel %vm12048_vm11, %v7499_v26, %v14432_v61  ;;  %v10964_v61 = vrot.slane %v7966_v62, 9  ;;  %v7531_v19 = vrot.slane %v7529_v0, 4  ;;  %v8088_v14 = vrot.slane %v8086_v2, 4  ;;  %v9386_v62 = vld [vmem:[#allocation3 + $0x60] sm:$0xe] }
 0x3fd   : > { %9272 = vmatmul.bf16.gmra.mxu0 %v9180_v55  ;;  %15648 = vst [vmem:[#allocation51_spill] sm:$0xff] %v14477_v52  ;;  %v14484_v55 = vld [vmem:[#allocation3 + $0x64] sm:$0xf]  ;;  %v7738_v38 = vunpack.c.l.b16 %v7504_v11  ;;  %v8089_v59 = vrot.slane %v14489_v57, 5  ;;  %v9151_v26 = vunpack.c.l.b16 %v8807_v13  ;;  %v8825_v51 = vor.u32 %v8824_v58, %v8821_v30  ;;  %v8710_v58 = vld [vmem:[#allocation3 + $0x48] sm:$0xf] }
 0x3fe   : > { %v6894_v53 = vpop.f32.mrf.mxu3  ;;  %v9488_v8 = vrot.slane %v14484_v55, 5  ;;  %v8087_v43 = vsel %vm12316_vm14, %v10964_v61, %v8086_v2  ;;  %v8835_v20 = vor.u32 %v8834_v16, %v14487_v42  ;;  %v7518_v11 = vrot.slane %v7516_v25, 4  ;;  %v14509_v2 = vld [vmem:[#allocation3 + $0x68] sm:$0x1] }
 0x3ff   : > { %v6516_v50 = vpop.f32.mrf.mxu2  ;;  %v7763_v5 = vpack.c.b16 %v7739_v7, %v7738_v38  ;;  %v7521_v0 = vrot.slane %v7519_v34, 5  ;;  %v8168_v61 = vunpack.c.l.b16 %v8087_v43  ;;  %v9181_v30 = vpack.c.b16 %v14482_v15, %v9151_v26 }
 0x400   : > { %v6517_v33 = vadd.f32 %v6516_v50, %v14087_v31  ;;  %v7532_v50 = vor.u32 %v7531_v19, %v14494_v24  ;;  %v11137_v16 = vrot.slane %v9386_v62, 9  ;;  %v9490_v7 = vrot.slane %v9488_v8, 4 }
 0x401   : > { %v7535_v34 = vshll.u32 %v14429_v6, 16  ;;  %v8826_v38 = vrot.slane %v8825_v51, 4  ;;  %v7522_v19 = vor.u32 %v7521_v0, %v7518_v11  ;;  %v8843_v6 = vshrl.u32 %v8710_v58, 16 }
 0x402   : > { %v14497_v4 = vadd.f32 %v6894_v53, %v6517_v33  ;;  %v8090_v53 = vsel %vm12316_vm14, %v8088_v14, %v8089_v59  ;;  %v8838_v33 = vshll.u32 %v14319_v27, 16  ;;  %v8836_v14 = vrot.slane %v8835_v20, 4  ;;  %v14527_v11 = vpop.f32.mrf.mxu0 }
 0x403   : > { %v14502_v31 = vpop.f32.mrf.mxu1  ;;  %v8169_v52 = vunpack.c.l.b16 %v8090_v53  ;;  %v9489_v43 = vsel %vm12316_vm14, %v11137_v16, %v9488_v8  ;;  %v11387_v53 = vld [vmem:[#allocation3 + $0x30] sm:$0xff]  ;;  %v7533_v15 = vrot.slane %v7532_v50, 4  ;;  %v8831_v26 = vsel %vm12048_vm11, %v8826_v38, %v14487_v42  ;;  %15652 = vst [vmem:[#allocation55_spill] sm:$0xff] %v14527_v11  ;;  %v7302_v16 = vld [vmem:[#allocation3 + $0x78] sm:$0xf] }
 0x404   : > { %15650 = vst [vmem:[#allocation53_spill] sm:$0xff] %v14497_v4  ;;  %v8840_v62 = vrot.slane %v8838_v33, 5  ;;  %v8852_v20 = vshll.u32 %v14352_v54, 16  ;;  %v7537_v0 = vrot.slane %v7535_v34, 5  ;;  %v8856_v50 = vshrl.u32 %v14352_v54, 16 }
 0x405   : > { %v14513_v59 = vpack.c.b16 %v8169_v52, %v8168_v61  ;;  %v8846_v52 = vshll.u32 %v8710_v58, 16  ;;  %v9585_v61 = vunpack.c.l.b16 %v9489_v43  ;;  %v7523_v33 = vrot.slane %v7522_v19, 4  ;;  %v14541_v54 = vld [vmem:[#allocation3 + $0x88] sm:$0xf]  ;;  %v7967_v38 = vld [vmem:[#allocation3 + $0x84] sm:$0xe] }
 0x406   : > { %7879 = vmatmul.bf16.gmra.mxu1 %v7763_v5  ;;  %v6896_v13 = vpop.f32.mrf.mxu3  ;;  %v9491_v5 = vrot.slane %v14509_v2, 5  ;;  %v14535_v58 = vunpack.c.l.b16 %v8831_v26  ;;  %v7553_v34 = vshrl.u32 %v14475_v49, 16  ;;  %v8845_v19 = vrot.slane %v8843_v6, 4 }
 0x407   : > { %v6518_v25 = vpop.f32.mrf.mxu2  ;;  %v8848_v43 = vrot.slane %v8846_v52, 5  ;;  %v14551_v26 = vrot.slane %v8852_v20, 5 }
 0x408   : > { %v6519_v27 = vadd.f32 %v6518_v25, %v14104_v35  ;;  %v9492_v35 = vsel %vm12316_vm14, %v9490_v7, %v9491_v5  ;;  %v7538_v7 = vsel %vm12048_vm11, %v7533_v15, %v7537_v0  ;;  %v7549_v25 = vshll.u32 %v14475_v49, 16 }
 0x409   : > { %v9586_v42 = vunpack.c.l.b16 %v9492_v35  ;;  %v7540_v15 = vshrl.u32 %v7302_v16, 16  ;;  %v8858_v49 = vrot.slane %v8856_v50, 4  ;;  %v7741_v0 = vunpack.c.l.b16 %v7538_v7 }
 0x40a   : > { %v14522_v51 = vadd.f32 %v6896_v13, %v6519_v27  ;;  %v8841_v13 = vsel %vm12048_vm11, %v8836_v14, %v8840_v62  ;;  %v7528_v14 = vsel %vm12048_vm11, %v7523_v33, %v14494_v24  ;;  %v14553_v62 = vld [vmem:[#allocation3 + $0x8c] sm:$0x1]  ;;  %v7243_v24 = vadd.f32 %v13974_v17, %v13987_v29 }
 0x40b   : > { %v14529_v8 = vpop.f32.mrf.mxu1  ;;  %8595 = vmatmul.bf16.gmra.mxu3 %v11387_v53  ;;  %v14543_v27 = vpack.c.b16 %v9586_v42, %v9585_v61  ;;  %v14549_v53 = vunpack.c.l.b16 %v8841_v13  ;;  %v7543_v61 = vshll.u32 %v7302_v16, 16  ;;  %v10965_v42 = vrot.slane %v7967_v38, 9 }
 0x40c   : > { %15651 = vst [vmem:[#allocation54_spill] sm:$0xff] %v14522_v51  ;;  %8280 = vmatmul.bf16.gmra.mxu2 %v14098_v37  ;;  %v7740_v6 = vunpack.c.l.b16 %v7528_v14  ;;  %v14558_v52 = vrot.slane %v7549_v25, 5  ;;  %v7555_v33 = vrot.slane %v7553_v34, 4  ;;  %v7542_v16 = vrot.slane %v7540_v15, 4  ;;  %v9387_v14 = vld [vmem:[#allocation3 + $0x6c] sm:$0xe] }
 0x40d   : > { %9277 = vmatmul.bf16.gmra.mxu0 %v9181_v30  ;;  %15653 = vst [vmem:[#allocation56_spill] sm:$0xff] %v14543_v27  ;;  %v8093_v30 = vrot.slane %v14541_v54, 5  ;;  %v14562_v27 = vld [vmem:[#allocation3 + $0x70] sm:$0xf]  ;;  %v8849_v38 = vor.u32 %v8848_v43, %v8845_v19  ;;  %v8862_v17 = vshll.u32 %v14386_v22, 16  ;;  %v7545_v34 = vrot.slane %v7543_v61, 5 }
 0x40e   : > { %v6899_v37 = vpop.f32.mrf.mxu3  ;;  %v7764_v25 = vpack.c.b16 %v7741_v0, %v7740_v6  ;;  %v9495_v19 = vrot.slane %v14562_v27, 5  ;;  %v9182_v22 = vpack.c.b16 %v14549_v53, %v14535_v58  ;;  %v11419_v15 = vld [vmem:[#allocation9 + $0x210] sm:$0xff]  ;;  %v7559_v61 = vshll.u32 %v14489_v57, 16  ;;  %v8713_v6 = vld [vmem:[#allocation3 + $0x54] sm:$0xf]  ;;  %v11388_v58 = vld [vmem:[#allocation3 + $0x3c] sm:$0xff] }
 0x40f   : > { %v6521_v5 = vpop.f32.mrf.mxu2  ;;  %v8094_v20 = vsel %vm12316_vm14, %v10965_v42, %v8093_v30  ;;  %v8095_v50 = vrot.slane %v8093_v30, 4  ;;  %v7556_v30 = vor.u32 %v7555_v33, %v14558_v52  ;;  %v11138_v33 = vrot.slane %v9387_v14, 9  ;;  %9690 = vmatpush.bf16.msra.mxu1 %v11419_v15 }
 0x410   : > { %v6522_v35 = vadd.f32 %v6521_v5, %v14132_v40  ;;  %v8096_v40 = vrot.slane %v14553_v62, 5  ;;  %v8859_v5 = vor.u32 %v8858_v49, %v14551_v26  ;;  %v8170_v42 = vunpack.c.l.b16 %v8094_v20  ;;  %v14579_v49 = vld [vmem:[#allocation3 + $0x74] sm:$0x1] }
 0x411   : > { %v7557_v53 = vrot.slane %v7556_v30, 4  ;;  %v9497_v57 = vrot.slane %v9495_v19, 4  ;;  %v8870_v30 = vshll.u32 %v8713_v6, 16 }
 0x412   : > { %v14560_v13 = vadd.f32 %v6899_v37, %v6522_v35  ;;  %v8097_v37 = vsel %vm12316_vm14, %v8095_v50, %v8096_v40  ;;  %v14573_v35 = vpop.f32.mrf.mxu0  ;;  %v7546_v40 = vor.u32 %v7545_v34, %v7542_v16  ;;  %v8876_v16 = vshll.u32 %v14423_v32, 16 }
 0x413   : > { %v7845_v7 = vpop.f32.mrf.mxu1  ;;  %15655 = vst [vmem:[#allocation58_spill] sm:$0xff] %v14573_v35  ;;  %v7561_v34 = vrot.slane %v7559_v61, 5  ;;  %v7573_v61 = vshll.u32 %v14541_v54, 16 }
 0x414   : > { %15654 = vst [vmem:[#allocation57_spill] sm:$0xff] %v14560_v13  ;;  %v14569_v29 = vadd.f32 %v7845_v7, %v7243_v24  ;;  %v8171_v13 = vunpack.c.l.b16 %v8097_v37  ;;  %v14582_v24 = vrot.slane %v8849_v38, 4  ;;  %v14587_v7 = vrot.slane %v8859_v5, 4  ;;  %v14599_v5 = vld [vmem:[#allocation3 + $0x7c] sm:$0xf] }
 0x415   : > { %v9496_v37 = vsel %vm12316_vm14, %v11138_v33, %v9495_v19  ;;  %v9498_v38 = vrot.slane %v14579_v49, 5  ;;  %v7562_v33 = vsel %vm12048_vm11, %v7557_v53, %v7561_v34  ;;  %v14627_v34 = vld [vmem:[#allocation3 + $0x80] sm:$0x1] }
 0x416   : > { %7884 = vmatmul.bf16.gmra.mxu1 %v7764_v25  ;;  %v6901_v43 = vpop.f32.mrf.mxu3  ;;  %v14584_v50 = vpack.c.b16 %v8171_v13, %v8170_v42  ;;  %v14589_v25 = vrot.slane %v8862_v17, 5  ;;  %v7244_v13 = vadd.f32 %v13989_v1, %v14007_v18  ;;  %v8880_v42 = vshrl.u32 %v14423_v32, 16  ;;  %v7305_v18 = vld [vmem:[#allocation3 + $0x84] sm:$0xf]  ;;  %v9388_v32 = vld [vmem:[#allocation3 + $0x78] sm:$0xe] }
 0x417   : > { %v6523_v0 = vpop.f32.mrf.mxu2  ;;  %v9499_v19 = vsel %vm12316_vm14, %v9497_v57, %v9498_v38  ;;  %v7547_v1 = vrot.slane %v7546_v40, 4  ;;  %v7564_v38 = vshrl.u32 %v7305_v18, 16 }
 0x418   : > { %v6524_v20 = vadd.f32 %v6523_v0, %v14161_v48  ;;  %v8867_v48 = vshrl.u32 %v8713_v6, 16  ;;  %v9588_v0 = vunpack.c.l.b16 %v9499_v19  ;;  %v7577_v6 = vshrl.u32 %v14541_v54, 16  ;;  %v15659_v19 = vld [vmem:[#allocation31_spill] sm:$0xff] }
 0x419   : > { %v7552_v54 = vsel %vm12048_vm11, %v7547_v1, %v14558_v52  ;;  %v9505_v1 = vrot.slane %v14627_v34, 5 }
 0x41a   : > { %v14596_v14 = vadd.f32 %v6901_v43, %v6524_v20  ;;  %v9587_v43 = vunpack.c.l.b16 %v9496_v37  ;;  %v9502_v20 = vrot.slane %v14599_v5, 5  ;;  %v14616_v40 = vrot.slane %v8867_v48, 4  ;;  %v14622_v53 = vpop.f32.mrf.mxu0 }
 0x41b   : > { %v7847_v17 = vpop.f32.mrf.mxu1  ;;  %8600 = vmatmul.bf16.gmra.mxu3 %v11388_v58  ;;  %v14618_v37 = vrot.slane %v8876_v16, 5  ;;  %15658 = vst [vmem:[#allocation61_spill] sm:$0xff] %v14622_v53  ;;  %v8872_v48 = vrot.slane %v8870_v30, 5  ;;  %v11139_v16 = vrot.slane %v9388_v32, 9  ;;  %v7742_v52 = vunpack.c.l.b16 %v7552_v54  ;;  %v8716_v54 = vld [vmem:[#allocation3 + $0x60] sm:$0xf] }
 0x41c   : > { %15656 = vst [vmem:[#allocation59_spill] sm:$0xff] %v14596_v14  ;;  %v14604_v15 = vadd.f32 %v7847_v17, %v7244_v13  ;;  %8285 = vmatmul.bf16.gmra.mxu2 %v14119_v46  ;;  %v8865_v46 = vsel %vm12048_vm11, %v14587_v7, %v14589_v25  ;;  %v7567_v13 = vshll.u32 %v7305_v18, 16  ;;  %v8882_v17 = vrot.slane %v8880_v42, 4 }
 0x41d   : > { %9282 = vmatmul.bf16.gmra.mxu0 %v9182_v22  ;;  %v14620_v22 = vpack.c.b16 %v9588_v0, %v9587_v43  ;;  %v7743_v25 = vunpack.c.l.b16 %v7562_v33  ;;  %v7245_v43 = vadd.f32 %v15659_v19, %v14021_v47  ;;  %v14632_v0 = vrot.slane %v7573_v61, 5 }
 0x41e   : > { %v6904_v58 = vpop.f32.mrf.mxu3  ;;  %v9504_v14 = vrot.slane %v9502_v20, 4  ;;  %v9503_v42 = vsel %vm12316_vm14, %v11139_v16, %v9502_v20  ;;  %v7566_v30 = vrot.slane %v7564_v38, 4  ;;  %v7569_v47 = vrot.slane %v7567_v13, 5 }
 0x41f   : > { %15657 = vst [vmem:[#allocation60_spill] sm:$0xff] %v14620_v22  ;;  %v6526_v57 = vpop.f32.mrf.mxu2  ;;  %v7579_v22 = vrot.slane %v7577_v6, 4  ;;  %v8883_v33 = vor.u32 %v8882_v17, %v14618_v37  ;;  %v7765_v6 = vpack.c.b16 %v7743_v25, %v7742_v52  ;;  %v8886_v32 = vshll.u32 %v14446_v9, 16 }
 0x420   : > { %v6527_v7 = vadd.f32 %v6526_v57, %v14200_v10  ;;  %v8855_v10 = vsel %vm12048_vm11, %v14582_v24, %v14551_v26  ;;  %v9506_v20 = vsel %vm12316_vm14, %v9504_v14, %v9505_v1  ;;  %v8873_v38 = vor.u32 %v8872_v48, %v14616_v40  ;;  %v14659_v40 = vld [vmem:[#allocation3 + $0x88] sm:$0xf]  ;;  %v15664_v48 = vld [vmem:[#allocation33_spill] sm:$0xff] }
 0x421   : > { %v7580_v57 = vor.u32 %v7579_v22, %v14632_v0  ;;  %v9590_v16 = vunpack.c.l.b16 %v9506_v20  ;;  %v9155_v24 = vunpack.c.l.b16 %v8855_v10  ;;  %v7570_v17 = vor.u32 %v7569_v47, %v7566_v30  ;;  %v15665_v30 = vld [vmem:[#allocation32_spill] sm:$0xff] }
 0x422   : > { %v14634_v53 = vadd.f32 %v6904_v58, %v6527_v7  ;;  %v9156_v58 = vunpack.c.l.b16 %v8865_v46  ;;  %v9589_v7 = vunpack.c.l.b16 %v9503_v42  ;;  %v7583_v25 = vshll.u32 %v14553_v62, 16  ;;  %v11389_v46 = vld [vmem:[#allocation3 + $0x48] sm:$0xff]  ;;  %v14655_v1 = vpop.f32.mrf.mxu0 }
 0x423   : > { %v7850_v18 = vpop.f32.mrf.mxu1  ;;  %v8884_v19 = vrot.slane %v8883_v33, 4  ;;  %v8888_v52 = vrot.slane %v8886_v32, 5  ;;  %v8891_v22 = vshrl.u32 %v8716_v54, 16  ;;  %v8894_v10 = vshll.u32 %v8716_v54, 16  ;;  %v9389_v32 = vld [vmem:[#allocation3 + $0x84] sm:$0xe] }
 0x424   : > { %15660 = vst [vmem:[#allocation31_spill] sm:$0xff] %v14634_v53  ;;  %v14644_v61 = vadd.f32 %v7850_v18, %v7245_v43  ;;  %v14652_v9 = vpack.c.b16 %v9590_v16, %v9589_v7  ;;  %v15662_v43 = vld [vmem:[#allocation37_spill] sm:$0xff]  ;;  %v9183_v42 = vpack.c.b16 %v9156_v58, %v9155_v24  ;;  %v7581_v18 = vrot.slane %v7580_v57, 4  ;;  %v15668_v53 = vld [vmem:[#allocation14_spill] sm:$0xff] }
 0x425   : > { %15663 = vst [vmem:[#allocation37_spill] sm:$0xff] %v14655_v1  ;;  %v7246_v62 = vadd.f32 %v15665_v30, %v15664_v48  ;;  %v8900_v33 = vshll.u32 %v14484_v55, 16  ;;  %v8904_v20 = vshrl.u32 %v14484_v55, 16  ;;  %v7571_v16 = vrot.slane %v7570_v17, 4  ;;  %v7308_v24 = vld [vmem:[#allocation3 + $0x90] sm:$0xf] }
 0x426   : > { %7889 = vmatmul.bf16.gmra.mxu1 %v7765_v6  ;;  %v6906_v26 = vpop.f32.mrf.mxu3  ;;  %15661 = vst [vmem:[#allocation62_spill] sm:$0xff] %v14652_v9  ;;  %v14657_v6 = vld [vmem:[#allocation3 + $0x94] sm:$0xf]  ;;  %v7585_v58 = vrot.slane %v7583_v25, 5  ;;  %v8874_v57 = vrot.slane %v8873_v38, 4  ;;  %v8889_v54 = vsel %vm12048_vm11, %v8884_v19, %v8888_v52  ;;  %v9509_v55 = vrot.slane %v14659_v40, 5 }
 0x427   : > { %v6528_v13 = vpop.f32.mrf.mxu2  ;;  %v14674_v48 = vld [vmem:[#allocation3 + $0x8c] sm:$0x1]  ;;  %v8893_v17 = vrot.slane %v8891_v22, 4  ;;  %v8896_v25 = vrot.slane %v8894_v10, 5  ;;  %v11140_v19 = vrot.slane %v9389_v32, 9  ;;  %v7576_v52 = vsel %vm12048_vm11, %v7571_v16, %v14632_v0  ;;  %v15669_v0 = vld [vmem:[#allocation34_spill] sm:$0xff] }
 0x428   : > { %v6529_v14 = vadd.f32 %v6528_v13, %v15662_v43  ;;  %v15667_v43 = vld [vmem:[#allocation23_spill] sm:$0xff]  ;;  %v7586_v38 = vsel %vm12048_vm11, %v7581_v18, %v7585_v58  ;;  %v7588_v30 = vshrl.u32 %v7308_v24, 16  ;;  %v7591_v9 = vshll.u32 %v7308_v24, 16  ;;  %v14703_v1 = vld [vmem:[#allocation3 + $0x98] sm:$0x1] }
 0x429   : > { %v9512_v18 = vrot.slane %v14674_v48, 5  ;;  %v7745_v10 = vunpack.c.l.b16 %v7586_v38  ;;  %v7247_v16 = vadd.f32 %v15669_v0, %v15668_v53  ;;  %v8897_v35 = vor.u32 %v8896_v25, %v8893_v17  ;;  %v11418_v17 = vld [vmem:[#allocation9 + $0x208] sm:$0xff] }
 0x42a   : > { %v14663_v47 = vadd.f32 %v6906_v26, %v6529_v14  ;;  %v7597_v26 = vshll.u32 %v14657_v6, 16  ;;  %v7601_v14 = vshrl.u32 %v14657_v6, 16  ;;  %v7590_v53 = vrot.slane %v7588_v30, 4  ;;  %9691 = vmatpush.bf16.msra.mxu1 %v11418_v17  ;;  %v9390_v17 = vld [vmem:[#allocation3 + $0x90] sm:$0xe] }
 0x42b   : > { %v7852_v7 = vpop.f32.mrf.mxu1  ;;  %8605 = vmatmul.bf16.gmra.mxu3 %v11389_v46  ;;  %v7593_v0 = vrot.slane %v7591_v9, 5  ;;  %v7607_v9 = vshll.u32 %v14703_v1, 16  ;;  %v8928_v25 = vshrl.u32 %v14562_v27, 16 }
 0x42c   : > { %15666 = vst [vmem:[#allocation33_spill] sm:$0xff] %v14663_v47  ;;  %v14669_v13 = vadd.f32 %v7852_v7, %v7246_v62  ;;  %8290 = vmatmul.bf16.gmra.mxu2 %v15667_v43  ;;  %v14682_v62 = vrot.slane %v8900_v33, 5  ;;  %v8906_v7 = vrot.slane %v8904_v20, 4  ;;  %v9511_v47 = vrot.slane %v9509_v55, 4 }
 0x42d   : > { %9287 = vmatmul.bf16.gmra.mxu0 %v9183_v42  ;;  %v9510_v42 = vsel %vm12316_vm14, %v11140_v19, %v9509_v55  ;;  %v14688_v32 = vrot.slane %v7597_v26, 5  ;;  %v7603_v58 = vrot.slane %v7601_v14, 4  ;;  %v8879_v33 = vsel %vm12048_vm11, %v8874_v57, %v14618_v37 }
 0x42e   : > { %v6909_v46 = vpop.f32.mrf.mxu3  ;;  %v14695_v20 = vunpack.c.l.b16 %v8889_v54  ;;  %v9513_v24 = vsel %vm12316_vm14, %v9511_v47, %v9512_v18  ;;  %v7744_v19 = vunpack.c.l.b16 %v7576_v52  ;;  %v9591_v38 = vunpack.c.l.b16 %v9510_v42 }
 0x42f   : > { %v6531_v43 = vpop.f32.mrf.mxu2  ;;  %v9592_v26 = vunpack.c.l.b16 %v9513_v24  ;;  %v8907_v37 = vor.u32 %v8906_v7, %v14682_v62  ;;  %v7604_v47 = vor.u32 %v7603_v58, %v14688_v32  ;;  %v8910_v52 = vshll.u32 %v14509_v2, 16 }
 0x430   : > { %v6532_v22 = vadd.f32 %v6531_v43, %v14292_v21  ;;  %v8719_v21 = vld [vmem:[#allocation3 + $0x6c] sm:$0xf]  ;;  %v14701_v43 = vpop.f32.mrf.mxu0  ;;  %v7766_v54 = vpack.c.b16 %v7745_v10, %v7744_v19  ;;  %v9157_v30 = vunpack.c.l.b16 %v8879_v33  ;;  %v7594_v10 = vor.u32 %v7593_v0, %v7590_v53  ;;  %v11390_v19 = vld [vmem:[#allocation3 + $0x54] sm:$0xff]  ;;  %v15673_v0 = vld [vmem:[#allocation15_spill] sm:$0xff] }
 0x431   : > { %15671 = vst [vmem:[#allocation23_spill] sm:$0xff] %v14701_v43  ;;  %v8915_v42 = vshrl.u32 %v8719_v21, 16  ;;  %v8918_v18 = vshll.u32 %v8719_v21, 16  ;;  %v7605_v21 = vrot.slane %v7604_v47, 4  ;;  %v14729_v53 = vld [vmem:[#allocation3 + $0x94] sm:$0xf] }
 0x432   : > { %v14699_v55 = vadd.f32 %v6909_v46, %v6532_v22  ;;  %v14709_v46 = vpack.c.b16 %v9592_v26, %v9591_v38  ;;  %v8924_v22 = vshll.u32 %v14562_v27, 16  ;;  %v9184_v2 = vpack.c.b16 %v14695_v20, %v9157_v30  ;;  %v14735_v47 = vld [vmem:[#allocation3 + $0xa0] sm:$0xf] }
 0x433   : > { %v7855_v14 = vpop.f32.mrf.mxu1  ;;  %v14719_v38 = vrot.slane %v8897_v35, 4  ;;  %v14721_v26 = vrot.slane %v8910_v52, 5  ;;  %v14723_v33 = vrot.slane %v8915_v42, 4  ;;  %v7609_v20 = vrot.slane %v7607_v9, 5  ;;  %v7968_v52 = vld [vmem:[#allocation3 + $0x90] sm:$0xe] }
 0x434   : > { %15670 = vst [vmem:[#allocation32_spill] sm:$0xff] %v14699_v55  ;;  %v14706_v57 = vadd.f32 %v7855_v14, %v7247_v16  ;;  %v14715_v16 = vrot.slane %v8907_v37, 4  ;;  %v14725_v14 = vrot.slane %v8918_v18, 5  ;;  %v14727_v27 = vrot.slane %v8924_v22, 5  ;;  %v15674_v37 = vld [vmem:[#allocation16_spill] sm:$0xff] }
 0x435   : > { %15672 = vst [vmem:[#allocation14_spill] sm:$0xff] %v14709_v46  ;;  %v14737_v35 = vrot.slane %v8928_v25, 4  ;;  %v7595_v42 = vrot.slane %v7594_v10, 4  ;;  %v8948_v9 = vshll.u32 %v14599_v5, 16  ;;  %v15678_v10 = vld [vmem:[#allocation17_spill] sm:$0xff]  ;;  %v8100_v18 = vrot.slane %v14657_v6, 5 }
 0x436   : > { %7894 = vmatmul.bf16.gmra.mxu1 %v7766_v54  ;;  %v6911_v24 = vpop.f32.mrf.mxu3  ;;  %v8913_v22 = vsel %vm12048_vm11, %v14715_v16, %v14721_v26  ;;  %v7621_v16 = vshll.u32 %v14735_v47, 16  ;;  %v7625_v26 = vshrl.u32 %v14735_v47, 16 }
 0x437   : > { %v6533_v7 = vpop.f32.mrf.mxu2 }
 0x438   : > { %v6534_v58 = vadd.f32 %v6533_v7, %v14335_v3  ;;  %v7248_v3 = vadd.f32 %v15674_v37, %v15673_v0  ;;  %v15676_v7 = vld [vmem:[#allocation30_spill] sm:$0xff]  ;;  %v7610_v0 = vsel %vm12048_vm11, %v7605_v21, %v7609_v20  ;;  %v14758_v46 = vpop.f32.mrf.mxu0  ;;  %v8103_v20 = vrot.slane %v14703_v1, 5 }
 0x439   : > { %v14755_v37 = vld [vmem:[#allocation3 + $0x98] sm:$0x1]  ;;  %15679 = vst [vmem:[#allocation15_spill] sm:$0xff] %v14758_v46  ;;  %v7747_v43 = vunpack.c.l.b16 %v7610_v0 }
 0x43a   : > { %v14733_v54 = vadd.f32 %v6911_v24, %v6534_v58  ;;  %v7311_v24 = vld [vmem:[#allocation3 + $0x9c] sm:$0xf]  ;;  %v15677_v58 = vld [vmem:[#allocation20_spill] sm:$0xff]  ;;  %v9519_v46 = vrot.slane %v14755_v37, 5 }
 0x43b   : > { %v7857_v30 = vpop.f32.mrf.mxu1  ;;  %8610 = vmatmul.bf16.gmra.mxu3 %v11390_v19  ;;  %v7249_v19 = vadd.f32 %v15678_v10, %v15677_v58  ;;  %v7600_v58 = vsel %vm12048_vm11, %v7595_v42, %v14688_v32  ;;  %v7612_v21 = vshrl.u32 %v7311_v24, 16  ;;  %v11141_v10 = vrot.slane %v9390_v17, 9 }
 0x43c   : > { %15675 = vst [vmem:[#allocation34_spill] sm:$0xff] %v14733_v54  ;;  %v14748_v25 = vadd.f32 %v7857_v30, %v7248_v3  ;;  %8295 = vmatmul.bf16.gmra.mxu2 %v15676_v7  ;;  %v10966_v3 = vrot.slane %v7968_v52, 9  ;;  %v9516_v30 = vrot.slane %v14729_v53, 5  ;;  %v8102_v54 = vrot.slane %v8100_v18, 4 }
 0x43d   : > { %9292 = vmatmul.bf16.gmra.mxu0 %v9184_v2  ;;  %v7615_v51 = vshll.u32 %v7311_v24, 16  ;;  %v14773_v32 = vrot.slane %v7621_v16, 5  ;;  %v7627_v42 = vrot.slane %v7625_v26, 4  ;;  %v7614_v0 = vrot.slane %v7612_v21, 4 }
 0x43e   : > { %v6914_v7 = vpop.f32.mrf.mxu3  ;;  %v8101_v2 = vsel %vm12316_vm14, %v10966_v3, %v8100_v18  ;;  %v9518_v55 = vrot.slane %v9516_v30, 4  ;;  %v9517_v11 = vsel %vm12316_vm14, %v11141_v10, %v9516_v30  ;;  %v8104_v1 = vsel %vm12316_vm14, %v8102_v54, %v8103_v20  ;;  %v14784_v10 = vld [vmem:[#allocation3 + $0xa4] sm:$0x1] }
 0x43f   : > { %v6536_v6 = vpop.f32.mrf.mxu2  ;;  %v7746_v3 = vunpack.c.l.b16 %v7600_v58  ;;  %v8172_v4 = vunpack.c.l.b16 %v8101_v2  ;;  %v8173_v12 = vunpack.c.l.b16 %v8104_v1  ;;  %v8952_v24 = vshrl.u32 %v14599_v5, 16  ;;  %v8722_v5 = vld [vmem:[#allocation3 + $0x78] sm:$0xf] }
 0x440   : > { %v6537_v52 = vadd.f32 %v6536_v6, %v14376_v28  ;;  %v9520_v17 = vsel %vm12316_vm14, %v9518_v55, %v9519_v46  ;;  %v9593_v6 = vunpack.c.l.b16 %v9517_v11  ;;  %v7617_v54 = vrot.slane %v7615_v51, 5 }
 0x441   : > { %v9594_v30 = vunpack.c.l.b16 %v9520_v17  ;;  %v7767_v26 = vpack.c.b16 %v7747_v43, %v7746_v3  ;;  %v14786_v20 = vpack.c.b16 %v8173_v12, %v8172_v4  ;;  %v7628_v55 = vor.u32 %v7627_v42, %v14773_v32  ;;  %v11391_v42 = vld [vmem:[#allocation3 + $0x60] sm:$0xff] }
 0x442   : > { %v14779_v18 = vadd.f32 %v6914_v7, %v6537_v52  ;;  %v8921_v46 = vor.u32 %v14725_v14, %v14723_v33  ;;  %v8931_v7 = vor.u32 %v14737_v35, %v14727_v27  ;;  %v9160_v21 = vunpack.c.l.b16 %v8913_v22  ;;  %v15683_v3 = vld [vmem:[#allocation19_spill] sm:$0xff] }
 0x443   : > { %v7860_v28 = vpop.f32.mrf.mxu1  ;;  %v14793_v58 = vpack.c.b16 %v9594_v30, %v9593_v6  ;;  %v7631_v12 = vshll.u32 %v14784_v10, 16  ;;  %v14798_v4 = vrot.slane %v8948_v9, 5  ;;  %v8954_v51 = vrot.slane %v8952_v24, 4  ;;  %v14815_v6 = vld [vmem:[#allocation3 + $0xac] sm:$0xf] }
 0x444   : > { %15680 = vst [vmem:[#allocation16_spill] sm:$0xff] %v14779_v18  ;;  %v14782_v16 = vadd.f32 %v7860_v28, %v7249_v19  ;;  %v14795_v19 = vpop.f32.mrf.mxu0  ;;  %v15682_v33 = vsel %vm12048_vm11, %v14719_v38, %v14682_v62  ;;  %v7618_v35 = vor.u32 %v7617_v54, %v7614_v0  ;;  %v8934_v52 = vshll.u32 %v14579_v49, 16  ;;  %v15684_v28 = vld [vmem:[#allocation18_spill] sm:$0xff] }
 0x445   : > { %15681 = vst [vmem:[#allocation30_spill] sm:$0xff] %v14793_v58  ;;  %v9159_v14 = vunpack.c.l.b16 %v15682_v33  ;;  %v7629_v1 = vrot.slane %v7628_v55, 4  ;;  %v14807_v17 = vrot.slane %v8921_v46, 4  ;;  %v14809_v22 = vrot.slane %v8931_v7, 4  ;;  %v15686_v55 = vld [vmem:[#allocation41_spill] sm:$0xff] }
 0x446   : > { %7899 = vmatmul.bf16.gmra.mxu1 %v7767_v26  ;;  %v6916_v11 = vpop.f32.mrf.mxu3  ;;  %v8939_v9 = vshrl.u32 %v8722_v5, 16  ;;  %v7250_v24 = vadd.f32 %v15684_v28, %v15683_v3  ;;  %v8942_v30 = vshll.u32 %v8722_v5, 16  ;;  %v8958_v62 = vshll.u32 %v14627_v34, 16  ;;  %v7314_v5 = vld [vmem:[#allocation3 + $0xa8] sm:$0xf] }
 0x447   : > { %v6538_v43 = vpop.f32.mrf.mxu2  ;;  %v9185_v49 = vpack.c.b16 %v9160_v21, %v9159_v14  ;;  %v7633_v0 = vrot.slane %v7631_v12, 5  ;;  %v8955_v26 = vor.u32 %v8954_v51, %v14798_v4  ;;  %v7619_v46 = vrot.slane %v7618_v35, 4  ;;  %v7969_v12 = vld [vmem:[#allocation3 + $0x9c] sm:$0xe]  ;;  %v14853_v58 = vld [vmem:[#allocation3 + $0xa0] sm:$0xf] }
 0x448   : > { %v6539_v2 = vadd.f32 %v6538_v43, %v14405_v45  ;;  %v8927_v7 = vsel %vm12048_vm11, %v14807_v17, %v14727_v27  ;;  %v7645_v43 = vshll.u32 %v14815_v6, 16  ;;  %v7649_v21 = vshrl.u32 %v14815_v6, 16 }
 0x449   : > { %v7634_v34 = vsel %vm12048_vm11, %v7629_v1, %v7633_v0  ;;  %v8107_v51 = vrot.slane %v14735_v47, 5  ;;  %v14834_v14 = vrot.slane %v8939_v9, 4  ;;  %v8944_v27 = vrot.slane %v8942_v30, 5 }
 0x44a   : > { %v14813_v45 = vadd.f32 %v6916_v11, %v6539_v2  ;;  %v8936_v11 = vrot.slane %v8934_v52, 5  ;;  %v14836_v35 = vrot.slane %v8958_v62, 5  ;;  %v8725_v52 = vld [vmem:[#allocation3 + $0x84] sm:$0xf]  ;;  %v7624_v1 = vsel %vm12048_vm11, %v7619_v46, %v14773_v32 }
 0x44b   : > { %v7862_v38 = vpop.f32.mrf.mxu1  ;;  %8615 = vmatmul.bf16.gmra.mxu3 %v11391_v42  ;;  %v7636_v17 = vshrl.u32 %v7314_v5, 16  ;;  %v14841_v3 = vrot.slane %v8955_v26, 4  ;;  %v8109_v47 = vrot.slane %v8107_v51, 4  ;;  %v14846_v30 = vrot.slane %v7645_v43, 5  ;;  %v15738_v56 = vld [vmem:[#allocation16_spill] sm:$0xff] }
 0x44c   : > { %15685 = vst [vmem:[#allocation20_spill] sm:$0xff] %v14813_v45  ;;  %v14819_v54 = vadd.f32 %v7862_v38, %v7250_v24  ;;  %8300 = vmatmul.bf16.gmra.mxu2 %v15686_v55  ;;  %v8937_v33 = vsel %vm12048_vm11, %v14809_v22, %v8936_v11  ;;  %v7749_v24 = vunpack.c.l.b16 %v7634_v34  ;;  %v7639_v38 = vshll.u32 %v7314_v5, 16  ;;  %v14844_v9 = vpop.f32.mrf.mxu0  ;;  %v15687_v55 = vld [vmem:[#allocation21_spill] sm:$0xff]  ;;  %v15688_v11 = vld [vmem:[#allocation22_spill] sm:$0xff] }
 0x44d   : > { %9297 = vmatmul.bf16.gmra.mxu0 %v9185_v49  ;;  %v10967_v22 = vrot.slane %v7969_v12, 9  ;;  %v7651_v62 = vrot.slane %v7649_v21, 4  ;;  %v8963_v49 = vshrl.u32 %v8725_v52, 16  ;;  %v8110_v0 = vrot.slane %v14784_v10, 5  ;;  %v14857_v34 = vld [vmem:[#allocation3 + $0xb0] sm:$0x1] }
 0x44e   : > { %v6919_v2 = vpop.f32.mrf.mxu3  ;;  %v7251_v32 = vadd.f32 %v15688_v11, %v15687_v55  ;;  %v7748_v26 = vunpack.c.l.b16 %v7624_v1  ;;  %v7638_v43 = vrot.slane %v7636_v17, 4  ;;  %v8966_v12 = vshll.u32 %v8725_v52, 16 }
 0x44f   : > { %v6541_v42 = vpop.f32.mrf.mxu2  ;;  %v8972_v21 = vshll.u32 %v14659_v40, 16  ;;  %v8111_v10 = vsel %vm12316_vm14, %v8109_v47, %v8110_v0  ;;  %v7652_v55 = vor.u32 %v7651_v62, %v14846_v30  ;;  %v8976_v11 = vshrl.u32 %v14659_v40, 16  ;;  %v11417_v47 = vld [vmem:[#allocation9 + $0x200] sm:$0xff]  ;;  %v14869_v0 = vld [vmem:[#allocation3 + $0xa4] sm:$0x1] }
 0x450   : > { %v6542_v28 = vadd.f32 %v6541_v42, %v14440_v60  ;;  %v8108_v60 = vsel %vm12316_vm14, %v10967_v22, %v8107_v51  ;;  %v8175_v1 = vunpack.c.l.b16 %v8111_v10  ;;  %v9523_v22 = vrot.slane %v14853_v58, 5  ;;  %9692 = vmatpush.bf16.msra.mxu1 %v11417_v47 }
 0x451   : > { %v8174_v51 = vunpack.c.l.b16 %v8108_v60  ;;  %v9161_v52 = vunpack.c.l.b16 %v8927_v7  ;;  %v8945_v45 = vor.u32 %v8944_v27, %v14834_v14  ;;  %v8961_v40 = vsel %vm12048_vm11, %v14841_v3, %v14836_v35  ;;  %v14880_v60 = vld [vmem:[#allocation3 + $0xb8] sm:$0xf]  ;;  %v15691_v3 = vld [vmem:[#allocation25_spill] sm:$0xff] }
 0x452   : > { %v14851_v46 = vadd.f32 %v6919_v2, %v6542_v28  ;;  %v7768_v2 = vpack.c.b16 %v7749_v24, %v7748_v26  ;;  %v7641_v28 = vrot.slane %v7639_v38, 5  ;;  %v9162_v38 = vunpack.c.l.b16 %v8937_v33  ;;  %v11392_v33 = vld [vmem:[#allocation3 + $0x6c] sm:$0xff] }
 0x453   : > { %v7865_v5 = vpop.f32.mrf.mxu1  ;;  %v14875_v62 = vrot.slane %v8963_v49, 4  ;;  %v14882_v14 = vrot.slane %v8966_v12, 5  ;;  %v14884_v27 = vrot.slane %v8972_v21, 5  ;;  %v8978_v10 = vrot.slane %v8976_v11, 4  ;;  %v15692_v49 = vld [vmem:[#allocation24_spill] sm:$0xff] }
 0x454   : > { %15689 = vst [vmem:[#allocation17_spill] sm:$0xff] %v14851_v46  ;;  %v14862_v42 = vadd.f32 %v7865_v5, %v7251_v32  ;;  %v7655_v46 = vshll.u32 %v14857_v34, 16  ;;  %v14877_v32 = vpack.c.b16 %v8175_v1, %v8174_v51  ;;  %v7642_v26 = vor.u32 %v7641_v28, %v7638_v43  ;;  %v14891_v28 = vpop.f32.mrf.mxu0  ;;  %v7317_v21 = vld [vmem:[#allocation3 + $0xb4] sm:$0xf]  ;;  %v9391_v11 = vld [vmem:[#allocation3 + $0x9c] sm:$0xe] }
 0x455   : > { %v7653_v5 = vrot.slane %v7652_v55, 4  ;;  %v9526_v35 = vrot.slane %v14869_v0, 5  ;;  %v7252_v1 = vadd.f32 %v15692_v49, %v15691_v3  ;;  %v8946_v43 = vrot.slane %v8945_v45, 4 }
 0x456   : > { %15690 = vst [vmem:[#allocation19_spill] sm:$0xff] %v14862_v42  ;;  %7904 = vmatmul.bf16.gmra.mxu1 %v7768_v2  ;;  %v6921_v17 = vpop.f32.mrf.mxu3  ;;  %v9525_v2 = vrot.slane %v9523_v22, 4  ;;  %v9186_v12 = vpack.c.b16 %v9162_v38, %v9161_v52  ;;  %v7673_v55 = vshrl.u32 %v14880_v60, 16  ;;  %v7970_v52 = vld [vmem:[#allocation3 + $0xa8] sm:$0xe] }
 0x457   : > { %v6543_v24 = vpop.f32.mrf.mxu2  ;;  %v8951_v45 = vsel %vm12048_vm11, %v8946_v43, %v14798_v4  ;;  %v7660_v4 = vshrl.u32 %v7317_v21, 16 }
 0x458   : > { %v6544_v7 = vadd.f32 %v6543_v24, %v14464_v36  ;;  %v7657_v36 = vrot.slane %v7655_v46, 5  ;;  %v7669_v24 = vshll.u32 %v14880_v60, 16  ;;  %v9527_v42 = vsel %vm12316_vm14, %v9525_v2, %v9526_v35 }
 0x459   : > { %v7643_v46 = vrot.slane %v7642_v26, 4  ;;  %v8982_v2 = vshll.u32 %v14674_v48, 16  ;;  %v11142_v35 = vrot.slane %v9391_v11, 9 }
 0x45a   : > { %v14889_v51 = vadd.f32 %v6921_v17, %v6544_v7  ;;  %v14903_v17 = vunpack.c.l.b16 %v8961_v40  ;;  %v7658_v38 = vsel %vm12048_vm11, %v7653_v5, %v7657_v36  ;;  %v8969_v7 = vor.u32 %v14882_v14, %v14875_v62  ;;  %v15695_v62 = vld [vmem:[#allocation28_spill] sm:$0xff]  ;;  %v15696_v14 = vld [vmem:[#allocation26_spill] sm:$0xff] }
 0x45b   : > { %v7867_v47 = vpop.f32.mrf.mxu1  ;;  %8620 = vmatmul.bf16.gmra.mxu3 %v11392_v33  ;;  %v8979_v33 = vor.u32 %v8978_v10, %v14884_v27  ;;  %v7648_v26 = vsel %vm12048_vm11, %v7643_v46, %v14846_v30  ;;  %v7663_v40 = vshll.u32 %v7317_v21, 16  ;;  %v14914_v49 = vrot.slane %v7669_v24, 5 }
 0x45c   : > { %15693 = vst [vmem:[#allocation18_spill] sm:$0xff] %v14889_v51  ;;  %v14897_v18 = vadd.f32 %v7867_v47, %v7252_v1  ;;  %8305 = vmatmul.bf16.gmra.mxu2 %v14393_v23  ;;  %v7675_v1 = vrot.slane %v7673_v55, 4  ;;  %v10968_v5 = vrot.slane %v7970_v52, 9  ;;  %v8114_v36 = vrot.slane %v14815_v6, 5  ;;  %v14927_v6 = vld [vmem:[#allocation3 + $0xbc] sm:$0x1] }
 0x45d   : > { %9302 = vmatmul.bf16.gmra.mxu0 %v9186_v12  ;;  %v7253_v10 = vadd.f32 %v15696_v14, %v15695_v62  ;;  %v7751_v43 = vunpack.c.l.b16 %v7658_v38  ;;  %v9524_v47 = vsel %vm12316_vm14, %v11142_v35, %v9523_v22  ;;  %v8117_v21 = vrot.slane %v14857_v34, 5 }
 0x45e   : > { %15694 = vst [vmem:[#allocation41_spill] sm:$0xff] %v14897_v18  ;;  %v6924_v23 = vpop.f32.mrf.mxu3  ;;  %v8115_v30 = vsel %vm12316_vm14, %v10968_v5, %v8114_v36  ;;  %v8116_v12 = vrot.slane %v8114_v36, 4  ;;  %v9596_v24 = vunpack.c.l.b16 %v9527_v42  ;;  %v7750_v11 = vunpack.c.l.b16 %v7648_v26  ;;  %v14936_v42 = vld [vmem:[#allocation3 + $0xac] sm:$0xf]  ;;  %v14938_v5 = vpop.f32.mrf.mxu0  ;;  %v14941_v36 = vld [vmem:[#allocation3 + $0x90] sm:$0xf] }
 0x45f   : > { %v6546_v3 = vpop.f32.mrf.mxu2  ;;  %v7662_v46 = vrot.slane %v7660_v4, 4  ;;  %v7665_v52 = vrot.slane %v7663_v40, 5  ;;  %v14930_v38 = vrot.slane %v8979_v33, 4  ;;  %v9595_v35 = vunpack.c.l.b16 %v9524_v47  ;;  %15699 = vst [vmem:[#allocation25_spill] sm:$0xff] %v14938_v5  ;;  %v7320_v18 = vld [vmem:[#allocation3 + $0xc0] sm:$0xf] }
 0x460   : > { %v6547_v48 = vadd.f32 %v6546_v3, %v14502_v31  ;;  %v7676_v31 = vor.u32 %v7675_v1, %v14914_v49  ;;  %v8118_v22 = vsel %vm12316_vm14, %v8116_v12, %v8117_v21  ;;  %v7769_v34 = vpack.c.b16 %v7751_v43, %v7750_v11  ;;  %v9392_v1 = vld [vmem:[#allocation3 + $0xa8] sm:$0xe]  ;;  %v14947_v43 = vld [vmem:[#allocation3 + $0xb0] sm:$0x1] }
 0x461   : > { %v8177_v26 = vunpack.c.l.b16 %v8118_v22  ;;  %v9163_v4 = vunpack.c.l.b16 %v8951_v45  ;;  %v7679_v40 = vshll.u32 %v14927_v6, 16  ;;  %v14943_v33 = vpack.c.b16 %v9596_v24, %v9595_v35  ;;  %v14961_v35 = vld [vmem:[#allocation3 + $0xc4] sm:$0xf] }
 0x462   : > { %v14925_v55 = vadd.f32 %v6924_v23, %v6547_v48  ;;  %v8176_v23 = vunpack.c.l.b16 %v8115_v30  ;;  %v7666_v48 = vor.u32 %v7665_v52, %v7662_v46  ;;  %v7677_v45 = vrot.slane %v7676_v31, 4 }
 0x463   : > { %v7870_v62 = vpop.f32.mrf.mxu1  ;;  %15700 = vst [vmem:[#allocation24_spill] sm:$0xff] %v14943_v33  ;;  %v9187_v12 = vpack.c.b16 %v14903_v17, %v9163_v4  ;;  %v14952_v21 = vrot.slane %v8969_v7, 4  ;;  %v9530_v11 = vrot.slane %v14936_v42, 5  ;;  %v11143_v52 = vrot.slane %v9392_v1, 9  ;;  %v15705_v1 = vld [vmem:[#allocation38_spill] sm:$0xff] }
 0x464   : > { %15697 = vst [vmem:[#allocation21_spill] sm:$0xff] %v14925_v55  ;;  %v14934_v3 = vadd.f32 %v7870_v62, %v7253_v10  ;;  %v14945_v10 = vrot.slane %v8982_v2, 5  ;;  %v14949_v47 = vpack.c.b16 %v8177_v26, %v8176_v23  ;;  %v11393_v62 = vld [vmem:[#allocation3 + $0x78] sm:$0xff]  ;;  %v7681_v22 = vrot.slane %v7679_v40, 5  ;;  %v15702_v23 = vld [vmem:[#allocation29_spill] sm:$0xff]  ;;  %v15704_v40 = vld [vmem:[#allocation39_spill] sm:$0xff] }
 0x465   : > { %v9532_v7 = vrot.slane %v9530_v11, 4  ;;  %v9533_v31 = vrot.slane %v14947_v43, 5  ;;  %v7667_v4 = vrot.slane %v7666_v48, 4  ;;  %v9531_v2 = vsel %vm12316_vm14, %v11143_v52, %v9530_v11  ;;  %v14976_v55 = vld [vmem:[#allocation3 + $0xb8] sm:$0xf] }
 0x466   : > { %15698 = vst [vmem:[#allocation22_spill] sm:$0xff] %v14934_v3  ;;  %7909 = vmatmul.bf16.gmra.mxu1 %v7769_v34  ;;  %v6926_v14 = vpop.f32.mrf.mxu3  ;;  %v15701_v34 = vld [vmem:[#allocation36_spill] sm:$0xff]  ;;  %v7255_v3 = vadd.f32 %v15705_v1, %v15704_v40  ;;  %v7682_v17 = vsel %vm12048_vm11, %v7677_v45, %v7681_v22  ;;  %v9000_v33 = vshrl.u32 %v14729_v53, 16  ;;  %v7697_v45 = vshrl.u32 %v14961_v35, 16 }
 0x467   : > { %v6548_v30 = vpop.f32.mrf.mxu2  ;;  %v7672_v11 = vsel %vm12048_vm11, %v7667_v4, %v14914_v49  ;;  %v8121_v52 = vrot.slane %v14880_v60, 5  ;;  %v9597_v22 = vunpack.c.l.b16 %v9531_v2  ;;  %v9537_v40 = vrot.slane %v14976_v55, 5  ;;  %v14992_v49 = vpop.f32.mrf.mxu0 }
 0x468   : > { %v6549_v24 = vadd.f32 %v6548_v30, %v14529_v8  ;;  %v7254_v8 = vadd.f32 %v15702_v23, %v15701_v34  ;;  %v7971_v30 = vld [vmem:[#allocation3 + $0xb4] sm:$0xe]  ;;  %15707 = vst [vmem:[#allocation36_spill] sm:$0xff] %v14992_v49  ;;  %v8124_v60 = vrot.slane %v14927_v6, 5 }
 0x469   : > { %v9393_v23 = vld [vmem:[#allocation3 + $0xb4] sm:$0xe]  ;;  %v9539_v51 = vrot.slane %v9537_v40, 4 }
 0x46a   : > { %v14967_v26 = vadd.f32 %v6926_v14, %v6549_v24  ;;  %v9534_v14 = vsel %vm12316_vm14, %v9532_v7, %v9533_v31  ;;  %v7693_v24 = vshll.u32 %v14961_v35, 16  ;;  %v7684_v31 = vshrl.u32 %v7320_v18, 16 }
 0x46b   : > { %v7872_v46 = vpop.f32.mrf.mxu1  ;;  %8625 = vmatmul.bf16.gmra.mxu3 %v11393_v62  ;;  %v10969_v62 = vrot.slane %v7971_v30, 9  ;;  %v9598_v34 = vunpack.c.l.b16 %v9534_v14  ;;  %v8123_v30 = vrot.slane %v8121_v52, 4  ;;  %v11144_v14 = vrot.slane %v9393_v23, 9 }
 0x46c   : > { %15703 = vst [vmem:[#allocation28_spill] sm:$0xff] %v14967_v26  ;;  %v14980_v48 = vadd.f32 %v7872_v46, %v7254_v8  ;;  %8310 = vmatmul.bf16.gmra.mxu2 %v14451_v63  ;;  %v7753_v46 = vunpack.c.l.b16 %v7682_v17  ;;  %v7687_v8 = vshll.u32 %v7320_v18, 16  ;;  %v14989_v63 = vld [vmem:[#allocation3 + $0xbc] sm:$0x1]  ;;  %v15000_v17 = vrot.slane %v7693_v24, 5 }
 0x46d   : > { %9307 = vmatmul.bf16.gmra.mxu0 %v9187_v12  ;;  %v8122_v12 = vsel %vm12316_vm14, %v10969_v62, %v8121_v52  ;;  %v14997_v2 = vpack.c.b16 %v9598_v34, %v9597_v22  ;;  %v7699_v18 = vrot.slane %v7697_v45, 4  ;;  %v8125_v26 = vsel %vm12316_vm14, %v8123_v30, %v8124_v60 }
 0x46e   : > { %15706 = vst [vmem:[#allocation26_spill] sm:$0xff] %v14980_v48  ;;  %v8586_v7 = vpop.f32.mrf.mxu3  ;;  %v7752_v48 = vunpack.c.l.b16 %v7672_v11  ;;  %v9540_v49 = vrot.slane %v14989_v63, 5  ;;  %v8178_v62 = vunpack.c.l.b16 %v8122_v12  ;;  %v8179_v52 = vunpack.c.l.b16 %v8125_v26 }
 0x46f   : > { %v8271_v4 = vpop.f32.mrf.mxu2  ;;  %v9538_v6 = vsel %vm12316_vm14, %v11144_v14, %v9537_v40  ;;  %v7686_v24 = vrot.slane %v7684_v31, 4  ;;  %v7689_v45 = vrot.slane %v7687_v8, 5  ;;  %v8990_v11 = vshll.u32 %v14941_v36, 16 }
 0x470   : > { %v8351_v1 = vadd.f32 %v8271_v4, %v14569_v29  ;;  %v15009_v29 = vld [vmem:[#allocation3 + $0xc8] sm:$0x1]  ;;  %v9541_v34 = vsel %vm12316_vm14, %v9539_v51, %v9540_v49  ;;  %v7770_v4 = vpack.c.b16 %v7753_v46, %v7752_v48  ;;  %v15017_v12 = vpack.c.b16 %v8179_v52, %v8178_v62  ;;  %v15038_v52 = vpop.f32.mrf.mxu0 }
 0x471   : > { %v9599_v26 = vunpack.c.l.b16 %v9538_v6  ;;  %v9600_v30 = vunpack.c.l.b16 %v9541_v34  ;;  %v8975_v31 = vsel %vm12048_vm11, %v14952_v21, %v14884_v27  ;;  %v7703_v8 = vshll.u32 %v15009_v29, 16  ;;  %v15712_v34 = vld [vmem:[#allocation42_spill] sm:$0xff] }
 0x472   : > { %v15005_v5 = vadd.f32 %v8586_v7, %v8351_v1  ;;  %v7700_v7 = vor.u32 %v7699_v18, %v15000_v17  ;;  %v15708_v51 = vshll.u32 %v14729_v53, 16  ;;  %v9002_v48 = vrot.slane %v9000_v33, 4  ;;  %v11394_v33 = vld [vmem:[#allocation3 + $0x84] sm:$0xff] }
 0x473   : > { %v7875_v22 = vpop.f32.mrf.mxu1  ;;  %v15709_v49 = vsel %vm12048_vm11, %v14930_v38, %v14945_v10  ;;  %v15710_v1 = vshrl.u32 %v14941_v36, 16  ;;  %v8992_v14 = vrot.slane %v8990_v11, 5  ;;  %v15035_v62 = vpack.c.b16 %v9600_v30, %v9599_v26  ;;  %v7972_v10 = vld [vmem:[#allocation3 + $0xc0] sm:$0xe] }
 0x474   : > { %v15014_v23 = vadd.f32 %v7875_v22, %v7255_v3  ;;  %v15026_v3 = vrot.slane %v15708_v51, 5  ;;  %v9166_v60 = vunpack.c.l.b16 %v15709_v49  ;;  %v7690_v21 = vor.u32 %v7689_v45, %v7686_v24  ;;  %v15711_v22 = vld [vmem:[#allocation43_spill] sm:$0xff]  ;;  %v15047_v45 = vld [vmem:[#allocation3 + $0xc8] sm:$0x1] }
 0x475   : > { %v8989_v18 = vrot.slane %v15710_v1, 4  ;;  %v7701_v53 = vrot.slane %v7700_v7, 4  ;;  %v9165_v6 = vunpack.c.l.b16 %v8975_v31  ;;  %v7705_v38 = vrot.slane %v7703_v8, 5  ;;  %v9394_v11 = vld [vmem:[#allocation3 + $0xc0] sm:$0xe] }
 0x476   : > { %7914 = vmatmul.bf16.gmra.mxu1 %v7770_v4  ;;  %v8588_v40 = vpop.f32.mrf.mxu3  ;;  %v7256_v4 = vadd.f32 %v15712_v34, %v15711_v22  ;;  %v9003_v36 = vor.u32 %v9002_v48, %v15026_v3  ;;  %v15045_v24 = vld [vmem:[#allocation3 + $0xc4] sm:$0xf]  ;;  %v7691_v31 = vrot.slane %v7690_v21, 4  ;;  %v9006_v8 = vshll.u32 %v14755_v37, 16  ;;  %v15714_v22 = vld [vmem:[#allocation46_spill] sm:$0xff] }
 0x477   : > { %v8273_v46 = vpop.f32.mrf.mxu2  ;;  %v9188_v30 = vpack.c.b16 %v9166_v60, %v9165_v6  ;;  %v10970_v48 = vrot.slane %v7972_v10, 9  ;;  %v11145_v49 = vrot.slane %v9394_v11, 9  ;;  %v9544_v60 = vrot.slane %v15045_v24, 5  ;;  %v15713_v6 = vld [vmem:[#allocation45_spill] sm:$0xff] }
 0x478   : > { %v8352_v27 = vadd.f32 %v8273_v46, %v14604_v15  ;;  %v8993_v15 = vor.u32 %v8992_v14, %v8989_v18  ;;  %v8128_v46 = vrot.slane %v14961_v35, 5  ;;  %v7696_v18 = vsel %vm12048_vm11, %v7691_v31, %v15000_v17 }
 0x479   : > { %v9004_v14 = vrot.slane %v9003_v36, 4  ;;  %v9545_v35 = vsel %vm12316_vm14, %v11145_v49, %v9544_v60  ;;  %v7257_v34 = vadd.f32 %v15714_v22, %v15713_v6  ;;  %v7754_v36 = vunpack.c.l.b16 %v7696_v18 }
 0x47a   : > { %v15042_v51 = vadd.f32 %v8588_v40, %v8352_v27  ;;  %v7706_v40 = vsel %vm12048_vm11, %v7701_v53, %v7705_v38  ;;  %v9547_v27 = vrot.slane %v15047_v45, 5  ;;  %v8129_v37 = vsel %vm12316_vm14, %v10970_v48, %v8128_v46 }
 0x47b   : > { %v7877_v26 = vpop.f32.mrf.mxu1  ;;  %8630 = vmatmul.bf16.gmra.mxu3 %v11394_v33  ;;  %v8130_v53 = vrot.slane %v8128_v46, 4  ;;  %v9546_v33 = vrot.slane %v9544_v60, 4  ;;  %v7755_v17 = vunpack.c.l.b16 %v7706_v40  ;;  %v9008_v38 = vrot.slane %v9006_v8, 5  ;;  %v15075_v46 = vpop.f32.mrf.mxu0 }
 0x47c   : > { %v15049_v7 = vadd.f32 %v7877_v26, %v7256_v4  ;;  %8315 = vmatmul.bf16.gmra.mxu2 %v14513_v59  ;;  %v8131_v59 = vrot.slane %v15009_v29, 5  ;;  %v8180_v10 = vunpack.c.l.b16 %v8129_v37  ;;  %v9601_v31 = vunpack.c.l.b16 %v9545_v35 }
 0x47d   : > { %9312 = vmatmul.bf16.gmra.mxu0 %v9188_v30  ;;  %v9548_v11 = vsel %vm12316_vm14, %v9546_v33, %v9547_v27  ;;  %v8994_v60 = vrot.slane %v8993_v15, 4  ;;  %v9020_v40 = vshll.u32 %v14853_v58, 16  ;;  %v9024_v8 = vshrl.u32 %v14853_v58, 16  ;;  %v8731_v27 = vld [vmem:[#allocation3 + $0x9c] sm:$0xf] }
 0x47e   : > { %v8591_v1 = vpop.f32.mrf.mxu3  ;;  %v8132_v29 = vsel %vm12316_vm14, %v8130_v53, %v8131_v59  ;;  %v9602_v48 = vunpack.c.l.b16 %v9548_v11  ;;  %v7771_v59 = vpack.c.b16 %v7755_v17, %v7754_v36  ;;  %v9011_v35 = vshrl.u32 %v8731_v27, 16  ;;  %v15715_v17 = vld [vmem:[#allocation47_spill] sm:$0xff] }
 0x47f   : > { %v8276_v21 = vpop.f32.mrf.mxu2  ;;  %v8181_v30 = vunpack.c.l.b16 %v8132_v29  ;;  %v8999_v15 = vsel %vm12048_vm11, %v8994_v60, %v15026_v3  ;;  %v9014_v33 = vshll.u32 %v8731_v27, 16  ;;  %v9022_v6 = vrot.slane %v9020_v40, 5 }
 0x480   : > { %v8353_v4 = vadd.f32 %v8276_v21, %v14644_v61  ;;  %v9009_v61 = vsel %vm12048_vm11, %v9004_v14, %v9008_v38  ;;  %v15085_v21 = vpack.c.b16 %v9602_v48, %v9601_v31  ;;  %v9026_v22 = vrot.slane %v9024_v8, 4  ;;  %v15716_v8 = vld [vmem:[#allocation49_spill] sm:$0xff] }
 0x481   : > { %v9168_v14 = vunpack.c.l.b16 %v9009_v61  ;;  %v7258_v38 = vadd.f32 %v15715_v17, %v14399_v44  ;;  %v9013_v11 = vrot.slane %v9011_v35, 4  ;;  %v9016_v3 = vrot.slane %v9014_v33, 5  ;;  %v8734_v33 = vld [vmem:[#allocation3 + $0xa8] sm:$0xf] }
 0x482   : > { %v15073_v26 = vadd.f32 %v8591_v1, %v8353_v4  ;;  %v15083_v1 = vpack.c.b16 %v8181_v30, %v8180_v10  ;;  %v9167_v4 = vunpack.c.l.b16 %v8999_v15  ;;  %v9027_v31 = vor.u32 %v9026_v22, %v9022_v6 }
 0x483   : > { %v7880_v49 = vpop.f32.mrf.mxu1  ;;  %v9017_v44 = vor.u32 %v9016_v3, %v9013_v11 }
 0x484   : > { %v15081_v18 = vadd.f32 %v7880_v49, %v7257_v34  ;;  %v11395_v34 = vld [vmem:[#allocation3 + $0x90] sm:$0xff]  ;;  %v9189_v10 = vpack.c.b16 %v9168_v14, %v9167_v4  ;;  %v9030_v49 = vshll.u32 %v14869_v0, 16  ;;  %v9028_v40 = vrot.slane %v9027_v31, 4 }
 0x485   : > { %v9044_v0 = vshll.u32 %v14936_v42, 16 }
 0x486   : > { %7919 = vmatmul.bf16.gmra.mxu1 %v7771_v59  ;;  %v8593_v37 = vpop.f32.mrf.mxu3  ;;  %v15717_v59 = vld [vmem:[#allocation50_spill] sm:$0xff]  ;;  %v9032_v15 = vrot.slane %v9030_v49, 5 }
 0x487   : > { %v8278_v53 = vpop.f32.mrf.mxu2  ;;  %v7259_v27 = vadd.f32 %v15717_v59, %v15716_v8  ;;  %v9046_v3 = vrot.slane %v9044_v0, 5  ;;  %v15720_v0 = vld [vmem:[#allocation53_spill] sm:$0xff] }
 0x488   : > { %v8354_v58 = vadd.f32 %v8278_v53, %v14669_v13  ;;  %v15098_v13 = vpop.f32.mrf.mxu0  ;;  %v9033_v35 = vsel %vm12048_vm11, %v9028_v40, %v9032_v15 }
 0x48a   : > { %v15093_v36 = vadd.f32 %v8593_v37, %v8354_v58  ;;  %v9048_v58 = vshrl.u32 %v14936_v42, 16  ;;  %v15719_v42 = vld [vmem:[#allocation52_spill] sm:$0xff] }
 0x48b   : > { %v7882_v29 = vpop.f32.mrf.mxu1  ;;  %8635 = vmatmul.bf16.gmra.mxu3 %v11395_v34 }
 0x48c   : > { %v15095_v30 = vadd.f32 %v7882_v29, %v7258_v38  ;;  %8320 = vmatmul.bf16.gmra.mxu2 %v14584_v50  ;;  %v9018_v50 = vrot.slane %v9017_v44, 4  ;;  %v9170_v38 = vunpack.c.l.b16 %v9033_v35  ;;  %v9035_v29 = vshrl.u32 %v8734_v33, 16 }
 0x48d   : > { %9317 = vmatmul.bf16.gmra.mxu0 %v9189_v10  ;;  %v9038_v10 = vshll.u32 %v8734_v33, 16  ;;  %v9050_v31 = vrot.slane %v9048_v58, 4  ;;  %v15721_v58 = vld [vmem:[#allocation55_spill] sm:$0xff] }
 0x48e   : > { %v8596_v48 = vpop.f32.mrf.mxu3  ;;  %v9023_v34 = vsel %vm12048_vm11, %v9018_v50, %v9022_v6  ;;  %v9037_v40 = vrot.slane %v9035_v29, 4  ;;  %v8737_v29 = vld [vmem:[#allocation3 + $0xb4] sm:$0xf] }
 0x48f   : > { %v8281_v60 = vpop.f32.mrf.mxu2  ;;  %v9169_v49 = vunpack.c.l.b16 %v9023_v34  ;;  %v9040_v8 = vrot.slane %v9038_v10, 5  ;;  %v9068_v10 = vshll.u32 %v14976_v55, 16 }
 0x490   : > { %v8355_v61 = vadd.f32 %v8281_v60, %v14706_v57  ;;  %v15718_v57 = vld [vmem:[#allocation27_spill] sm:$0xff]  ;;  %v15115_v4 = vpop.f32.mrf.mxu0  ;;  %v7260_v60 = vadd.f32 %v15719_v42, %v14457_v41  ;;  %v9059_v42 = vshrl.u32 %v8737_v29, 16 }
 0x491   : > { %v9190_v6 = vpack.c.b16 %v9170_v38, %v9169_v49  ;;  %v9041_v50 = vor.u32 %v9040_v8, %v9037_v40 }
 0x492   : > { %v15104_v37 = vadd.f32 %v8596_v48, %v8355_v61  ;;  %v11396_v48 = vld [vmem:[#allocation3 + $0x9c] sm:$0xff] }
 0x493   : > { %v7885_v53 = vpop.f32.mrf.mxu1 }
 0x494   : > { %v15106_v14 = vadd.f32 %v7885_v53, %v7259_v27  ;;  %v9051_v27 = vor.u32 %v9050_v31, %v9046_v3 }
 0x496   : > { %9693 = vmatmul.bf16.vlgmr.msra.gmra.mxu1 %v15718_v57  ;;  %v8598_v22 = vpop.f32.mrf.mxu3  ;;  %v9052_v35 = vrot.slane %v9051_v27, 4  ;;  %v7261_v57 = vadd.f32 %v15721_v58, %v15720_v0  ;;  %v11397_v27 = vld [vmem:[#allocation3 + $0xa8] sm:$0xff]  ;;  %v9061_v0 = vrot.slane %v9059_v42, 4  ;;  %v9092_v42 = vshll.u32 %v15045_v24, 16 }
 0x497   : > { %v8283_v17 = vpop.f32.mrf.mxu2 }
 0x498   : > { %v8356_v11 = vadd.f32 %v8283_v17, %v14748_v25  ;;  %v9054_v25 = vshll.u32 %v14947_v43, 16  ;;  %v15127_v33 = vpop.f32.mrf.mxu0 }
 0x49a   : > { %v15120_v44 = vadd.f32 %v8598_v22, %v8356_v11  ;;  %v9056_v34 = vrot.slane %v9054_v25, 5  ;;  %v15722_v11 = vld [vmem:[#allocation35_spill] sm:$0xff] }
 0x49b   : > { %v7887_v61 = vpop.f32.mrf.mxu1  ;;  %8640 = vmatmul.bf16.gmra.mxu3 %v11396_v48 }
 0x49c   : > { %v15122_v59 = vadd.f32 %v7887_v61, %v7260_v60  ;;  %8325 = vmatmul.bf16.gmra.mxu2 %v14786_v20  ;;  %v9042_v20 = vrot.slane %v9041_v50, 4  ;;  %v9057_v43 = vsel %vm12048_vm11, %v9052_v35, %v9056_v34  ;;  %v9062_v60 = vshll.u32 %v8737_v29, 16  ;;  %v15726_v29 = vld [vmem:[#allocation61_spill] sm:$0xff] }
 0x49d   : > { %9322 = vmatmul.bf16.gmra.mxu0 %v9190_v6  ;;  %v9172_v49 = vunpack.c.l.b16 %v9057_v43  ;;  %v9070_v6 = vrot.slane %v9068_v10, 5  ;;  %v9078_v34 = vshll.u32 %v14989_v63, 16  ;;  %v15725_v43 = vld [vmem:[#allocation57_spill] sm:$0xff]  ;;  %v8740_v63 = vld [vmem:[#allocation3 + $0xc0] sm:$0xf] }
 0x49e   : > { %v8601_v53 = vpop.f32.mrf.mxu3  ;;  %v9047_v31 = vsel %vm12048_vm11, %v9042_v20, %v9046_v3  ;;  %v9064_v58 = vrot.slane %v9062_v60, 5  ;;  %v7263_v10 = vadd.f32 %v15726_v29, %v15725_v43  ;;  %v9102_v43 = vshll.u32 %v15047_v45, 16 }
 0x49f   : > { %v8286_v15 = vpop.f32.mrf.mxu2  ;;  %v9171_v25 = vunpack.c.l.b16 %v9047_v31 }
 0x4a0   : > { %v8357_v41 = vadd.f32 %v8286_v15, %v14782_v16  ;;  %v9072_v16 = vshrl.u32 %v14976_v55, 16  ;;  %v15723_v15 = vld [vmem:[#allocation54_spill] sm:$0xff] }
 0x4a1   : > { %v9191_v3 = vpack.c.b16 %v9172_v49, %v9171_v25  ;;  %v9086_v25 = vshll.u32 %v8740_v63, 16 }
 0x4a2   : > { %v15131_v22 = vadd.f32 %v8601_v53, %v8357_v41  ;;  %v9074_v40 = vrot.slane %v9072_v16, 4  ;;  %v15724_v53 = vld [vmem:[#allocation58_spill] sm:$0xff]  ;;  %v15147_v41 = vpop.f32.mrf.mxu0  ;;  %v9080_v16 = vrot.slane %v9078_v34, 5 }
 0x4a3   : > { %v7890_v17 = vpop.f32.mrf.mxu1  ;;  %v7262_v50 = vadd.f32 %v15724_v53, %v15723_v15  ;;  %v9094_v15 = vrot.slane %v9092_v42, 5  ;;  %v9104_v42 = vrot.slane %v9102_v43, 5 }
 0x4a4   : > { %v15133_v38 = vadd.f32 %v7890_v17, %v7261_v57  ;;  %v9065_v17 = vor.u32 %v9064_v58, %v9061_v0  ;;  %v15729_v0 = vld [vmem:[#allocation37_spill] sm:$0xff] }
 0x4a6   : > { %9698 = vmatmul.bf16.gmra.mxu1 %v15722_v11  ;;  %v8603_v8 = vpop.f32.mrf.mxu3  ;;  %v9066_v31 = vrot.slane %v9065_v17, 4 }
 0x4a7   : > { %v8288_v48 = vpop.f32.mrf.mxu2 }
 0x4a8   : > { %v8358_v61 = vadd.f32 %v8288_v48, %v14819_v54  ;;  %v9075_v54 = vor.u32 %v9074_v40, %v9070_v6  ;;  %v9071_v40 = vsel %vm12048_vm11, %v9066_v31, %v9070_v6  ;;  %v15731_v31 = vld [vmem:[#allocation23_spill] sm:$0xff] }
 0x4aa   : > { %v15145_v55 = vadd.f32 %v8603_v8, %v8358_v61  ;;  %v9076_v20 = vrot.slane %v9075_v54, 4  ;;  %v15161_v60 = vpop.f32.mrf.mxu0  ;;  %v15727_v61 = vld [vmem:[#allocation40_spill] sm:$0xff] }
 0x4ab   : > { %v7892_v35 = vpop.f32.mrf.mxu1  ;;  %8645 = vmatmul.bf16.gmra.mxu3 %v11397_v27  ;;  %v9083_v27 = vshrl.u32 %v8740_v63, 16 }
 0x4ac   : > { %v15149_v57 = vadd.f32 %v7892_v35, %v7262_v50  ;;  %8330 = vmatmul.bf16.gmra.mxu2 %v14877_v32  ;;  %v9081_v49 = vsel %vm12048_vm11, %v9076_v20, %v9080_v16  ;;  %v9096_v32 = vshrl.u32 %v15045_v24, 16  ;;  %v11398_v50 = vld [vmem:[#allocation3 + $0xb4] sm:$0xff]  ;;  %v9173_v35 = vunpack.c.l.b16 %v9071_v40  ;;  %v15732_v40 = vld [vmem:[#allocation44_spill] sm:$0xff] }
 0x4ad   : > { %9327 = vmatmul.bf16.gmra.mxu0 %v9191_v3  ;;  %v9174_v8 = vunpack.c.l.b16 %v9081_v49  ;;  %v15728_v3 = vld [vmem:[#allocation59_spill] sm:$0xff]  ;;  %v9085_v17 = vrot.slane %v9083_v27, 4  ;;  %v9088_v20 = vrot.slane %v9086_v25, 5 }
 0x4ae   : > { %v9098_v53 = vrot.slane %v9096_v32, 4  ;;  %v7264_v58 = vadd.f32 %v15729_v0, %v15728_v3  ;;  %v11399_v25 = vld [vmem:[#allocation3 + $0xc0] sm:$0xff] }
 0x4af   : > { %v9192_v24 = vpack.c.b16 %v9174_v8, %v9173_v35  ;;  %v15734_v35 = vld [vmem:[#allocation15_spill] sm:$0xff] }
 0x4b0   : > { %v9099_v6 = vor.u32 %v9098_v53, %v9094_v15 }
 0x4b2   : > { %v15172_v29 = vpop.f32.mrf.mxu0  ;;  %v9100_v16 = vrot.slane %v9099_v6, 4 }
 0x4b3   : > { %v7895_v11 = vpop.f32.mrf.mxu1 }
 0x4b4   : > { %v15155_v48 = vadd.f32 %v7895_v11, %v7263_v10  ;;  %v9089_v10 = vor.u32 %v9088_v20, %v9085_v17  ;;  %v15730_v11 = vld [vmem:[#allocation31_spill] sm:$0xff]  ;;  %v15190_v17 = vld [vmem:[#allocation3 + $0xd0] sm:$0xf]  ;;  %v15192_v20 = vld [vmem:[#allocation3 + $0xd4] sm:$0x1] }
 0x4b5   : > { %v7265_v49 = vadd.f32 %v15731_v31, %v15730_v11  ;;  %v9116_v43 = vshll.u32 %v15190_v17, 16 }
 0x4b6   : > { %9703 = vmatmul.bf16.gmra.mxu1 %v15727_v61  ;;  %v9090_v61 = vrot.slane %v9089_v10, 4  ;;  %v9120_v10 = vshrl.u32 %v15190_v17, 16 }
 0x4b8   : > { %v9095_v45 = vsel %vm12048_vm11, %v9090_v61, %v9094_v15 }
 0x4b9   : > { %v9175_v53 = vunpack.c.l.b16 %v9095_v45 }
 0x4ba   : > { %v15183_v27 = vpop.f32.mrf.mxu0 }
 0x4bb   : > { %v7897_v54 = vpop.f32.mrf.mxu1  ;;  %8650 = vmatmul.bf16.gmra.mxu3 %v11398_v50  ;;  %v15733_v50 = vld [vmem:[#allocation33_spill] sm:$0xff] }
 0x4bc   : > { %v15168_v34 = vadd.f32 %v7897_v54, %v7264_v58  ;;  %8335 = vmatmul.bf16.gmra.mxu2 %v14949_v47  ;;  %v9105_v47 = vsel %vm12048_vm11, %v9100_v16, %v9104_v42  ;;  %v7266_v3 = vadd.f32 %v15734_v35, %v15733_v50  ;;  %v9126_v16 = vshll.u32 %v15192_v20, 16 }
 0x4bd   : > { %9332 = vmatmul.bf16.gmra.mxu0 %v9192_v24  ;;  %v9176_v8 = vunpack.c.l.b16 %v9105_v47  ;;  %v8743_v24 = vld [vmem:[#allocation3 + $0xcc] sm:$0xf]  ;;  %v9122_v42 = vrot.slane %v9120_v10, 4 }
 0x4be   : > { %v9107_v15 = vshrl.u32 %v8743_v24, 16  ;;  %v9110_v6 = vshll.u32 %v8743_v24, 16  ;;  %v9128_v61 = vrot.slane %v9126_v16, 5  ;;  %v15735_v47 = vld [vmem:[#allocation32_spill] sm:$0xff] }
 0x4bf   : > { %v9193_v58 = vpack.c.b16 %v9176_v8, %v9175_v53 }
 0x4c0   : > { %v9109_v11 = vrot.slane %v9107_v15, 4  ;;  %v9112_v31 = vrot.slane %v9110_v6, 5  ;;  %v11400_v15 = vld [vmem:[#allocation3 + $0xcc] sm:$0xff] }
 0x4c2   : > { %v15199_v45 = vpop.f32.mrf.mxu0 }
 0x4c3   : > { %v7900_v32 = vpop.f32.mrf.mxu1 }
 0x4c4   : > { %v15176_v63 = vadd.f32 %v7900_v32, %v7265_v49  ;;  %v9118_v49 = vrot.slane %v9116_v43, 5  ;;  %v9113_v32 = vor.u32 %v9112_v31, %v9109_v11  ;;  %v7269_v31 = vadd.f32 %v14891_v28, %v15738_v56  ;;  %v15745_v28 = vld [vmem:[#allocation18_spill] sm:$0xff]  ;;  %v15748_v56 = vld [vmem:[#allocation28_spill] sm:$0xff] }
 0x4c6   : > { %9708 = vmatmul.bf16.gmra.mxu1 %v15732_v40  ;;  %v7267_v40 = vadd.f32 %v14795_v19, %v15735_v47  ;;  %v15737_v19 = vld [vmem:[#allocation34_spill] sm:$0xff] }
 0x4c7   : > { %v7268_v43 = vadd.f32 %v14844_v9, %v15737_v19 }
 0x4ca   : > { %v15213_v11 = vpop.f32.mrf.mxu0 }
 0x4cb   : > { %v7902_v0 = vpop.f32.mrf.mxu1  ;;  %8655 = vmatmul.bf16.gmra.mxu3 %v11399_v25  ;;  %v9114_v25 = vrot.slane %v9113_v32, 4  ;;  %v15739_v32 = vld [vmem:[#allocation51_spill] sm:$0xff] }
 0x4cc   : > { %v15187_v54 = vadd.f32 %v7902_v0, %v7266_v3  ;;  %8340 = vmatmul.bf16.gmra.mxu2 %v15017_v12  ;;  %v9123_v12 = vor.u32 %v9122_v42, %v9118_v49  ;;  %v15736_v0 = vld [vmem:[#allocation48_spill] sm:$0xff] }
 0x4cd   : > { %9337 = vmatmul.bf16.gmra.mxu0 %v9193_v58  ;;  %v9119_v35 = vsel %vm12048_vm11, %v9114_v25, %v9118_v49  ;;  %v15743_v25 = vld [vmem:[#allocation36_spill] sm:$0xff] }
 0x4ce   : > { %v9124_v53 = vrot.slane %v9123_v12, 4  ;;  %v9177_v58 = vunpack.c.l.b16 %v9119_v35  ;;  %v15740_v12 = vld [vmem:[#allocation20_spill] sm:$0xff] }
 0x4d0   : > { %v9129_v3 = vsel %vm12048_vm11, %v9124_v53, %v9128_v61  ;;  %v15741_v61 = vld [vmem:[#allocation25_spill] sm:$0xff] }
 0x4d1   : > { %v9178_v24 = vunpack.c.l.b16 %v9129_v3  ;;  %v7270_v9 = vadd.f32 %v15741_v61, %v15740_v12  ;;  %v15744_v3 = vld [vmem:[#allocation56_spill] sm:$0xff]  ;;  %v9348_v12 = vadd.f32 %v15115_v4, %v15005_v5  ;;  %v11652_v4 = vld [vmem:[%s11993_s28 + $0x4] sm:$0xf] }
 0x4d3   : > { %v7905_v8 = vpop.f32.mrf.mxu1  ;;  %v9194_v6 = vpack.c.b16 %v9178_v24, %v9177_v58 }
 0x4d4   : > { %v15201_v50 = vadd.f32 %v7905_v8, %v7267_v40  ;;  %v15742_v8 = vld [vmem:[#allocation17_spill] sm:$0xff] }
 0x4d6   : > { %9713 = vmatmul.bf16.gmra.mxu1 %v15736_v0  ;;  %v7272_v0 = vadd.f32 %v15038_v52, %v15745_v28 }
 0x4db   : > { %v7907_v10 = vpop.f32.mrf.mxu1  ;;  %8660 = vmatmul.bf16.gmra.mxu3 %v11400_v15  ;;  %v15746_v15 = vld [vmem:[#allocation21_spill] sm:$0xff] }
 0x4dc   : > { %v15210_v16 = vadd.f32 %v7907_v10, %v7268_v43  ;;  %8345 = vmatmul.bf16.gmra.mxu2 %v15083_v1  ;;  %v7271_v1 = vadd.f32 %v15743_v25, %v15742_v8  ;;  %v15747_v10 = vld [vmem:[#allocation60_spill] sm:$0xff] }
 0x4dd   : > { %9342 = vmatmul.bf16.gmra.mxu0 %v9194_v6  ;;  %v7273_v6 = vadd.f32 %v15075_v46, %v15746_v15  ;;  %v15247_v46 = vld [vmem:[%s15506_s4] ss:$0 sm:$0xff] }
 0x4e3   : > { %v7910_v49 = vpop.f32.mrf.mxu1 }
 0x4e4   : > { %v15217_v42 = vadd.f32 %v7910_v49, %v7269_v31  ;;  %v7274_v31 = vadd.f32 %v15098_v13, %v15748_v56  ;;  %v11651_v13 = vld [vmem:[%s11993_s28] sm:$0xf] }
 0x4e5   : > { %v9842_v25 = vunpack.c.l.bf16 %v11651_v13  ;;  %v9351_v13 = vadd.f32 %v15161_v60, %v15093_v36 }
 0x4e6   : > { %9718 = vmatmul.bf16.gmra.mxu1 %v15739_v32 }
 0x4eb   : > { %v7912_v47 = vpop.f32.mrf.mxu1 }
 0x4ec   : > { %v15222_v40 = vadd.f32 %v7912_v47, %v7270_v9  ;;  %v15749_v9 = vld [vmem:[#allocation62_spill] sm:$0xff]  ;;  %v15250_v47 = vpop.f32.mrf.mxu2 }
 0x4f3   : > { %v7915_v53 = vpop.f32.mrf.mxu1 }
 0x4f4   : > { %v15226_v35 = vadd.f32 %v7915_v53, %v7271_v1  ;;  %v9349_v1 = vadd.f32 %v15127_v33, %v15042_v51  ;;  %v15262_v56 = vpop.f32.mrf.mxu2 }
 0x4f6   : > { %9723 = vmatmul.bf16.gmra.mxu1 %v15744_v3  ;;  %v9843_v3 = vunpack.c.l.bf16 %v11652_v4 }
 0x4fb   : > { %v7917_v58 = vpop.f32.mrf.mxu1 }
 0x4fc   : > { %v15231_v24 = vadd.f32 %v7917_v58, %v7272_v0  ;;  %v15258_v58 = vpop.f32.mrf.mxu3 }
 0x503   : > { %v7920_v19 = vpop.f32.mrf.mxu1 }
 0x504   : > { %v15235_v43 = vadd.f32 %v7920_v19, %v7273_v6  ;;  %v15260_v6 = vpop.f32.mrf.mxu0 }
 0x506   : > { %9728 = vmatmul.bf16.gmra.mxu1 %v15747_v10 }
 0x50b   : > { %v7922_v49 = vpop.f32.mrf.mxu1 }
 0x50c   : > { %v15240_v32 = vadd.f32 %v7922_v49, %v7274_v31  ;;  %v9350_v31 = vadd.f32 %v15147_v41, %v15073_v26  ;;  %v15278_v26 = vpop.f32.mrf.mxu0 }
 0x513   : > { %v9694_v52 = vpop.f32.mrf.mxu1 }
 0x514   : > { %v9774_v61 = vadd.f32 %v9694_v52, %v9348_v12  ;;  %v15750_v52 = vld [vmem:[#allocation14_spill] sm:$0xff]  ;;  %v15272_v12 = vpop.f32.mrf.mxu3 }
 0x516   : > { %9733 = vmatmul.bf16.gmra.mxu1 %v15749_v9  ;;  %v9810_v8 = vadd.f32 %v15247_v46, %v9774_v61  ;;  %v11653_v9 = vld [vmem:[%s11993_s28 + $0x8] sm:$0xf] }
 0x518   : > { %v9874_v28 = vadd.f32 %v9842_v25, %v9810_v8  ;;  %v9844_v8 = vunpack.c.l.bf16 %v11653_v9 }
 0x51a   : > { %v9906_v19 = vmax.f32 %v9874_v28, 0.0 }
 0x51b   : > { %v9696_v53 = vpop.f32.mrf.mxu1 }
 0x51c   : > { %v9775_v5 = vadd.f32 %v9696_v53, %v9349_v1  ;;  %v11654_v1 = vld [vmem:[%s11993_s28 + $0xc] sm:$0xf] }
 0x51d   : > { %v9845_v53 = vunpack.c.l.bf16 %v11654_v1 }
 0x51e   : > { %v9811_v0 = vadd.f32 %v15247_v46, %v9775_v5  ;;  %v15281_v5 = vpop.f32.mrf.mxu2 }
 0x520   : > { %v9875_v15 = vadd.f32 %v9843_v3, %v9811_v0 }
 0x522   : > { %v9907_v10 = vmax.f32 %v9875_v15, 0.0 }
 0x523   : > { %v9699_v51 = vpop.f32.mrf.mxu1 }
 0x524   : > { %v11429_v33 = vpack.c.bf16 %v9907_v10, %v9906_v19  ;;  %v9776_v49 = vadd.f32 %v9699_v51, %v9350_v31  ;;  %v15284_v19 = vpop.f32.mrf.mxu3  ;;  %v9352_v10 = vadd.f32 %v15172_v29, %v15104_v37  ;;  %v15288_v51 = vpop.f32.mrf.mxu0  ;;  %v15751_v31 = vld [vmem:[#allocation30_spill] sm:$0xff] }
 0x526   : > { %11430 = vst [vmem:[%s15268_s30] sm:$0xff] %v11429_v33   ;;  %9738 = vmatmul.bf16.gmra.mxu1 %v15750_v52  ;;  %v9812_v61 = vadd.f32 %v15247_v46, %v9776_v49  ;;  %v15292_v49 = vpop.f32.mrf.mxu2 }
 0x528   : > { %v9876_v4 = vadd.f32 %v9844_v8, %v9812_v61  ;;  %v11655_v61 = vld [vmem:[%s11993_s28 + $0x10] sm:$0xf]  ;;  %v9353_v8 = vadd.f32 %v15183_v27, %v15120_v44  ;;  %v9354_v27 = vadd.f32 %v15199_v45, %v15131_v22 }
 0x529   : > { %v9846_v9 = vunpack.c.l.bf16 %v11655_v61  ;;  %v11657_v61 = vld [vmem:[%s11993_s28 + $0x18] sm:$0xf] }
 0x52a   : > { %v9908_v0 = vmax.f32 %v9876_v4, 0.0 }
 0x52b   : > { %v9701_v25 = vpop.f32.mrf.mxu1 }
 0x52c   : > { %v9777_v41 = vadd.f32 %v9701_v25, %v9351_v13  ;;  %v15299_v29 = vpop.f32.mrf.mxu3  ;;  %v15302_v4 = vpop.f32.mrf.mxu0 }
 0x52e   : > { %v9813_v3 = vadd.f32 %v15247_v46, %v9777_v41  ;;  %v11656_v41 = vld [vmem:[%s11993_s28 + $0x14] sm:$0xf] }
 0x52f   : > { %v9847_v37 = vunpack.c.l.bf16 %v11656_v41  ;;  %v15753_v41 = vld [vmem:[#allocation19_spill] sm:$0xff] }
 0x530   : > { %v9877_v28 = vadd.f32 %v9845_v53, %v9813_v3  ;;  %v8359_v22 = vadd.f32 %v15250_v47, %v15753_v41 }
 0x532   : > { %v9909_v15 = vmax.f32 %v9877_v28, 0.0  ;;  %v15304_v28 = vpop.f32.mrf.mxu2 }
 0x533   : > { %v9704_v36 = vpop.f32.mrf.mxu1 }
 0x534   : > { %v11434_v60 = vpack.c.bf16 %v9909_v15, %v9908_v0  ;;  %v9778_v33 = vadd.f32 %v9704_v36, %v9352_v10  ;;  %v15752_v10 = vld [vmem:[#allocation24_spill] sm:$0xff] }
 0x536   : > { %11506 = vst [vmem:[%s15268_s30 + $0x8] sm:$0xff] %v11434_v60   ;;  %9743 = vmatmul.bf16.gmra.mxu1 %v15751_v31  ;;  %v9814_v52 = vadd.f32 %v15247_v46, %v9778_v33  ;;  %v15310_v33 = vpop.f32.mrf.mxu3  ;;  %v15312_v31 = vpop.f32.mrf.mxu0 }
 0x538   : > { %v9878_v1 = vadd.f32 %v9846_v9, %v9814_v52  ;;  %v9848_v9 = vunpack.c.l.bf16 %v11657_v61 }
 0x53a   : > { %v9910_v0 = vmax.f32 %v9878_v1, 0.0 }
 0x53b   : > { %v9706_v13 = vpop.f32.mrf.mxu1 }
 0x53c   : > { %v9779_v25 = vadd.f32 %v9706_v13, %v9353_v8  ;;  %v9355_v8 = vadd.f32 %v15213_v11, %v15145_v55  ;;  %v15318_v13 = vpop.f32.mrf.mxu2  ;;  %v15754_v55 = vld [vmem:[#allocation41_spill] sm:$0xff] }
 0x53d   : > { %v8360_v11 = vadd.f32 %v15262_v56, %v15754_v55  ;;  %v11659_v56 = vld [vmem:[%s11993_s28 + $0x20] sm:$0xf] }
 0x53e   : > { %v9815_v53 = vadd.f32 %v15247_v46, %v9779_v25  ;;  %v15329_v47 = vpop.f32.mrf.mxu0 }
 0x540   : > { %v9879_v3 = vadd.f32 %v9847_v37, %v9815_v53  ;;  %v11658_v37 = vld [vmem:[%s11993_s28 + $0x1c] sm:$0xf] }
 0x541   : > { %v9849_v1 = vunpack.c.l.bf16 %v11658_v37  ;;  %v15755_v37 = vld [vmem:[#allocation22_spill] sm:$0xff] }
 0x542   : > { %v9911_v15 = vmax.f32 %v9879_v3, 0.0 }
 0x543   : > { %v9709_v36 = vpop.f32.mrf.mxu1 }
 0x544   : > { %v11439_v44 = vpack.c.bf16 %v9911_v15, %v9910_v0  ;;  %v9780_v60 = vadd.f32 %v9709_v36, %v9354_v27  ;;  %v8674_v0 = vadd.f32 %v15258_v58, %v8359_v22  ;;  %v15325_v36 = vpop.f32.mrf.mxu3  ;;  %v15332_v61 = vpop.f32.mrf.mxu2  ;;  %v8675_v58 = vadd.f32 %v15272_v12, %v8360_v11  ;;  %v15756_v11 = vld [vmem:[#allocation26_spill] sm:$0xff] }
 0x546   : > { %11507 = vst [vmem:[%s15268_s30 + $0x10] sm:$0xff] %v11439_v44   ;;  %9748 = vmatmul.bf16.gmra.mxu1 %v15752_v10  ;;  %v9816_v52 = vadd.f32 %v15247_v46, %v9780_v60  ;;  %v9357_v41 = vadd.f32 %v15278_v26, %v8675_v58 }
 0x548   : > { %v9880_v53 = vadd.f32 %v9848_v9, %v9816_v52  ;;  %v9356_v52 = vadd.f32 %v15260_v6, %v8674_v0  ;;  %v8361_v6 = vadd.f32 %v15281_v5, %v15755_v37 }
 0x54a   : > { %v9912_v44 = vmax.f32 %v9880_v53, 0.0  ;;  %v11660_v53 = vld [vmem:[%s11993_s28 + $0x24] sm:$0xf]  ;;  %v8676_v55 = vadd.f32 %v15284_v19, %v8361_v6 }
 0x54b   : > { %v9711_v25 = vpop.f32.mrf.mxu1  ;;  %v9851_v12 = vunpack.c.l.bf16 %v11660_v53 }
 0x54c   : > { %v9781_v45 = vadd.f32 %v9711_v25, %v9355_v8  ;;  %v9850_v25 = vunpack.c.l.bf16 %v11659_v56  ;;  %v15340_v22 = vpop.f32.mrf.mxu3 }
 0x54e   : > { %v9817_v3 = vadd.f32 %v15247_v46, %v9781_v45 }
 0x550   : > { %v9881_v15 = vadd.f32 %v9849_v1, %v9817_v3  ;;  %v15345_v3 = vpop.f32.mrf.mxu0 }
 0x552   : > { %v9913_v27 = vmax.f32 %v9881_v15, 0.0  ;;  %v15348_v15 = vpop.f32.mrf.mxu2 }
 0x553   : > { %v9714_v60 = vpop.f32.mrf.mxu1  ;;  %v8366_v39 = vadd.f32 %v15348_v15, %v15095_v30 }
 0x554   : > { %v11444_v10 = vpack.c.bf16 %v9913_v27, %v9912_v44  ;;  %v9782_v9 = vadd.f32 %v9714_v60, %v9356_v52  ;;  %v8362_v44 = vadd.f32 %v15292_v49, %v15756_v11  ;;  %v9358_v52 = vadd.f32 %v15288_v51, %v8676_v55  ;;  %v15354_v58 = vpop.f32.mrf.mxu3 }
 0x555   : > { %v8363_v51 = vadd.f32 %v15304_v28, %v15014_v23  ;;  %v8364_v55 = vadd.f32 %v15318_v13, %v15049_v7 }
 0x556   : > { %11508 = vst [vmem:[%s15268_s30 + $0x18] sm:$0xff] %v11444_v10   ;;  %9753 = vmatmul.bf16.gmra.mxu1 %v14997_v2  ;;  %v9818_v8 = vadd.f32 %v15247_v46, %v9782_v9  ;;  %v8677_v9 = vadd.f32 %v15299_v29, %v8362_v44  ;;  %v11662_v29 = vld [vmem:[%s11993_s28 + $0x2c] sm:$0xf]  ;;  %v9551_v44 = vrot.slane %v15190_v17, 5 }
 0x558   : > { %v9882_v0 = vadd.f32 %v9850_v25, %v9818_v8  ;;  %v15359_v19 = vpop.f32.mrf.mxu0  ;;  %v11661_v25 = vld [vmem:[%s11993_s28 + $0x28] sm:$0xf]  ;;  %v9553_v13 = vrot.slane %v9551_v44, 4 }
 0x55a   : > { %v9914_v27 = vmax.f32 %v9882_v0, 0.0  ;;  %v15361_v56 = vpop.f32.mrf.mxu2  ;;  %v8678_v0 = vadd.f32 %v15310_v33, %v8363_v51  ;;  %v8679_v33 = vadd.f32 %v15325_v36, %v8364_v55 }
 0x55b   : > { %v9716_v45 = vpop.f32.mrf.mxu1 }
 0x55c   : > { %v9783_v1 = vadd.f32 %v9716_v45, %v9357_v41  ;;  %v9852_v41 = vunpack.c.l.bf16 %v11661_v25  ;;  %v9359_v45 = vadd.f32 %v15302_v4, %v8677_v9  ;;  %v9361_v25 = vadd.f32 %v15329_v47, %v8679_v33  ;;  %v11665_v33 = vld [vmem:[%s11993_s28 + $0x38] sm:$0xf] }
 0x55d   : > { %v9856_v30 = vunpack.c.l.bf16 %v11665_v33 }
 0x55e   : > { %v9819_v2 = vadd.f32 %v15247_v46, %v9783_v1  ;;  %v9853_v1 = vunpack.c.l.bf16 %v11662_v29 }
 0x560   : > { %v9883_v26 = vadd.f32 %v9851_v12, %v9819_v2  ;;  %v15370_v12 = vpop.f32.mrf.mxu3  ;;  %v15375_v4 = vpop.f32.mrf.mxu0 }
 0x562   : > { %v9915_v5 = vmax.f32 %v9883_v26, 0.0  ;;  %v15377_v23 = vpop.f32.mrf.mxu2 }
 0x563   : > { %v9719_v60 = vpop.f32.mrf.mxu1 }
 0x564   : > { %v11449_v10 = vpack.c.bf16 %v9915_v5, %v9914_v27  ;;  %v9784_v8 = vadd.f32 %v9719_v60, %v9358_v52  ;;  %v9360_v5 = vadd.f32 %v15312_v31, %v8678_v0  ;;  %v9395_v60 = vld [vmem:[#allocation3 + $0xcc] sm:$0xe]  ;;  %v9554_v52 = vrot.slane %v15192_v20, 5 }
 0x565   : > { %v11146_v7 = vrot.slane %v9395_v60, 9  ;;  %v11664_v20 = vld [vmem:[%s11993_s28 + $0x34] sm:$0xf] }
 0x566   : > { %11509 = vst [vmem:[%s15268_s30 + $0x20] sm:$0xff] %v11449_v10   ;;  %9758 = vmatmul.bf16.gmra.mxu1 %v15035_v62  ;;  %v9820_v49 = vadd.f32 %v15247_v46, %v9784_v8  ;;  %v9855_v51 = vunpack.c.l.bf16 %v11664_v20 }
 0x567   : > { %v9552_v36 = vsel %vm12316_vm14, %v11146_v7, %v9551_v44  ;;  %v8681_v44 = vadd.f32 %v15354_v58, %v8366_v39  ;;  %v8367_v7 = vadd.f32 %v15361_v56, %v15106_v14 }
 0x568   : > { %v9884_v53 = vadd.f32 %v9852_v41, %v9820_v49  ;;  %v8628_v9 = vpop.f32.mrf.mxu3  ;;  %v11663_v49 = vld [vmem:[%s11993_s28 + $0x30] sm:$0xf]  ;;  %v9555_v41 = vsel %vm12316_vm14, %v9553_v13, %v9554_v52  ;;  %v9603_v47 = vunpack.c.l.b16 %v9552_v36  ;;  %v11666_v52 = vld [vmem:[%s11993_s28 + $0x3c] sm:$0xf] }
 0x569   : > { %v9854_v17 = vunpack.c.l.bf16 %v11663_v49  ;;  %v9363_v15 = vadd.f32 %v15359_v19, %v8681_v44  ;;  %v8368_v19 = vadd.f32 %v15377_v23, %v15122_v59 }
 0x56a   : > { %v9916_v26 = vmax.f32 %v9884_v53, 0.0  ;;  %v9604_v53 = vunpack.c.l.b16 %v9555_v41 }
 0x56b   : > { %v9721_v37 = vpop.f32.mrf.mxu1  ;;  %v8683_v20 = vadd.f32 %v8628_v9, %v8368_v19 }
 0x56c   : > { %v9785_v6 = vadd.f32 %v9721_v37, %v9359_v45  ;;  %v9310_v45 = vpop.f32.mrf.mxu0 }
 0x56e   : > { %v9821_v62 = vadd.f32 %v15247_v46, %v9785_v6  ;;  %v8316_v6 = vpop.f32.mrf.mxu2 }
 0x56f   : > { %v8369_v59 = vadd.f32 %v8316_v6, %v15133_v38 }
 0x570   : > { %v9885_v2 = vadd.f32 %v9853_v1, %v9821_v62  ;;  %v8631_v55 = vpop.f32.mrf.mxu3 }
 0x571   : > { %v8684_v9 = vadd.f32 %v8631_v55, %v8369_v59 }
 0x572   : > { %v9917_v11 = vmax.f32 %v9885_v2, 0.0 }
 0x573   : > { %v9724_v28 = vpop.f32.mrf.mxu1 }
 0x574   : > { %v11454_v27 = vpack.c.bf16 %v9917_v11, %v9916_v26  ;;  %v9786_v10 = vadd.f32 %v9724_v28, %v9360_v5 }
 0x576   : > { %11510 = vst [vmem:[%s15268_s30 + $0x28] sm:$0xff] %v11454_v27   ;;  %9763 = vmatmul.bf16.gmra.mxu1 %v15085_v21  ;;  %v9822_v8 = vadd.f32 %v15247_v46, %v9786_v10  ;;  %v8365_v21 = vadd.f32 %v15332_v61, %v15081_v18  ;;  %v9620_v61 = vpack.c.b16 %v9604_v53, %v9603_v47  ;;  %v9313_v27 = vpop.f32.mrf.mxu0  ;;  %v11667_v47 = vld [vmem:[%s11993_s28 + $0x40] sm:$0xf] }
 0x577   : > { %v9858_v53 = vunpack.c.l.bf16 %v11667_v47  ;;  %v9366_v38 = vadd.f32 %v9313_v27, %v8684_v9 }
 0x578   : > { %v9886_v29 = vadd.f32 %v9854_v17, %v9822_v8  ;;  %v8680_v62 = vadd.f32 %v15340_v22, %v8365_v21  ;;  %v8318_v22 = vpop.f32.mrf.mxu2  ;;  %v8633_v58 = vpop.f32.mrf.mxu3  ;;  %v8682_v17 = vadd.f32 %v15370_v12, %v8367_v7  ;;  %v11669_v7 = vld [vmem:[%s11993_s28 + $0x48] sm:$0xf] }
 0x57a   : > { %v9918_v2 = vmax.f32 %v9886_v29, 0.0  ;;  %v9362_v28 = vadd.f32 %v15345_v3, %v8680_v62  ;;  %v9857_v3 = vunpack.c.l.bf16 %v11666_v52  ;;  %v9365_v62 = vadd.f32 %v9310_v45, %v8683_v20 }
 0x57b   : > { %v9726_v31 = vpop.f32.mrf.mxu1 }
 0x57c   : > { %v9787_v37 = vadd.f32 %v9726_v31, %v9361_v25 }
 0x57e   : > { %v9823_v1 = vadd.f32 %v15247_v46, %v9787_v37  ;;  %v9315_v25 = vpop.f32.mrf.mxu0  ;;  %v9364_v37 = vadd.f32 %v15375_v4, %v8682_v17 }
 0x580   : > { %v9887_v0 = vadd.f32 %v9855_v51, %v9823_v1  ;;  %v8321_v36 = vpop.f32.mrf.mxu2  ;;  %v8636_v29 = vpop.f32.mrf.mxu3 }
 0x582   : > { %v9919_v18 = vmax.f32 %v9887_v0, 0.0 }
 0x583   : > { %v9729_v26 = vpop.f32.mrf.mxu1 }
 0x584   : > { %v11459_v11 = vpack.c.bf16 %v9919_v18, %v9918_v2  ;;  %v9788_v5 = vadd.f32 %v9729_v26, %v9362_v28  ;;  %v11668_v2 = vld [vmem:[%s11993_s28 + $0x44] sm:$0xf]  ;;  %v8370_v28 = vadd.f32 %v8318_v22, %v15149_v57  ;;  %v8371_v57 = vadd.f32 %v8321_v36, %v15155_v48 }
 0x585   : > { %v9859_v18 = vunpack.c.l.bf16 %v11668_v2 }
 0x586   : > { %11511 = vst [vmem:[%s15268_s30 + $0x30] sm:$0xff] %v11459_v11   ;;  %9768 = vmatmul.bf16.gmra.mxu1 %v9620_v61  ;;  %v9824_v60 = vadd.f32 %v15247_v46, %v9788_v5  ;;  %v9318_v1 = vpop.f32.mrf.mxu0  ;;  %v8686_v19 = vadd.f32 %v8636_v29, %v8371_v57 }
 0x588   : > { %v9888_v8 = vadd.f32 %v9856_v30, %v9824_v60  ;;  %v8323_v0 = vpop.f32.mrf.mxu2  ;;  %v8638_v11 = vpop.f32.mrf.mxu3  ;;  %v8685_v30 = vadd.f32 %v8633_v58, %v8370_v28  ;;  %v9368_v48 = vadd.f32 %v9318_v1, %v8686_v19 }
 0x58a   : > { %v9920_v41 = vmax.f32 %v9888_v8, 0.0  ;;  %v9367_v55 = vadd.f32 %v9315_v25, %v8685_v30  ;;  %v11670_v8 = vld [vmem:[%s11993_s28 + $0x4c] sm:$0xf] }
 0x58b   : > { %v9731_v10 = vpop.f32.mrf.mxu1 }
 0x58c   : > { %v9789_v13 = vadd.f32 %v9731_v10, %v9363_v15 }
 0x58e   : > { %v9825_v49 = vadd.f32 %v15247_v46, %v9789_v13  ;;  %v9320_v60 = vpop.f32.mrf.mxu0  ;;  %v9860_v13 = vunpack.c.l.bf16 %v11669_v7 }
 0x590   : > { %v9889_v31 = vadd.f32 %v9857_v3, %v9825_v49  ;;  %v8326_v6 = vpop.f32.mrf.mxu2  ;;  %v8641_v52 = vpop.f32.mrf.mxu3  ;;  %v9861_v49 = vunpack.c.l.bf16 %v11670_v8 }
 0x592   : > { %v9921_v21 = vmax.f32 %v9889_v31, 0.0 }
 0x593   : > { %v9734_v14 = vpop.f32.mrf.mxu1 }
 0x594   : > { %v11464_v56 = vpack.c.bf16 %v9921_v21, %v9920_v41  ;;  %v9790_v51 = vadd.f32 %v9734_v14, %v9364_v37  ;;  %v8372_v21 = vadd.f32 %v8323_v0, %v15168_v34  ;;  %v8373_v34 = vadd.f32 %v8326_v6, %v15176_v63 }
 0x596   : > { %11512 = vst [vmem:[%s15268_s30 + $0x38] sm:$0xff] %v11464_v56   ;;  %v9826_v12 = vadd.f32 %v15247_v46, %v9790_v51  ;;  %v9323_v17 = vpop.f32.mrf.mxu0  ;;  %v8687_v20 = vadd.f32 %v8638_v11, %v8372_v21 }
 0x598   : > { %v9890_v61 = vadd.f32 %v9858_v53, %v9826_v12  ;;  %v8328_v58 = vpop.f32.mrf.mxu2  ;;  %v8643_v36 = vpop.f32.mrf.mxu3  ;;  %v9369_v29 = vadd.f32 %v9320_v60, %v8687_v20  ;;  %v11675_v20 = vld [vmem:[%s11993_s28 + $0x60] sm:$0xf] }
 0x59a   : > { %v9922_v44 = vmax.f32 %v9890_v61, 0.0 }
 0x59b   : > { %v9736_v39 = vpop.f32.mrf.mxu1 }
 0x59c   : > { %v9791_v23 = vadd.f32 %v9736_v39, %v9365_v62  ;;  %v11671_v62 = vld [vmem:[%s11993_s28 + $0x50] sm:$0xf] }
 0x59d   : > { %v9862_v39 = vunpack.c.l.bf16 %v11671_v62  ;;  %v11676_v62 = vld [vmem:[%s11993_s28 + $0x64] sm:$0xf] }
 0x59e   : > { %v9827_v4 = vadd.f32 %v15247_v46, %v9791_v23  ;;  %v9325_v12 = vpop.f32.mrf.mxu0  ;;  %v11672_v23 = vld [vmem:[%s11993_s28 + $0x54] sm:$0xf] }
 0x59f   : > { %v9863_v2 = vunpack.c.l.bf16 %v11672_v23 }
 0x5a0   : > { %v9891_v26 = vadd.f32 %v9859_v18, %v9827_v4  ;;  %v8331_v47 = vpop.f32.mrf.mxu2  ;;  %v8646_v61 = vpop.f32.mrf.mxu3  ;;  %v8688_v4 = vadd.f32 %v8641_v52, %v8373_v34 }
 0x5a2   : > { %v9923_v5 = vmax.f32 %v9891_v26, 0.0  ;;  %v8374_v26 = vadd.f32 %v8328_v58, %v15187_v54  ;;  %v9370_v60 = vadd.f32 %v9323_v17, %v8688_v4  ;;  %v8375_v54 = vadd.f32 %v8331_v47, %v15201_v50 }
 0x5a3   : > { %v9739_v45 = vpop.f32.mrf.mxu1 }
 0x5a4   : > { %v11469_v33 = vpack.c.bf16 %v9923_v5, %v9922_v44  ;;  %v9792_v15 = vadd.f32 %v9739_v45, %v9366_v38  ;;  %v8690_v17 = vadd.f32 %v8646_v61, %v8375_v54 }
 0x5a6   : > { %11513 = vst [vmem:[%s15268_s30 + $0x40] sm:$0xff] %v11469_v33   ;;  %v9828_v10 = vadd.f32 %v15247_v46, %v9792_v15  ;;  %v9328_v11 = vpop.f32.mrf.mxu0  ;;  %v8689_v33 = vadd.f32 %v8643_v36, %v8374_v26  ;;  %v11673_v15 = vld [vmem:[%s11993_s28 + $0x58] sm:$0xf] }
 0x5a8   : > { %v9892_v31 = vadd.f32 %v9860_v13, %v9828_v10  ;;  %v8333_v5 = vpop.f32.mrf.mxu2  ;;  %v8648_v6 = vpop.f32.mrf.mxu3  ;;  %v9864_v10 = vunpack.c.l.bf16 %v11673_v15  ;;  %v9371_v7 = vadd.f32 %v9325_v12, %v8689_v33  ;;  %v11678_v15 = vld [vmem:[%s11993_s28 + $0x6c] sm:$0xf] }
 0x5aa   : > { %v9924_v14 = vmax.f32 %v9892_v31, 0.0 }
 0x5ab   : > { %v9741_v3 = vpop.f32.mrf.mxu1 }
 0x5ac   : > { %v9793_v22 = vadd.f32 %v9741_v3, %v9367_v55  ;;  %v11674_v3 = vld [vmem:[%s11993_s28 + $0x5c] sm:$0xf] }
 0x5ad   : > { %v9865_v57 = vunpack.c.l.bf16 %v11674_v3 }
 0x5ae   : > { %v9829_v27 = vadd.f32 %v15247_v46, %v9793_v22  ;;  %v9330_v55 = vpop.f32.mrf.mxu0 }
 0x5b0   : > { %v9893_v41 = vadd.f32 %v9861_v49, %v9829_v27  ;;  %v8336_v22 = vpop.f32.mrf.mxu2  ;;  %v8376_v27 = vadd.f32 %v8333_v5, %v15210_v16 }
 0x5b1   : > { %v8377_v16 = vadd.f32 %v8336_v22, %v15217_v42 }
 0x5b2   : > { %v9925_v25 = vmax.f32 %v9893_v41, 0.0  ;;  %v8651_v41 = vpop.f32.mrf.mxu3 }
 0x5b3   : > { %v9744_v56 = vpop.f32.mrf.mxu1 }
 0x5b4   : > { %v11474_v37 = vpack.c.bf16 %v9925_v25, %v9924_v14  ;;  %v9794_v51 = vadd.f32 %v9744_v56, %v9368_v48  ;;  %v9372_v14 = vadd.f32 %v9328_v11, %v8690_v17  ;;  %v8691_v25 = vadd.f32 %v8648_v6, %v8376_v27 }
 0x5b6   : > { %11514 = vst [vmem:[%s15268_s30 + $0x48] sm:$0xff] %v11474_v37   ;;  %v9830_v53 = vadd.f32 %v15247_v46, %v9794_v51  ;;  %v9333_v56 = vpop.f32.mrf.mxu0  ;;  %v9866_v51 = vunpack.c.l.bf16 %v11675_v20  ;;  %v9373_v12 = vadd.f32 %v9330_v55, %v8691_v25 }
 0x5b8   : > { %v9894_v18 = vadd.f32 %v9862_v39, %v9830_v53  ;;  %v8338_v48 = vpop.f32.mrf.mxu2  ;;  %v9867_v39 = vunpack.c.l.bf16 %v11676_v62 }
 0x5ba   : > { %v9926_v28 = vmax.f32 %v9894_v18, 0.0 }
 0x5bb   : > { %v9746_v59 = vpop.f32.mrf.mxu1 }
 0x5bc   : > { %v9795_v0 = vadd.f32 %v9746_v59, %v9369_v29  ;;  %v8653_v29 = vpop.f32.mrf.mxu3 }
 0x5be   : > { %v9831_v1 = vadd.f32 %v15247_v46, %v9795_v0  ;;  %v8692_v0 = vadd.f32 %v8651_v41, %v8377_v16  ;;  %v9335_v23 = vpop.f32.mrf.mxu0 }
 0x5c0   : > { %v9895_v9 = vadd.f32 %v9863_v2, %v9831_v1  ;;  %v8341_v18 = vpop.f32.mrf.mxu2  ;;  %v8378_v1 = vadd.f32 %v8338_v48, %v15222_v40  ;;  %v9374_v26 = vadd.f32 %v9333_v56, %v8692_v0 }
 0x5c1   : > { %v8379_v40 = vadd.f32 %v8341_v18, %v15226_v35 }
 0x5c2   : > { %v9927_v44 = vmax.f32 %v9895_v9, 0.0  ;;  %v8693_v11 = vadd.f32 %v8653_v29, %v8378_v1 }
 0x5c3   : > { %v9749_v45 = vpop.f32.mrf.mxu1 }
 0x5c4   : > { %v11479_v63 = vpack.c.bf16 %v9927_v44, %v9926_v28  ;;  %v9796_v38 = vadd.f32 %v9749_v45, %v9370_v60  ;;  %v8656_v44 = vpop.f32.mrf.mxu3  ;;  %v9375_v33 = vadd.f32 %v9335_v23, %v8693_v11 }
 0x5c5   : > { %v8694_v54 = vadd.f32 %v8656_v44, %v8379_v40 }
 0x5c6   : > { %11515 = vst [vmem:[%s15268_s30 + $0x50] sm:$0xff] %v11479_v63   ;;  %v9832_v30 = vadd.f32 %v15247_v46, %v9796_v38  ;;  %v9338_v5 = vpop.f32.mrf.mxu0  ;;  %v11677_v63 = vld [vmem:[%s11993_s28 + $0x68] sm:$0xf] }
 0x5c7   : > { %v9868_v60 = vunpack.c.l.bf16 %v11677_v63  ;;  %v9376_v17 = vadd.f32 %v9338_v5, %v8694_v54 }
 0x5c8   : > { %v9896_v8 = vadd.f32 %v9864_v10, %v9832_v30  ;;  %v8343_v38 = vpop.f32.mrf.mxu2  ;;  %v9869_v10 = vunpack.c.l.bf16 %v11678_v15 }
 0x5c9   : > { %v8380_v3 = vadd.f32 %v8343_v38, %v15231_v24 }
 0x5ca   : > { %v9928_v58 = vmax.f32 %v9896_v8, 0.0 }
 0x5cb   : > { %v9751_v13 = vpop.f32.mrf.mxu1 }
 0x5cc   : > { %v9797_v52 = vadd.f32 %v9751_v13, %v9371_v7 }
 0x5ce   : > { %v9833_v49 = vadd.f32 %v15247_v46, %v9797_v52  ;;  %v8658_v52 = vpop.f32.mrf.mxu3  ;;  %v9340_v35 = vpop.f32.mrf.mxu0 }
 0x5cf   : > { %v8695_v27 = vadd.f32 %v8658_v52, %v8380_v3 }
 0x5d0   : > { %v9897_v31 = vadd.f32 %v9865_v57, %v9833_v49 }
 0x5d2   : > { %v9929_v19 = vmax.f32 %v9897_v31, 0.0  ;;  %v8346_v31 = vpop.f32.mrf.mxu2 }
 0x5d3   : > { %v9754_v21 = vpop.f32.mrf.mxu1  ;;  %v8381_v24 = vadd.f32 %v8346_v31, %v15235_v43 }
 0x5d4   : > { %v11484_v50 = vpack.c.bf16 %v9929_v19, %v9928_v58  ;;  %v9798_v37 = vadd.f32 %v9754_v21, %v9372_v14  ;;  %v11679_v21 = vld [vmem:[%s11993_s28 + $0x70] sm:$0xf]  ;;  %v9377_v14 = vadd.f32 %v9340_v35, %v8695_v27 }
 0x5d6   : > { %11516 = vst [vmem:[%s15268_s30 + $0x58] sm:$0xff] %v11484_v50   ;;  %v9834_v36 = vadd.f32 %v15247_v46, %v9798_v37  ;;  %v8661_v19 = vpop.f32.mrf.mxu3  ;;  %v9870_v50 = vunpack.c.l.bf16 %v11679_v21  ;;  %v11680_v37 = vld [vmem:[%s11993_s28 + $0x74] sm:$0xf] }
 0x5d7   : > { %v9871_v48 = vunpack.c.l.bf16 %v11680_v37 }
 0x5d8   : > { %v9898_v59 = vadd.f32 %v9866_v51, %v9834_v36  ;;  %v9343_v36 = vpop.f32.mrf.mxu0 }
 0x5da   : > { %v9930_v61 = vmax.f32 %v9898_v59, 0.0 }
 0x5db   : > { %v9756_v47 = vpop.f32.mrf.mxu1 }
 0x5dc   : > { %v9799_v53 = vadd.f32 %v9756_v47, %v9373_v12  ;;  %v8348_v12 = vpop.f32.mrf.mxu2  ;;  %v8696_v47 = vadd.f32 %v8661_v19, %v8381_v24 }
 0x5de   : > { %v9835_v34 = vadd.f32 %v15247_v46, %v9799_v53  ;;  %v8382_v53 = vadd.f32 %v8348_v12, %v15240_v32  ;;  %v8663_v29 = vpop.f32.mrf.mxu3  ;;  %v9378_v59 = vadd.f32 %v9343_v36, %v8696_v47 }
 0x5e0   : > { %v9899_v2 = vadd.f32 %v9867_v39, %v9835_v34  ;;  %v8697_v0 = vadd.f32 %v8663_v29, %v8382_v53 }
 0x5e2   : > { %v9931_v4 = vmax.f32 %v9899_v2, 0.0  ;;  %v9345_v2 = vpop.f32.mrf.mxu0 }
 0x5e3   : > { %v9759_v9 = vpop.f32.mrf.mxu1  ;;  %v9379_v18 = vadd.f32 %v9345_v2, %v8697_v0 }
 0x5e4   : > { %v11489_v42 = vpack.c.bf16 %v9931_v4, %v9930_v61  ;;  %v9800_v28 = vadd.f32 %v9759_v9, %v9374_v26  ;;  %v11681_v61 = vld [vmem:[%s11993_s28 + $0x78] sm:$0xf] }
 0x5e5   : > { %v9872_v4 = vunpack.c.l.bf16 %v11681_v61 }
 0x5e6   : > { %11517 = vst [vmem:[%s15268_s30 + $0x60] sm:$0xff] %v11489_v42   ;;  %v9836_v45 = vadd.f32 %v15247_v46, %v9800_v28  ;;  %v11682_v42 = vld [vmem:[%s11993_s28 + $0x7c] sm:$0xf]  ;;  %s11787_s28 = sshra.s32 %s10018_s24, 4  ;;  %s11788_s28 = int_to_ptr.hbm [resolvable:$true] %s11787_s28 }
 0x5e7   : > { %v9873_v26 = vunpack.c.l.bf16 %v11682_v42  ;;  %s11789_s29 = scalar_lea.hbm %s11788_s28, 128  ;;  %p11794_p11 = scmp.lt.s32.totalorder %s11788_s28, %s15507_s5 }
 0x5e8   : > { %v9900_v7 = vadd.f32 %v9868_v60, %v9836_v45  ;;  %p11790_p1 = scmp.ne.s32.totalorder %s11788_s28, %s11789_s29  ;;  %p11795_p2 = scmp.lt.s32.totalorder %s11793_s12, %s11789_s29 }
 0x5ea   : > { %v9932_v57 = vmax.f32 %v9900_v7, 0.0  ;;  %p11791_p4 = pnand %p11790_p1, %p11954_p3  ;;  %p11796_p9 = por %p11795_p2, %p11794_p11 }
 0x5eb   : > { %v9761_v6 = vpop.f32.mrf.mxu1 }
 0x5ec   : > { %v9801_v30 = vadd.f32 %v9761_v6, %v9375_v33  ;;  %p11792_p8 = pneg %p11791_p4 }
 0x5ee   : > { %v9837_v13 = vadd.f32 %v15247_v46, %v9801_v30  ;;  %p11797_p10 = pnand %p11796_p9, %p11792_p8 }
 0x5f0   : > { %v9901_v55 = vadd.f32 %v9869_v10, %v9837_v13 }
 0x5f2   : > { %v9933_v22 = vmax.f32 %v9901_v55, 0.0 }
 0x5f3   : > { %v9764_v8 = vpop.f32.mrf.mxu1 }
 0x5f4   : > { %v11494_v49 = vpack.c.bf16 %v9933_v22, %v9932_v57  ;;  %v9802_v58 = vadd.f32 %v9764_v8, %v9376_v17 }
 0x5f6   : > { %11518 = vst [vmem:[%s15268_s30 + $0x68] sm:$0xff] %v11494_v49   ;;  %v9838_v41 = vadd.f32 %v15247_v46, %v9802_v58 }
 0x5f8   : > { %v9902_v20 = vadd.f32 %v9870_v50, %v9838_v41 }
 0x5fa   : > { %v9934_v62 = vmax.f32 %v9902_v20, 0.0 }
 0x5fb   : > { %v9766_v25 = vpop.f32.mrf.mxu1 }
 0x5fc   : > { %v9803_v56 = vadd.f32 %v9766_v25, %v9377_v14 }
 0x5fe   : > { %v9839_v51 = vadd.f32 %v15247_v46, %v9803_v56 }
 0x600   : > { %v9903_v16 = vadd.f32 %v9871_v48, %v9839_v51 }
 0x602   : > { %v9935_v39 = vmax.f32 %v9903_v16, 0.0 }
 0x603   : > { %v9769_v43 = vpop.f32.mrf.mxu1 }
 0x604   : > { %v11499_v34 = vpack.c.bf16 %v9935_v39, %v9934_v62  ;;  %v9804_v23 = vadd.f32 %v9769_v43, %v9378_v59 }
 0x606   : > { %11519 = vst [vmem:[%s15268_s30 + $0x70] sm:$0xff] %v11499_v34   ;;  %v9840_v1 = vadd.f32 %v15247_v46, %v9804_v23 }
 0x608   : > { %v9904_v11 = vadd.f32 %v9872_v4, %v9840_v1 }
 0x60a   : > { %v9936_v5 = vmax.f32 %v9904_v11, 0.0 }
 0x60b   : > { %v9771_v32 = vpop.f32.mrf.mxu1 }
 0x60c   : > { %v9805_v9 = vadd.f32 %v9771_v32, %v9379_v18 }
 0x60e   : > { %v9841_v28 = vadd.f32 %v15247_v46, %v9805_v9 }
 0x610   : > { %v9905_v44 = vadd.f32 %v9873_v26, %v9841_v28 }
 0x612   : > { %v9937_v45 = vmax.f32 %v9905_v44, 0.0 }
 0x614   : > { %v11504_v63 = vpack.c.bf16 %v9937_v45, %v9936_v5 }
 0x616   : > { %11520 = vst [vmem:[%s15268_s30 + $0x78] sm:$0xff] %v11504_v63  }
 0x617   : > { %11800 = shalt.err (!%p11797_p10)
}
 0x618   : > { %s11850_s8 = smov 64   ;;  %s11851_s27 = smov 4  }
 0x619   : > { %11547 = dma.vmem_to_hbm [thread:$0]  (%p11954_p3), %s10016_s16, 2048, %s10018_s24, %s10003_s22, %s11850_s8, %s11850_s8, %s11851_s27  }
 0x61a PF: > { %s10032_s30 = sand.u32 1, %s11831_s18   ;;  %p15757_p12 = scmp.ge.s32.totalorder %s11843_s21, 2 }
 0x61b   : > { %s10033_s6 = scalar_lea.sflag [#allocation6], %s10032_s30 }
 0x61c   : > { %p11561_p13 = pnand %p15757_p12, %p11917_p6 }
 0x61e   : > { %p11562_p0 = pneg %p11561_p13 }
 0x620   : > { %11826 = dma.done.wait (%p11562_p0), %s10033_s6, 2048  }
 0x621   : > { %11828 = vsyncadd (%p11562_p0), %s10033_s6, 4294965248  ;;  %p19_p5 = scmp.ge.s32.totalorder %s11944_s14, 4   ;;  %s15758_s18 = smov %s11835_s19 }
 0x622   : > { %s15759_s19 = smov %s11839_s20  ;;  %s15760_s20 = smov %s11960_s23 }
 0x623   : > { %s15761_s21 = smov %s11944_s14  ;;  %21 = sbr.rel (!%p19_p5) target bundleno = 6 (0x6), region = 115 }
 0x628   :  { %10039 = vsyncpa [#allocation5], 1 }
 0x629   :  { %10041 = vsyncpa [#allocation5 + $0x1], 1 }
 0x62a   :  { %10042 = vsyncpa [#allocation8], 1 }
 0x62b   :  { %10043 = vsyncpa [#allocation6], 1 }
 0x62c   :  { %10045 = vsyncpa [#allocation6 + $0x1], 1 }

</bundles_post_ra>
